<compile_context>
chip_gen: v7x
topology: tpu7x:2x2x1
jax: 0.10.0
libtpu: 0.0.40
codegen_flags: <defaults>
</compile_context>

<pallas_src>
import jax
import jax.numpy as jnp
from jax.experimental import pallas as pl
from jax.experimental.pallas import tpu as pltpu

VMEM = pltpu.MemorySpace.VMEM


# ----------------------------- Pallas kernels ------------------------------


def _conv_pool_bn_sign_kernel(a0_ref, a1_ref, a2_ref, a3_ref, w_ref, scale_ref,
                              shift_ref, o_ref):
    # a*_ref: (nb, P, K) im2col patches, one tensor per position of the 2x2 pool window.
    # w_ref: (K, C) binarized conv weights.  scale/shift: (1, C) folded BN (+ conv bias).
    # o_ref: (nb, P, C) sign(+-1) activations after conv -> maxpool2 -> BN -> htanh -> sign.
    nb = a0_ref.shape[0]
    wv = w_ref[...]
    sc = scale_ref[...]
    sh = shift_ref[...]
    for i in range(nb):  # static unroll over the images in this block
        y = jnp.dot(a0_ref[i], wv, preferred_element_type=jnp.float32)
        y = jnp.maximum(y, jnp.dot(a1_ref[i], wv, preferred_element_type=jnp.float32))
        y = jnp.maximum(y, jnp.dot(a2_ref[i], wv, preferred_element_type=jnp.float32))
        y = jnp.maximum(y, jnp.dot(a3_ref[i], wv, preferred_element_type=jnp.float32))
        y = y * sc + sh  # BN (inference); conv bias pre-folded into the shift
        # hardtanh then sign == sign (sign(0) -> +1), so the clip is dropped.
        o_ref[i] = jnp.where(y >= 0.0, 1.0, -1.0).astype(o_ref.dtype)


def _fc1_bn_sign_kernel(a_ref, w_ref, scale_ref, shift_ref, o_ref):
    # fc1: int8 +-1 weights up-converted to bf16 after the DMA (halves the HBM stream),
    # bf16 MXU with f32 accumulation, then BN1d + hardtanh + sign (bias folded in shift).
    w = w_ref[...].astype(jnp.bfloat16)
    y = jnp.dot(a_ref[...], w, preferred_element_type=jnp.float32)
    y = y * scale_ref[...] + shift_ref[...]
    o_ref[...] = jnp.where(y >= 0.0, 1.0, -1.0).astype(o_ref.dtype)


def _fc2_scale_kernel(a_ref, w_ref, scale_ref, bias_ref, o_ref):
    # fc2: int8 +-1 weights -> bf16; bias and Scale(0.001) folded into the epilogue.
    w = w_ref[...].astype(jnp.bfloat16)
    y = jnp.dot(a_ref[...], w, preferred_element_type=jnp.float32)
    o_ref[...] = y * scale_ref[...] + bias_ref[...]


# ----------------------------- kernel wrappers ------------------------------


def conv_pool_bn_sign(a_windows, w, scale, shift, *, out_dtype, nb):
    # a_windows: four (B, P, K) im2col tensors (one per 2x2 pool-window position).
    # Returns (B, P, C) activations of +-1 in `out_dtype`.
    a0, a1, a2, a3 = a_windows
    B, P, K = a0.shape
    C = w.shape[1]
    assert B % nb == 0
    act_spec = pl.BlockSpec((nb, P, K), lambda i: (i, 0, 0))
    return pl.pallas_call(
        _conv_pool_bn_sign_kernel,
        out_shape=jax.ShapeDtypeStruct((B, P, C), out_dtype),
        grid=(B // nb,),
        in_specs=[
            act_spec, act_spec, act_spec, act_spec,
            pl.BlockSpec((K, C), lambda i: (0, 0)),
            pl.BlockSpec((1, C), lambda i: (0, 0)),
            pl.BlockSpec((1, C), lambda i: (0, 0)),
        ],
        out_specs=pl.BlockSpec((nb, P, C), lambda i: (i, 0, 0)),
        compiler_params=pltpu.CompilerParams(dimension_semantics=("parallel",)),
    )(a0, a1, a2, a3, w,
      scale.reshape(1, C).astype(jnp.float32),
      shift.reshape(1, C).astype(jnp.float32))


def fc1_bn_sign(a, w_int8, scale, shift, *, out_dtype=jnp.bfloat16, tn=256):
    # a: (B, K) bf16 of +-1; w_int8: (K, N) int8 of +-1.  tn=256 -> 8 grid steps so each
    # v7x TensorCore gets 4 steps and the DMA prologue is well hidden.
    M, K = a.shape
    N = w_int8.shape[1]
    tn = min(tn, N)
    assert N % tn == 0
    return pl.pallas_call(
        _fc1_bn_sign_kernel,
        out_shape=jax.ShapeDtypeStruct((M, N), out_dtype),
        grid=(N // tn,),
        in_specs=[
            pl.BlockSpec((M, K), lambda j: (0, 0)),
            pl.BlockSpec((K, tn), lambda j: (0, j)),
            pl.BlockSpec((1, tn), lambda j: (0, j)),
            pl.BlockSpec((1, tn), lambda j: (0, j)),
        ],
        out_specs=pl.BlockSpec((M, tn), lambda j: (0, j)),
        compiler_params=pltpu.CompilerParams(dimension_semantics=("parallel",)),
    )(a, w_int8,
      scale.reshape(1, N).astype(jnp.float32),
      shift.reshape(1, N).astype(jnp.float32))


def fc2_scale_bias(a, w_int8, scale_row, bias_row):
    M, K = a.shape
    N = w_int8.shape[1]
    return pl.pallas_call(
        _fc2_scale_kernel,
        out_shape=jax.ShapeDtypeStruct((M, N), jnp.float32),
        in_specs=[pl.BlockSpec(memory_space=VMEM)] * 4,
        out_specs=pl.BlockSpec(memory_space=VMEM),
    )(a, w_int8, scale_row, bias_row)


# ------------------------------- glue (JAX) ---------------------------------


def binarize_pm1(w):
    return jnp.where(w >= 0.0, 1.0, -1.0).astype(jnp.float32)


def apply_bit_flip(w_bin, key, p):
    flips = jax.random.bernoulli(key, p, w_bin.shape)
    return jnp.where(flips, -w_bin, w_bin)


def bn_affine(gamma, beta, mean, var, eps=1e-5):
    scale = gamma / jnp.sqrt(var + eps)
    shift = beta - mean * scale
    return scale, shift


def conv_weight_to_matrix(w_oihw):
    # (O, I, kh, kw) -> (kh*kw*I, O), matching the im2col patch ordering below.
    O, I, kh, kw = w_oihw.shape
    return jnp.transpose(w_oihw, (2, 3, 1, 0)).reshape(kh * kw * I, O)


def im2col_3x3_pool_windows(x):
    """x: (B, H, W, C) -> four (B, (H//2)*(W//2), 9*C) im2col tensors, one per position
    (dy, dx) of the 2x2 max-pool window (padding=1, stride=1 conv; pool stride 2).
    Patch feature order is (kh, kw, C), matching conv_weight_to_matrix."""
    B, H, W, C = x.shape
    xp = jnp.pad(x, ((0, 0), (1, 1), (1, 1), (0, 0)))
    outs = []
    for dy in (0, 1):
        for dx in (0, 1):
            cols = [
                xp[:, dy + i: dy + i + H - 1: 2, dx + j: dx + j + W - 1: 2, :]
                for i in range(3) for j in range(3)
            ]
            p = jnp.stack(cols, axis=3)  # (B, H//2, W//2, 9, C)
            outs.append(p.reshape(B, (H // 2) * (W // 2), 9 * C))
    return outs


# ------------------------------ model params --------------------------------


def init_params(key):
    ks = jax.random.split(key, 24)
    p = {}
    p["conv1_w"] = 0.1 * jax.random.normal(ks[0], (64, 1, 3, 3), jnp.float32)
    p["conv1_b"] = 0.01 * jax.random.normal(ks[1], (64,), jnp.float32)
    p["bn1_gamma"] = 1.0 + 0.1 * jax.random.normal(ks[2], (64,), jnp.float32)
    p["bn1_beta"] = 0.1 * jax.random.normal(ks[3], (64,), jnp.float32)
    p["bn1_mean"] = 0.1 * jax.random.normal(ks[4], (64,), jnp.float32)
    p["bn1_var"] = jax.random.uniform(ks[5], (64,), jnp.float32, 0.5, 1.5)

    p["conv2_w"] = 0.1 * jax.random.normal(ks[6], (64, 64, 3, 3), jnp.float32)
    p["conv2_b"] = 0.01 * jax.random.normal(ks[7], (64,), jnp.float32)
    p["bn2_gamma"] = 1.0 + 0.1 * jax.random.normal(ks[8], (64,), jnp.float32)
    p["bn2_beta"] = 0.1 * jax.random.normal(ks[9], (64,), jnp.float32)
    p["bn2_mean"] = 0.1 * jax.random.normal(ks[10], (64,), jnp.float32)
    p["bn2_var"] = jax.random.uniform(ks[11], (64,), jnp.float32, 0.5, 1.5)

    p["fc1_w"] = 0.02 * jax.random.normal(ks[12], (2048, 3136), jnp.float32)
    p["fc1_b"] = 0.01 * jax.random.normal(ks[13], (2048,), jnp.float32)
    p["bn3_gamma"] = 1.0 + 0.1 * jax.random.normal(ks[14], (2048,), jnp.float32)
    p["bn3_beta"] = 0.1 * jax.random.normal(ks[15], (2048,), jnp.float32)
    p["bn3_mean"] = 0.1 * jax.random.normal(ks[16], (2048,), jnp.float32)
    p["bn3_var"] = jax.random.uniform(ks[17], (2048,), jnp.float32, 0.5, 1.5)

    p["fc2_w"] = 0.05 * jax.random.normal(ks[18], (10, 2048), jnp.float32)
    p["fc2_b"] = 0.01 * jax.random.normal(ks[19], (10,), jnp.float32)

    p["scale"] = jnp.float32(0.001)  # Scale(init_value=0.001)

    # fixed keys for the symmetric bit-flip error model on fc1 / fc2 weights
    p["fc1_flip_key"] = ks[20]
    p["fc2_flip_key"] = ks[21]
    return p


def prepare_params(raw):
    """Pre-fold the constant weight pipeline once, outside the jitted forward:
    binarize, bit-flip error model, transposes, BN folding (with conv/fc biases),
    the NCHW-flatten permutation, Scale(0.001), and the int8 weight casts."""
    p = {}
    # conv1: activation is the real-valued image -> keep f32 operands (exactness).
    p["conv1_w"] = conv_weight_to_matrix(binarize_pm1(raw["conv1_w"]))  # (9, 64) f32
    s1, sh1 = bn_affine(raw["bn1_gamma"], raw["bn1_beta"], raw["bn1_mean"], raw["bn1_var"])
    p["bn1_scale"] = s1
    p["bn1_shift"] = sh1 + raw["conv1_b"] * s1  # bias commutes with max-pool -> fold here

    # conv2: +-1 x +-1 is exact in bf16 -> bf16 weights, f32 accumulate.
    p["conv2_w"] = conv_weight_to_matrix(binarize_pm1(raw["conv2_w"])).astype(jnp.bfloat16)
    s2, sh2 = bn_affine(raw["bn2_gamma"], raw["bn2_beta"], raw["bn2_mean"], raw["bn2_var"])
    p["bn2_scale"] = s2
    p["bn2_shift"] = sh2 + raw["conv2_b"] * s2

    # fc1: binarize + symmetric bit-flip error model; store as int8 (+-1 exact) to halve
    # the dominant HBM weight stream.  Row order is permuted so the kernel consumes the
    # (pooled-h, pooled-w, channel) activation layout directly (torch.flatten(NCHW) is
    # folded into the weight instead of transposing the activation at runtime).
    wfc1 = apply_bit_flip(binarize_pm1(raw["fc1_w"]), raw["fc1_flip_key"], 0.1).T  # (3136, 2048)
    f = jnp.arange(7 * 7 * 64)
    perm = (f % 64) * 49 + f // 64  # our feature (h*7+w)*64+c  ->  torch feature c*49 + h*7+w
    p["fc1_w"] = wfc1[perm].astype(jnp.int8)
    s3, sh3 = bn_affine(raw["bn3_gamma"], raw["bn3_beta"], raw["bn3_mean"], raw["bn3_var"])
    p["bn3_scale"] = s3
    p["bn3_shift"] = sh3 + raw["fc1_b"] * s3  # fc1 bias folded into the BN shift

    # fc2: binarize + bit flips; Scale(0.001) folded into the epilogue constants so the
    # stored weights stay +-1 (int8).
    wfc2 = apply_bit_flip(binarize_pm1(raw["fc2_w"]), raw["fc2_flip_key"], 0.1)
    p["fc2_w"] = wfc2.T.astype(jnp.int8)                              # (2048, 10)
    p["fc2_scale"] = jnp.full((1, 10), raw["scale"], jnp.float32)
    p["fc2_bias"] = (raw["fc2_b"] * raw["scale"]).reshape(1, 10).astype(jnp.float32)
    return p


# ------------------------------ forward pass --------------------------------


def bnn_fmnist_forward(x_nchw, params):
    B = x_nchw.shape[0]
    nb = max(d for d in (8, 4, 2, 1) if B % d == 0)  # images per conv grid step
    x = jnp.transpose(x_nchw, (0, 2, 3, 1)).astype(jnp.float32)  # (B, 28, 28, 1)

    # conv1 -> maxpool2 -> bn1 -> hardtanh -> sign  (one fused kernel)
    y = conv_pool_bn_sign(
        im2col_3x3_pool_windows(x), params["conv1_w"],
        params["bn1_scale"], params["bn1_shift"],
        out_dtype=jnp.bfloat16, nb=nb)                          # (B, 196, 64) of +-1

    # conv2 -> maxpool2 -> bn2 -> hardtanh -> sign  (one fused kernel)
    y = conv_pool_bn_sign(
        im2col_3x3_pool_windows(y.reshape(B, 14, 14, 64)), params["conv2_w"],
        params["bn2_scale"], params["bn2_shift"],
        out_dtype=jnp.bfloat16, nb=nb)                          # (B, 49, 64) of +-1

    # torch.flatten(x, 1) ordering was folded into fc1_w's rows -> plain reshape here.
    y = y.reshape(B, 7 * 7 * 64)

    # fc1 (int8 +-1 weights, bf16 MXU) -> bn3 -> hardtanh -> sign  (fused, N-tiled)
    y = fc1_bn_sign(y, params["fc1_w"], params["bn3_scale"], params["bn3_shift"], tn=256)

    # fc2 (int8 +-1 weights) + bias + Scale(0.001)  (all folded into one kernel)
    return fc2_scale_bias(y, params["fc2_w"], params["fc2_scale"], params["fc2_bias"])


# ----------------------------------- main ------------------------------------


if __name__ == "__main__":
    key = jax.random.PRNGKey(0)
    pkey, xkey = jax.random.split(key)
    raw_params = init_params(pkey)
    params = prepare_params(raw_params)  # constant weight pipeline folded once

    # FMNIST-shaped input (fc1 expects 7*7*64, so spatial must be 28x28).
    x = jax.random.normal(xkey, (2, 1, 28, 28), dtype=jnp.float32)

    fwd = jax.jit(bnn_fmnist_forward)
    out = jax.block_until_ready(fwd(x, params))

    assert out.shape == (2, 10), out.shape
    assert out.dtype == jnp.float32
    assert bool(jnp.all(jnp.isfinite(out)))
    print("KERNEL_OK")
</pallas_src>

<mosaic_0001>
module attributes {stable_mosaic.version = 11 : i64} {
  func.func @_conv_pool_bn_sign_kernel(%arg0: i32, %arg1: memref<2x196x9xf32, #tpu.memory_space<vmem>>, %arg2: memref<2x196x9xf32, #tpu.memory_space<vmem>>, %arg3: memref<2x196x9xf32, #tpu.memory_space<vmem>>, %arg4: memref<2x196x9xf32, #tpu.memory_space<vmem>>, %arg5: memref<9x64xf32, #tpu.memory_space<vmem>>, %arg6: memref<1x64xf32, #tpu.memory_space<vmem>>, %arg7: memref<1x64xf32, #tpu.memory_space<vmem>>, %arg8: memref<2x196x64xbf16, #tpu.memory_space<vmem>>) attributes {dimension_semantics = [#tpu.dimension_semantics<parallel>], iteration_bounds = array<i64: 1>, scalar_prefetch = 0 : i64, scratch_operands = 0 : i64, tpu.core_type = #tpu.core_type<tc>, window_params = [{transform_indices = @transform_0, window_bounds = array<i64: 2, 196, 9>}, {transform_indices = @transform_1, window_bounds = array<i64: 2, 196, 9>}, {transform_indices = @transform_2, window_bounds = array<i64: 2, 196, 9>}, {transform_indices = @transform_3, window_bounds = array<i64: 2, 196, 9>}, {pipeline_mode = #tpu.pipeline_mode<synchronous>, transform_indices = @transform_4, window_bounds = array<i64: 9, 64>}, {pipeline_mode = #tpu.pipeline_mode<synchronous>, transform_indices = @transform_5, window_bounds = array<i64: 1, 64>}, {pipeline_mode = #tpu.pipeline_mode<synchronous>, transform_indices = @transform_6, window_bounds = array<i64: 1, 64>}, {transform_indices = @transform_7, window_bounds = array<i64: 2, 196, 64>}]} {
    %c0 = arith.constant 0 : index
    %c0_0 = arith.constant 0 : index
    %0 = vector.load %arg5[%c0, %c0_0] : memref<9x64xf32, #tpu.memory_space<vmem>>, vector<9x64xf32>
    %c0_1 = arith.constant 0 : index
    %c0_2 = arith.constant 0 : index
    %1 = vector.load %arg6[%c0_1, %c0_2] : memref<1x64xf32, #tpu.memory_space<vmem>>, vector<1x64xf32>
    %c0_3 = arith.constant 0 : index
    %c0_4 = arith.constant 0 : index
    %2 = vector.load %arg7[%c0_3, %c0_4] : memref<1x64xf32, #tpu.memory_space<vmem>>, vector<1x64xf32>
    %c0_5 = arith.constant 0 : index
    %c0_6 = arith.constant 0 : index
    %c0_7 = arith.constant 0 : index
    %3 = vector.load %arg1[%c0_5, %c0_6, %c0_7] : memref<2x196x9xf32, #tpu.memory_space<vmem>>, vector<1x196x9xf32>
    %4 = vector.shape_cast %3 : vector<1x196x9xf32> to vector<196x9xf32>
    %cst = arith.constant dense<0.000000e+00> : vector<196x64xf32>
    %5 = tpu.matmul %4, %0, %cst {dimension_numbers = #tpu.dot_dimension_numbers<[1], [0], [0], [1], [0, 0, 1, 1], [], []>} : vector<196x9xf32>, vector<9x64xf32>, vector<196x64xf32> -> vector<196x64xf32>
    %c0_8 = arith.constant 0 : index
    %c0_9 = arith.constant 0 : index
    %c0_10 = arith.constant 0 : index
    %6 = vector.load %arg2[%c0_8, %c0_9, %c0_10] : memref<2x196x9xf32, #tpu.memory_space<vmem>>, vector<1x196x9xf32>
    %7 = vector.shape_cast %6 : vector<1x196x9xf32> to vector<196x9xf32>
    %cst_11 = arith.constant dense<0.000000e+00> : vector<196x64xf32>
    %8 = tpu.matmul %7, %0, %cst_11 {dimension_numbers = #tpu.dot_dimension_numbers<[1], [0], [0], [1], [0, 0, 1, 1], [], []>} : vector<196x9xf32>, vector<9x64xf32>, vector<196x64xf32> -> vector<196x64xf32>
    %9 = arith.maximumf %5, %8 : vector<196x64xf32>
    %c0_12 = arith.constant 0 : index
    %c0_13 = arith.constant 0 : index
    %c0_14 = arith.constant 0 : index
    %10 = vector.load %arg3[%c0_12, %c0_13, %c0_14] : memref<2x196x9xf32, #tpu.memory_space<vmem>>, vector<1x196x9xf32>
    %11 = vector.shape_cast %10 : vector<1x196x9xf32> to vector<196x9xf32>
    %cst_15 = arith.constant dense<0.000000e+00> : vector<196x64xf32>
    %12 = tpu.matmul %11, %0, %cst_15 {dimension_numbers = #tpu.dot_dimension_numbers<[1], [0], [0], [1], [0, 0, 1, 1], [], []>} : vector<196x9xf32>, vector<9x64xf32>, vector<196x64xf32> -> vector<196x64xf32>
    %13 = arith.maximumf %9, %12 : vector<196x64xf32>
    %c0_16 = arith.constant 0 : index
    %c0_17 = arith.constant 0 : index
    %c0_18 = arith.constant 0 : index
    %14 = vector.load %arg4[%c0_16, %c0_17, %c0_18] : memref<2x196x9xf32, #tpu.memory_space<vmem>>, vector<1x196x9xf32>
    %15 = vector.shape_cast %14 : vector<1x196x9xf32> to vector<196x9xf32>
    %cst_19 = arith.constant dense<0.000000e+00> : vector<196x64xf32>
    %16 = tpu.matmul %15, %0, %cst_19 {dimension_numbers = #tpu.dot_dimension_numbers<[1], [0], [0], [1], [0, 0, 1, 1], [], []>} : vector<196x9xf32>, vector<9x64xf32>, vector<196x64xf32> -> vector<196x64xf32>
    %17 = arith.maximumf %13, %16 : vector<196x64xf32>
    %18 = vector.broadcast %1 : vector<1x64xf32> to vector<196x64xf32>
    %19 = arith.mulf %17, %18 : vector<196x64xf32>
    %20 = vector.broadcast %2 : vector<1x64xf32> to vector<196x64xf32>
    %21 = arith.addf %19, %20 : vector<196x64xf32>
    %cst_20 = arith.constant 0.000000e+00 : f32
    %22 = vector.broadcast %cst_20 : f32 to vector<196x64xf32>
    %23 = arith.cmpf oge, %21, %22 : vector<196x64xf32>
    %cst_21 = arith.constant 1.000000e+00 : f32
    %cst_22 = arith.constant -1.000000e+00 : f32
    %24 = vector.broadcast %cst_21 : f32 to vector<196x64xf32>
    %25 = vector.broadcast %cst_22 : f32 to vector<196x64xf32>
    %26 = arith.select %23, %24, %25 : vector<196x64xi1>, vector<196x64xf32>
    %27 = arith.truncf %26 : vector<196x64xf32> to vector<196x64xbf16>
    %c0_23 = arith.constant 0 : index
    %c0_24 = arith.constant 0 : index
    %c0_25 = arith.constant 0 : index
    %28 = vector.load %arg8[%c0_23, %c0_24, %c0_25] : memref<2x196x64xbf16, #tpu.memory_space<vmem>>, vector<1x196x64xbf16>
    %29 = vector.shape_cast %28 : vector<1x196x64xbf16> to vector<196x64xbf16>
    %30 = vector.shape_cast %27 : vector<196x64xbf16> to vector<1x196x64xbf16>
    tpu.vector_store %arg8[%c0_23, %c0_24, %c0_25], %30 {strides = array<i32>} : memref<2x196x64xbf16, #tpu.memory_space<vmem>>, vector<1x196x64xbf16>,
    %c1 = arith.constant 1 : index
    %c0_26 = arith.constant 0 : index
    %c0_27 = arith.constant 0 : index
    %31 = vector.load %arg1[%c1, %c0_26, %c0_27] : memref<2x196x9xf32, #tpu.memory_space<vmem>>, vector<1x196x9xf32>
    %32 = vector.shape_cast %31 : vector<1x196x9xf32> to vector<196x9xf32>
    %cst_28 = arith.constant dense<0.000000e+00> : vector<196x64xf32>
    %33 = tpu.matmul %32, %0, %cst_28 {dimension_numbers = #tpu.dot_dimension_numbers<[1], [0], [0], [1], [0, 0, 1, 1], [], []>} : vector<196x9xf32>, vector<9x64xf32>, vector<196x64xf32> -> vector<196x64xf32>
    %c1_29 = arith.constant 1 : index
    %c0_30 = arith.constant 0 : index
    %c0_31 = arith.constant 0 : index
    %34 = vector.load %arg2[%c1_29, %c0_30, %c0_31] : memref<2x196x9xf32, #tpu.memory_space<vmem>>, vector<1x196x9xf32>
    %35 = vector.shape_cast %34 : vector<1x196x9xf32> to vector<196x9xf32>
    %cst_32 = arith.constant dense<0.000000e+00> : vector<196x64xf32>
    %36 = tpu.matmul %35, %0, %cst_32 {dimension_numbers = #tpu.dot_dimension_numbers<[1], [0], [0], [1], [0, 0, 1, 1], [], []>} : vector<196x9xf32>, vector<9x64xf32>, vector<196x64xf32> -> vector<196x64xf32>
    %37 = arith.maximumf %33, %36 : vector<196x64xf32>
    %c1_33 = arith.constant 1 : index
    %c0_34 = arith.constant 0 : index
    %c0_35 = arith.constant 0 : index
    %38 = vector.load %arg3[%c1_33, %c0_34, %c0_35] : memref<2x196x9xf32, #tpu.memory_space<vmem>>, vector<1x196x9xf32>
    %39 = vector.shape_cast %38 : vector<1x196x9xf32> to vector<196x9xf32>
    %cst_36 = arith.constant dense<0.000000e+00> : vector<196x64xf32>
    %40 = tpu.matmul %39, %0, %cst_36 {dimension_numbers = #tpu.dot_dimension_numbers<[1], [0], [0], [1], [0, 0, 1, 1], [], []>} : vector<196x9xf32>, vector<9x64xf32>, vector<196x64xf32> -> vector<196x64xf32>
    %41 = arith.maximumf %37, %40 : vector<196x64xf32>
    %c1_37 = arith.constant 1 : index
    %c0_38 = arith.constant 0 : index
    %c0_39 = arith.constant 0 : index
    %42 = vector.load %arg4[%c1_37, %c0_38, %c0_39] : memref<2x196x9xf32, #tpu.memory_space<vmem>>, vector<1x196x9xf32>
    %43 = vector.shape_cast %42 : vector<1x196x9xf32> to vector<196x9xf32>
    %cst_40 = arith.constant dense<0.000000e+00> : vector<196x64xf32>
    %44 = tpu.matmul %43, %0, %cst_40 {dimension_numbers = #tpu.dot_dimension_numbers<[1], [0], [0], [1], [0, 0, 1, 1], [], []>} : vector<196x9xf32>, vector<9x64xf32>, vector<196x64xf32> -> vector<196x64xf32>
    %45 = arith.maximumf %41, %44 : vector<196x64xf32>
    %46 = vector.broadcast %1 : vector<1x64xf32> to vector<196x64xf32>
    %47 = arith.mulf %45, %46 : vector<196x64xf32>
    %48 = vector.broadcast %2 : vector<1x64xf32> to vector<196x64xf32>
    %49 = arith.addf %47, %48 : vector<196x64xf32>
    %cst_41 = arith.constant 0.000000e+00 : f32
    %50 = vector.broadcast %cst_41 : f32 to vector<196x64xf32>
    %51 = arith.cmpf oge, %49, %50 : vector<196x64xf32>
    %cst_42 = arith.constant 1.000000e+00 : f32
    %cst_43 = arith.constant -1.000000e+00 : f32
    %52 = vector.broadcast %cst_42 : f32 to vector<196x64xf32>
    %53 = vector.broadcast %cst_43 : f32 to vector<196x64xf32>
    %54 = arith.select %51, %52, %53 : vector<196x64xi1>, vector<196x64xf32>
    %55 = arith.truncf %54 : vector<196x64xf32> to vector<196x64xbf16>
    %c1_44 = arith.constant 1 : index
    %c0_45 = arith.constant 0 : index
    %c0_46 = arith.constant 0 : index
    %56 = vector.load %arg8[%c1_44, %c0_45, %c0_46] : memref<2x196x64xbf16, #tpu.memory_space<vmem>>, vector<1x196x64xbf16>
    %57 = vector.shape_cast %56 : vector<1x196x64xbf16> to vector<196x64xbf16>
    %58 = vector.shape_cast %55 : vector<196x64xbf16> to vector<1x196x64xbf16>
    tpu.vector_store %arg8[%c1_44, %c0_45, %c0_46], %58 {strides = array<i32>} : memref<2x196x64xbf16, #tpu.memory_space<vmem>>, vector<1x196x64xbf16>,
    return
  }
  func.func @transform_0(%arg0: i32) -> (i32, i32, i32) {
    %c0_i32 = arith.constant 0 : i32
    %c0_i32_0 = arith.constant 0 : i32
    %c0_i32_1 = arith.constant 0 : i32
    return %arg0, %c0_i32, %c0_i32_0 : i32, i32, i32
  }
  func.func @transform_1(%arg0: i32) -> (i32, i32, i32) {
    %c0_i32 = arith.constant 0 : i32
    %c0_i32_0 = arith.constant 0 : i32
    %c0_i32_1 = arith.constant 0 : i32
    return %arg0, %c0_i32, %c0_i32_0 : i32, i32, i32
  }
  func.func @transform_2(%arg0: i32) -> (i32, i32, i32) {
    %c0_i32 = arith.constant 0 : i32
    %c0_i32_0 = arith.constant 0 : i32
    %c0_i32_1 = arith.constant 0 : i32
    return %arg0, %c0_i32, %c0_i32_0 : i32, i32, i32
  }
  func.func @transform_3(%arg0: i32) -> (i32, i32, i32) {
    %c0_i32 = arith.constant 0 : i32
    %c0_i32_0 = arith.constant 0 : i32
    %c0_i32_1 = arith.constant 0 : i32
    return %arg0, %c0_i32, %c0_i32_0 : i32, i32, i32
  }
  func.func @transform_4(%arg0: i32) -> (i32, i32) {
    %c0_i32 = arith.constant 0 : i32
    %c0_i32_0 = arith.constant 0 : i32
    %c0_i32_1 = arith.constant 0 : i32
    return %c0_i32, %c0_i32_0 : i32, i32
  }
  func.func @transform_5(%arg0: i32) -> (i32, i32) {
    %c0_i32 = arith.constant 0 : i32
    %c0_i32_0 = arith.constant 0 : i32
    %c0_i32_1 = arith.constant 0 : i32
    return %c0_i32, %c0_i32_0 : i32, i32
  }
  func.func @transform_6(%arg0: i32) -> (i32, i32) {
    %c0_i32 = arith.constant 0 : i32
    %c0_i32_0 = arith.constant 0 : i32
    %c0_i32_1 = arith.constant 0 : i32
    return %c0_i32, %c0_i32_0 : i32, i32
  }
  func.func @transform_7(%arg0: i32) -> (i32, i32, i32) {
    %c0_i32 = arith.constant 0 : i32
    %c0_i32_0 = arith.constant 0 : i32
    %c0_i32_1 = arith.constant 0 : i32
    return %arg0, %c0_i32, %c0_i32_0 : i32, i32, i32
  }
}

module attributes {stable_mosaic.version = 11 : i64} {
  func.func @_conv_pool_bn_sign_kernel(%arg0: i32, %arg1: memref<2x49x576xbf16, #tpu.memory_space<vmem>>, %arg2: memref<2x49x576xbf16, #tpu.memory_space<vmem>>, %arg3: memref<2x49x576xbf16, #tpu.memory_space<vmem>>, %arg4: memref<2x49x576xbf16, #tpu.memory_space<vmem>>, %arg5: memref<576x64xbf16, #tpu.memory_space<vmem>>, %arg6: memref<1x64xf32, #tpu.memory_space<vmem>>, %arg7: memref<1x64xf32, #tpu.memory_space<vmem>>, %arg8: memref<2x49x64xbf16, #tpu.memory_space<vmem>>) attributes {dimension_semantics = [#tpu.dimension_semantics<parallel>], iteration_bounds = array<i64: 1>, scalar_prefetch = 0 : i64, scratch_operands = 0 : i64, tpu.core_type = #tpu.core_type<tc>, window_params = [{transform_indices = @transform_0, window_bounds = array<i64: 2, 49, 576>}, {transform_indices = @transform_1, window_bounds = array<i64: 2, 49, 576>}, {transform_indices = @transform_2, window_bounds = array<i64: 2, 49, 576>}, {transform_indices = @transform_3, window_bounds = array<i64: 2, 49, 576>}, {pipeline_mode = #tpu.pipeline_mode<synchronous>, transform_indices = @transform_4, window_bounds = array<i64: 576, 64>}, {pipeline_mode = #tpu.pipeline_mode<synchronous>, transform_indices = @transform_5, window_bounds = array<i64: 1, 64>}, {pipeline_mode = #tpu.pipeline_mode<synchronous>, transform_indices = @transform_6, window_bounds = array<i64: 1, 64>}, {transform_indices = @transform_7, window_bounds = array<i64: 2, 49, 64>}]} {
    %c0 = arith.constant 0 : index
    %c0_0 = arith.constant 0 : index
    %0 = vector.load %arg5[%c0, %c0_0] : memref<576x64xbf16, #tpu.memory_space<vmem>>, vector<576x64xbf16>
    %c0_1 = arith.constant 0 : index
    %c0_2 = arith.constant 0 : index
    %1 = vector.load %arg6[%c0_1, %c0_2] : memref<1x64xf32, #tpu.memory_space<vmem>>, vector<1x64xf32>
    %c0_3 = arith.constant 0 : index
    %c0_4 = arith.constant 0 : index
    %2 = vector.load %arg7[%c0_3, %c0_4] : memref<1x64xf32, #tpu.memory_space<vmem>>, vector<1x64xf32>
    %c0_5 = arith.constant 0 : index
    %c0_6 = arith.constant 0 : index
    %c0_7 = arith.constant 0 : index
    %3 = vector.load %arg1[%c0_5, %c0_6, %c0_7] : memref<2x49x576xbf16, #tpu.memory_space<vmem>>, vector<1x49x576xbf16>
    %4 = vector.shape_cast %3 : vector<1x49x576xbf16> to vector<49x576xbf16>
    %cst = arith.constant dense<0.000000e+00> : vector<49x64xf32>
    %5 = tpu.matmul %4, %0, %cst {dimension_numbers = #tpu.dot_dimension_numbers<[1], [0], [0], [1], [0, 0, 1, 1], [], []>} : vector<49x576xbf16>, vector<576x64xbf16>, vector<49x64xf32> -> vector<49x64xf32>
    %c0_8 = arith.constant 0 : index
    %c0_9 = arith.constant 0 : index
    %c0_10 = arith.constant 0 : index
    %6 = vector.load %arg2[%c0_8, %c0_9, %c0_10] : memref<2x49x576xbf16, #tpu.memory_space<vmem>>, vector<1x49x576xbf16>
    %7 = vector.shape_cast %6 : vector<1x49x576xbf16> to vector<49x576xbf16>
    %cst_11 = arith.constant dense<0.000000e+00> : vector<49x64xf32>
    %8 = tpu.matmul %7, %0, %cst_11 {dimension_numbers = #tpu.dot_dimension_numbers<[1], [0], [0], [1], [0, 0, 1, 1], [], []>} : vector<49x576xbf16>, vector<576x64xbf16>, vector<49x64xf32> -> vector<49x64xf32>
    %9 = arith.maximumf %5, %8 : vector<49x64xf32>
    %c0_12 = arith.constant 0 : index
    %c0_13 = arith.constant 0 : index
    %c0_14 = arith.constant 0 : index
    %10 = vector.load %arg3[%c0_12, %c0_13, %c0_14] : memref<2x49x576xbf16, #tpu.memory_space<vmem>>, vector<1x49x576xbf16>
    %11 = vector.shape_cast %10 : vector<1x49x576xbf16> to vector<49x576xbf16>
    %cst_15 = arith.constant dense<0.000000e+00> : vector<49x64xf32>
    %12 = tpu.matmul %11, %0, %cst_15 {dimension_numbers = #tpu.dot_dimension_numbers<[1], [0], [0], [1], [0, 0, 1, 1], [], []>} : vector<49x576xbf16>, vector<576x64xbf16>, vector<49x64xf32> -> vector<49x64xf32>
    %13 = arith.maximumf %9, %12 : vector<49x64xf32>
    %c0_16 = arith.constant 0 : index
    %c0_17 = arith.constant 0 : index
    %c0_18 = arith.constant 0 : index
    %14 = vector.load %arg4[%c0_16, %c0_17, %c0_18] : memref<2x49x576xbf16, #tpu.memory_space<vmem>>, vector<1x49x576xbf16>
    %15 = vector.shape_cast %14 : vector<1x49x576xbf16> to vector<49x576xbf16>
    %cst_19 = arith.constant dense<0.000000e+00> : vector<49x64xf32>
    %16 = tpu.matmul %15, %0, %cst_19 {dimension_numbers = #tpu.dot_dimension_numbers<[1], [0], [0], [1], [0, 0, 1, 1], [], []>} : vector<49x576xbf16>, vector<576x64xbf16>, vector<49x64xf32> -> vector<49x64xf32>
    %17 = arith.maximumf %13, %16 : vector<49x64xf32>
    %18 = vector.broadcast %1 : vector<1x64xf32> to vector<49x64xf32>
    %19 = arith.mulf %17, %18 : vector<49x64xf32>
    %20 = vector.broadcast %2 : vector<1x64xf32> to vector<49x64xf32>
    %21 = arith.addf %19, %20 : vector<49x64xf32>
    %cst_20 = arith.constant 0.000000e+00 : f32
    %22 = vector.broadcast %cst_20 : f32 to vector<49x64xf32>
    %23 = arith.cmpf oge, %21, %22 : vector<49x64xf32>
    %cst_21 = arith.constant 1.000000e+00 : f32
    %cst_22 = arith.constant -1.000000e+00 : f32
    %24 = vector.broadcast %cst_21 : f32 to vector<49x64xf32>
    %25 = vector.broadcast %cst_22 : f32 to vector<49x64xf32>
    %26 = arith.select %23, %24, %25 : vector<49x64xi1>, vector<49x64xf32>
    %27 = arith.truncf %26 : vector<49x64xf32> to vector<49x64xbf16>
    %c0_23 = arith.constant 0 : index
    %c0_24 = arith.constant 0 : index
    %c0_25 = arith.constant 0 : index
    %28 = vector.load %arg8[%c0_23, %c0_24, %c0_25] : memref<2x49x64xbf16, #tpu.memory_space<vmem>>, vector<1x49x64xbf16>
    %29 = vector.shape_cast %28 : vector<1x49x64xbf16> to vector<49x64xbf16>
    %30 = vector.shape_cast %27 : vector<49x64xbf16> to vector<1x49x64xbf16>
    tpu.vector_store %arg8[%c0_23, %c0_24, %c0_25], %30 {strides = array<i32>} : memref<2x49x64xbf16, #tpu.memory_space<vmem>>, vector<1x49x64xbf16>,
    %c1 = arith.constant 1 : index
    %c0_26 = arith.constant 0 : index
    %c0_27 = arith.constant 0 : index
    %31 = vector.load %arg1[%c1, %c0_26, %c0_27] : memref<2x49x576xbf16, #tpu.memory_space<vmem>>, vector<1x49x576xbf16>
    %32 = vector.shape_cast %31 : vector<1x49x576xbf16> to vector<49x576xbf16>
    %cst_28 = arith.constant dense<0.000000e+00> : vector<49x64xf32>
    %33 = tpu.matmul %32, %0, %cst_28 {dimension_numbers = #tpu.dot_dimension_numbers<[1], [0], [0], [1], [0, 0, 1, 1], [], []>} : vector<49x576xbf16>, vector<576x64xbf16>, vector<49x64xf32> -> vector<49x64xf32>
    %c1_29 = arith.constant 1 : index
    %c0_30 = arith.constant 0 : index
    %c0_31 = arith.constant 0 : index
    %34 = vector.load %arg2[%c1_29, %c0_30, %c0_31] : memref<2x49x576xbf16, #tpu.memory_space<vmem>>, vector<1x49x576xbf16>
    %35 = vector.shape_cast %34 : vector<1x49x576xbf16> to vector<49x576xbf16>
    %cst_32 = arith.constant dense<0.000000e+00> : vector<49x64xf32>
    %36 = tpu.matmul %35, %0, %cst_32 {dimension_numbers = #tpu.dot_dimension_numbers<[1], [0], [0], [1], [0, 0, 1, 1], [], []>} : vector<49x576xbf16>, vector<576x64xbf16>, vector<49x64xf32> -> vector<49x64xf32>
    %37 = arith.maximumf %33, %36 : vector<49x64xf32>
    %c1_33 = arith.constant 1 : index
    %c0_34 = arith.constant 0 : index
    %c0_35 = arith.constant 0 : index
    %38 = vector.load %arg3[%c1_33, %c0_34, %c0_35] : memref<2x49x576xbf16, #tpu.memory_space<vmem>>, vector<1x49x576xbf16>
    %39 = vector.shape_cast %38 : vector<1x49x576xbf16> to vector<49x576xbf16>
    %cst_36 = arith.constant dense<0.000000e+00> : vector<49x64xf32>
    %40 = tpu.matmul %39, %0, %cst_36 {dimension_numbers = #tpu.dot_dimension_numbers<[1], [0], [0], [1], [0, 0, 1, 1], [], []>} : vector<49x576xbf16>, vector<576x64xbf16>, vector<49x64xf32> -> vector<49x64xf32>
    %41 = arith.maximumf %37, %40 : vector<49x64xf32>
    %c1_37 = arith.constant 1 : index
    %c0_38 = arith.constant 0 : index
    %c0_39 = arith.constant 0 : index
    %42 = vector.load %arg4[%c1_37, %c0_38, %c0_39] : memref<2x49x576xbf16, #tpu.memory_space<vmem>>, vector<1x49x576xbf16>
    %43 = vector.shape_cast %42 : vector<1x49x576xbf16> to vector<49x576xbf16>
    %cst_40 = arith.constant dense<0.000000e+00> : vector<49x64xf32>
    %44 = tpu.matmul %43, %0, %cst_40 {dimension_numbers = #tpu.dot_dimension_numbers<[1], [0], [0], [1], [0, 0, 1, 1], [], []>} : vector<49x576xbf16>, vector<576x64xbf16>, vector<49x64xf32> -> vector<49x64xf32>
    %45 = arith.maximumf %41, %44 : vector<49x64xf32>
    %46 = vector.broadcast %1 : vector<1x64xf32> to vector<49x64xf32>
    %47 = arith.mulf %45, %46 : vector<49x64xf32>
    %48 = vector.broadcast %2 : vector<1x64xf32> to vector<49x64xf32>
    %49 = arith.addf %47, %48 : vector<49x64xf32>
    %cst_41 = arith.constant 0.000000e+00 : f32
    %50 = vector.broadcast %cst_41 : f32 to vector<49x64xf32>
    %51 = arith.cmpf oge, %49, %50 : vector<49x64xf32>
    %cst_42 = arith.constant 1.000000e+00 : f32
    %cst_43 = arith.constant -1.000000e+00 : f32
    %52 = vector.broadcast %cst_42 : f32 to vector<49x64xf32>
    %53 = vector.broadcast %cst_43 : f32 to vector<49x64xf32>
    %54 = arith.select %51, %52, %53 : vector<49x64xi1>, vector<49x64xf32>
    %55 = arith.truncf %54 : vector<49x64xf32> to vector<49x64xbf16>
    %c1_44 = arith.constant 1 : index
    %c0_45 = arith.constant 0 : index
    %c0_46 = arith.constant 0 : index
    %56 = vector.load %arg8[%c1_44, %c0_45, %c0_46] : memref<2x49x64xbf16, #tpu.memory_space<vmem>>, vector<1x49x64xbf16>
    %57 = vector.shape_cast %56 : vector<1x49x64xbf16> to vector<49x64xbf16>
    %58 = vector.shape_cast %55 : vector<49x64xbf16> to vector<1x49x64xbf16>
    tpu.vector_store %arg8[%c1_44, %c0_45, %c0_46], %58 {strides = array<i32>} : memref<2x49x64xbf16, #tpu.memory_space<vmem>>, vector<1x49x64xbf16>,
    return
  }
  func.func @transform_0(%arg0: i32) -> (i32, i32, i32) {
    %c0_i32 = arith.constant 0 : i32
    %c0_i32_0 = arith.constant 0 : i32
    %c0_i32_1 = arith.constant 0 : i32
    return %arg0, %c0_i32, %c0_i32_0 : i32, i32, i32
  }
  func.func @transform_1(%arg0: i32) -> (i32, i32, i32) {
    %c0_i32 = arith.constant 0 : i32
    %c0_i32_0 = arith.constant 0 : i32
    %c0_i32_1 = arith.constant 0 : i32
    return %arg0, %c0_i32, %c0_i32_0 : i32, i32, i32
  }
  func.func @transform_2(%arg0: i32) -> (i32, i32, i32) {
    %c0_i32 = arith.constant 0 : i32
    %c0_i32_0 = arith.constant 0 : i32
    %c0_i32_1 = arith.constant 0 : i32
    return %arg0, %c0_i32, %c0_i32_0 : i32, i32, i32
  }
  func.func @transform_3(%arg0: i32) -> (i32, i32, i32) {
    %c0_i32 = arith.constant 0 : i32
    %c0_i32_0 = arith.constant 0 : i32
    %c0_i32_1 = arith.constant 0 : i32
    return %arg0, %c0_i32, %c0_i32_0 : i32, i32, i32
  }
  func.func @transform_4(%arg0: i32) -> (i32, i32) {
    %c0_i32 = arith.constant 0 : i32
    %c0_i32_0 = arith.constant 0 : i32
    %c0_i32_1 = arith.constant 0 : i32
    return %c0_i32, %c0_i32_0 : i32, i32
  }
  func.func @transform_5(%arg0: i32) -> (i32, i32) {
    %c0_i32 = arith.constant 0 : i32
    %c0_i32_0 = arith.constant 0 : i32
    %c0_i32_1 = arith.constant 0 : i32
    return %c0_i32, %c0_i32_0 : i32, i32
  }
  func.func @transform_6(%arg0: i32) -> (i32, i32) {
    %c0_i32 = arith.constant 0 : i32
    %c0_i32_0 = arith.constant 0 : i32
    %c0_i32_1 = arith.constant 0 : i32
    return %c0_i32, %c0_i32_0 : i32, i32
  }
  func.func @transform_7(%arg0: i32) -> (i32, i32, i32) {
    %c0_i32 = arith.constant 0 : i32
    %c0_i32_0 = arith.constant 0 : i32
    %c0_i32_1 = arith.constant 0 : i32
    return %arg0, %c0_i32, %c0_i32_0 : i32, i32, i32
  }
}

module attributes {stable_mosaic.version = 11 : i64} {
  func.func @_fc1_bn_sign_kernel(%arg0: i32, %arg1: memref<2x3136xbf16, #tpu.memory_space<vmem>>, %arg2: memref<3136x256xi8, #tpu.memory_space<vmem>>, %arg3: memref<1x256xf32, #tpu.memory_space<vmem>>, %arg4: memref<1x256xf32, #tpu.memory_space<vmem>>, %arg5: memref<2x256xbf16, #tpu.memory_space<vmem>>) attributes {dimension_semantics = [#tpu.dimension_semantics<parallel>], iteration_bounds = array<i64: 8>, scalar_prefetch = 0 : i64, scratch_operands = 0 : i64, tpu.core_type = #tpu.core_type<tc>, window_params = [{pipeline_mode = #tpu.pipeline_mode<synchronous>, transform_indices = @transform_0, window_bounds = array<i64: 2, 3136>}, {transform_indices = @transform_1, window_bounds = array<i64: 3136, 256>}, {transform_indices = @transform_2, window_bounds = array<i64: 1, 256>}, {transform_indices = @transform_3, window_bounds = array<i64: 1, 256>}, {transform_indices = @transform_4, window_bounds = array<i64: 2, 256>}]} {
    %c0 = arith.constant 0 : index
    %c0_0 = arith.constant 0 : index
    %0 = vector.load %arg2[%c0, %c0_0] : memref<3136x256xi8, #tpu.memory_space<vmem>>, vector<3136x256xi8>
    %1 = arith.sitofp %0 : vector<3136x256xi8> to vector<3136x256xbf16>
    %c0_1 = arith.constant 0 : index
    %c0_2 = arith.constant 0 : index
    %2 = vector.load %arg1[%c0_1, %c0_2] : memref<2x3136xbf16, #tpu.memory_space<vmem>>, vector<2x3136xbf16>
    %cst = arith.constant dense<0.000000e+00> : vector<2x256xf32>
    %3 = tpu.matmul %2, %1, %cst {dimension_numbers = #tpu.dot_dimension_numbers<[1], [0], [0], [1], [0, 0, 1, 1], [], []>} : vector<2x3136xbf16>, vector<3136x256xbf16>, vector<2x256xf32> -> vector<2x256xf32>
    %c0_3 = arith.constant 0 : index
    %c0_4 = arith.constant 0 : index
    %4 = vector.load %arg3[%c0_3, %c0_4] : memref<1x256xf32, #tpu.memory_space<vmem>>, vector<1x256xf32>
    %5 = vector.broadcast %4 : vector<1x256xf32> to vector<2x256xf32>
    %6 = arith.mulf %3, %5 : vector<2x256xf32>
    %c0_5 = arith.constant 0 : index
    %c0_6 = arith.constant 0 : index
    %7 = vector.load %arg4[%c0_5, %c0_6] : memref<1x256xf32, #tpu.memory_space<vmem>>, vector<1x256xf32>
    %8 = vector.broadcast %7 : vector<1x256xf32> to vector<2x256xf32>
    %9 = arith.addf %6, %8 : vector<2x256xf32>
    %cst_7 = arith.constant 0.000000e+00 : f32
    %10 = vector.broadcast %cst_7 : f32 to vector<2x256xf32>
    %11 = arith.cmpf oge, %9, %10 : vector<2x256xf32>
    %cst_8 = arith.constant 1.000000e+00 : f32
    %cst_9 = arith.constant -1.000000e+00 : f32
    %12 = vector.broadcast %cst_8 : f32 to vector<2x256xf32>
    %13 = vector.broadcast %cst_9 : f32 to vector<2x256xf32>
    %14 = arith.select %11, %12, %13 : vector<2x256xi1>, vector<2x256xf32>
    %15 = arith.truncf %14 : vector<2x256xf32> to vector<2x256xbf16>
    %c0_10 = arith.constant 0 : index
    %c0_11 = arith.constant 0 : index
    %16 = vector.load %arg5[%c0_10, %c0_11] : memref<2x256xbf16, #tpu.memory_space<vmem>>, vector<2x256xbf16>
    tpu.vector_store %arg5[%c0_10, %c0_11], %15 {strides = array<i32>} : memref<2x256xbf16, #tpu.memory_space<vmem>>, vector<2x256xbf16>,
    return
  }
  func.func @transform_0(%arg0: i32) -> (i32, i32) {
    %c0_i32 = arith.constant 0 : i32
    %c0_i32_0 = arith.constant 0 : i32
    %c0_i32_1 = arith.constant 0 : i32
    return %c0_i32, %c0_i32_0 : i32, i32
  }
  func.func @transform_1(%arg0: i32) -> (i32, i32) {
    %c0_i32 = arith.constant 0 : i32
    %c0_i32_0 = arith.constant 0 : i32
    return %c0_i32, %arg0 : i32, i32
  }
  func.func @transform_2(%arg0: i32) -> (i32, i32) {
    %c0_i32 = arith.constant 0 : i32
    %c0_i32_0 = arith.constant 0 : i32
    return %c0_i32, %arg0 : i32, i32
  }
  func.func @transform_3(%arg0: i32) -> (i32, i32) {
    %c0_i32 = arith.constant 0 : i32
    %c0_i32_0 = arith.constant 0 : i32
    return %c0_i32, %arg0 : i32, i32
  }
  func.func @transform_4(%arg0: i32) -> (i32, i32) {
    %c0_i32 = arith.constant 0 : i32
    %c0_i32_0 = arith.constant 0 : i32
    return %c0_i32, %arg0 : i32, i32
  }
}

module attributes {stable_mosaic.version = 11 : i64} {
  func.func @_fc2_scale_kernel(%arg0: memref<2x2048xbf16, #tpu.memory_space<vmem>>, %arg1: memref<2048x10xi8, #tpu.memory_space<vmem>>, %arg2: memref<1x10xf32, #tpu.memory_space<vmem>>, %arg3: memref<1x10xf32, #tpu.memory_space<vmem>>, %arg4: memref<2x10xf32, #tpu.memory_space<vmem>>) attributes {dimension_semantics = [], scalar_prefetch = 0 : i64, scratch_operands = 0 : i64, tpu.core_type = #tpu.core_type<tc>} {
    %c0 = arith.constant 0 : index
    %c0_0 = arith.constant 0 : index
    %0 = vector.load %arg1[%c0, %c0_0] : memref<2048x10xi8, #tpu.memory_space<vmem>>, vector<2048x10xi8>
    %1 = arith.sitofp %0 : vector<2048x10xi8> to vector<2048x10xbf16>
    %c0_1 = arith.constant 0 : index
    %c0_2 = arith.constant 0 : index
    %2 = vector.load %arg0[%c0_1, %c0_2] : memref<2x2048xbf16, #tpu.memory_space<vmem>>, vector<2x2048xbf16>
    %cst = arith.constant dense<0.000000e+00> : vector<2x10xf32>
    %3 = tpu.matmul %2, %1, %cst {dimension_numbers = #tpu.dot_dimension_numbers<[1], [0], [0], [1], [0, 0, 1, 1], [], []>} : vector<2x2048xbf16>, vector<2048x10xbf16>, vector<2x10xf32> -> vector<2x10xf32>
    %c0_3 = arith.constant 0 : index
    %c0_4 = arith.constant 0 : index
    %4 = vector.load %arg2[%c0_3, %c0_4] : memref<1x10xf32, #tpu.memory_space<vmem>>, vector<1x10xf32>
    %5 = vector.broadcast %4 : vector<1x10xf32> to vector<2x10xf32>
    %6 = arith.mulf %3, %5 : vector<2x10xf32>
    %c0_5 = arith.constant 0 : index
    %c0_6 = arith.constant 0 : index
    %7 = vector.load %arg3[%c0_5, %c0_6] : memref<1x10xf32, #tpu.memory_space<vmem>>, vector<1x10xf32>
    %8 = vector.broadcast %7 : vector<1x10xf32> to vector<2x10xf32>
    %9 = arith.addf %6, %8 : vector<2x10xf32>
    %c0_7 = arith.constant 0 : index
    %c0_8 = arith.constant 0 : index
    %10 = vector.load %arg4[%c0_7, %c0_8] : memref<2x10xf32, #tpu.memory_space<vmem>>, vector<2x10xf32>
    tpu.vector_store %arg4[%c0_7, %c0_8], %9 {strides = array<i32>} : memref<2x10xf32, #tpu.memory_space<vmem>>, vector<2x10xf32>,
    return
  }
}

</mosaic_0001>

<bundles_post_ra>
// kernel: bnn_fmnist_forward.4
= control target key start
LH: loop header
LB: loop body
LE: loop exit
PB: predicated region body
PF: predicated region fallthrough
CT: control target
= control target key end

     0   :  { %12 = vsyncpa [#allocation3], 0  ;;  %s6555_s0 = inlined_call_operand.vmem [shape: f32[2,196,9], index: 0, kind: input, shape index: {}]   ;;  %s6556_s1 = inlined_call_operand.vmem [shape: f32[2,196,9], index: 1, kind: input, shape index: {}]   ;;  %s6557_s2 = inlined_call_operand.vmem [shape: f32[2,196,9], index: 2, kind: input, shape index: {}]   ;;  %s6558_s3 = inlined_call_operand.vmem [shape: f32[2,196,9], index: 3, kind: input, shape index: {}]   ;;  %s6559_s4 = inlined_call_operand.hbm [shape: f32[9,64], index: 4, kind: input, shape index: {}]   ;;  %s6560_s5 = inlined_call_operand.hbm [shape: f32[1,64], index: 5, kind: input, shape index: {}]   ;;  %s6561_s6 = inlined_call_operand.hbm [shape: f32[1,64], index: 6, kind: input, shape index: {}]   ;;  %s6562_s7 = inlined_call_operand.vmem [shape: bf16[2,196,64], index: 7, kind: output, shape index: {}]  }
   0x1   :  { %13 = vsyncpa [#allocation5], 0  ;;  %s4416_s24 = smov [#allocation4]   ;;  %s4417_s26 = smov [#allocation2]  }
   0x2   :  { %s40_s25 = sshll.u32 %s4416_s24, 4  ;;  %s27_s27 = sshll.u32 %s4417_s26, 4  ;;  %s41_s25 = int_to_ptr.vmem [resolvable:$true] %s40_s25  ;;  %s4466_s27 = int_to_ptr.vmem [resolvable:$true] %s27_s27 }
   0x3   :  { %s4346_s30 = scalar_lea.hbm %s6560_s5, 16 }
   0x4   :  { %p4347_p0 = scmp.ne.s32.totalorder %s6560_s5, %s4346_s30  ;;  %p4350_p1 = scmp.lt.u32.totalorder %s4346_s30, %s6560_s5 }
   0x6   :  { %p4352_p2 = pnand %p4350_p1, %p4347_p0 }
   0x8   :  { %4355 = shalt.err (!%p4352_p2)
}
   0x9   :  { %s4356_s12 = scalar_lea.vmem %s41_s25, 16  ;;  %s4360_s13 = scalar_lea.vmem %s41_s25, 32 }
   0xa   :  { %p4357_p3 = scmp.ne.s32.totalorder %s41_s25, %s4356_s12  ;;  %p4361_p4 = scmp.lt.s32.totalorder %s41_s25, %s41_s25 }
   0xb   :  { %p4362_p5 = scmp.lt.s32.totalorder %s4360_s13, %s4356_s12 }
   0xd   :  { %p4363_p6 = por %p4362_p5, %p4361_p4 }
   0xf   :  { %p4364_p7 = pnand %p4363_p6, %p4357_p3 }
  0x11   :  { %4367 = shalt.err (!%p4364_p7)
}
  0x12   :  { %43 = dma.hbm_to_vmem [thread:$0]  %s6560_s5, 16, %s41_s25, [#allocation5]  }
  0x13   :  { %s4368_s18 = scalar_lea.hbm %s6559_s4, 256 }
  0x14   :  { %p4369_p8 = scmp.ne.s32.totalorder %s6559_s4, %s4368_s18  ;;  %p4372_p9 = scmp.lt.u32.totalorder %s4368_s18, %s6559_s4 }
  0x16   :  { %p4374_p10 = pnand %p4372_p9, %p4369_p8 }
  0x18   :  { %4377 = shalt.err (!%p4374_p10)
}
  0x19   :  { %s4378_s23 = scalar_lea.vmem %s4466_s27, 256  ;;  %p4383_p12 = scmp.lt.s32.totalorder %s4466_s27, %s4466_s27 }
  0x1a   :  { %p4379_p11 = scmp.ne.s32.totalorder %s4466_s27, %s4378_s23  ;;  %p4384_p13 = scmp.lt.s32.totalorder %s4378_s23, %s4378_s23 }
  0x1c   :  { %p4385_p0 = por %p4384_p13, %p4383_p12 }
  0x1e   :  { %p4386_p1 = pnand %p4385_p0, %p4379_p11 }
  0x20   :  { %4389 = shalt.err (!%p4386_p1)
}
  0x21   :  { %s4418_s5 = smov 128   ;;  %s4419_s24 = smov 8  }
  0x22   :  { %33 = dma.hbm_to_vmem [thread:$0]  %s6559_s4, 256, %s4466_s27, [#allocation3], %s4418_s5, %s4418_s5, %s4419_s24  }
  0x23   :  { %s4420_s28 = smov [#allocation6]   ;;  %s4390_s9 = scalar_lea.hbm %s6561_s6, 16 }
  0x24   :  { %s50_s29 = sshll.u32 %s4420_s28, 4  ;;  %p4391_p2 = scmp.ne.s32.totalorder %s6561_s6, %s4390_s9  ;;  %s51_s29 = int_to_ptr.vmem [resolvable:$true] %s50_s29 }
  0x25   :  { %p4394_p3 = scmp.lt.u32.totalorder %s4390_s9, %s6561_s6 }
  0x27   :  { %p4396_p4 = pnand %p4394_p3, %p4391_p2 }
  0x29   :  { %4399 = shalt.err (!%p4396_p4)
}
  0x2a   :  { %s4400_s14 = scalar_lea.vmem %s51_s29, 16  ;;  %s4404_s4 = scalar_lea.vmem %s51_s29, 32 }
  0x2b   :  { %p4401_p5 = scmp.ne.s32.totalorder %s51_s29, %s4400_s14  ;;  %p4405_p6 = scmp.lt.s32.totalorder %s51_s29, %s51_s29 }
  0x2c   :  { %p4406_p7 = scmp.lt.s32.totalorder %s4404_s4, %s4400_s14 }
  0x2e   :  { %p4407_p8 = por %p4406_p7, %p4405_p6 }
  0x30   :  { %p4408_p9 = pnand %p4407_p8, %p4401_p5 }
  0x32   :  { %4411 = shalt.err (!%p4408_p9)
}
  0x33   :  { %53 = dma.hbm_to_vmem [thread:$0]  %s6561_s6, 16, %s51_s29, [#allocation5]  }
  0x34   :  { %4412 = dma.done.wait [#allocation3], 256  }
  0x35   :  { %4413 = vsyncadd [#allocation3], 4294967040 }
  0x36   :  { %4414 = dma.done.wait [#allocation5], 32  }
  0x37   :  { %4415 = vsyncadd [#allocation5], 4294967264  ;;  %v4421_v0 = vmov 0.0|0.0   ;;  %vm4422_vm0 = vmmov 0   ;;  %v6563_v1 = vmov 0.0   ;;  %vm168_vm1 = vcmask 1040384  }
  0x38   :  { %4302 = vmatprep.subr.bf16.mxu0 %v4421_v0  ;;  %4306 = vmatprep.subr.bf16.mxu1 %v4421_v0  ;;  %v63_v2 = vld [vmem:[#allocation2] sm:$0xff]  ;;  %v64_v3 = vld [vmem:[#allocation2 + $0x8] sm:$0x1]  ;;  %vm4424_vm2 = vmmov 1   ;;  %vm92_vm4 = vcmask 72704   ;;  %v69_v10 = vld [vmem:[%s6555_s0 + $0x10] sm:$0xff] }
  0x39   :  { %3674 = vmatprep.mubr.msk.f32.mxu0 %vm4422_vm0, %v6563_v1  ;;  %3753 = vmatprep.mubr.msk.f32.mxu1 %vm4422_vm0, %v6563_v1  ;;  %vm4515_vm3 = vmpackc.low %vm168_vm1, %vm4424_vm2  ;;  %v4519_v5 = vpack.c.bf16 %v64_v3, %v63_v2  ;;  %v67_v6 = vld [vmem:[%s6555_s0] sm:$0xff]  ;;  %v68_v8 = vld [vmem:[%s6555_s0 + $0x8] sm:$0xff]  ;;  %vm1520_vm6 = vcmask 519168  }
  0x3a   :  { %v362_v7 = vld [vmem:[%s6556_s1] sm:$0xff]  ;;  %v363_v9 = vld [vmem:[%s6556_s1 + $0x8] sm:$0xff]  ;;  %v364_v11 = vld [vmem:[%s6556_s1 + $0x10] sm:$0xff] }
  0x3b   :  { %4305 = vmatpush3.bf16.msk.msra.mxu0 %vm4515_vm3, %v4519_v5  ;;  %4309 = vmatpush3.bf16.msk.msra.mxu1 %vm4515_vm3, %v4519_v5  ;;  %v70_v12 = vld [vmem:[%s6555_s0 + $0x18] sm:$0xff]  ;;  %v71_v14 = vld [vmem:[%s6555_s0 + $0x20] sm:$0xff]  ;;  %v72_v16 = vld [vmem:[%s6555_s0 + $0x28] sm:$0xff] }
  0x3c   :  { %4310 = vmatprep.subr.bf16.mxu0 %v4421_v0  ;;  %4314 = vmatprep.subr.bf16.mxu1 %v4421_v0  ;;  %v365_v13 = vld [vmem:[%s6556_s1 + $0x18] sm:$0xff]  ;;  %v366_v15 = vld [vmem:[%s6556_s1 + $0x20] sm:$0xff]  ;;  %v367_v17 = vld [vmem:[%s6556_s1 + $0x28] sm:$0xff] }
  0x3d   :  { %v73_v18 = vld [vmem:[%s6555_s0 + $0x30] sm:$0xff]  ;;  %v74_v20 = vld [vmem:[%s6555_s0 + $0x38] sm:$0xff]  ;;  %v75_v22 = vld [vmem:[%s6555_s0 + $0x40] sm:$0xff] }
  0x3e   :  { %3675 = vmatmul.mubr.msk.f32.vlgmr.msra.gmra.mrb[0].mxu0 %vm92_vm4, %v67_v6  ;;  %3754 = vmatmul.mubr.msk.f32.vlgmr.msra.gmra.mrb[0].mxu1 %vm92_vm4, %v362_v7  ;;  %v368_v19 = vld [vmem:[%s6556_s1 + $0x30] sm:$0xff]  ;;  %v369_v21 = vld [vmem:[%s6556_s1 + $0x38] sm:$0xff]  ;;  %v370_v23 = vld [vmem:[%s6556_s1 + $0x40] sm:$0xff] }
  0x3f   :  { %4313 = vmatpush3.bf16.msk.msra.mxu0 %vm4515_vm3, %v4519_v5  ;;  %3677 = vmatprep.mubr.msk.f32.mxu0 %vm4422_vm0, %v6563_v1  ;;  %v76_v24 = vld [vmem:[%s6555_s0 + $0x48] sm:$0xff]  ;;  %v77_v26 = vld [vmem:[%s6555_s0 + $0x50] sm:$0xff]  ;;  %v78_v28 = vld [vmem:[%s6555_s0 + $0x58] sm:$0xff] }
  0x40   :  { %4317 = vmatpush3.bf16.msk.msra.mxu1 %vm4515_vm3, %v4519_v5  ;;  %3756 = vmatprep.mubr.msk.f32.mxu1 %vm4422_vm0, %v6563_v1  ;;  %v371_v25 = vld [vmem:[%s6556_s1 + $0x48] sm:$0xff]  ;;  %v372_v27 = vld [vmem:[%s6556_s1 + $0x50] sm:$0xff]  ;;  %v373_v29 = vld [vmem:[%s6556_s1 + $0x58] sm:$0xff] }
  0x41   :  { %4318 = vmatprep.subr.bf16.mxu0 %v4421_v0  ;;  %4322 = vmatprep.subr.bf16.mxu1 %v4421_v0  ;;  %v79_v30 = vld [vmem:[%s6555_s0 + $0x60] sm:$0xff]  ;;  %v80_v32 = vld [vmem:[%s6555_s0 + $0x68] sm:$0xff]  ;;  %v81_v34 = vld [vmem:[%s6555_s0 + $0x70] sm:$0xff] }
  0x42   :  { %3678 = vmatmul.mubr.msk.f32.gmra.mrb[2].mxu0 %vm92_vm4, %v68_v8  ;;  %3757 = vmatmul.mubr.msk.f32.gmra.mrb[2].mxu1 %vm92_vm4, %v363_v9  ;;  %v374_v31 = vld [vmem:[%s6556_s1 + $0x60] sm:$0xff]  ;;  %v375_v33 = vld [vmem:[%s6556_s1 + $0x68] sm:$0xff]  ;;  %v376_v35 = vld [vmem:[%s6556_s1 + $0x70] sm:$0xff] }
  0x43   :  { %3680 = vmatprep.mubr.msk.f32.mxu0 %vm4422_vm0, %v6563_v1  ;;  %3759 = vmatprep.mubr.msk.f32.mxu1 %vm4422_vm0, %v6563_v1  ;;  %v82_v36 = vld [vmem:[%s6555_s0 + $0x78] sm:$0xff]  ;;  %v83_v38 = vld [vmem:[%s6555_s0 + $0x80] sm:$0xff]  ;;  %v84_v40 = vld [vmem:[%s6555_s0 + $0x88] sm:$0xff] }
  0x44   :  { %v377_v37 = vld [vmem:[%s6556_s1 + $0x78] sm:$0xff]  ;;  %v378_v39 = vld [vmem:[%s6556_s1 + $0x80] sm:$0xff]  ;;  %v379_v41 = vld [vmem:[%s6556_s1 + $0x88] sm:$0xff] }
  0x45   :  { %v85_v42 = vld [vmem:[%s6555_s0 + $0x90] sm:$0xff]  ;;  %v86_v44 = vld [vmem:[%s6555_s0 + $0x98] sm:$0xff]  ;;  %v87_v46 = vld [vmem:[%s6555_s0 + $0xa0] sm:$0xff] }
  0x46   :  { %3681 = vmatmul.mubr.msk.f32.gmra.mrb[4].mxu0 %vm92_vm4, %v69_v10  ;;  %3760 = vmatmul.mubr.msk.f32.gmra.mrb[4].mxu1 %vm92_vm4, %v364_v11  ;;  %v380_v43 = vld [vmem:[%s6556_s1 + $0x90] sm:$0xff]  ;;  %v381_v45 = vld [vmem:[%s6556_s1 + $0x98] sm:$0xff]  ;;  %v382_v47 = vld [vmem:[%s6556_s1 + $0xa0] sm:$0xff] }
  0x47   :  { %3683 = vmatprep.mubr.msk.f32.mxu0 %vm4422_vm0, %v6563_v1  ;;  %3762 = vmatprep.mubr.msk.f32.mxu1 %vm4422_vm0, %v6563_v1  ;;  %v88_v48 = vld [vmem:[%s6555_s0 + $0xa8] sm:$0xff]  ;;  %v89_v50 = vld [vmem:[%s6555_s0 + $0xb0] sm:$0xff]  ;;  %v90_v52 = vld [vmem:[%s6555_s0 + $0xb8] sm:$0xff] }
  0x48   :  { %v383_v49 = vld [vmem:[%s6556_s1 + $0xa8] sm:$0xff]  ;;  %v384_v51 = vld [vmem:[%s6556_s1 + $0xb0] sm:$0xff]  ;;  %v385_v53 = vld [vmem:[%s6556_s1 + $0xb8] sm:$0xff] }
  0x49   :  { %v91_v54 = vld [vmem:[%s6555_s0 + $0xc0] sm:$0xf]  ;;  %v678_v58 = vld [vmem:[%s6557_s2 + $0x8] sm:$0xff]  ;;  %v679_v60 = vld [vmem:[%s6557_s2 + $0x10] sm:$0xff] }
  0x4a   :  { %3684 = vmatmul.mubr.msk.f32.gmra.mrb[6].mxu0 %vm92_vm4, %v70_v12  ;;  %3763 = vmatmul.mubr.msk.f32.gmra.mrb[6].mxu1 %vm92_vm4, %v365_v13  ;;  %v386_v55 = vld [vmem:[%s6556_s1 + $0xc0] sm:$0xf]  ;;  %v993_v59 = vld [vmem:[%s6558_s3 + $0x8] sm:$0xff]  ;;  %v994_v61 = vld [vmem:[%s6558_s3 + $0x10] sm:$0xff] }
  0x4b   :  { %3686 = vmatprep.mubr.msk.f32.mxu0 %vm4422_vm0, %v6563_v1  ;;  %3765 = vmatprep.mubr.msk.f32.mxu1 %vm4422_vm0, %v6563_v1  ;;  %v677_v56 = vld [vmem:[%s6557_s2] sm:$0xff]  ;;  %v680_v62 = vld [vmem:[%s6557_s2 + $0x18] sm:$0xff]  ;;  %v682_v3 = vld [vmem:[%s6557_s2 + $0x28] sm:$0xff] }
  0x4c   :  { %v992_v57 = vld [vmem:[%s6558_s3] sm:$0xff]  ;;  %v995_v63 = vld [vmem:[%s6558_s3 + $0x18] sm:$0xff]  ;;  %v997_v6 = vld [vmem:[%s6558_s3 + $0x28] sm:$0xff] }
  0x4d   :  { %v996_v2 = vld [vmem:[%s6558_s3 + $0x20] sm:$0xff]  ;;  %v683_v7 = vld [vmem:[%s6557_s2 + $0x30] sm:$0xff]  ;;  %v684_v9 = vld [vmem:[%s6557_s2 + $0x38] sm:$0xff] }
  0x4e   :  { %3687 = vmatmul.mubr.msk.f32.gmra.mrb[8].mxu0 %vm92_vm4, %v71_v14  ;;  %3766 = vmatmul.mubr.msk.f32.gmra.mrb[8].mxu1 %vm92_vm4, %v366_v15  ;;  %v998_v8 = vld [vmem:[%s6558_s3 + $0x30] sm:$0xff]  ;;  %v999_v10 = vld [vmem:[%s6558_s3 + $0x38] sm:$0xff]  ;;  %v685_v11 = vld [vmem:[%s6557_s2 + $0x40] sm:$0xff] }
  0x4f   :  { %3689 = vmatprep.mubr.msk.f32.mxu0 %vm4422_vm0, %v6563_v1  ;;  %3768 = vmatprep.mubr.msk.f32.mxu1 %vm4422_vm0, %v6563_v1  ;;  %v1000_v12 = vld [vmem:[%s6558_s3 + $0x40] sm:$0xff]  ;;  %v686_v13 = vld [vmem:[%s6557_s2 + $0x48] sm:$0xff]  ;;  %v687_v15 = vld [vmem:[%s6557_s2 + $0x50] sm:$0xff] }
  0x50   :  { %v1001_v14 = vld [vmem:[%s6558_s3 + $0x48] sm:$0xff]  ;;  %v3203_v4 = vld [vmem:[%s6556_s1 + $0xd8] sm:$0xff] }
  0x52   :  { %3690 = vmatmul.mubr.msk.f32.gmra.mrb[10].mxu0 %vm92_vm4, %v72_v16  ;;  %3769 = vmatmul.mubr.msk.f32.gmra.mrb[10].mxu1 %vm92_vm4, %v367_v17  ;;  %v1002_v16 = vld [vmem:[%s6558_s3 + $0x50] sm:$0xff]  ;;  %v688_v17 = vld [vmem:[%s6557_s2 + $0x58] sm:$0xff] }
  0x53   :  { %3692 = vmatprep.mubr.msk.f32.mxu0 %vm4422_vm0, %v6563_v1  ;;  %3771 = vmatprep.mubr.msk.f32.mxu1 %vm4422_vm0, %v6563_v1 }
  0x56   :  { %3693 = vmatmul.mubr.msk.f32.gmra.mrb[12].mxu0 %vm92_vm4, %v73_v18  ;;  %3772 = vmatmul.mubr.msk.f32.gmra.mrb[12].mxu1 %vm92_vm4, %v368_v19  ;;  %v1003_v18 = vld [vmem:[%s6558_s3 + $0x58] sm:$0xff]  ;;  %v689_v19 = vld [vmem:[%s6557_s2 + $0x60] sm:$0xff] }
  0x57   :  { %3695 = vmatprep.mubr.msk.f32.mxu0 %vm4422_vm0, %v6563_v1  ;;  %3774 = vmatprep.mubr.msk.f32.mxu1 %vm4422_vm0, %v6563_v1 }
  0x5a   :  { %3696 = vmatmul.mubr.msk.f32.gmra.mrb[14].mxu0 %vm92_vm4, %v74_v20  ;;  %3775 = vmatmul.mubr.msk.f32.gmra.mrb[14].mxu1 %vm92_vm4, %v369_v21  ;;  %v1004_v20 = vld [vmem:[%s6558_s3 + $0x60] sm:$0xff]  ;;  %v690_v21 = vld [vmem:[%s6557_s2 + $0x68] sm:$0xff] }
  0x5b   :  { %3698 = vmatprep.mubr.msk.f32.mxu0 %vm4422_vm0, %v6563_v1  ;;  %3777 = vmatprep.mubr.msk.f32.mxu1 %vm4422_vm0, %v6563_v1 }
  0x5e   :  { %3699 = vmatmul.mubr.msk.f32.gmra.mrb[16].mxu0 %vm92_vm4, %v75_v22  ;;  %3778 = vmatmul.mubr.msk.f32.gmra.mrb[16].mxu1 %vm92_vm4, %v370_v23  ;;  %v1005_v22 = vld [vmem:[%s6558_s3 + $0x68] sm:$0xff]  ;;  %v691_v23 = vld [vmem:[%s6557_s2 + $0x70] sm:$0xff] }
  0x5f   :  { %3701 = vmatprep.mubr.msk.f32.mxu0 %vm4422_vm0, %v6563_v1  ;;  %3780 = vmatprep.mubr.msk.f32.mxu1 %vm4422_vm0, %v6563_v1 }
  0x62   :  { %3702 = vmatmul.mubr.msk.f32.gmra.mrb[18].mxu0 %vm92_vm4, %v76_v24  ;;  %3781 = vmatmul.mubr.msk.f32.gmra.mrb[18].mxu1 %vm92_vm4, %v371_v25  ;;  %v1006_v24 = vld [vmem:[%s6558_s3 + $0x70] sm:$0xff]  ;;  %v692_v25 = vld [vmem:[%s6557_s2 + $0x78] sm:$0xff] }
  0x63   :  { %3704 = vmatprep.mubr.msk.f32.mxu0 %vm4422_vm0, %v6563_v1  ;;  %3783 = vmatprep.mubr.msk.f32.mxu1 %vm4422_vm0, %v6563_v1 }
  0x66   :  { %3705 = vmatmul.mubr.msk.f32.gmra.mrb[20].mxu0 %vm92_vm4, %v77_v26  ;;  %3784 = vmatmul.mubr.msk.f32.gmra.mrb[20].mxu1 %vm92_vm4, %v372_v27  ;;  %v1007_v26 = vld [vmem:[%s6558_s3 + $0x78] sm:$0xff]  ;;  %v693_v27 = vld [vmem:[%s6557_s2 + $0x80] sm:$0xff] }
  0x67   :  { %3707 = vmatprep.mubr.msk.f32.mxu0 %vm4422_vm0, %v6563_v1  ;;  %3786 = vmatprep.mubr.msk.f32.mxu1 %vm4422_vm0, %v6563_v1 }
  0x6a   :  { %3708 = vmatmul.mubr.msk.f32.gmra.mrb[22].mxu0 %vm92_vm4, %v78_v28  ;;  %3787 = vmatmul.mubr.msk.f32.gmra.mrb[22].mxu1 %vm92_vm4, %v373_v29  ;;  %v1008_v28 = vld [vmem:[%s6558_s3 + $0x80] sm:$0xff]  ;;  %v694_v29 = vld [vmem:[%s6557_s2 + $0x88] sm:$0xff] }
  0x6b   :  { %3710 = vmatprep.mubr.msk.f32.mxu0 %vm4422_vm0, %v6563_v1  ;;  %3789 = vmatprep.mubr.msk.f32.mxu1 %vm4422_vm0, %v6563_v1 }
  0x6e   :  { %3711 = vmatmul.mubr.msk.f32.gmra.mrb[24].mxu0 %vm92_vm4, %v79_v30  ;;  %3790 = vmatmul.mubr.msk.f32.gmra.mrb[24].mxu1 %vm92_vm4, %v374_v31  ;;  %v1009_v30 = vld [vmem:[%s6558_s3 + $0x88] sm:$0xff]  ;;  %v695_v31 = vld [vmem:[%s6557_s2 + $0x90] sm:$0xff] }
  0x6f   :  { %3713 = vmatprep.mubr.msk.f32.mxu0 %vm4422_vm0, %v6563_v1  ;;  %3792 = vmatprep.mubr.msk.f32.mxu1 %vm4422_vm0, %v6563_v1 }
  0x72   :  { %3714 = vmatmul.mubr.msk.f32.gmra.mrb[26].mxu0 %vm92_vm4, %v80_v32  ;;  %3793 = vmatmul.mubr.msk.f32.gmra.mrb[26].mxu1 %vm92_vm4, %v375_v33  ;;  %v1010_v32 = vld [vmem:[%s6558_s3 + $0x90] sm:$0xff]  ;;  %v696_v33 = vld [vmem:[%s6557_s2 + $0x98] sm:$0xff] }
  0x73   :  { %3716 = vmatprep.mubr.msk.f32.mxu0 %vm4422_vm0, %v6563_v1  ;;  %3795 = vmatprep.mubr.msk.f32.mxu1 %vm4422_vm0, %v6563_v1 }
  0x76   :  { %3717 = vmatmul.mubr.msk.f32.gmra.mrb[28].mxu0 %vm92_vm4, %v81_v34  ;;  %3796 = vmatmul.mubr.msk.f32.gmra.mrb[28].mxu1 %vm92_vm4, %v376_v35  ;;  %v1011_v34 = vld [vmem:[%s6558_s3 + $0x98] sm:$0xff]  ;;  %v697_v35 = vld [vmem:[%s6557_s2 + $0xa0] sm:$0xff] }
  0x77   :  { %3719 = vmatprep.mubr.msk.f32.mxu0 %vm4422_vm0, %v6563_v1  ;;  %3798 = vmatprep.mubr.msk.f32.mxu1 %vm4422_vm0, %v6563_v1 }
  0x7a   :  { %3720 = vmatmul.mubr.msk.f32.gmra.mrb[30].mxu0 %vm92_vm4, %v82_v36  ;;  %3799 = vmatmul.mubr.msk.f32.gmra.mrb[30].mxu1 %vm92_vm4, %v377_v37  ;;  %v1012_v36 = vld [vmem:[%s6558_s3 + $0xa0] sm:$0xff]  ;;  %v698_v37 = vld [vmem:[%s6557_s2 + $0xa8] sm:$0xff] }
  0x7b   :  { %3722 = vmatprep.mubr.msk.f32.mxu0 %vm4422_vm0, %v6563_v1  ;;  %3801 = vmatprep.mubr.msk.f32.mxu1 %vm4422_vm0, %v6563_v1 }
  0x7e   :  { %3723 = vmatmul.mubr.msk.f32.gmra.mrb[32].mxu0 %vm92_vm4, %v83_v38  ;;  %3802 = vmatmul.mubr.msk.f32.gmra.mrb[32].mxu1 %vm92_vm4, %v378_v39  ;;  %v1013_v38 = vld [vmem:[%s6558_s3 + $0xa8] sm:$0xff]  ;;  %v699_v39 = vld [vmem:[%s6557_s2 + $0xb0] sm:$0xff] }
  0x7f   :  { %3725 = vmatprep.mubr.msk.f32.mxu0 %vm4422_vm0, %v6563_v1  ;;  %3804 = vmatprep.mubr.msk.f32.mxu1 %vm4422_vm0, %v6563_v1 }
  0x82   :  { %3726 = vmatmul.mubr.msk.f32.gmra.mrb[34].mxu0 %vm92_vm4, %v84_v40  ;;  %3805 = vmatmul.mubr.msk.f32.gmra.mrb[34].mxu1 %vm92_vm4, %v379_v41  ;;  %v1014_v40 = vld [vmem:[%s6558_s3 + $0xb0] sm:$0xff]  ;;  %v700_v41 = vld [vmem:[%s6557_s2 + $0xb8] sm:$0xff] }
  0x83   :  { %3728 = vmatprep.mubr.msk.f32.mxu0 %vm4422_vm0, %v6563_v1  ;;  %3807 = vmatprep.mubr.msk.f32.mxu1 %vm4422_vm0, %v6563_v1 }
  0x86   :  { %3729 = vmatmul.mubr.msk.f32.gmra.mrb[36].mxu0 %vm92_vm4, %v85_v42  ;;  %3808 = vmatmul.mubr.msk.f32.gmra.mrb[36].mxu1 %vm92_vm4, %v380_v43  ;;  %v1015_v42 = vld [vmem:[%s6558_s3 + $0xb8] sm:$0xff]  ;;  %v701_v43 = vld [vmem:[%s6557_s2 + $0xc0] sm:$0xf] }
  0x87   :  { %3731 = vmatprep.mubr.msk.f32.mxu0 %vm4422_vm0, %v6563_v1  ;;  %3810 = vmatprep.mubr.msk.f32.mxu1 %vm4422_vm0, %v6563_v1 }
  0x8a   :  { %3732 = vmatmul.mubr.msk.f32.gmra.mrb[38].mxu0 %vm92_vm4, %v86_v44  ;;  %3811 = vmatmul.mubr.msk.f32.gmra.mrb[38].mxu1 %vm92_vm4, %v381_v45  ;;  %v1016_v44 = vld [vmem:[%s6558_s3 + $0xc0] sm:$0xf]  ;;  %v3150_v45 = vld [vmem:[%s6555_s0 + $0xc8] sm:$0xff] }
  0x8b   :  { %3734 = vmatprep.mubr.msk.f32.mxu0 %vm4422_vm0, %v6563_v1  ;;  %3813 = vmatprep.mubr.msk.f32.mxu1 %vm4422_vm0, %v6563_v1 }
  0x8e   :  { %3735 = vmatmul.mubr.msk.f32.gmra.mrb[40].mxu0 %vm92_vm4, %v87_v46  ;;  %3814 = vmatmul.mubr.msk.f32.gmra.mrb[40].mxu1 %vm92_vm4, %v382_v47  ;;  %v3201_v46 = vld [vmem:[%s6556_s1 + $0xc8] sm:$0xff]  ;;  %v3151_v47 = vld [vmem:[%s6555_s0 + $0xd0] sm:$0xff] }
  0x8f   :  { %3737 = vmatprep.mubr.msk.f32.mxu0 %vm4422_vm0, %v6563_v1  ;;  %3816 = vmatprep.mubr.msk.f32.mxu1 %vm4422_vm0, %v6563_v1 }
  0x92   :  { %3738 = vmatmul.mubr.msk.f32.gmra.mrb[42].mxu0 %vm92_vm4, %v88_v48  ;;  %3817 = vmatmul.mubr.msk.f32.gmra.mrb[42].mxu1 %vm92_vm4, %v383_v49  ;;  %v3202_v48 = vld [vmem:[%s6556_s1 + $0xd0] sm:$0xff]  ;;  %v3152_v49 = vld [vmem:[%s6555_s0 + $0xd8] sm:$0xff] }
  0x93   :  { %3740 = vmatprep.mubr.msk.f32.mxu0 %vm4422_vm0, %v6563_v1  ;;  %3819 = vmatprep.mubr.msk.f32.mxu1 %vm4422_vm0, %v6563_v1 }
  0x96   :  { %3741 = vmatmul.mubr.msk.f32.gmra.mrb[44].mxu0 %vm92_vm4, %v89_v50  ;;  %3820 = vmatmul.mubr.msk.f32.gmra.mrb[44].mxu1 %vm92_vm4, %v384_v51  ;;  %v3204_v50 = vld [vmem:[%s6556_s1 + $0xe0] sm:$0xff] }
  0x97   :  { %3743 = vmatprep.mubr.msk.f32.mxu0 %vm4422_vm0, %v6563_v1  ;;  %3822 = vmatprep.mubr.msk.f32.mxu1 %vm4422_vm0, %v6563_v1 }
  0x9a   :  { %3744 = vmatmul.mubr.msk.f32.gmra.mrb[46].mxu0 %vm92_vm4, %v90_v52  ;;  %3823 = vmatmul.mubr.msk.f32.gmra.mrb[46].mxu1 %vm92_vm4, %v385_v53 }
  0x9b   :  { %3746 = vmatprep.mubr.msk.f32.mxu0 %vm4422_vm0, %v6563_v1  ;;  %3825 = vmatprep.mubr.msk.f32.mxu1 %vm4422_vm0, %v6563_v1 }
  0x9e   :  { %3747 = vmatmul.mubr.msk.f32.gmra.mrb[48].mxu0 %vm92_vm4, %v91_v54  ;;  %3826 = vmatmul.mubr.msk.f32.gmra.mrb[48].mxu1 %vm92_vm4, %v386_v55 }
  0x9f   :  { %3832 = vmatprep.mubr.msk.f32.mxu0 %vm4422_vm0, %v6563_v1  ;;  %3911 = vmatprep.mubr.msk.f32.mxu1 %vm4422_vm0, %v6563_v1 }
  0xa2   :  { %3833 = vmatmul.mubr.msk.f32.vlgmr.msra.gmra.mrb[50].mxu0 %vm92_vm4, %v677_v56  ;;  %3912 = vmatmul.mubr.msk.f32.vlgmr.msra.gmra.mrb[50].mxu1 %vm92_vm4, %v992_v57  ;;  %v3154_v56 = vld [vmem:[%s6555_s0 + $0xe8] sm:$0xff] }
  0xa3   :  { %4321 = vmatpush3.bf16.msk.msra.mxu0 %vm4515_vm3, %v4519_v5  ;;  %3835 = vmatprep.mubr.msk.f32.mxu0 %vm4422_vm0, %v6563_v1  ;;  %v3205_v57 = vld [vmem:[%s6556_s1 + $0xe8] sm:$0xff] }
  0xa4   :  { %4325 = vmatpush3.bf16.msk.msra.mxu1 %vm4515_vm3, %v4519_v5  ;;  %3914 = vmatprep.mubr.msk.f32.mxu1 %vm4422_vm0, %v6563_v1 }
  0xa5   :  { %4326 = vmatprep.subr.bf16.mxu0 %v4421_v0  ;;  %4330 = vmatprep.subr.bf16.mxu1 %v4421_v0  ;;  %v681_v0 = vld [vmem:[%s6557_s2 + $0x20] sm:$0xff] }
  0xa6   :  { %3836 = vmatmul.mubr.msk.f32.gmra.mrb[52].mxu0 %vm92_vm4, %v678_v58  ;;  %3915 = vmatmul.mubr.msk.f32.gmra.mrb[52].mxu1 %vm92_vm4, %v993_v59 }
  0xa7   :  { %3838 = vmatprep.mubr.msk.f32.mxu0 %vm4422_vm0, %v6563_v1  ;;  %3917 = vmatprep.mubr.msk.f32.mxu1 %vm4422_vm0, %v6563_v1 }
  0xaa   :  { %3839 = vmatmul.mubr.msk.f32.gmra.mrb[54].mxu0 %vm92_vm4, %v679_v60  ;;  %3918 = vmatmul.mubr.msk.f32.gmra.mrb[54].mxu1 %vm92_vm4, %v994_v61 }
  0xab   :  { %3841 = vmatprep.mubr.msk.f32.mxu0 %vm4422_vm0, %v6563_v1  ;;  %3920 = vmatprep.mubr.msk.f32.mxu1 %vm4422_vm0, %v6563_v1 }
  0xae   :  { %3842 = vmatmul.mubr.msk.f32.gmra.mrb[56].mxu0 %vm92_vm4, %v680_v62  ;;  %3921 = vmatmul.mubr.msk.f32.gmra.mrb[56].mxu1 %vm92_vm4, %v995_v63  ;;  %v3155_v63 = vld [vmem:[%s6555_s0 + $0xf0] sm:$0xff] }
  0xaf   :  { %3844 = vmatprep.mubr.msk.f32.mxu0 %vm4422_vm0, %v6563_v1  ;;  %3923 = vmatprep.mubr.msk.f32.mxu1 %vm4422_vm0, %v6563_v1 }
  0xb2   :  { %3845 = vmatmul.mubr.msk.f32.gmra.mrb[58].mxu0 %vm92_vm4, %v681_v0  ;;  %3924 = vmatmul.mubr.msk.f32.gmra.mrb[58].mxu1 %vm92_vm4, %v996_v2  ;;  %v3206_v0 = vld [vmem:[%s6556_s1 + $0xf0] sm:$0xff] }
  0xb3   :  { %3847 = vmatprep.mubr.msk.f32.mxu0 %vm4422_vm0, %v6563_v1  ;;  %3926 = vmatprep.mubr.msk.f32.mxu1 %vm4422_vm0, %v6563_v1 }
  0xb6   :  { %3848 = vmatmul.mubr.msk.f32.gmra.mrb[60].mxu0 %vm92_vm4, %v682_v3  ;;  %3927 = vmatmul.mubr.msk.f32.gmra.mrb[60].mxu1 %vm92_vm4, %v997_v6 }
  0xb7   :  { %3850 = vmatprep.mubr.msk.f32.mxu0 %vm4422_vm0, %v6563_v1  ;;  %3929 = vmatprep.mubr.msk.f32.mxu1 %vm4422_vm0, %v6563_v1 }
  0xba   :  { %3851 = vmatmul.mubr.msk.f32.gmra.mrb[62].mxu0 %vm92_vm4, %v683_v7  ;;  %3930 = vmatmul.mubr.msk.f32.gmra.mrb[62].mxu1 %vm92_vm4, %v998_v8 }
  0xbb   :  { %3853 = vmatprep.mubr.msk.f32.mxu0 %vm4422_vm0, %v6563_v1  ;;  %3932 = vmatprep.mubr.msk.f32.mxu1 %vm4422_vm0, %v6563_v1 }
  0xbe   :  { %3854 = vmatmul.mubr.msk.f32.gmra.mrb[64].mxu0 %vm92_vm4, %v684_v9  ;;  %3933 = vmatmul.mubr.msk.f32.gmra.mrb[64].mxu1 %vm92_vm4, %v999_v10  ;;  %v3156_v9 = vld [vmem:[%s6555_s0 + $0xf8] sm:$0xff] }
  0xbf   :  { %3856 = vmatprep.mubr.msk.f32.mxu0 %vm4422_vm0, %v6563_v1  ;;  %3935 = vmatprep.mubr.msk.f32.mxu1 %vm4422_vm0, %v6563_v1  ;;  %v3207_v10 = vld [vmem:[%s6556_s1 + $0xf8] sm:$0xff] }
  0xc2   :  { %3857 = vmatmul.mubr.msk.f32.gmra.mrb[66].mxu0 %vm92_vm4, %v685_v11  ;;  %3936 = vmatmul.mubr.msk.f32.gmra.mrb[66].mxu1 %vm92_vm4, %v1000_v12 }
  0xc3   :  { %3859 = vmatprep.mubr.msk.f32.mxu0 %vm4422_vm0, %v6563_v1  ;;  %3938 = vmatprep.mubr.msk.f32.mxu1 %vm4422_vm0, %v6563_v1 }
  0xc6   :  { %3860 = vmatmul.mubr.msk.f32.gmra.mrb[68].mxu0 %vm92_vm4, %v686_v13  ;;  %3939 = vmatmul.mubr.msk.f32.gmra.mrb[68].mxu1 %vm92_vm4, %v1001_v14 }
  0xc7   :  { %3862 = vmatprep.mubr.msk.f32.mxu0 %vm4422_vm0, %v6563_v1  ;;  %3941 = vmatprep.mubr.msk.f32.mxu1 %vm4422_vm0, %v6563_v1 }
  0xca   :  { %3863 = vmatmul.mubr.msk.f32.gmra.mrb[70].mxu0 %vm92_vm4, %v687_v15  ;;  %3942 = vmatmul.mubr.msk.f32.gmra.mrb[70].mxu1 %vm92_vm4, %v1002_v16  ;;  %v3157_v16 = vld [vmem:[%s6555_s0 + $0x100] sm:$0xff] }
  0xcb   :  { %3865 = vmatprep.mubr.msk.f32.mxu0 %vm4422_vm0, %v6563_v1  ;;  %3944 = vmatprep.mubr.msk.f32.mxu1 %vm4422_vm0, %v6563_v1 }
  0xce   :  { %3866 = vmatmul.mubr.msk.f32.gmra.mrb[72].mxu0 %vm92_vm4, %v688_v17  ;;  %3945 = vmatmul.mubr.msk.f32.gmra.mrb[72].mxu1 %vm92_vm4, %v1003_v18  ;;  %v3208_v17 = vld [vmem:[%s6556_s1 + $0x100] sm:$0xff] }
  0xcf   :  { %3868 = vmatprep.mubr.msk.f32.mxu0 %vm4422_vm0, %v6563_v1  ;;  %3947 = vmatprep.mubr.msk.f32.mxu1 %vm4422_vm0, %v6563_v1 }
  0xd2   :  { %3869 = vmatmul.mubr.msk.f32.gmra.mrb[74].mxu0 %vm92_vm4, %v689_v19  ;;  %3948 = vmatmul.mubr.msk.f32.gmra.mrb[74].mxu1 %vm92_vm4, %v1004_v20 }
  0xd3   :  { %3871 = vmatprep.mubr.msk.f32.mxu0 %vm4422_vm0, %v6563_v1  ;;  %3950 = vmatprep.mubr.msk.f32.mxu1 %vm4422_vm0, %v6563_v1 }
  0xd6   :  { %3872 = vmatmul.mubr.msk.f32.gmra.mrb[76].mxu0 %vm92_vm4, %v690_v21  ;;  %3951 = vmatmul.mubr.msk.f32.gmra.mrb[76].mxu1 %vm92_vm4, %v1005_v22  ;;  %v3256_v21 = vld [vmem:[%s6557_s2 + $0xe8] sm:$0xff] }
  0xd7   :  { %3874 = vmatprep.mubr.msk.f32.mxu0 %vm4422_vm0, %v6563_v1  ;;  %3953 = vmatprep.mubr.msk.f32.mxu1 %vm4422_vm0, %v6563_v1 }
  0xda   :  { %3875 = vmatmul.mubr.msk.f32.gmra.mrb[78].mxu0 %vm92_vm4, %v691_v23  ;;  %3954 = vmatmul.mubr.msk.f32.gmra.mrb[78].mxu1 %vm92_vm4, %v1006_v24  ;;  %v3158_v23 = vld [vmem:[%s6555_s0 + $0x108] sm:$0xff] }
  0xdb   :  { %3877 = vmatprep.mubr.msk.f32.mxu0 %vm4422_vm0, %v6563_v1  ;;  %3956 = vmatprep.mubr.msk.f32.mxu1 %vm4422_vm0, %v6563_v1  ;;  %v3209_v24 = vld [vmem:[%s6556_s1 + $0x108] sm:$0xff] }
  0xde   :  { %3878 = vmatmul.mubr.msk.f32.gmra.mrb[80].mxu0 %vm92_vm4, %v692_v25  ;;  %3957 = vmatmul.mubr.msk.f32.gmra.mrb[80].mxu1 %vm92_vm4, %v1007_v26 }
  0xdf   :  { %3880 = vmatprep.mubr.msk.f32.mxu0 %vm4422_vm0, %v6563_v1  ;;  %3959 = vmatprep.mubr.msk.f32.mxu1 %vm4422_vm0, %v6563_v1 }
  0xe2   :  { %3881 = vmatmul.mubr.msk.f32.gmra.mrb[82].mxu0 %vm92_vm4, %v693_v27  ;;  %3960 = vmatmul.mubr.msk.f32.gmra.mrb[82].mxu1 %vm92_vm4, %v1008_v28  ;;  %v5648_v28 = vld [vmem:[#allocation4] ss:$0 sm:$0xff] }
  0xe3   :  { %3883 = vmatprep.mubr.msk.f32.mxu0 %vm4422_vm0, %v6563_v1  ;;  %3962 = vmatprep.mubr.msk.f32.mxu1 %vm4422_vm0, %v6563_v1 }
  0xe6   :  { %3884 = vmatmul.mubr.msk.f32.gmra.mrb[84].mxu0 %vm92_vm4, %v694_v29  ;;  %3963 = vmatmul.mubr.msk.f32.gmra.mrb[84].mxu1 %vm92_vm4, %v1009_v30  ;;  %v3159_v30 = vld [vmem:[%s6555_s0 + $0x110] sm:$0xff] }
  0xe7   :  { %3886 = vmatprep.mubr.msk.f32.mxu0 %vm4422_vm0, %v6563_v1  ;;  %3965 = vmatprep.mubr.msk.f32.mxu1 %vm4422_vm0, %v6563_v1 }
  0xea   :  { %3887 = vmatmul.mubr.msk.f32.gmra.mrb[86].mxu0 %vm92_vm4, %v695_v31  ;;  %3966 = vmatmul.mubr.msk.f32.gmra.mrb[86].mxu1 %vm92_vm4, %v1010_v32  ;;  %v3210_v31 = vld [vmem:[%s6556_s1 + $0x110] sm:$0xff] }
  0xeb   :  { %3889 = vmatprep.mubr.msk.f32.mxu0 %vm4422_vm0, %v6563_v1  ;;  %3968 = vmatprep.mubr.msk.f32.mxu1 %vm4422_vm0, %v6563_v1 }
  0xee   :  { %3890 = vmatmul.mubr.msk.f32.gmra.mrb[88].mxu0 %vm92_vm4, %v696_v33  ;;  %3969 = vmatmul.mubr.msk.f32.gmra.mrb[88].mxu1 %vm92_vm4, %v1011_v34 }
  0xef   :  { %3892 = vmatprep.mubr.msk.f32.mxu0 %vm4422_vm0, %v6563_v1  ;;  %3971 = vmatprep.mubr.msk.f32.mxu1 %vm4422_vm0, %v6563_v1 }
  0xf2   :  { %3893 = vmatmul.mubr.msk.f32.gmra.mrb[90].mxu0 %vm92_vm4, %v697_v35  ;;  %3972 = vmatmul.mubr.msk.f32.gmra.mrb[90].mxu1 %vm92_vm4, %v1012_v36 }
  0xf3   :  { %3895 = vmatprep.mubr.msk.f32.mxu0 %vm4422_vm0, %v6563_v1  ;;  %3974 = vmatprep.mubr.msk.f32.mxu1 %vm4422_vm0, %v6563_v1 }
  0xf6   :  { %3896 = vmatmul.mubr.msk.f32.gmra.mrb[92].mxu0 %vm92_vm4, %v698_v37  ;;  %3975 = vmatmul.mubr.msk.f32.gmra.mrb[92].mxu1 %vm92_vm4, %v1013_v38  ;;  %v3160_v37 = vld [vmem:[%s6555_s0 + $0x118] sm:$0xff] }
  0xf7   :  { %3898 = vmatprep.mubr.msk.f32.mxu0 %vm4422_vm0, %v6563_v1  ;;  %3977 = vmatprep.mubr.msk.f32.mxu1 %vm4422_vm0, %v6563_v1  ;;  %v3211_v38 = vld [vmem:[%s6556_s1 + $0x118] sm:$0xff] }
  0xfa   :  { %3899 = vmatmul.mubr.msk.f32.gmra.mrb[94].mxu0 %vm92_vm4, %v699_v39  ;;  %3978 = vmatmul.mubr.msk.f32.gmra.mrb[94].mxu1 %vm92_vm4, %v1014_v40 }
  0xfb   :  { %3901 = vmatprep.mubr.msk.f32.mxu0 %vm4422_vm0, %v6563_v1  ;;  %3980 = vmatprep.mubr.msk.f32.mxu1 %vm4422_vm0, %v6563_v1 }
  0xfe   :  { %3902 = vmatmul.mubr.msk.f32.gmra.mrb[96].mxu0 %vm92_vm4, %v700_v41  ;;  %3981 = vmatmul.mubr.msk.f32.gmra.mrb[96].mxu1 %vm92_vm4, %v1015_v42  ;;  %v3255_v42 = vld [vmem:[%s6557_s2 + $0xe0] sm:$0xff] }
  0xff   :  { %3904 = vmatprep.mubr.msk.f32.mxu0 %vm4422_vm0, %v6563_v1  ;;  %3983 = vmatprep.mubr.msk.f32.mxu1 %vm4422_vm0, %v6563_v1 }
 0x102   :  { %3905 = vmatmul.mubr.msk.f32.gmra.mrb[98].mxu0 %vm92_vm4, %v701_v43  ;;  %3984 = vmatmul.mubr.msk.f32.gmra.mrb[98].mxu1 %vm92_vm4, %v1016_v44  ;;  %v3161_v44 = vld [vmem:[%s6555_s0 + $0x120] sm:$0xff] }
 0x103   :  { %3990 = vmatprep.mubr.msk.f32.mxu0 %vm4422_vm0, %v6563_v1  ;;  %4069 = vmatprep.mubr.msk.f32.mxu1 %vm4422_vm0, %v6563_v1 }
 0x106   :  { %3991 = vmatmul.mubr.msk.f32.vlgmr.msra.gmra.mrb[100].mxu0 %vm92_vm4, %v3150_v45  ;;  %4070 = vmatmul.mubr.msk.f32.vlgmr.msra.gmra.mrb[100].mxu1 %vm92_vm4, %v3201_v46  ;;  %v3212_v45 = vld [vmem:[%s6556_s1 + $0x120] sm:$0xff] }
 0x107   :  { %4329 = vmatpush3.bf16.msk.msra.mxu0 %vm4515_vm3, %v4519_v5  ;;  %3993 = vmatprep.mubr.msk.f32.mxu0 %vm4422_vm0, %v6563_v1 }
 0x108   :  { %4333 = vmatpush3.bf16.msk.msra.mxu1 %vm4515_vm3, %v4519_v5  ;;  %4072 = vmatprep.mubr.msk.f32.mxu1 %vm4422_vm0, %v6563_v1  ;;  %v3153_v5 = vld [vmem:[%s6555_s0 + $0xe0] sm:$0xff] }
 0x10a   :  { %3994 = vmatmul.mubr.msk.f32.gmra.mrb[102].mxu0 %vm92_vm4, %v3151_v47  ;;  %4073 = vmatmul.mubr.msk.f32.gmra.mrb[102].mxu1 %vm92_vm4, %v3202_v48 }
 0x10b   :  { %3996 = vmatprep.mubr.msk.f32.mxu0 %vm4422_vm0, %v6563_v1  ;;  %4075 = vmatprep.mubr.msk.f32.mxu1 %vm4422_vm0, %v6563_v1 }
 0x10e   :  { %3997 = vmatmul.mubr.msk.f32.gmra.mrb[104].mxu0 %vm92_vm4, %v3152_v49  ;;  %4076 = vmatmul.mubr.msk.f32.gmra.mrb[104].mxu1 %vm92_vm4, %v3203_v4 }
 0x10f   :  { %3999 = vmatprep.mubr.msk.f32.mxu0 %vm4422_vm0, %v6563_v1  ;;  %4078 = vmatprep.mubr.msk.f32.mxu1 %vm4422_vm0, %v6563_v1 }
 0x111   :  { %v5193_v51 = vpop.f32.mrb[0].mxu0  ;;  %v5195_v52 = vpop.f32.mrb[0].mxu1 }
 0x112   :  { %v3676_v53 = vpop.f32.mrb[1].mxu0  ;;  %v652_v54 = vmax.f32 %v5193_v51, %v5195_v52  ;;  %4000 = vmatmul.mubr.msk.f32.gmra.mrb[106].mxu0 %vm92_vm4, %v3153_v5  ;;  %4079 = vmatmul.mubr.msk.f32.gmra.mrb[106].mxu1 %vm92_vm4, %v3204_v50  ;;  %v3755_v55 = vpop.f32.mrb[1].mxu1  ;;  %v3162_v5 = vld [vmem:[%s6555_s0 + $0x128] sm:$0xff] }
 0x113   :  { %4002 = vmatprep.mubr.msk.f32.mxu0 %vm4422_vm0, %v6563_v1  ;;  %4081 = vmatprep.mubr.msk.f32.mxu1 %vm4422_vm0, %v6563_v1  ;;  %v3213_v50 = vld [vmem:[%s6556_s1 + $0x128] sm:$0xff] }
 0x114   :  { %v3307_v51 = vld [vmem:[%s6558_s3 + $0xe8] sm:$0xff] }
 0x115   :  { %v5211_v58 = vpop.f32.mrb[2].mxu0  ;;  %v5213_v59 = vpop.f32.mrb[2].mxu1 }
 0x116   :  { %v3679_v60 = vpop.f32.mrb[3].mxu0  ;;  %v653_v61 = vmax.f32 %v5211_v58, %v5213_v59  ;;  %4003 = vmatmul.mubr.msk.f32.gmra.mrb[108].mxu0 %vm92_vm4, %v3154_v56  ;;  %4082 = vmatmul.mubr.msk.f32.gmra.mrb[108].mxu1 %vm92_vm4, %v3205_v57  ;;  %v3758_v62 = vpop.f32.mrb[3].mxu1  ;;  %v3254_v57 = vld [vmem:[%s6557_s2 + $0xd8] sm:$0xff]  ;;  %v3308_v58 = vld [vmem:[%s6558_s3 + $0xf0] sm:$0xff] }
 0x117   :  { %4005 = vmatprep.mubr.msk.f32.mxu0 %vm4422_vm0, %v6563_v1  ;;  %4084 = vmatprep.mubr.msk.f32.mxu1 %vm4422_vm0, %v6563_v1  ;;  %v3163_v62 = vld [vmem:[%s6555_s0 + $0x130] sm:$0xff] }
 0x119   :  { %v5229_v2 = vpop.f32.mrb[4].mxu0  ;;  %v5231_v3 = vpop.f32.mrb[4].mxu1 }
 0x11a   :  { %v3682_v6 = vpop.f32.mrb[5].mxu0  ;;  %v654_v7 = vmax.f32 %v5229_v2, %v5231_v3  ;;  %4006 = vmatmul.mubr.msk.f32.gmra.mrb[110].mxu0 %vm92_vm4, %v3155_v63  ;;  %4085 = vmatmul.mubr.msk.f32.gmra.mrb[110].mxu1 %vm92_vm4, %v3206_v0  ;;  %v3761_v8 = vpop.f32.mrb[5].mxu1  ;;  %v3214_v63 = vld [vmem:[%s6556_s1 + $0x130] sm:$0xff]  ;;  %v3309_v2 = vld [vmem:[%s6558_s3 + $0xf8] sm:$0xff] }
 0x11b   :  { %4008 = vmatprep.mubr.msk.f32.mxu0 %vm4422_vm0, %v6563_v1  ;;  %4087 = vmatprep.mubr.msk.f32.mxu1 %vm4422_vm0, %v6563_v1 }
 0x11d   :  { %v5247_v11 = vpop.f32.mrb[6].mxu0  ;;  %v5249_v12 = vpop.f32.mrb[6].mxu1 }
 0x11e   :  { %v3685_v13 = vpop.f32.mrb[7].mxu0  ;;  %4009 = vmatmul.mubr.msk.f32.gmra.mrb[112].mxu0 %vm92_vm4, %v3156_v9  ;;  %4088 = vmatmul.mubr.msk.f32.gmra.mrb[112].mxu1 %vm92_vm4, %v3207_v10  ;;  %v3764_v15 = vpop.f32.mrb[7].mxu1 }
 0x11f   :  { %4011 = vmatprep.mubr.msk.f32.mxu0 %vm4422_vm0, %v6563_v1  ;;  %4090 = vmatprep.mubr.msk.f32.mxu1 %vm4422_vm0, %v6563_v1  ;;  %v3164_v13 = vld [vmem:[%s6555_s0 + $0x138] sm:$0xff] }
 0x120   :  { %v3215_v15 = vld [vmem:[%s6556_s1 + $0x138] sm:$0xff] }
 0x121   :  { %v5265_v18 = vpop.f32.mrb[8].mxu0  ;;  %v5267_v19 = vpop.f32.mrb[8].mxu1 }
 0x122   :  { %v3688_v20 = vpop.f32.mrb[9].mxu0  ;;  %4012 = vmatmul.mubr.msk.f32.gmra.mrb[114].mxu0 %vm92_vm4, %v3157_v16  ;;  %4091 = vmatmul.mubr.msk.f32.gmra.mrb[114].mxu1 %vm92_vm4, %v3208_v17  ;;  %v3767_v22 = vpop.f32.mrb[9].mxu1 }
 0x123   :  { %4014 = vmatprep.mubr.msk.f32.mxu0 %vm4422_vm0, %v6563_v1  ;;  %4093 = vmatprep.mubr.msk.f32.mxu1 %vm4422_vm0, %v6563_v1  ;;  %v3253_v22 = vld [vmem:[%s6557_s2 + $0xd0] sm:$0xff] }
 0x125   :  { %v5283_v25 = vpop.f32.mrb[10].mxu0  ;;  %v5285_v26 = vpop.f32.mrb[10].mxu1 }
 0x126   :  { %v3691_v27 = vpop.f32.mrb[11].mxu0  ;;  %4015 = vmatmul.mubr.msk.f32.gmra.mrb[116].mxu0 %vm92_vm4, %v3158_v23  ;;  %4094 = vmatmul.mubr.msk.f32.gmra.mrb[116].mxu1 %vm92_vm4, %v3209_v24  ;;  %v3770_v29 = vpop.f32.mrb[11].mxu1  ;;  %v3165_v24 = vld [vmem:[%s6555_s0 + $0x140] sm:$0xff] }
 0x127   :  { %4017 = vmatprep.mubr.msk.f32.mxu0 %vm4422_vm0, %v6563_v1  ;;  %4096 = vmatprep.mubr.msk.f32.mxu1 %vm4422_vm0, %v6563_v1  ;;  %v3216_v27 = vld [vmem:[%s6556_s1 + $0x140] sm:$0xff] }
 0x129   :  { %v5301_v32 = vpop.f32.mrb[12].mxu0  ;;  %v5303_v33 = vpop.f32.mrb[12].mxu1 }
 0x12a   :  { %v3694_v34 = vpop.f32.mrb[13].mxu0  ;;  %4018 = vmatmul.mubr.msk.f32.gmra.mrb[118].mxu0 %vm92_vm4, %v3159_v30  ;;  %4097 = vmatmul.mubr.msk.f32.gmra.mrb[118].mxu1 %vm92_vm4, %v3210_v31  ;;  %v3773_v36 = vpop.f32.mrb[13].mxu1 }
 0x12b   :  { %4020 = vmatprep.mubr.msk.f32.mxu0 %vm4422_vm0, %v6563_v1  ;;  %4099 = vmatprep.mubr.msk.f32.mxu1 %vm4422_vm0, %v6563_v1 }
 0x12d   :  { %v5319_v39 = vpop.f32.mrb[14].mxu0  ;;  %v5321_v40 = vpop.f32.mrb[14].mxu1 }
 0x12e   :  { %v3697_v41 = vpop.f32.mrb[15].mxu0  ;;  %4021 = vmatmul.mubr.msk.f32.gmra.mrb[120].mxu0 %vm92_vm4, %v3160_v37  ;;  %4100 = vmatmul.mubr.msk.f32.gmra.mrb[120].mxu1 %vm92_vm4, %v3211_v38  ;;  %v3776_v43 = vpop.f32.mrb[15].mxu1  ;;  %v3166_v37 = vld [vmem:[%s6555_s0 + $0x148] sm:$0xff] }
 0x12f   :  { %4023 = vmatprep.mubr.msk.f32.mxu0 %vm4422_vm0, %v6563_v1  ;;  %4102 = vmatprep.mubr.msk.f32.mxu1 %vm4422_vm0, %v6563_v1  ;;  %v3217_v38 = vld [vmem:[%s6556_s1 + $0x148] sm:$0xff] }
 0x131   :  { %v5337_v46 = vpop.f32.mrb[16].mxu0  ;;  %v5339_v47 = vpop.f32.mrb[16].mxu1 }
 0x132   :  { %v3700_v48 = vpop.f32.mrb[17].mxu0  ;;  %4024 = vmatmul.mubr.msk.f32.gmra.mrb[122].mxu0 %vm92_vm4, %v3161_v44  ;;  %4103 = vmatmul.mubr.msk.f32.gmra.mrb[122].mxu1 %vm92_vm4, %v3212_v45  ;;  %v3779_v4 = vpop.f32.mrb[17].mxu1  ;;  %v3252_v45 = vld [vmem:[%s6557_s2 + $0xc8] sm:$0xff] }
 0x133   :  { %4026 = vmatprep.mubr.msk.f32.mxu0 %vm4422_vm0, %v6563_v1  ;;  %4105 = vmatprep.mubr.msk.f32.mxu1 %vm4422_vm0, %v6563_v1  ;;  %v3167_v4 = vld [vmem:[%s6555_s0 + $0x150] sm:$0xff] }
 0x135   :  { %v5355_v53 = vpop.f32.mrb[18].mxu0  ;;  %v5357_v55 = vpop.f32.mrb[18].mxu1 }
 0x136   :  { %v3703_v56 = vpop.f32.mrb[19].mxu0  ;;  %4027 = vmatmul.mubr.msk.f32.gmra.mrb[124].mxu0 %vm92_vm4, %v3162_v5  ;;  %4106 = vmatmul.mubr.msk.f32.gmra.mrb[124].mxu1 %vm92_vm4, %v3213_v50  ;;  %v3782_v60 = vpop.f32.mrb[19].mxu1  ;;  %v3218_v5 = vld [vmem:[%s6556_s1 + $0x150] sm:$0xff] }
 0x137   :  { %4029 = vmatprep.mubr.msk.f32.mxu0 %vm4422_vm0, %v6563_v1  ;;  %4108 = vmatprep.mubr.msk.f32.mxu1 %vm4422_vm0, %v6563_v1 }
 0x139   :  { %v5373_v0 = vpop.f32.mrb[20].mxu0  ;;  %v5375_v6 = vpop.f32.mrb[20].mxu1 }
 0x13a   :  { %v3706_v8 = vpop.f32.mrb[21].mxu0  ;;  %4030 = vmatmul.mubr.msk.f32.gmra.mrb[126].mxu0 %vm92_vm4, %v3163_v62  ;;  %4109 = vmatmul.mubr.msk.f32.gmra.mrb[126].mxu1 %vm92_vm4, %v3214_v63  ;;  %v3785_v10 = vpop.f32.mrb[21].mxu1 }
 0x13b   :  { %4032 = vmatprep.mubr.msk.f32.mxu0 %vm4422_vm0, %v6563_v1  ;;  %4111 = vmatprep.mubr.msk.f32.mxu1 %vm4422_vm0, %v6563_v1  ;;  %v3168_v8 = vld [vmem:[%s6555_s0 + $0x158] sm:$0xff] }
 0x13c   :  { %v3219_v10 = vld [vmem:[%s6556_s1 + $0x158] sm:$0xff] }
 0x13d   :  { %v5391_v16 = vpop.f32.mrb[22].mxu0  ;;  %v5393_v17 = vpop.f32.mrb[22].mxu1 }
 0x13e   :  { %v3709_v20 = vpop.f32.mrb[23].mxu0  ;;  %4033 = vmatmul.mubr.msk.f32.gmra.mrb[128].mxu0 %vm92_vm4, %v3164_v13  ;;  %4112 = vmatmul.mubr.msk.f32.gmra.mrb[128].mxu1 %vm92_vm4, %v3215_v15  ;;  %v3788_v23 = vpop.f32.mrb[23].mxu1 }
 0x13f   :  { %4035 = vmatprep.mubr.msk.f32.mxu0 %vm4422_vm0, %v6563_v1  ;;  %4114 = vmatprep.mubr.msk.f32.mxu1 %vm4422_vm0, %v6563_v1  ;;  %v3174_v23 = vld [vmem:[%s6555_s0 + $0x188] sm:$0xf] }
 0x141   :  { %v5409_v29 = vpop.f32.mrb[24].mxu0  ;;  %v5411_v30 = vpop.f32.mrb[24].mxu1 }
 0x142   :  { %v3712_v31 = vpop.f32.mrb[25].mxu0  ;;  %4036 = vmatmul.mubr.msk.f32.gmra.mrb[130].mxu0 %vm92_vm4, %v3165_v24  ;;  %4115 = vmatmul.mubr.msk.f32.gmra.mrb[130].mxu1 %vm92_vm4, %v3216_v27  ;;  %v3791_v36 = vpop.f32.mrb[25].mxu1  ;;  %v3169_v27 = vld [vmem:[%s6555_s0 + $0x160] sm:$0xff] }
 0x143   :  { %4038 = vmatprep.mubr.msk.f32.mxu0 %vm4422_vm0, %v6563_v1  ;;  %4117 = vmatprep.mubr.msk.f32.mxu1 %vm4422_vm0, %v6563_v1  ;;  %v3220_v31 = vld [vmem:[%s6556_s1 + $0x160] sm:$0xff] }
 0x145   :  { %v5427_v41 = vpop.f32.mrb[26].mxu0  ;;  %v5429_v43 = vpop.f32.mrb[26].mxu1 }
 0x146   :  { %v3715_v44 = vpop.f32.mrb[27].mxu0  ;;  %4039 = vmatmul.mubr.msk.f32.gmra.mrb[132].mxu0 %vm92_vm4, %v3166_v37  ;;  %4118 = vmatmul.mubr.msk.f32.gmra.mrb[132].mxu1 %vm92_vm4, %v3217_v38  ;;  %v3794_v48 = vpop.f32.mrb[27].mxu1 }
 0x147   :  { %4041 = vmatprep.mubr.msk.f32.mxu0 %vm4422_vm0, %v6563_v1  ;;  %4120 = vmatprep.mubr.msk.f32.mxu1 %vm4422_vm0, %v6563_v1 }
 0x149   :  { %v5445_v50 = vpop.f32.mrb[28].mxu0  ;;  %v5447_v56 = vpop.f32.mrb[28].mxu1 }
 0x14a   :  { %v3718_v60 = vpop.f32.mrb[29].mxu0  ;;  %4042 = vmatmul.mubr.msk.f32.gmra.mrb[134].mxu0 %vm92_vm4, %v3167_v4  ;;  %4121 = vmatmul.mubr.msk.f32.gmra.mrb[134].mxu1 %vm92_vm4, %v3218_v5  ;;  %v3797_v63 = vpop.f32.mrb[29].mxu1  ;;  %v3170_v4 = vld [vmem:[%s6555_s0 + $0x168] sm:$0xff] }
 0x14b   :  { %4044 = vmatprep.mubr.msk.f32.mxu0 %vm4422_vm0, %v6563_v1  ;;  %4123 = vmatprep.mubr.msk.f32.mxu1 %vm4422_vm0, %v6563_v1  ;;  %v3221_v5 = vld [vmem:[%s6556_s1 + $0x168] sm:$0xff] }
 0x14d   :  { %v5463_v13 = vpop.f32.mrb[30].mxu0  ;;  %v5465_v15 = vpop.f32.mrb[30].mxu1 }
 0x14e   :  { %v3721_v20 = vpop.f32.mrb[31].mxu0  ;;  %4045 = vmatmul.mubr.msk.f32.gmra.mrb[136].mxu0 %vm92_vm4, %v3168_v8  ;;  %4124 = vmatmul.mubr.msk.f32.gmra.mrb[136].mxu1 %vm92_vm4, %v3219_v10  ;;  %v3800_v24 = vpop.f32.mrb[31].mxu1  ;;  %v3173_v10 = vld [vmem:[%s6555_s0 + $0x180] sm:$0xff] }
 0x14f   :  { %4047 = vmatprep.mubr.msk.f32.mxu0 %vm4422_vm0, %v6563_v1  ;;  %4126 = vmatprep.mubr.msk.f32.mxu1 %vm4422_vm0, %v6563_v1  ;;  %v3171_v24 = vld [vmem:[%s6555_s0 + $0x170] sm:$0xff] }
 0x151   :  { %v5481_v36 = vpop.f32.mrb[32].mxu0  ;;  %v5483_v37 = vpop.f32.mrb[32].mxu1 }
 0x152   :  { %v3724_v38 = vpop.f32.mrb[33].mxu0  ;;  %4048 = vmatmul.mubr.msk.f32.gmra.mrb[138].mxu0 %vm92_vm4, %v3169_v27  ;;  %4127 = vmatmul.mubr.msk.f32.gmra.mrb[138].mxu1 %vm92_vm4, %v3220_v31  ;;  %v3803_v48 = vpop.f32.mrb[33].mxu1  ;;  %v3222_v27 = vld [vmem:[%s6556_s1 + $0x170] sm:$0xff] }
 0x153   :  { %4050 = vmatprep.mubr.msk.f32.mxu0 %vm4422_vm0, %v6563_v1  ;;  %4129 = vmatprep.mubr.msk.f32.mxu1 %vm4422_vm0, %v6563_v1 }
 0x155   :  { %v5499_v60 = vpop.f32.mrb[34].mxu0  ;;  %v5501_v63 = vpop.f32.mrb[34].mxu1 }
 0x156   :  { %v3727_v8 = vpop.f32.mrb[35].mxu0  ;;  %4051 = vmatmul.mubr.msk.f32.gmra.mrb[140].mxu0 %vm92_vm4, %v3170_v4  ;;  %4130 = vmatmul.mubr.msk.f32.gmra.mrb[140].mxu1 %vm92_vm4, %v3221_v5  ;;  %v3806_v20 = vpop.f32.mrb[35].mxu1 }
 0x157   :  { %4053 = vmatprep.mubr.msk.f32.mxu0 %vm4422_vm0, %v6563_v1  ;;  %4132 = vmatprep.mubr.msk.f32.mxu1 %vm4422_vm0, %v6563_v1  ;;  %v3172_v8 = vld [vmem:[%s6555_s0 + $0x178] sm:$0xff] }
 0x158   :  { %v3223_v20 = vld [vmem:[%s6556_s1 + $0x178] sm:$0xff] }
 0x159   :  { %v5517_v31 = vpop.f32.mrb[36].mxu0  ;;  %v5519_v38 = vpop.f32.mrb[36].mxu1 }
 0x15a   :  { %v3730_v48 = vpop.f32.mrb[37].mxu0  ;;  %4054 = vmatmul.mubr.msk.f32.gmra.mrb[142].mxu0 %vm92_vm4, %v3171_v24  ;;  %4133 = vmatmul.mubr.msk.f32.gmra.mrb[142].mxu1 %vm92_vm4, %v3222_v27  ;;  %v3809_v5 = vpop.f32.mrb[37].mxu1 }
 0x15b   :  { %4056 = vmatprep.mubr.msk.f32.mxu0 %vm4422_vm0, %v6563_v1  ;;  %4135 = vmatprep.mubr.msk.f32.mxu1 %vm4422_vm0, %v6563_v1 }
 0x15d   :  { %v5535_v48 = vpop.f32.mrb[38].mxu0  ;;  %v5537_v24 = vpop.f32.mrb[38].mxu1 }
 0x15e   :  { %v3733_v27 = vpop.f32.mrb[39].mxu0  ;;  %4057 = vmatmul.mubr.msk.f32.gmra.mrb[144].mxu0 %vm92_vm4, %v3172_v8  ;;  %4136 = vmatmul.mubr.msk.f32.gmra.mrb[144].mxu1 %vm92_vm4, %v3223_v20  ;;  %v3812_v4 = vpop.f32.mrb[39].mxu1 }
 0x15f   :  { %4059 = vmatprep.mubr.msk.f32.mxu0 %vm4422_vm0, %v6563_v1  ;;  %4138 = vmatprep.mubr.msk.f32.mxu1 %vm4422_vm0, %v6563_v1  ;;  %v3224_v27 = vld [vmem:[%s6556_s1 + $0x180] sm:$0xff] }
 0x161   :  { %v5553_v5 = vpop.f32.mrb[40].mxu0  ;;  %v5555_v8 = vpop.f32.mrb[40].mxu1 }
 0x162   :  { %v3736_v20 = vpop.f32.mrb[41].mxu0  ;;  %4060 = vmatmul.mubr.msk.f32.gmra.mrb[146].mxu0 %vm92_vm4, %v3173_v10  ;;  %4139 = vmatmul.mubr.msk.f32.gmra.mrb[146].mxu1 %vm92_vm4, %v3224_v27  ;;  %v3815_v44 = vpop.f32.mrb[41].mxu1 }
 0x163   :  { %4062 = vmatprep.mubr.msk.f32.mxu0 %vm4422_vm0, %v6563_v1  ;;  %4141 = vmatprep.mubr.msk.f32.mxu1 %vm4422_vm0, %v6563_v1  ;;  %v3225_v20 = vld [vmem:[%s6556_s1 + $0x188] sm:$0xf] }
 0x165   :  { %v5571_v4 = vpop.f32.mrb[42].mxu0  ;;  %v5573_v10 = vpop.f32.mrb[42].mxu1 }
 0x166   :  { %v3739_v27 = vpop.f32.mrb[43].mxu0  ;;  %4063 = vmatmul.mubr.msk.f32.gmra.mrb[148].mxu0 %vm92_vm4, %v3174_v23  ;;  %4142 = vmatmul.mubr.msk.f32.gmra.mrb[148].mxu1 %vm92_vm4, %v3225_v20  ;;  %v3818_v62 = vpop.f32.mrb[43].mxu1 }
 0x167   :  { %4148 = vmatprep.mubr.msk.f32.mxu0 %vm4422_vm0, %v6563_v1  ;;  %4227 = vmatprep.mubr.msk.f32.mxu1 %vm4422_vm0, %v6563_v1  ;;  %v3303_v27 = vld [vmem:[%s6558_s3 + $0xc8] sm:$0xff] }
 0x169   :  { %v5589_v44 = vpop.f32.mrb[44].mxu0  ;;  %v5591_v23 = vpop.f32.mrb[44].mxu1 }
 0x16a   :  { %v3742_v20 = vpop.f32.mrb[45].mxu0  ;;  %4149 = vmatmul.mubr.msk.f32.vlgmr.msra.gmra.mrb[150].mxu0 %vm92_vm4, %v3252_v45  ;;  %v3821_v34 = vpop.f32.mrb[45].mxu1  ;;  %4228 = vmatmul.mubr.msk.f32.vlgmr.msra.gmra.mrb[150].mxu1 %vm92_vm4, %v3303_v27 }
 0x16b   :  { %4151 = vmatprep.mubr.msk.f32.mxu0 %vm4422_vm0, %v6563_v1  ;;  %4230 = vmatprep.mubr.msk.f32.mxu1 %vm4422_vm0, %v6563_v1  ;;  %v3304_v20 = vld [vmem:[%s6558_s3 + $0xd0] sm:$0xff] }
 0x16d   :  { %v5607_v62 = vpop.f32.mrb[46].mxu0  ;;  %v5609_v45 = vpop.f32.mrb[46].mxu1 }
 0x16e   :  { %v3745_v34 = vpop.f32.mrb[47].mxu0  ;;  %4152 = vmatmul.mubr.msk.f32.gmra.mrb[152].mxu0 %vm92_vm4, %v3253_v22  ;;  %v3824_v9 = vpop.f32.mrb[47].mxu1  ;;  %4231 = vmatmul.mubr.msk.f32.gmra.mrb[152].mxu1 %vm92_vm4, %v3304_v20 }
 0x16f   :  { %4154 = vmatprep.mubr.msk.f32.mxu0 %vm4422_vm0, %v6563_v1  ;;  %4233 = vmatprep.mubr.msk.f32.mxu1 %vm4422_vm0, %v6563_v1  ;;  %v3305_v34 = vld [vmem:[%s6558_s3 + $0xd8] sm:$0xff] }
 0x171   :  { %v5625_v27 = vpop.f32.mrb[48].mxu0  ;;  %v5627_v22 = vpop.f32.mrb[48].mxu1 }
 0x172   :  { %v3748_v9 = vpop.f32.mrb[49].mxu0  ;;  %4155 = vmatmul.mubr.msk.f32.gmra.mrb[154].mxu0 %vm92_vm4, %v3254_v57  ;;  %v3827_v49 = vpop.f32.mrb[49].mxu1  ;;  %4234 = vmatmul.mubr.msk.f32.gmra.mrb[154].mxu1 %vm92_vm4, %v3305_v34 }
 0x173   :  { %4157 = vmatprep.mubr.msk.f32.mxu0 %vm4422_vm0, %v6563_v1  ;;  %4236 = vmatprep.mubr.msk.f32.mxu1 %vm4422_vm0, %v6563_v1  ;;  %v3306_v9 = vld [vmem:[%s6558_s3 + $0xe0] sm:$0xff] }
 0x175   :  { %v843_v20 = vpop.f32.mrb[50].mxu0  ;;  %v1158_v35 = vpop.f32.mrb[50].mxu1 }
 0x176   :  { %v967_v49 = vmax.f32 %v652_v54, %v843_v20  ;;  %v3834_v57 = vpop.f32.mrb[51].mxu0  ;;  %4158 = vmatmul.mubr.msk.f32.gmra.mrb[156].mxu0 %vm92_vm4, %v3255_v42  ;;  %v3913_v34 = vpop.f32.mrb[51].mxu1  ;;  %4237 = vmatmul.mubr.msk.f32.gmra.mrb[156].mxu1 %vm92_vm4, %v3306_v9  ;;  %v5660_v54 = vld [vmem:[#allocation6] ss:$0 sm:$0xff] }
 0x177   :  { %4160 = vmatprep.mubr.msk.f32.mxu0 %vm4422_vm0, %v6563_v1  ;;  %4239 = vmatprep.mubr.msk.f32.mxu1 %vm4422_vm0, %v6563_v1 }
 0x178   :  { %v1282_v52 = vmax.f32 %v967_v49, %v1158_v35  ;;  %v3257_v35 = vld [vmem:[%s6557_s2 + $0xf0] sm:$0xff] }
 0x179   :  { %v848_v42 = vpop.f32.mrb[52].mxu0  ;;  %v1163_v20 = vpop.f32.mrb[52].mxu1 }
 0x17a   :  { %v1313_v9 = vmul.f32 %v5648_v28, %v1282_v52  ;;  %v968_v57 = vmax.f32 %v653_v61, %v848_v42  ;;  %v3837_v34 = vpop.f32.mrb[53].mxu0  ;;  %4161 = vmatmul.mubr.msk.f32.gmra.mrb[158].mxu0 %vm92_vm4, %v3256_v21  ;;  %v3916_v14 = vpop.f32.mrb[53].mxu1  ;;  %4240 = vmatmul.mubr.msk.f32.gmra.mrb[158].mxu1 %vm92_vm4, %v3307_v51 }
 0x17b   :  { %4163 = vmatprep.mubr.msk.f32.mxu0 %vm4422_vm0, %v6563_v1  ;;  %4242 = vmatprep.mubr.msk.f32.mxu1 %vm4422_vm0, %v6563_v1  ;;  %v6565_v34 = vmov -1.0  }
 0x17c   :  { %v1344_v59 = vadd.f32 %v5660_v54, %v1313_v9  ;;  %v1283_v61 = vmax.f32 %v968_v57, %v1163_v20  ;;  %v6571_v20 = vmov 0.0   ;;  %v3258_v9 = vld [vmem:[%s6557_s2 + $0xf8] sm:$0xff] }
 0x17d   :  { %v853_v14 = vpop.f32.mrb[54].mxu0  ;;  %v1168_v21 = vpop.f32.mrb[54].mxu1 }
 0x17e   :  { %vm1369_vm5 = vcmp.ge.f32.partialorder %v1344_v59, 0.0  ;;  %v1314_v49 = vmul.f32 %v5648_v28, %v1283_v61  ;;  %v969_v51 = vmax.f32 %v654_v7, %v853_v14  ;;  %v3840_v52 = vpop.f32.mrb[55].mxu0  ;;  %4164 = vmatmul.mubr.msk.f32.gmra.mrb[160].mxu0 %vm92_vm4, %v3257_v35  ;;  %v3919_v42 = vpop.f32.mrb[55].mxu1  ;;  %4243 = vmatmul.mubr.msk.f32.gmra.mrb[160].mxu1 %vm92_vm4, %v3308_v58  ;;  %v6572_v61 = vmax.f32 %v5247_v11, %v5249_v12  ;;  %v3310_v11 = vld [vmem:[%s6558_s3 + $0x100] sm:$0xff] }
 0x17f   :  { %v1394_v1 = vsel %vm1369_vm5, 1.0, %v6565_v34  ;;  %4166 = vmatprep.mubr.msk.f32.mxu0 %vm4422_vm0, %v6571_v20  ;;  %4245 = vmatprep.mubr.msk.f32.mxu1 %vm4422_vm0, %v6571_v20 }
 0x180   :  { %v3404_v3 = vpack.c.bf16 %v1394_v1, %v1394_v1  ;;  %v1345_v7 = vadd.f32 %v5660_v54, %v1314_v49  ;;  %v1284_v57 = vmax.f32 %v969_v51, %v1168_v21  ;;  %v3259_v49 = vld [vmem:[%s6557_s2 + $0x100] sm:$0xff] }
 0x181   :  { %v858_v35 = vpop.f32.mrb[56].mxu0  ;;  %v1173_v58 = vpop.f32.mrb[56].mxu1 }
 0x182   :  { %1521 = vst.msk [vmem:[%s6562_s7] sm:$0xf] %vm1520_vm6, %v3404_v3  ;;  %vm1370_vm7 = vcmp.ge.f32.partialorder %v1345_v7, 0.0  ;;  %v1315_v59 = vmul.f32 %v5648_v28, %v1284_v57  ;;  %v970_v14 = vmax.f32 %v6572_v61, %v858_v35  ;;  %v3843_v52 = vpop.f32.mrb[57].mxu0  ;;  %4167 = vmatmul.mubr.msk.f32.gmra.mrb[162].mxu0 %vm92_vm4, %v3258_v9  ;;  %v3922_v1 = vpop.f32.mrb[57].mxu1  ;;  %4246 = vmatmul.mubr.msk.f32.gmra.mrb[162].mxu1 %vm92_vm4, %v3309_v2 }
 0x183   :  { %v1395_v21 = vsel %vm1370_vm7, 1.0, %v6565_v34  ;;  %4169 = vmatprep.mubr.msk.f32.mxu0 %vm4422_vm0, %v6571_v20  ;;  %4248 = vmatprep.mubr.msk.f32.mxu1 %vm4422_vm0, %v6571_v20  ;;  %v6573_v7 = vmax.f32 %v5265_v18, %v5267_v19  ;;  %v3311_v18 = vld [vmem:[%s6558_s3 + $0x108] sm:$0xff] }
 0x184   :  { %v3405_v12 = vpack.c.bf16 %v1395_v21, %v1395_v21  ;;  %v1346_v51 = vadd.f32 %v5660_v54, %v1315_v59  ;;  %v1285_v42 = vmax.f32 %v970_v14, %v1173_v58  ;;  %v3260_v59 = vld [vmem:[%s6557_s2 + $0x108] sm:$0xff] }
 0x185   :  { %v863_v9 = vpop.f32.mrb[58].mxu0  ;;  %v1178_v2 = vpop.f32.mrb[58].mxu1 }
 0x186   :  { %1522 = vst.msk [vmem:[%s6562_s7 + $0x4] sm:$0xf] %vm1520_vm6, %v3405_v12  ;;  %vm1371_vm8 = vcmp.ge.f32.partialorder %v1346_v51, 0.0  ;;  %v1316_v3 = vmul.f32 %v5648_v28, %v1285_v42  ;;  %v971_v57 = vmax.f32 %v6573_v7, %v863_v9  ;;  %v3846_v35 = vpop.f32.mrb[59].mxu0  ;;  %4170 = vmatmul.mubr.msk.f32.gmra.mrb[164].mxu0 %vm92_vm4, %v3259_v49  ;;  %v3925_v61 = vpop.f32.mrb[59].mxu1  ;;  %4249 = vmatmul.mubr.msk.f32.gmra.mrb[164].mxu1 %vm92_vm4, %v3310_v11 }
 0x187   :  { %v1396_v58 = vsel %vm1371_vm8, 1.0, %v6565_v34  ;;  %4172 = vmatprep.mubr.msk.f32.mxu0 %vm4422_vm0, %v6571_v20  ;;  %4251 = vmatprep.mubr.msk.f32.mxu1 %vm4422_vm0, %v6571_v20  ;;  %v6574_v11 = vmax.f32 %v5283_v25, %v5285_v26  ;;  %v3312_v25 = vld [vmem:[%s6558_s3 + $0x110] sm:$0xff] }
 0x188   :  { %v3406_v19 = vpack.c.bf16 %v1396_v58, %v1396_v58  ;;  %v1347_v14 = vadd.f32 %v5660_v54, %v1316_v3  ;;  %v1286_v52 = vmax.f32 %v971_v57, %v1178_v2  ;;  %v3261_v2 = vld [vmem:[%s6557_s2 + $0x110] sm:$0xff]  ;;  %v6575_v58 = vmax.f32 %v5301_v32, %v5303_v33  ;;  %v3313_v32 = vld [vmem:[%s6558_s3 + $0x118] sm:$0xff] }
 0x189   :  { %v868_v1 = vpop.f32.mrb[60].mxu0  ;;  %v1183_v21 = vpop.f32.mrb[60].mxu1 }
 0x18a   :  { %1523 = vst.msk [vmem:[%s6562_s7 + $0x8] sm:$0xf] %vm1520_vm6, %v3406_v19  ;;  %vm1372_vm9 = vcmp.ge.f32.partialorder %v1347_v14, 0.0  ;;  %v1317_v49 = vmul.f32 %v5648_v28, %v1286_v52  ;;  %v972_v12 = vmax.f32 %v6574_v11, %v868_v1  ;;  %v3849_v51 = vpop.f32.mrb[61].mxu0  ;;  %4173 = vmatmul.mubr.msk.f32.gmra.mrb[166].mxu0 %vm92_vm4, %v3260_v59  ;;  %v3928_v42 = vpop.f32.mrb[61].mxu1  ;;  %4252 = vmatmul.mubr.msk.f32.gmra.mrb[166].mxu1 %vm92_vm4, %v3311_v18  ;;  %v3262_v52 = vld [vmem:[%s6557_s2 + $0x118] sm:$0xff] }
 0x18b   :  { %v1397_v9 = vsel %vm1372_vm9, 1.0, %v6565_v34  ;;  %4175 = vmatprep.mubr.msk.f32.mxu0 %vm4422_vm0, %v6571_v20  ;;  %4254 = vmatprep.mubr.msk.f32.mxu1 %vm4422_vm0, %v6571_v20  ;;  %v6576_v51 = vmax.f32 %v5319_v39, %v5321_v40  ;;  %v3314_v39 = vld [vmem:[%s6558_s3 + $0x120] sm:$0xff] }
 0x18c   :  { %v3407_v26 = vpack.c.bf16 %v1397_v9, %v1397_v9  ;;  %v1348_v3 = vadd.f32 %v5660_v54, %v1317_v49  ;;  %v1287_v7 = vmax.f32 %v972_v12, %v1183_v21 }
 0x18d   :  { %v873_v57 = vpop.f32.mrb[62].mxu0  ;;  %v1188_v35 = vpop.f32.mrb[62].mxu1 }
 0x18e   :  { %1524 = vst.msk [vmem:[%s6562_s7 + $0xc] sm:$0xf] %vm1520_vm6, %v3407_v26  ;;  %vm1373_vm10 = vcmp.ge.f32.partialorder %v1348_v3, 0.0  ;;  %v1318_v61 = vmul.f32 %v5648_v28, %v1287_v7  ;;  %v973_v59 = vmax.f32 %v6575_v58, %v873_v57  ;;  %v3852_v18 = vpop.f32.mrb[63].mxu0  ;;  %4176 = vmatmul.mubr.msk.f32.gmra.mrb[168].mxu0 %vm92_vm4, %v3261_v2  ;;  %v3931_v19 = vpop.f32.mrb[63].mxu1  ;;  %4255 = vmatmul.mubr.msk.f32.gmra.mrb[168].mxu1 %vm92_vm4, %v3312_v25  ;;  %v3263_v26 = vld [vmem:[%s6557_s2 + $0x120] sm:$0xff] }
 0x18f   :  { %v1398_v14 = vsel %vm1373_vm10, 1.0, %v6565_v34  ;;  %4178 = vmatprep.mubr.msk.f32.mxu0 %vm4422_vm0, %v6571_v20  ;;  %4257 = vmatprep.mubr.msk.f32.mxu1 %vm4422_vm0, %v6571_v20  ;;  %v6577_v58 = vmax.f32 %v5337_v46, %v5339_v47  ;;  %v3315_v46 = vld [vmem:[%s6558_s3 + $0x128] sm:$0xff] }
 0x190   :  { %v3408_v33 = vpack.c.bf16 %v1398_v14, %v1398_v14  ;;  %v1349_v1 = vadd.f32 %v5660_v54, %v1318_v61  ;;  %v1288_v21 = vmax.f32 %v973_v59, %v1188_v35 }
 0x191   :  { %v878_v49 = vpop.f32.mrb[64].mxu0  ;;  %v1193_v11 = vpop.f32.mrb[64].mxu1 }
 0x192   :  { %1525 = vst.msk [vmem:[%s6562_s7 + $0x10] sm:$0xf] %vm1520_vm6, %v3408_v33  ;;  %vm1374_vm11 = vcmp.ge.f32.partialorder %v1349_v1, 0.0  ;;  %v1319_v12 = vmul.f32 %v5648_v28, %v1288_v21  ;;  %v974_v42 = vmax.f32 %v6576_v51, %v878_v49  ;;  %v3855_v9 = vpop.f32.mrb[65].mxu0  ;;  %4179 = vmatmul.mubr.msk.f32.gmra.mrb[170].mxu0 %vm92_vm4, %v3262_v52  ;;  %v3934_v2 = vpop.f32.mrb[65].mxu1  ;;  %4258 = vmatmul.mubr.msk.f32.gmra.mrb[170].mxu1 %vm92_vm4, %v3313_v32  ;;  %v3264_v52 = vld [vmem:[%s6557_s2 + $0x128] sm:$0xff] }
 0x193   :  { %v1399_v25 = vsel %vm1374_vm11, 1.0, %v6565_v34  ;;  %4181 = vmatprep.mubr.msk.f32.mxu0 %vm4422_vm0, %v6571_v20  ;;  %4260 = vmatprep.mubr.msk.f32.mxu1 %vm4422_vm0, %v6571_v20  ;;  %v3265_v2 = vld [vmem:[%s6557_s2 + $0x130] sm:$0xff] }
 0x194   :  { %v3409_v40 = vpack.c.bf16 %v1399_v25, %v1399_v25  ;;  %v1350_v3 = vadd.f32 %v5660_v54, %v1319_v12  ;;  %v1289_v7 = vmax.f32 %v974_v42, %v1193_v11  ;;  %v6578_v11 = vmax.f32 %v5355_v53, %v5357_v55  ;;  %v3316_v53 = vld [vmem:[%s6558_s3 + $0x130] sm:$0xff] }
 0x195   :  { %v883_v57 = vpop.f32.mrb[66].mxu0  ;;  %v1198_v35 = vpop.f32.mrb[66].mxu1 }
 0x196   :  { %1526 = vst.msk [vmem:[%s6562_s7 + $0x14] sm:$0xf] %vm1520_vm6, %v3409_v40  ;;  %vm1375_vm12 = vcmp.ge.f32.partialorder %v1350_v3, 0.0  ;;  %v1320_v61 = vmul.f32 %v5648_v28, %v1289_v7  ;;  %v975_v59 = vmax.f32 %v6577_v58, %v883_v57  ;;  %v3858_v18 = vpop.f32.mrb[67].mxu0  ;;  %4182 = vmatmul.mubr.msk.f32.gmra.mrb[172].mxu0 %vm92_vm4, %v3263_v26  ;;  %v3937_v19 = vpop.f32.mrb[67].mxu1  ;;  %4261 = vmatmul.mubr.msk.f32.gmra.mrb[172].mxu1 %vm92_vm4, %v3314_v39 }
 0x197   :  { %v1400_v14 = vsel %vm1375_vm12, 1.0, %v6565_v34  ;;  %4184 = vmatprep.mubr.msk.f32.mxu0 %vm4422_vm0, %v6571_v20  ;;  %4263 = vmatprep.mubr.msk.f32.mxu1 %vm4422_vm0, %v6571_v20  ;;  %v6579_v7 = vmax.f32 %v5373_v0, %v5375_v6  ;;  %v3317_v0 = vld [vmem:[%s6558_s3 + $0x138] sm:$0xff] }
 0x198   :  { %v3410_v47 = vpack.c.bf16 %v1400_v14, %v1400_v14  ;;  %v1351_v32 = vadd.f32 %v5660_v54, %v1320_v61  ;;  %v1290_v33 = vmax.f32 %v975_v59, %v1198_v35  ;;  %v3266_v59 = vld [vmem:[%s6557_s2 + $0x138] sm:$0xff] }
 0x199   :  { %v888_v1 = vpop.f32.mrb[68].mxu0  ;;  %v1203_v21 = vpop.f32.mrb[68].mxu1 }
 0x19a   :  { %1527 = vst.msk [vmem:[%s6562_s7 + $0x18] sm:$0xf] %vm1520_vm6, %v3410_v47  ;;  %vm1376_vm13 = vcmp.ge.f32.partialorder %v1351_v32, 0.0  ;;  %v1321_v49 = vmul.f32 %v5648_v28, %v1290_v33  ;;  %v976_v12 = vmax.f32 %v6578_v11, %v888_v1  ;;  %v3861_v51 = vpop.f32.mrb[69].mxu0  ;;  %4185 = vmatmul.mubr.msk.f32.gmra.mrb[174].mxu0 %vm92_vm4, %v3264_v52  ;;  %v3940_v42 = vpop.f32.mrb[69].mxu1  ;;  %4264 = vmatmul.mubr.msk.f32.gmra.mrb[174].mxu1 %vm92_vm4, %v3315_v46 }
 0x19b   :  { %v1401_v9 = vsel %vm1376_vm13, 1.0, %v6565_v34  ;;  %4187 = vmatprep.mubr.msk.f32.mxu0 %vm4422_vm0, %v6571_v20  ;;  %4266 = vmatprep.mubr.msk.f32.mxu1 %vm4422_vm0, %v6571_v20  ;;  %v6580_v47 = vmax.f32 %v5391_v16, %v5393_v17  ;;  %v3318_v16 = vld [vmem:[%s6558_s3 + $0x140] sm:$0xff] }
 0x19c   :  { %v3411_v55 = vpack.c.bf16 %v1401_v9, %v1401_v9  ;;  %v1352_v25 = vadd.f32 %v5660_v54, %v1321_v49  ;;  %v1291_v26 = vmax.f32 %v976_v12, %v1203_v21  ;;  %v3267_v49 = vld [vmem:[%s6557_s2 + $0x140] sm:$0xff] }
 0x19d   :  { %v893_v39 = vpop.f32.mrb[70].mxu0  ;;  %v1208_v40 = vpop.f32.mrb[70].mxu1 }
 0x19e   :  { %1528 = vst.msk [vmem:[%s6562_s7 + $0x1c] sm:$0xf] %vm1520_vm6, %v3411_v55  ;;  %vm1377_vm14 = vcmp.ge.f32.partialorder %v1352_v25, 0.0  ;;  %v1322_v3 = vmul.f32 %v5648_v28, %v1291_v26  ;;  %v977_v57 = vmax.f32 %v6579_v7, %v893_v39  ;;  %v3864_v35 = vpop.f32.mrb[71].mxu0  ;;  %4188 = vmatmul.mubr.msk.f32.gmra.mrb[176].mxu0 %vm92_vm4, %v3265_v2  ;;  %v3943_v61 = vpop.f32.mrb[71].mxu1  ;;  %4267 = vmatmul.mubr.msk.f32.gmra.mrb[176].mxu1 %vm92_vm4, %v3316_v53  ;;  %v3268_v39 = vld [vmem:[%s6557_s2 + $0x148] sm:$0xff] }
 0x19f   :  { %v1402_v58 = vsel %vm1377_vm14, 1.0, %v6565_v34  ;;  %4190 = vmatprep.mubr.msk.f32.mxu0 %vm4422_vm0, %v6571_v20  ;;  %4269 = vmatprep.mubr.msk.f32.mxu1 %vm4422_vm0, %v6571_v20  ;;  %v6581_v2 = vmax.f32 %v5409_v29, %v5411_v30  ;;  %v3319_v29 = vld [vmem:[%s6558_s3 + $0x148] sm:$0xff]  ;;  %v6582_v61 = vmax.f32 %v5427_v41, %v5429_v43  ;;  %v3320_v41 = vld [vmem:[%s6558_s3 + $0x150] sm:$0xff] }
 0x1a0   :  { %v3412_v6 = vpack.c.bf16 %v1402_v58, %v1402_v58  ;;  %v1353_v18 = vadd.f32 %v5660_v54, %v1322_v3  ;;  %v1292_v19 = vmax.f32 %v977_v57, %v1208_v40 }
 0x1a1   :  { %v898_v14 = vpop.f32.mrb[72].mxu0  ;;  %v1213_v52 = vpop.f32.mrb[72].mxu1 }
 0x1a2   :  { %1529 = vst.msk [vmem:[%s6562_s7 + $0x20] sm:$0xf] %vm1520_vm6, %v3412_v6  ;;  %vm1378_vm15 = vcmp.ge.f32.partialorder %v1353_v18, 0.0  ;;  %v1323_v46 = vmul.f32 %v5648_v28, %v1292_v19  ;;  %v978_v32 = vmax.f32 %v6580_v47, %v898_v14  ;;  %v3867_v33 = vpop.f32.mrb[73].mxu0  ;;  %4191 = vmatmul.mubr.msk.f32.gmra.mrb[178].mxu0 %vm92_vm4, %v3266_v59  ;;  %v3946_v1 = vpop.f32.mrb[73].mxu1  ;;  %4270 = vmatmul.mubr.msk.f32.gmra.mrb[178].mxu1 %vm92_vm4, %v3317_v0  ;;  %v3269_v18 = vld [vmem:[%s6557_s2 + $0x150] sm:$0xff] }
 0x1a3   :  { %v1403_v21 = vsel %vm1378_vm15, 1.0, %v6565_v34  ;;  %4193 = vmatprep.mubr.msk.f32.mxu0 %vm4422_vm0, %v6571_v20  ;;  %4272 = vmatprep.mubr.msk.f32.mxu1 %vm4422_vm0, %v6571_v20 }
 0x1a4   :  { %v3413_v17 = vpack.c.bf16 %v1403_v21, %v1403_v21  ;;  %v1354_v11 = vadd.f32 %v5660_v54, %v1323_v46  ;;  %v1293_v12 = vmax.f32 %v978_v32, %v1213_v52  ;;  %v6583_v32 = vmax.f32 %v5445_v50, %v5447_v56  ;;  %v3321_v50 = vld [vmem:[%s6558_s3 + $0x158] sm:$0xff] }
 0x1a5   :  { %v903_v51 = vpop.f32.mrb[74].mxu0  ;;  %v1218_v42 = vpop.f32.mrb[74].mxu1 }
 0x1a6   :  { %1530 = vst.msk [vmem:[%s6562_s7 + $0x24] sm:$0xf] %vm1520_vm6, %v3413_v17  ;;  %vm1379_vm1 = vcmp.ge.f32.partialorder %v1354_v11, 0.0  ;;  %v1324_v9 = vmul.f32 %v5648_v28, %v1293_v12  ;;  %v979_v53 = vmax.f32 %v6581_v2, %v903_v51  ;;  %v3870_v55 = vpop.f32.mrb[75].mxu0  ;;  %4194 = vmatmul.mubr.msk.f32.gmra.mrb[180].mxu0 %vm92_vm4, %v3267_v49  ;;  %v3949_v25 = vpop.f32.mrb[75].mxu1  ;;  %4273 = vmatmul.mubr.msk.f32.gmra.mrb[180].mxu1 %vm92_vm4, %v3318_v16  ;;  %v3270_v16 = vld [vmem:[%s6557_s2 + $0x158] sm:$0xff] }
 0x1a7   :  { %v1404_v26 = vsel %vm1379_vm1, 1.0, %v6565_v34  ;;  %4196 = vmatprep.mubr.msk.f32.mxu0 %vm4422_vm0, %v6571_v20  ;;  %4275 = vmatprep.mubr.msk.f32.mxu1 %vm4422_vm0, %v6571_v20  ;;  %vm1545_vm1 = vcmask 517120  }
 0x1a8   :  { %v3414_v30 = vpack.c.bf16 %v1404_v26, %v1404_v26  ;;  %v1355_v40 = vadd.f32 %v5660_v54, %v1324_v9  ;;  %v1294_v3 = vmax.f32 %v979_v53, %v1218_v42  ;;  %v6584_v9 = vmax.f32 %v5463_v13, %v5465_v15  ;;  %v3271_v26 = vld [vmem:[%s6557_s2 + $0x160] sm:$0xff] }
 0x1a9   :  { %v908_v7 = vpop.f32.mrb[76].mxu0  ;;  %v1223_v57 = vpop.f32.mrb[76].mxu1  ;;  %v3322_v13 = vld [vmem:[%s6558_s3 + $0x160] sm:$0xff] }
 0x1aa   :  { %1531 = vst.msk [vmem:[%s6562_s7 + $0x28] sm:$0xf] %vm1520_vm6, %v3414_v30  ;;  %vm1380_vm2 = vcmp.ge.f32.partialorder %v1355_v40, 0.0  ;;  %v1325_v35 = vmul.f32 %v5648_v28, %v1294_v3  ;;  %v980_v58 = vmax.f32 %v6582_v61, %v908_v7  ;;  %v3873_v59 = vpop.f32.mrb[77].mxu0  ;;  %4197 = vmatmul.mubr.msk.f32.gmra.mrb[182].mxu0 %vm92_vm4, %v3268_v39  ;;  %v3952_v0 = vpop.f32.mrb[77].mxu1  ;;  %4276 = vmatmul.mubr.msk.f32.gmra.mrb[182].mxu1 %vm92_vm4, %v3319_v29 }
 0x1ab   :  { %v1405_v6 = vsel %vm1380_vm2, 1.0, %v6565_v34  ;;  %4199 = vmatprep.mubr.msk.f32.mxu0 %vm4422_vm0, %v6571_v20  ;;  %4278 = vmatprep.mubr.msk.f32.mxu1 %vm4422_vm0, %v6571_v20  ;;  %v6585_v7 = vmax.f32 %v5481_v36, %v5483_v37  ;;  %v3272_v59 = vld [vmem:[%s6557_s2 + $0x168] sm:$0xff] }
 0x1ac   :  { %v3415_v43 = vpack.c.bf16 %v1405_v6, %v1405_v6  ;;  %v1356_v19 = vadd.f32 %v5660_v54, %v1325_v35  ;;  %v1295_v14 = vmax.f32 %v980_v58, %v1223_v57  ;;  %v3323_v36 = vld [vmem:[%s6558_s3 + $0x168] sm:$0xff] }
 0x1ad   :  { %v913_v52 = vpop.f32.mrb[78].mxu0  ;;  %v1228_v46 = vpop.f32.mrb[78].mxu1 }
 0x1ae   :  { %1532 = vst.msk [vmem:[%s6562_s7 + $0x2c] sm:$0xf] %vm1520_vm6, %v3415_v43  ;;  %vm1381_vm3 = vcmp.ge.f32.partialorder %v1356_v19, 0.0  ;;  %v1326_v47 = vmul.f32 %v5648_v28, %v1295_v14  ;;  %v981_v33 = vmax.f32 %v6583_v32, %v913_v52  ;;  %v3876_v1 = vpop.f32.mrb[79].mxu0  ;;  %4200 = vmatmul.mubr.msk.f32.gmra.mrb[184].mxu0 %vm92_vm4, %v3269_v18  ;;  %v3955_v21 = vpop.f32.mrb[79].mxu1  ;;  %4279 = vmatmul.mubr.msk.f32.gmra.mrb[184].mxu1 %vm92_vm4, %v3320_v41  ;;  %v3273_v32 = vld [vmem:[%s6557_s2 + $0x170] sm:$0xff] }
 0x1af   :  { %v1406_v49 = vsel %vm1381_vm3, 1.0, %v6565_v34  ;;  %4202 = vmatprep.mubr.msk.f32.mxu0 %vm4422_vm0, %v6571_v20  ;;  %4281 = vmatprep.mubr.msk.f32.mxu1 %vm4422_vm0, %v6571_v20  ;;  %v6586_v19 = vmax.f32 %v5499_v60, %v5501_v63  ;;  %v3324_v60 = vld [vmem:[%s6558_s3 + $0x170] sm:$0xff] }
 0x1b0   :  { %v3416_v56 = vpack.c.bf16 %v1406_v49, %v1406_v49  ;;  %v1357_v17 = vadd.f32 %v5660_v54, %v1326_v47  ;;  %v1296_v11 = vmax.f32 %v981_v33, %v1228_v46 }
 0x1b1   :  { %v918_v12 = vpop.f32.mrb[80].mxu0  ;;  %v1233_v51 = vpop.f32.mrb[80].mxu1 }
 0x1b2   :  { %1533 = vst.msk [vmem:[%s6562_s7 + $0x30] sm:$0xf] %vm1520_vm6, %v3416_v56  ;;  %vm1382_vm5 = vcmp.ge.f32.partialorder %v1357_v17, 0.0  ;;  %v1327_v42 = vmul.f32 %v5648_v28, %v1296_v11  ;;  %v982_v2 = vmax.f32 %v6584_v9, %v918_v12  ;;  %v3879_v53 = vpop.f32.mrb[81].mxu0  ;;  %4203 = vmatmul.mubr.msk.f32.gmra.mrb[186].mxu0 %vm92_vm4, %v3270_v16  ;;  %v3958_v55 = vpop.f32.mrb[81].mxu1  ;;  %4282 = vmatmul.mubr.msk.f32.gmra.mrb[186].mxu1 %vm92_vm4, %v3321_v50 }
 0x1b3   :  { %v1407_v25 = vsel %vm1382_vm5, 1.0, %v6565_v34  ;;  %4205 = vmatprep.mubr.msk.f32.mxu0 %vm4422_vm0, %v6571_v20  ;;  %4284 = vmatprep.mubr.msk.f32.mxu1 %vm4422_vm0, %v6571_v20  ;;  %v6587_v50 = vmax.f32 %v5517_v31, %v5519_v38  ;;  %v3325_v31 = vld [vmem:[%s6558_s3 + $0x178] sm:$0xff] }
 0x1b4   :  { %v3417_v15 = vpack.c.bf16 %v1407_v25, %v1407_v25  ;;  %v1358_v39 = vadd.f32 %v5660_v54, %v1327_v42  ;;  %v1297_v29 = vmax.f32 %v982_v2, %v1233_v51  ;;  %v3274_v51 = vld [vmem:[%s6557_s2 + $0x178] sm:$0xff]  ;;  %v6588_v25 = vmax.f32 %v5535_v48, %v5537_v24  ;;  %v3326_v48 = vld [vmem:[%s6558_s3 + $0x180] sm:$0xff] }
 0x1b5   :  { %v923_v30 = vpop.f32.mrb[82].mxu0  ;;  %v1238_v40 = vpop.f32.mrb[82].mxu1 }
 0x1b6   :  { %1534 = vst.msk [vmem:[%s6562_s7 + $0x34] sm:$0xf] %vm1520_vm6, %v3417_v15  ;;  %vm1383_vm7 = vcmp.ge.f32.partialorder %v1358_v39, 0.0  ;;  %v1328_v3 = vmul.f32 %v5648_v28, %v1297_v29  ;;  %v983_v57 = vmax.f32 %v6585_v7, %v923_v30  ;;  %v3882_v35 = vpop.f32.mrb[83].mxu0  ;;  %4206 = vmatmul.mubr.msk.f32.gmra.mrb[188].mxu0 %vm92_vm4, %v3271_v26  ;;  %v3961_v61 = vpop.f32.mrb[83].mxu1  ;;  %4285 = vmatmul.mubr.msk.f32.gmra.mrb[188].mxu1 %vm92_vm4, %v3322_v13  ;;  %v3275_v29 = vld [vmem:[%s6557_s2 + $0x180] sm:$0xff] }
 0x1b7   :  { %v1408_v58 = vsel %vm1383_vm7, 1.0, %v6565_v34  ;;  %4208 = vmatprep.mubr.msk.f32.mxu0 %vm4422_vm0, %v6571_v20  ;;  %4287 = vmatprep.mubr.msk.f32.mxu1 %vm4422_vm0, %v6571_v20  ;;  %v6589_v35 = vmax.f32 %v5553_v5, %v5555_v8  ;;  %v3327_v5 = vld [vmem:[%s6558_s3 + $0x188] sm:$0xf] }
 0x1b8   :  { %v3418_v37 = vpack.c.bf16 %v1408_v58, %v1408_v58  ;;  %v1359_v0 = vadd.f32 %v5660_v54, %v1328_v3  ;;  %v1298_v6 = vmax.f32 %v983_v57, %v1238_v40 }
 0x1b9   :  { %v928_v18 = vpop.f32.mrb[84].mxu0  ;;  %v1243_v41 = vpop.f32.mrb[84].mxu1 }
 0x1ba   :  { %1535 = vst.msk [vmem:[%s6562_s7 + $0x38] sm:$0xf] %vm1520_vm6, %v3418_v37  ;;  %vm1384_vm8 = vcmp.ge.f32.partialorder %v1359_v0, 0.0  ;;  %v1329_v43 = vmul.f32 %v5648_v28, %v1298_v6  ;;  %v984_v14 = vmax.f32 %v6586_v19, %v928_v18  ;;  %v3885_v52 = vpop.f32.mrb[85].mxu0  ;;  %4209 = vmatmul.mubr.msk.f32.gmra.mrb[190].mxu0 %vm92_vm4, %v3272_v59  ;;  %v3964_v46 = vpop.f32.mrb[85].mxu1  ;;  %4288 = vmatmul.mubr.msk.f32.gmra.mrb[190].mxu1 %vm92_vm4, %v3323_v36 }
 0x1bb   :  { %v1409_v47 = vsel %vm1384_vm8, 1.0, %v6565_v34  ;;  %4211 = vmatprep.mubr.msk.f32.mxu0 %vm4422_vm0, %v6571_v20  ;;  %4290 = vmatprep.mubr.msk.f32.mxu1 %vm4422_vm0, %v6571_v20  ;;  %v3276_v37 = vld [vmem:[%s6557_s2 + $0x188] sm:$0xf] }
 0x1bc   :  { %v3419_v63 = vpack.c.bf16 %v1409_v47, %v1409_v47  ;;  %v1360_v33 = vadd.f32 %v5660_v54, %v1329_v43  ;;  %v1299_v1 = vmax.f32 %v984_v14, %v1243_v41 }
 0x1bd   :  { %v933_v21 = vpop.f32.mrb[86].mxu0  ;;  %v1248_v49 = vpop.f32.mrb[86].mxu1 }
 0x1be   :  { %1536 = vst.msk [vmem:[%s6562_s7 + $0x3c] sm:$0xf] %vm1520_vm6, %v3419_v63  ;;  %vm1385_vm9 = vcmp.ge.f32.partialorder %v1360_v33, 0.0  ;;  %v1330_v16 = vmul.f32 %v5648_v28, %v1299_v1  ;;  %v985_v56 = vmax.f32 %v6587_v50, %v933_v21  ;;  %v3888_v17 = vpop.f32.mrb[87].mxu0  ;;  %4212 = vmatmul.mubr.msk.f32.gmra.mrb[192].mxu0 %vm92_vm4, %v3273_v32  ;;  %v3967_v11 = vpop.f32.mrb[87].mxu1  ;;  %4291 = vmatmul.mubr.msk.f32.gmra.mrb[192].mxu1 %vm92_vm4, %v3324_v60 }
 0x1bf   :  { %v1410_v12 = vsel %vm1385_vm9, 1.0, %v6565_v34  ;;  %4214 = vmatprep.mubr.msk.f32.mxu0 %vm4422_vm0, %v6571_v20  ;;  %4293 = vmatprep.mubr.msk.f32.mxu1 %vm4422_vm0, %v6571_v20 }
 0x1c0   :  { %v3420_v38 = vpack.c.bf16 %v1410_v12, %v1410_v12  ;;  %v1361_v42 = vadd.f32 %v5660_v54, %v1330_v16  ;;  %v1300_v9 = vmax.f32 %v985_v56, %v1248_v49 }
 0x1c1   :  { %v938_v2 = vpop.f32.mrb[88].mxu0  ;;  %v1253_v53 = vpop.f32.mrb[88].mxu1 }
 0x1c2   :  { %1537 = vst.msk [vmem:[%s6562_s7 + $0x40] sm:$0xf] %vm1520_vm6, %v3420_v38  ;;  %vm1386_vm10 = vcmp.ge.f32.partialorder %v1361_v42, 0.0  ;;  %v1331_v55 = vmul.f32 %v5648_v28, %v1300_v9  ;;  %v986_v26 = vmax.f32 %v6588_v25, %v938_v2  ;;  %v3891_v13 = vpop.f32.mrb[89].mxu0  ;;  %4215 = vmatmul.mubr.msk.f32.gmra.mrb[194].mxu0 %vm92_vm4, %v3274_v51  ;;  %v3970_v15 = vpop.f32.mrb[89].mxu1  ;;  %4294 = vmatmul.mubr.msk.f32.gmra.mrb[194].mxu1 %vm92_vm4, %v3325_v31 }
 0x1c3   :  { %v1411_v39 = vsel %vm1386_vm10, 1.0, %v6565_v34  ;;  %4217 = vmatprep.mubr.msk.f32.mxu0 %vm4422_vm0, %v6571_v20  ;;  %4296 = vmatprep.mubr.msk.f32.mxu1 %vm4422_vm0, %v6571_v20 }
 0x1c4   :  { %v3421_v24 = vpack.c.bf16 %v1411_v39, %v1411_v39  ;;  %v1362_v30 = vadd.f32 %v5660_v54, %v1331_v55  ;;  %v1301_v40 = vmax.f32 %v986_v26, %v1253_v53 }
 0x1c5   :  { %v943_v3 = vpop.f32.mrb[90].mxu0  ;;  %v1258_v7 = vpop.f32.mrb[90].mxu1 }
 0x1c6   :  { %1538 = vst.msk [vmem:[%s6562_s7 + $0x44] sm:$0xf] %vm1520_vm6, %v3421_v24  ;;  %vm1387_vm11 = vcmp.ge.f32.partialorder %v1362_v30, 0.0  ;;  %v1332_v57 = vmul.f32 %v5648_v28, %v1301_v40  ;;  %v987_v61 = vmax.f32 %v6589_v35, %v943_v3  ;;  %v3894_v58 = vpop.f32.mrb[91].mxu0  ;;  %4218 = vmatmul.mubr.msk.f32.gmra.mrb[196].mxu0 %vm92_vm4, %v3275_v29  ;;  %v3973_v59 = vpop.f32.mrb[91].mxu1  ;;  %4297 = vmatmul.mubr.msk.f32.gmra.mrb[196].mxu1 %vm92_vm4, %v3326_v48 }
 0x1c7   :  { %v1412_v36 = vsel %vm1387_vm11, 1.0, %v6565_v34  ;;  %4220 = vmatprep.mubr.msk.f32.mxu0 %vm4422_vm0, %v6571_v20  ;;  %4299 = vmatprep.mubr.msk.f32.mxu1 %vm4422_vm0, %v6571_v20  ;;  %v6590_v20 = vmax.f32 %v5571_v4, %v5573_v10  ;;  %v6591_v10 = vmax.f32 %v5589_v44, %v5591_v23  ;;  %v6592_v44 = vmax.f32 %v5607_v62, %v5609_v45 }
 0x1c8   :  { %v3422_v8 = vpack.c.bf16 %v1412_v36, %v1412_v36  ;;  %v1363_v0 = vadd.f32 %v5660_v54, %v1332_v57  ;;  %v1302_v6 = vmax.f32 %v987_v61, %v1258_v7  ;;  %v6593_v62 = vmax.f32 %v5625_v27, %v5627_v22 }
 0x1c9   :  { %v948_v18 = vpop.f32.mrb[92].mxu0  ;;  %v1263_v41 = vpop.f32.mrb[92].mxu1 }
 0x1ca   :  { %1539 = vst.msk [vmem:[%s6562_s7 + $0x48] sm:$0xf] %vm1520_vm6, %v3422_v8  ;;  %vm1388_vm12 = vcmp.ge.f32.partialorder %v1363_v0, 0.0  ;;  %v1333_v43 = vmul.f32 %v5648_v28, %v1302_v6  ;;  %v988_v19 = vmax.f32 %v6590_v20, %v948_v18  ;;  %v3897_v14 = vpop.f32.mrb[93].mxu0  ;;  %4221 = vmatmul.mubr.msk.f32.gmra.mrb[198].mxu0 %vm92_vm4, %v3276_v37  ;;  %v3976_v52 = vpop.f32.mrb[93].mxu1  ;;  %4300 = vmatmul.mubr.msk.f32.gmra.mrb[198].mxu1 %vm92_vm4, %v3327_v5 }
 0x1cb   :  { %v1413_v46 = vsel %vm1388_vm12, 1.0, %v6565_v34  ;;  %v6304_v18 = vld [vmem:[#allocation4] ss:$0 sm:$0xff] }
 0x1cc   :  { %v3423_v47 = vpack.c.bf16 %v1413_v46, %v1413_v46  ;;  %v1364_v32 = vadd.f32 %v5660_v54, %v1333_v43  ;;  %v1303_v60 = vmax.f32 %v988_v19, %v1263_v41 }
 0x1cd   :  { %v953_v63 = vpop.f32.mrb[94].mxu0  ;;  %v1268_v33 = vpop.f32.mrb[94].mxu1 }
 0x1ce   :  { %1540 = vst.msk [vmem:[%s6562_s7 + $0x4c] sm:$0xf] %vm1520_vm6, %v3423_v47  ;;  %vm1389_vm0 = vcmp.ge.f32.partialorder %v1364_v32, 0.0  ;;  %v1334_v4 = vmul.f32 %v5648_v28, %v1303_v60  ;;  %v989_v1 = vmax.f32 %v6591_v10, %v953_v63  ;;  %v3900_v21 = vpop.f32.mrb[95].mxu0  ;;  %v3979_v49 = vpop.f32.mrb[95].mxu1 }
 0x1cf   :  { %v1414_v16 = vsel %vm1389_vm0, 1.0, %v6565_v34 }
 0x1d0   :  { %v3424_v50 = vpack.c.bf16 %v1414_v16, %v1414_v16  ;;  %v1365_v56 = vadd.f32 %v5660_v54, %v1334_v4  ;;  %v1304_v17 = vmax.f32 %v989_v1, %v1268_v33 }
 0x1d1   :  { %v958_v11 = vpop.f32.mrb[96].mxu0  ;;  %v1273_v12 = vpop.f32.mrb[96].mxu1 }
 0x1d2   :  { %1541 = vst.msk [vmem:[%s6562_s7 + $0x50] sm:$0xf] %vm1520_vm6, %v3424_v50  ;;  %vm1390_vm4 = vcmp.ge.f32.partialorder %v1365_v56, 0.0  ;;  %v1335_v51 = vmul.f32 %v5648_v28, %v1304_v17  ;;  %v990_v23 = vmax.f32 %v6592_v44, %v958_v11  ;;  %v3903_v31 = vpop.f32.mrb[97].mxu0  ;;  %v3982_v38 = vpop.f32.mrb[97].mxu1 }
 0x1d3   :  { %v1415_v42 = vsel %vm1390_vm4, 1.0, %v6565_v34 }
 0x1d4   :  { %v3425_v9 = vpack.c.bf16 %v1415_v42, %v1415_v42  ;;  %v1366_v2 = vadd.f32 %v5660_v54, %v1335_v51  ;;  %v1305_v53 = vmax.f32 %v990_v23, %v1273_v12 }
 0x1d5   :  { %v963_v55 = vpop.f32.mrb[98].mxu0  ;;  %v1278_v25 = vpop.f32.mrb[98].mxu1 }
 0x1d6   :  { %1542 = vst.msk [vmem:[%s6562_s7 + $0x54] sm:$0xf] %vm1520_vm6, %v3425_v9  ;;  %vm1391_vm13 = vcmp.ge.f32.partialorder %v1366_v2, 0.0  ;;  %v1336_v26 = vmul.f32 %v5648_v28, %v1305_v53  ;;  %v991_v45 = vmax.f32 %v6593_v62, %v963_v55  ;;  %v3906_v13 = vpop.f32.mrb[99].mxu0  ;;  %v3985_v15 = vpop.f32.mrb[99].mxu1 }
 0x1d7   :  { %v1416_v39 = vsel %vm1391_vm13, 1.0, %v6565_v34 }
 0x1d8   :  { %v3426_v29 = vpack.c.bf16 %v1416_v39, %v1416_v39  ;;  %v1367_v48 = vadd.f32 %v5660_v54, %v1336_v26  ;;  %v1306_v24 = vmax.f32 %v991_v45, %v1278_v25 }
 0x1d9   :  { %v6135_v30 = vpop.f32.mrb[100].mxu0  ;;  %v6137_v40 = vpop.f32.mrb[100].mxu1 }
 0x1da   :  { %1543 = vst.msk [vmem:[%s6562_s7 + $0x58] sm:$0xf] %vm1520_vm6, %v3426_v29  ;;  %vm1392_vm14 = vcmp.ge.f32.partialorder %v1367_v48, 0.0  ;;  %v1337_v27 = vmul.f32 %v5648_v28, %v1306_v24  ;;  %v3992_v22 = vpop.f32.mrb[101].mxu0  ;;  %v2129_v3 = vmax.f32 %v6135_v30, %v6137_v40  ;;  %v4071_v7 = vpop.f32.mrb[101].mxu1 }
 0x1db   :  { %v1417_v57 = vsel %vm1392_vm14, 1.0, %v6565_v34 }
 0x1dc   :  { %v3427_v35 = vpack.c.bf16 %v1417_v57, %v1417_v57  ;;  %v1368_v61 = vadd.f32 %v5660_v54, %v1337_v27 }
 0x1dd   :  { %v6148_v58 = vpop.f32.mrb[102].mxu0  ;;  %v6150_v59 = vpop.f32.mrb[102].mxu1 }
 0x1de   :  { %1544 = vst.msk [vmem:[%s6562_s7 + $0x5c] sm:$0xf] %vm1520_vm6, %v3427_v35  ;;  %vm1393_vm15 = vcmp.ge.f32.partialorder %v1368_v61, 0.0  ;;  %v3995_v28 = vpop.f32.mrb[103].mxu0  ;;  %v4074_v37 = vpop.f32.mrb[103].mxu1 }
 0x1df   :  { %v1418_v5 = vsel %vm1393_vm15, 1.0, %v6565_v34 }
 0x1e0   :  { %v3428_v8 = vpack.c.bf16 %v1418_v5, %v1418_v5 }
 0x1e1   :  { %v6159_v54 = vpop.f32.mrb[104].mxu0  ;;  %v6161_v0 = vpop.f32.mrb[104].mxu1 }
 0x1e2   :  { %1546 = vst.msk [vmem:[%s6562_s7 + $0x60] sm:$0x3] %vm1545_vm1, %v3428_v8  ;;  %v3998_v6 = vpop.f32.mrb[105].mxu0  ;;  %v4077_v41 = vpop.f32.mrb[105].mxu1 }
 0x1e5   :  { %v6169_v43 = vpop.f32.mrb[106].mxu0  ;;  %v6171_v20 = vpop.f32.mrb[106].mxu1 }
 0x1e6   :  { %v4001_v19 = vpop.f32.mrb[107].mxu0  ;;  %v4080_v52 = vpop.f32.mrb[107].mxu1 }
 0x1e9   :  { %v6175_v46 = vpop.f32.mrb[108].mxu0  ;;  %v6177_v47 = vpop.f32.mrb[108].mxu1 }
 0x1ea   :  { %v4004_v32 = vpop.f32.mrb[109].mxu0  ;;  %v4083_v63 = vpop.f32.mrb[109].mxu1 }
 0x1ed   :  { %v6181_v33 = vpop.f32.mrb[110].mxu0  ;;  %v6183_v4 = vpop.f32.mrb[110].mxu1 }
 0x1ee   :  { %v4007_v10 = vpop.f32.mrb[111].mxu0  ;;  %v4086_v21 = vpop.f32.mrb[111].mxu1 }
 0x1f1   :  { %v6187_v49 = vpop.f32.mrb[112].mxu0  ;;  %v6189_v16 = vpop.f32.mrb[112].mxu1 }
 0x1f2   :  { %v4010_v50 = vpop.f32.mrb[113].mxu0  ;;  %v4089_v17 = vpop.f32.mrb[113].mxu1 }
 0x1f5   :  { %v6193_v11 = vpop.f32.mrb[114].mxu0  ;;  %v6195_v12 = vpop.f32.mrb[114].mxu1 }
 0x1f6   :  { %v4013_v51 = vpop.f32.mrb[115].mxu0  ;;  %v4092_v23 = vpop.f32.mrb[115].mxu1 }
 0x1f9   :  { %v6199_v31 = vpop.f32.mrb[116].mxu0  ;;  %v6201_v38 = vpop.f32.mrb[116].mxu1 }
 0x1fa   :  { %v4016_v42 = vpop.f32.mrb[117].mxu0  ;;  %v4095_v2 = vpop.f32.mrb[117].mxu1 }
 0x1fd   :  { %v6205_v53 = vpop.f32.mrb[118].mxu0  ;;  %v6207_v55 = vpop.f32.mrb[118].mxu1 }
 0x1fe   :  { %v4019_v25 = vpop.f32.mrb[119].mxu0  ;;  %v4098_v62 = vpop.f32.mrb[119].mxu1 }
 0x201   :  { %v6211_v45 = vpop.f32.mrb[120].mxu0  ;;  %v6213_v13 = vpop.f32.mrb[120].mxu1 }
 0x202   :  { %v4022_v15 = vpop.f32.mrb[121].mxu0  ;;  %v4101_v29 = vpop.f32.mrb[121].mxu1 }
 0x205   :  { %v6217_v48 = vpop.f32.mrb[122].mxu0  ;;  %v6219_v24 = vpop.f32.mrb[122].mxu1 }
 0x206   :  { %v4025_v27 = vpop.f32.mrb[123].mxu0  ;;  %v4104_v7 = vpop.f32.mrb[123].mxu1 }
 0x209   :  { %v6223_v57 = vpop.f32.mrb[124].mxu0  ;;  %v6225_v35 = vpop.f32.mrb[124].mxu1 }
 0x20a   :  { %v4028_v61 = vpop.f32.mrb[125].mxu0  ;;  %v4107_v37 = vpop.f32.mrb[125].mxu1 }
 0x20d   :  { %v6229_v5 = vpop.f32.mrb[126].mxu0  ;;  %v6231_v8 = vpop.f32.mrb[126].mxu1 }
 0x20e   :  { %v4031_v6 = vpop.f32.mrb[127].mxu0  ;;  %v4110_v19 = vpop.f32.mrb[127].mxu1 }
 0x211   :  { %v6235_v52 = vpop.f32.mrb[128].mxu0  ;;  %v6237_v32 = vpop.f32.mrb[128].mxu1 }
 0x212   :  { %v4034_v63 = vpop.f32.mrb[129].mxu0  ;;  %v4113_v21 = vpop.f32.mrb[129].mxu1 }
 0x215   :  { %v6241_v50 = vpop.f32.mrb[130].mxu0  ;;  %v6243_v17 = vpop.f32.mrb[130].mxu1 }
 0x216   :  { %v4037_v51 = vpop.f32.mrb[131].mxu0  ;;  %v4116_v42 = vpop.f32.mrb[131].mxu1 }
 0x219   :  { %v6247_v2 = vpop.f32.mrb[132].mxu0  ;;  %v6249_v25 = vpop.f32.mrb[132].mxu1 }
 0x21a   :  { %v4040_v62 = vpop.f32.mrb[133].mxu0  ;;  %v4119_v29 = vpop.f32.mrb[133].mxu1 }
 0x21d   :  { %v6253_v27 = vpop.f32.mrb[134].mxu0  ;;  %v6255_v7 = vpop.f32.mrb[134].mxu1 }
 0x21e   :  { %v4043_v61 = vpop.f32.mrb[135].mxu0  ;;  %v4122_v6 = vpop.f32.mrb[135].mxu1 }
 0x221   :  { %v6259_v19 = vpop.f32.mrb[136].mxu0  ;;  %v6261_v63 = vpop.f32.mrb[136].mxu1 }
 0x222   :  { %v4046_v21 = vpop.f32.mrb[137].mxu0  ;;  %v4125_v42 = vpop.f32.mrb[137].mxu1 }
 0x225   :  { %v6265_v62 = vpop.f32.mrb[138].mxu0  ;;  %v6267_v29 = vpop.f32.mrb[138].mxu1 }
 0x226   :  { %v4049_v15 = vpop.f32.mrb[139].mxu0  ;;  %v4128_v23 = vpop.f32.mrb[139].mxu1 }
 0x229   :  { %v6271_v37 = vpop.f32.mrb[140].mxu0  ;;  %v6273_v6 = vpop.f32.mrb[140].mxu1 }
 0x22a   :  { %v4052_v10 = vpop.f32.mrb[141].mxu0  ;;  %v4131_v41 = vpop.f32.mrb[141].mxu1 }
 0x22d   :  { %v6277_v51 = vpop.f32.mrb[142].mxu0  ;;  %v6279_v42 = vpop.f32.mrb[142].mxu1 }
 0x22e   :  { %v4055_v28 = vpop.f32.mrb[143].mxu0  ;;  %v4134_v22 = vpop.f32.mrb[143].mxu1 }
 0x231   :  { %v6283_v61 = vpop.f32.mrb[144].mxu0  ;;  %v6285_v23 = vpop.f32.mrb[144].mxu1 }
 0x232   :  { %v4058_v39 = vpop.f32.mrb[145].mxu0  ;;  %v4137_v26 = vpop.f32.mrb[145].mxu1 }
 0x235   :  { %v6289_v21 = vpop.f32.mrb[146].mxu0  ;;  %v6291_v41 = vpop.f32.mrb[146].mxu1 }
 0x236   :  { %v4061_v9 = vpop.f32.mrb[147].mxu0  ;;  %v4140_v44 = vpop.f32.mrb[147].mxu1 }
 0x239   :  { %v6295_v15 = vpop.f32.mrb[148].mxu0  ;;  %v6297_v22 = vpop.f32.mrb[148].mxu1 }
 0x23a   :  { %6594 = vst [vmem:[#allocation9_spill] sm:$0xff] %v6295_v15  ;;  %6595 = vst [vmem:[#allocation10_spill] sm:$0xff] %v6297_v22  ;;  %v4064_v56 = vpop.f32.mrb[149].mxu0  ;;  %v4143_v1 = vpop.f32.mrb[149].mxu1  ;;  %v6310_v15 = vld [vmem:[#allocation6] ss:$0 sm:$0xff] }
 0x23b   :  { %v6596_v56 = vmax.f32 %v6148_v58, %v6150_v59  ;;  %v6598_v58 = vmov -1.0  }
 0x23d   :  { %v2321_v10 = vpop.f32.mrb[150].mxu0  ;;  %v2637_v26 = vpop.f32.mrb[150].mxu1 }
 0x23e   :  { %v2445_v60 = vmax.f32 %v2129_v3, %v2321_v10  ;;  %v4150_v9 = vpop.f32.mrb[151].mxu0  ;;  %v4229_v14 = vpop.f32.mrb[151].mxu1  ;;  %v6597_v10 = vmax.f32 %v6159_v54, %v6161_v0  ;;  %v6599_v54 = vmax.f32 %v6169_v43, %v6171_v20  ;;  %v6600_v43 = vmax.f32 %v6175_v46, %v6177_v47 }
 0x23f   :  { %v6601_v46 = vmax.f32 %v6181_v33, %v6183_v4  ;;  %v6602_v33 = vmax.f32 %v6187_v49, %v6189_v16  ;;  %v6603_v49 = vmax.f32 %v6193_v11, %v6195_v12  ;;  %v6604_v11 = vmax.f32 %v6199_v31, %v6201_v38 }
 0x240   :  { %v2761_v34 = vmax.f32 %v2445_v60, %v2637_v26  ;;  %v6605_v31 = vmax.f32 %v6205_v53, %v6207_v55  ;;  %v6606_v53 = vmax.f32 %v6211_v45, %v6213_v13  ;;  %v6607_v45 = vmax.f32 %v6217_v48, %v6219_v24 }
 0x241   :  { %v2326_v28 = vpop.f32.mrb[152].mxu0  ;;  %v2642_v44 = vpop.f32.mrb[152].mxu1  ;;  %v6608_v48 = vmax.f32 %v6223_v57, %v6225_v35  ;;  %v6609_v57 = vmax.f32 %v6229_v5, %v6231_v8  ;;  %v6610_v5 = vmax.f32 %v6235_v52, %v6237_v32  ;;  %v6611_v52 = vmax.f32 %v6241_v50, %v6243_v17 }
 0x242   :  { %v2786_v36 = vmul.f32 %v6304_v18, %v2761_v34  ;;  %v2446_v39 = vmax.f32 %v6596_v56, %v2326_v28  ;;  %v4153_v1 = vpop.f32.mrb[153].mxu0  ;;  %v4232_v22 = vpop.f32.mrb[153].mxu1  ;;  %v6612_v50 = vmax.f32 %v6247_v2, %v6249_v25  ;;  %v6613_v2 = vmax.f32 %v6253_v27, %v6255_v7 }
 0x243   :  { %v6614_v27 = vmax.f32 %v6259_v19, %v6261_v63  ;;  %v6615_v19 = vmax.f32 %v6265_v62, %v6267_v29  ;;  %v6616_v62 = vmax.f32 %v6271_v37, %v6273_v6  ;;  %v6617_v37 = vmax.f32 %v6277_v51, %v6279_v42 }
 0x244   :  { %v2811_v30 = vadd.f32 %v6310_v15, %v2786_v36  ;;  %v2762_v40 = vmax.f32 %v2446_v39, %v2642_v44  ;;  %v6618_v51 = vmax.f32 %v6283_v61, %v6285_v23  ;;  %v6619_v61 = vmax.f32 %v6289_v21, %v6291_v41  ;;  %v6620_v21 = vld [vmem:[#allocation9_spill] sm:$0xff]  ;;  %v6621_v41 = vld [vmem:[#allocation10_spill] sm:$0xff] }
 0x245   :  { %v2331_v3 = vpop.f32.mrb[154].mxu0  ;;  %v2647_v14 = vpop.f32.mrb[154].mxu1 }
 0x246   :  { %vm2836_vm2 = vcmp.ge.f32.partialorder %v2811_v30, 0.0  ;;  %v2787_v60 = vmul.f32 %v6304_v18, %v2762_v40  ;;  %v2447_v34 = vmax.f32 %v6597_v10, %v2331_v3  ;;  %v4156_v26 = vpop.f32.mrb[155].mxu0  ;;  %v4235_v9 = vpop.f32.mrb[155].mxu1 }
 0x247   :  { %v2861_v59 = vsel %vm2836_vm2, 1.0, %v6598_v58 }
 0x248   :  { %v3429_v28 = vpack.c.bf16 %v2861_v59, %v2861_v59  ;;  %v2812_v22 = vadd.f32 %v6310_v15, %v2787_v60  ;;  %v2763_v56 = vmax.f32 %v2447_v34, %v2647_v14 }
 0x249   :  { %v2336_v1 = vpop.f32.mrb[156].mxu0  ;;  %v2652_v36 = vpop.f32.mrb[156].mxu1 }
 0x24a   :  { %3379 = vst.msk [vmem:[%s6562_s7 + $0x64] sm:$0xf] %vm1520_vm6, %v3429_v28  ;;  %vm2837_vm3 = vcmp.ge.f32.partialorder %v2812_v22, 0.0  ;;  %v2788_v39 = vmul.f32 %v6304_v18, %v2763_v56  ;;  %v2448_v0 = vmax.f32 %v6599_v54, %v2336_v1  ;;  %v4159_v44 = vpop.f32.mrb[157].mxu0  ;;  %v4238_v30 = vpop.f32.mrb[157].mxu1 }
 0x24b   :  { %v2862_v40 = vsel %vm2837_vm3, 1.0, %v6598_v58 }
 0x24c   :  { %v3430_v3 = vpack.c.bf16 %v2862_v40, %v2862_v40  ;;  %v2813_v14 = vadd.f32 %v6310_v15, %v2788_v39  ;;  %v2764_v60 = vmax.f32 %v2448_v0, %v2652_v36 }
 0x24d   :  { %v2341_v10 = vpop.f32.mrb[158].mxu0  ;;  %v2657_v34 = vpop.f32.mrb[158].mxu1 }
 0x24e   :  { %3380 = vst.msk [vmem:[%s6562_s7 + $0x68] sm:$0xf] %vm1520_vm6, %v3430_v3  ;;  %vm2838_vm5 = vcmp.ge.f32.partialorder %v2813_v14, 0.0  ;;  %v2789_v26 = vmul.f32 %v6304_v18, %v2764_v60  ;;  %v2449_v20 = vmax.f32 %v6600_v43, %v2341_v10  ;;  %v4162_v9 = vpop.f32.mrb[159].mxu0  ;;  %v4241_v59 = vpop.f32.mrb[159].mxu1 }
 0x24f   :  { %v2863_v28 = vsel %vm2838_vm5, 1.0, %v6598_v58 }
 0x250   :  { %v3431_v22 = vpack.c.bf16 %v2863_v28, %v2863_v28  ;;  %v2814_v56 = vadd.f32 %v6310_v15, %v2789_v26  ;;  %v2765_v1 = vmax.f32 %v2449_v20, %v2657_v34 }
 0x251   :  { %v2346_v36 = vpop.f32.mrb[160].mxu0  ;;  %v2662_v39 = vpop.f32.mrb[160].mxu1 }
 0x252   :  { %3381 = vst.msk [vmem:[%s6562_s7 + $0x6c] sm:$0xf] %vm1520_vm6, %v3431_v22  ;;  %vm2839_vm7 = vcmp.ge.f32.partialorder %v2814_v56, 0.0  ;;  %v2790_v54 = vmul.f32 %v6304_v18, %v2765_v1  ;;  %v2450_v47 = vmax.f32 %v6601_v46, %v2346_v36  ;;  %v4165_v0 = vpop.f32.mrb[161].mxu0  ;;  %v4244_v44 = vpop.f32.mrb[161].mxu1 }
 0x253   :  { %v2864_v30 = vsel %vm2839_vm7, 1.0, %v6598_v58 }
 0x254   :  { %v3432_v40 = vpack.c.bf16 %v2864_v30, %v2864_v30  ;;  %v2815_v3 = vadd.f32 %v6310_v15, %v2790_v54  ;;  %v2766_v14 = vmax.f32 %v2450_v47, %v2662_v39 }
 0x255   :  { %v2351_v60 = vpop.f32.mrb[162].mxu0  ;;  %v2667_v10 = vpop.f32.mrb[162].mxu1 }
 0x256   :  { %3382 = vst.msk [vmem:[%s6562_s7 + $0x70] sm:$0xf] %vm1520_vm6, %v3432_v40  ;;  %vm2840_vm8 = vcmp.ge.f32.partialorder %v2815_v3, 0.0  ;;  %v2791_v34 = vmul.f32 %v6304_v18, %v2766_v14  ;;  %v2451_v4 = vmax.f32 %v6602_v33, %v2351_v60  ;;  %v4168_v26 = vpop.f32.mrb[163].mxu0  ;;  %v4247_v43 = vpop.f32.mrb[163].mxu1 }
 0x257   :  { %v2865_v20 = vsel %vm2840_vm8, 1.0, %v6598_v58 }
 0x258   :  { %v3433_v9 = vpack.c.bf16 %v2865_v20, %v2865_v20  ;;  %v2816_v59 = vadd.f32 %v6310_v15, %v2791_v34  ;;  %v2767_v28 = vmax.f32 %v2451_v4, %v2667_v10 }
 0x259   :  { %v2356_v22 = vpop.f32.mrb[164].mxu0  ;;  %v2672_v56 = vpop.f32.mrb[164].mxu1 }
 0x25a   :  { %3383 = vst.msk [vmem:[%s6562_s7 + $0x74] sm:$0xf] %vm1520_vm6, %v3433_v9  ;;  %vm2841_vm9 = vcmp.ge.f32.partialorder %v2816_v59, 0.0  ;;  %v2792_v1 = vmul.f32 %v6304_v18, %v2767_v28  ;;  %v2452_v16 = vmax.f32 %v6603_v49, %v2356_v22  ;;  %v4171_v36 = vpop.f32.mrb[165].mxu0  ;;  %v4250_v39 = vpop.f32.mrb[165].mxu1 }
 0x25b   :  { %v2866_v54 = vsel %vm2841_vm9, 1.0, %v6598_v58 }
 0x25c   :  { %v3434_v46 = vpack.c.bf16 %v2866_v54, %v2866_v54  ;;  %v2817_v47 = vadd.f32 %v6310_v15, %v2792_v1  ;;  %v2768_v0 = vmax.f32 %v2452_v16, %v2672_v56 }
 0x25d   :  { %v2361_v44 = vpop.f32.mrb[166].mxu0  ;;  %v2677_v30 = vpop.f32.mrb[166].mxu1 }
 0x25e   :  { %3384 = vst.msk [vmem:[%s6562_s7 + $0x78] sm:$0xf] %vm1520_vm6, %v3434_v46  ;;  %vm2842_vm10 = vcmp.ge.f32.partialorder %v2817_v47, 0.0  ;;  %v2793_v40 = vmul.f32 %v6304_v18, %v2768_v0  ;;  %v2453_v12 = vmax.f32 %v6604_v11, %v2361_v44  ;;  %v4174_v3 = vpop.f32.mrb[167].mxu0  ;;  %v4253_v14 = vpop.f32.mrb[167].mxu1 }
 0x25f   :  { %v2867_v60 = vsel %vm2842_vm10, 1.0, %v6598_v58 }
 0x260   :  { %v3435_v10 = vpack.c.bf16 %v2867_v60, %v2867_v60  ;;  %v2818_v34 = vadd.f32 %v6310_v15, %v2793_v40  ;;  %v2769_v33 = vmax.f32 %v2453_v12, %v2677_v30 }
 0x261   :  { %v2366_v4 = vpop.f32.mrb[168].mxu0  ;;  %v2682_v26 = vpop.f32.mrb[168].mxu1 }
 0x262   :  { %3385 = vst.msk [vmem:[%s6562_s7 + $0x7c] sm:$0xf] %vm1520_vm6, %v3435_v10  ;;  %vm2843_vm11 = vcmp.ge.f32.partialorder %v2818_v34, 0.0  ;;  %v2794_v43 = vmul.f32 %v6304_v18, %v2769_v33  ;;  %v2454_v38 = vmax.f32 %v6605_v31, %v2366_v4  ;;  %v4177_v20 = vpop.f32.mrb[169].mxu0  ;;  %v4256_v9 = vpop.f32.mrb[169].mxu1 }
 0x263   :  { %v2868_v59 = vsel %vm2843_vm11, 1.0, %v6598_v58 }
 0x264   :  { %v3436_v28 = vpack.c.bf16 %v2868_v59, %v2868_v59  ;;  %v2819_v22 = vadd.f32 %v6310_v15, %v2794_v43  ;;  %v2770_v56 = vmax.f32 %v2454_v38, %v2682_v26 }
 0x265   :  { %v2371_v1 = vpop.f32.mrb[170].mxu0  ;;  %v2687_v49 = vpop.f32.mrb[170].mxu1 }
 0x266   :  { %3386 = vst.msk [vmem:[%s6562_s7 + $0x80] sm:$0xf] %vm1520_vm6, %v3436_v28  ;;  %vm2844_vm12 = vcmp.ge.f32.partialorder %v2819_v22, 0.0  ;;  %v2795_v16 = vmul.f32 %v6304_v18, %v2770_v56  ;;  %v2455_v55 = vmax.f32 %v6606_v53, %v2371_v1  ;;  %v4180_v36 = vpop.f32.mrb[171].mxu0  ;;  %v4259_v39 = vpop.f32.mrb[171].mxu1 }
 0x267   :  { %v2869_v54 = vsel %vm2844_vm12, 1.0, %v6598_v58 }
 0x268   :  { %v3437_v46 = vpack.c.bf16 %v2869_v54, %v2869_v54  ;;  %v2820_v47 = vadd.f32 %v6310_v15, %v2795_v16  ;;  %v2771_v0 = vmax.f32 %v2455_v55, %v2687_v49 }
 0x269   :  { %v2376_v44 = vpop.f32.mrb[172].mxu0  ;;  %v2692_v30 = vpop.f32.mrb[172].mxu1 }
 0x26a   :  { %3387 = vst.msk [vmem:[%s6562_s7 + $0x84] sm:$0xf] %vm1520_vm6, %v3437_v46  ;;  %vm2845_vm0 = vcmp.ge.f32.partialorder %v2820_v47, 0.0  ;;  %v2796_v40 = vmul.f32 %v6304_v18, %v2771_v0  ;;  %v2456_v13 = vmax.f32 %v6607_v45, %v2376_v44  ;;  %v4183_v11 = vpop.f32.mrb[173].mxu0  ;;  %v4262_v12 = vpop.f32.mrb[173].mxu1 }
 0x26b   :  { %v2870_v3 = vsel %vm2845_vm0, 1.0, %v6598_v58 }
 0x26c   :  { %v3438_v14 = vpack.c.bf16 %v2870_v3, %v2870_v3  ;;  %v2821_v60 = vadd.f32 %v6310_v15, %v2796_v40  ;;  %v2772_v10 = vmax.f32 %v2456_v13, %v2692_v30 }
 0x26d   :  { %v2381_v34 = vpop.f32.mrb[174].mxu0  ;;  %v2697_v33 = vpop.f32.mrb[174].mxu1 }
 0x26e   :  { %3388 = vst.msk [vmem:[%s6562_s7 + $0x88] sm:$0xf] %vm1520_vm6, %v3438_v14  ;;  %vm2846_vm4 = vcmp.ge.f32.partialorder %v2821_v60, 0.0  ;;  %v2797_v4 = vmul.f32 %v6304_v18, %v2772_v10  ;;  %v2457_v24 = vmax.f32 %v6608_v48, %v2381_v34  ;;  %v4186_v26 = vpop.f32.mrb[175].mxu0  ;;  %v4265_v43 = vpop.f32.mrb[175].mxu1 }
 0x26f   :  { %v2871_v31 = vsel %vm2846_vm4, 1.0, %v6598_v58 }
 0x270   :  { %v3439_v38 = vpack.c.bf16 %v2871_v31, %v2871_v31  ;;  %v2822_v20 = vadd.f32 %v6310_v15, %v2797_v4  ;;  %v2773_v9 = vmax.f32 %v2457_v24, %v2697_v33 }
 0x271   :  { %v2386_v59 = vpop.f32.mrb[176].mxu0  ;;  %v2702_v28 = vpop.f32.mrb[176].mxu1 }
 0x272   :  { %3389 = vst.msk [vmem:[%s6562_s7 + $0x8c] sm:$0xf] %vm1520_vm6, %v3439_v38  ;;  %vm2847_vm13 = vcmp.ge.f32.partialorder %v2822_v20, 0.0  ;;  %v2798_v22 = vmul.f32 %v6304_v18, %v2773_v9  ;;  %v2458_v35 = vmax.f32 %v6609_v57, %v2386_v59  ;;  %v4189_v56 = vpop.f32.mrb[177].mxu0  ;;  %v4268_v1 = vpop.f32.mrb[177].mxu1 }
 0x273   :  { %v2872_v49 = vsel %vm2847_vm13, 1.0, %v6598_v58 }
 0x274   :  { %v3440_v16 = vpack.c.bf16 %v2872_v49, %v2872_v49  ;;  %v2823_v53 = vadd.f32 %v6310_v15, %v2798_v22  ;;  %v2774_v55 = vmax.f32 %v2458_v35, %v2702_v28 }
 0x275   :  { %v2391_v36 = vpop.f32.mrb[178].mxu0  ;;  %v2707_v39 = vpop.f32.mrb[178].mxu1 }
 0x276   :  { %3390 = vst.msk [vmem:[%s6562_s7 + $0x90] sm:$0xf] %vm1520_vm6, %v3440_v16  ;;  %vm2848_vm14 = vcmp.ge.f32.partialorder %v2823_v53, 0.0  ;;  %v2799_v54 = vmul.f32 %v6304_v18, %v2774_v55  ;;  %v2459_v8 = vmax.f32 %v6610_v5, %v2391_v36  ;;  %v4192_v46 = vpop.f32.mrb[179].mxu0  ;;  %v4271_v47 = vpop.f32.mrb[179].mxu1 }
 0x277   :  { %v2873_v0 = vsel %vm2848_vm14, 1.0, %v6598_v58 }
 0x278   :  { %v3441_v44 = vpack.c.bf16 %v2873_v0, %v2873_v0  ;;  %v2824_v30 = vadd.f32 %v6310_v15, %v2799_v54  ;;  %v2775_v40 = vmax.f32 %v2459_v8, %v2707_v39 }
 0x279   :  { %v2396_v45 = vpop.f32.mrb[180].mxu0  ;;  %v2712_v13 = vpop.f32.mrb[180].mxu1 }
 0x27a   :  { %3391 = vst.msk [vmem:[%s6562_s7 + $0x94] sm:$0xf] %vm1520_vm6, %v3441_v44  ;;  %vm2849_vm15 = vcmp.ge.f32.partialorder %v2824_v30, 0.0  ;;  %v2800_v11 = vmul.f32 %v6304_v18, %v2775_v40  ;;  %v2460_v32 = vmax.f32 %v6611_v52, %v2396_v45  ;;  %v4195_v12 = vpop.f32.mrb[181].mxu0  ;;  %v4274_v3 = vpop.f32.mrb[181].mxu1 }
 0x27b   :  { %v2874_v14 = vsel %vm2849_vm15, 1.0, %v6598_v58 }
 0x27c   :  { %v3442_v60 = vpack.c.bf16 %v2874_v14, %v2874_v14  ;;  %v2825_v10 = vadd.f32 %v6310_v15, %v2800_v11  ;;  %v2776_v34 = vmax.f32 %v2460_v32, %v2712_v13 }
 0x27d   :  { %v2401_v33 = vpop.f32.mrb[182].mxu0  ;;  %v2717_v4 = vpop.f32.mrb[182].mxu1 }
 0x27e   :  { %3392 = vst.msk [vmem:[%s6562_s7 + $0x98] sm:$0xf] %vm1520_vm6, %v3442_v60  ;;  %vm2850_vm2 = vcmp.ge.f32.partialorder %v2825_v10, 0.0  ;;  %v2801_v48 = vmul.f32 %v6304_v18, %v2776_v34  ;;  %v2461_v17 = vmax.f32 %v6612_v50, %v2401_v33  ;;  %v4198_v24 = vpop.f32.mrb[183].mxu0  ;;  %v4277_v26 = vpop.f32.mrb[183].mxu1 }
 0x27f   :  { %v2875_v43 = vsel %vm2850_vm2, 1.0, %v6598_v58 }
 0x280   :  { %v3443_v31 = vpack.c.bf16 %v2875_v43, %v2875_v43  ;;  %v2826_v38 = vadd.f32 %v6310_v15, %v2801_v48  ;;  %v2777_v20 = vmax.f32 %v2461_v17, %v2717_v4 }
 0x281   :  { %v2406_v9 = vpop.f32.mrb[184].mxu0  ;;  %v2722_v59 = vpop.f32.mrb[184].mxu1 }
 0x282   :  { %3393 = vst.msk [vmem:[%s6562_s7 + $0x9c] sm:$0xf] %vm1520_vm6, %v3443_v31  ;;  %vm2851_vm3 = vcmp.ge.f32.partialorder %v2826_v38, 0.0  ;;  %v2802_v28 = vmul.f32 %v6304_v18, %v2777_v20  ;;  %v2462_v25 = vmax.f32 %v6613_v2, %v2406_v9  ;;  %v4201_v22 = vpop.f32.mrb[185].mxu0  ;;  %v4280_v57 = vpop.f32.mrb[185].mxu1 }
 0x283   :  { %v2876_v35 = vsel %vm2851_vm3, 1.0, %v6598_v58 }
 0x284   :  { %v3444_v56 = vpack.c.bf16 %v2876_v35, %v2876_v35  ;;  %v2827_v1 = vadd.f32 %v6310_v15, %v2802_v28  ;;  %v2778_v49 = vmax.f32 %v2462_v25, %v2722_v59 }
 0x285   :  { %v2411_v16 = vpop.f32.mrb[186].mxu0  ;;  %v2727_v53 = vpop.f32.mrb[186].mxu1 }
 0x286   :  { %3394 = vst.msk [vmem:[%s6562_s7 + $0xa0] sm:$0xf] %vm1520_vm6, %v3444_v56  ;;  %vm2852_vm5 = vcmp.ge.f32.partialorder %v2827_v1, 0.0  ;;  %v2803_v55 = vmul.f32 %v6304_v18, %v2778_v49  ;;  %v2463_v7 = vmax.f32 %v6614_v27, %v2411_v16  ;;  %v4204_v36 = vpop.f32.mrb[187].mxu0  ;;  %v4283_v39 = vpop.f32.mrb[187].mxu1 }
 0x287   :  { %v2877_v54 = vsel %vm2852_vm5, 1.0, %v6598_v58 }
 0x288   :  { %v3445_v5 = vpack.c.bf16 %v2877_v54, %v2877_v54  ;;  %v2828_v8 = vadd.f32 %v6310_v15, %v2803_v55  ;;  %v2779_v46 = vmax.f32 %v2463_v7, %v2727_v53 }
 0x289   :  { %v2416_v47 = vpop.f32.mrb[188].mxu0  ;;  %v2732_v0 = vpop.f32.mrb[188].mxu1 }
 0x28a   :  { %3395 = vst.msk [vmem:[%s6562_s7 + $0xa4] sm:$0xf] %vm1520_vm6, %v3445_v5  ;;  %vm2853_vm7 = vcmp.ge.f32.partialorder %v2828_v8, 0.0  ;;  %v2804_v44 = vmul.f32 %v6304_v18, %v2779_v46  ;;  %v2464_v63 = vmax.f32 %v6615_v19, %v2416_v47  ;;  %v4207_v30 = vpop.f32.mrb[189].mxu0  ;;  %v4286_v40 = vpop.f32.mrb[189].mxu1  ;;  %v6622_v46 = vmax.f32 %v6620_v21, %v6621_v41 }
 0x28b   :  { %v2878_v45 = vsel %vm2853_vm7, 1.0, %v6598_v58 }
 0x28c   :  { %v3446_v13 = vpack.c.bf16 %v2878_v45, %v2878_v45  ;;  %v2829_v11 = vadd.f32 %v6310_v15, %v2804_v44  ;;  %v2780_v52 = vmax.f32 %v2464_v63, %v2732_v0 }
 0x28d   :  { %v2421_v32 = vpop.f32.mrb[190].mxu0  ;;  %v2737_v12 = vpop.f32.mrb[190].mxu1 }
 0x28e   :  { %3396 = vst.msk [vmem:[%s6562_s7 + $0xa8] sm:$0xf] %vm1520_vm6, %v3446_v13  ;;  %vm2854_vm8 = vcmp.ge.f32.partialorder %v2829_v11, 0.0  ;;  %v2805_v3 = vmul.f32 %v6304_v18, %v2780_v52  ;;  %v2465_v29 = vmax.f32 %v6616_v62, %v2421_v32  ;;  %v4210_v14 = vpop.f32.mrb[191].mxu0  ;;  %v4289_v60 = vpop.f32.mrb[191].mxu1 }
 0x28f   :  { %v2879_v10 = vsel %vm2854_vm8, 1.0, %v6598_v58 }
 0x290   :  { %v3447_v34 = vpack.c.bf16 %v2879_v10, %v2879_v10  ;;  %v2830_v33 = vadd.f32 %v6310_v15, %v2805_v3  ;;  %v2781_v4 = vmax.f32 %v2465_v29, %v2737_v12 }
 0x291   :  { %v2426_v48 = vpop.f32.mrb[192].mxu0  ;;  %v2742_v50 = vpop.f32.mrb[192].mxu1 }
 0x292   :  { %3397 = vst.msk [vmem:[%s6562_s7 + $0xac] sm:$0xf] %vm1520_vm6, %v3447_v34  ;;  %vm2855_vm9 = vcmp.ge.f32.partialorder %v2830_v33, 0.0  ;;  %v2806_v17 = vmul.f32 %v6304_v18, %v2781_v4  ;;  %v2466_v6 = vmax.f32 %v6617_v37, %v2426_v48  ;;  %v4213_v24 = vpop.f32.mrb[193].mxu0  ;;  %v4292_v26 = vpop.f32.mrb[193].mxu1 }
 0x293   :  { %v2880_v43 = vsel %vm2855_vm9, 1.0, %v6598_v58 }
 0x294   :  { %v3448_v31 = vpack.c.bf16 %v2880_v43, %v2880_v43  ;;  %v2831_v38 = vadd.f32 %v6310_v15, %v2806_v17  ;;  %v2782_v20 = vmax.f32 %v2466_v6, %v2742_v50 }
 0x295   :  { %v2431_v9 = vpop.f32.mrb[194].mxu0  ;;  %v2747_v59 = vpop.f32.mrb[194].mxu1 }
 0x296   :  { %3398 = vst.msk [vmem:[%s6562_s7 + $0xb0] sm:$0xf] %vm1520_vm6, %v3448_v31  ;;  %vm2856_vm10 = vcmp.ge.f32.partialorder %v2831_v38, 0.0  ;;  %v2807_v28 = vmul.f32 %v6304_v18, %v2782_v20  ;;  %v2467_v42 = vmax.f32 %v6618_v51, %v2431_v9  ;;  %v4216_v2 = vpop.f32.mrb[195].mxu0  ;;  %v4295_v25 = vpop.f32.mrb[195].mxu1 }
 0x297   :  { %v2881_v22 = vsel %vm2856_vm10, 1.0, %v6598_v58 }
 0x298   :  { %v3449_v57 = vpack.c.bf16 %v2881_v22, %v2881_v22  ;;  %v2832_v35 = vadd.f32 %v6310_v15, %v2807_v28  ;;  %v2783_v56 = vmax.f32 %v2467_v42, %v2747_v59 }
 0x299   :  { %v2436_v1 = vpop.f32.mrb[196].mxu0  ;;  %v2752_v49 = vpop.f32.mrb[196].mxu1 }
 0x29a   :  { %3399 = vst.msk [vmem:[%s6562_s7 + $0xb4] sm:$0xf] %vm1520_vm6, %v3449_v57  ;;  %vm2857_vm11 = vcmp.ge.f32.partialorder %v2832_v35, 0.0  ;;  %v2808_v16 = vmul.f32 %v6304_v18, %v2783_v56  ;;  %v2468_v23 = vmax.f32 %v6619_v61, %v2436_v1  ;;  %v4219_v53 = vpop.f32.mrb[197].mxu0  ;;  %v4298_v55 = vpop.f32.mrb[197].mxu1 }
 0x29b   :  { %v2882_v27 = vsel %vm2857_vm11, 1.0, %v6598_v58 }
 0x29c   :  { %v3450_v7 = vpack.c.bf16 %v2882_v27, %v2882_v27  ;;  %v2833_v36 = vadd.f32 %v6310_v15, %v2808_v16  ;;  %v2784_v39 = vmax.f32 %v2468_v23, %v2752_v49 }
 0x29d   :  { %v2441_v54 = vpop.f32.mrb[198].mxu0  ;;  %v2757_v5 = vpop.f32.mrb[198].mxu1 }
 0x29e   :  { %3400 = vst.msk [vmem:[%s6562_s7 + $0xb8] sm:$0xf] %vm1520_vm6, %v3450_v7  ;;  %vm2858_vm12 = vcmp.ge.f32.partialorder %v2833_v36, 0.0  ;;  %v2809_v8 = vmul.f32 %v6304_v18, %v2784_v39  ;;  %v2469_v47 = vmax.f32 %v6622_v46, %v2441_v54  ;;  %v4222_v0 = vpop.f32.mrb[199].mxu0  ;;  %v4301_v44 = vpop.f32.mrb[199].mxu1 }
 0x29f   :  { %v2883_v19 = vsel %vm2858_vm12, 1.0, %v6598_v58 }
 0x2a0   :  { %v3451_v63 = vpack.c.bf16 %v2883_v19, %v2883_v19  ;;  %v2834_v30 = vadd.f32 %v6310_v15, %v2809_v8  ;;  %v2785_v40 = vmax.f32 %v2469_v47, %v2757_v5 }
 0x2a2   :  { %3401 = vst.msk [vmem:[%s6562_s7 + $0xbc] sm:$0xf] %vm1520_vm6, %v3451_v63  ;;  %vm2859_vm0 = vcmp.ge.f32.partialorder %v2834_v30, 0.0  ;;  %v2810_v45 = vmul.f32 %v6304_v18, %v2785_v40 }
 0x2a3   :  { %v2884_v13 = vsel %vm2859_vm0, 1.0, %v6598_v58 }
 0x2a4   :  { %v3452_v11 = vpack.c.bf16 %v2884_v13, %v2884_v13  ;;  %v2835_v52 = vadd.f32 %v6310_v15, %v2810_v45 }
 0x2a6   :  { %3402 = vst.msk [vmem:[%s6562_s7 + $0xc0] sm:$0xf] %vm1520_vm6, %v3452_v11  ;;  %vm2860_vm4 = vcmp.ge.f32.partialorder %v2835_v52, 0.0 }
 0x2a7   :  { %v2885_v32 = vsel %vm2860_vm4, 1.0, %v6598_v58 }
 0x2a8   :  { %v3453_v12 = vpack.c.bf16 %v2885_v32, %v2885_v32 }
 0x2aa   :  { %3403 = vst.msk [vmem:[%s6562_s7 + $0xc4] sm:$0x3] %vm1545_vm1, %v3453_v12 }
 0x2ab   :  { %3017 = vsyncpa [#allocation3], 1 }
 0x2ac   :  { %3018 = vsyncpa [#allocation5], 1 }

// kernel: bnn_fmnist_forward.6
= control target key start
LH: loop header
LB: loop body
LE: loop exit
PB: predicated region body
PF: predicated region fallthrough
CT: control target
= control target key end

     0   :  { %s2241_s15 = smov 0   ;;  %s2243_s16 = smov 0   ;;  %s3039_s0 = inlined_call_operand.vmem [shape: bf16[2,3136], index: 0, kind: input, shape index: {}]   ;;  %s3040_s1 = inlined_call_operand.vmem [shape: s8[3136,2048], index: 1, kind: input, shape index: {}]   ;;  %s3041_s2 = inlined_call_operand.vmem [shape: f32[1,2048], index: 2, kind: input, shape index: {}]   ;;  %s3042_s3 = inlined_call_operand.vmem [shape: f32[1,2048], index: 3, kind: input, shape index: {}]   ;;  %s3043_s4 = inlined_call_operand.vmem [shape: bf16[2,2048], index: 4, kind: output, shape index: {}]  }
   0x1   :  { %s2245_s17 = smov 0  }
   0x2 LB: > { %s2092_s18 = sadd.s32 4294967295, %s2211_s17   ;;  %s2258_s19 = sadd.s32 1, %s2211_s17   ;;  %s2211_s17 = sphi %s2245_s17, %s3046_s17   ;;  %s2207_s16 = sphi %s2243_s16, %s3045_s16   ;;  %s2203_s15 = sphi %s2241_s15, %s3044_s15  }
   0x3   : > { %s39_s20 = ssub.s32 %s2211_s17, %s2258_s19  ;;  %s42_s21 = sadd.s32 1, %s2207_s16 }
   0x4   : > { %p40_p0 = scmp.eq.s32.totalorder %s39_s20, 0  ;;  %p49_p1 = scmp.ne.s32.totalorder %s2207_s16, %s2203_s15 }
   0x5   : > { %p50_p2 = scmp.eq.s32.totalorder %s2211_s17, 0  ;;  %p2095_p4 = scmp.ge.s32.totalorder %s2211_s17, 8 }
   0x6   : > { %s2267_s22 = scalar_select %p40_p0, %s2207_s16, %s42_s21  }
   0x7   : > { %p51_p3 = por %p50_p2, %p49_p1  ;;  %156 = sbr.rel (%p2095_p4) target bundleno = 116 (0x74), region = 20 }
   0xe   : > { %159 = sbr.rel (!%p51_p3) target bundleno = 116 (0x74), region = 24  ;;  %s161_s23 = sand.u32 (%p51_p3), 1, %s2207_s16  }
   0xf   : > { %s2108_s24 = sshll.u32 (%p51_p3), %s2211_s17, 4  ;;  %s2155_s25 = smul.u32 (%p51_p3), 1568, %s161_s23 }
  0x10   : > { %s2275_s28 = scalar_lea.vmem (%p51_p3), %s3040_s1, %s2108_s24 }
  0x11   : > { %v179_v0 = vld [vmem:[%s2275_s28] sm:$0xff] (%p51_p3)  ;;  %v181_v1 = vld [vmem:[%s2275_s28 + $0x8] sm:$0xff] (%p51_p3)  ;;  %s2283_s29 = scalar_lea.vmem (%p51_p3), [#allocation2], %s2155_s25 }
  0x12   : > { %v183_v2 = vld [vmem:[%s2275_s28 + $0x80] sm:$0xff] (%p51_p3)  ;;  %v185_v3 = vld [vmem:[%s2275_s28 + $0x88] sm:$0xff] (%p51_p3)  ;;  %180 = vst [vmem:[%s2283_s29] sm:$0xff] (%p51_p3), %v179_v0  ;;  %182 = vst [vmem:[%s2283_s29 + $0x8] sm:$0xff] (%p51_p3), %v181_v1 }
  0x13   : > { %v187_v4 = vld [vmem:[%s2275_s28 + $0x100] sm:$0xff] (%p51_p3)  ;;  %v189_v5 = vld [vmem:[%s2275_s28 + $0x108] sm:$0xff] (%p51_p3)  ;;  %184 = vst [vmem:[%s2283_s29 + $0x10] sm:$0xff] (%p51_p3), %v183_v2  ;;  %186 = vst [vmem:[%s2283_s29 + $0x18] sm:$0xff] (%p51_p3), %v185_v3 }
  0x14   : > { %188 = vst [vmem:[%s2283_s29 + $0x20] sm:$0xff] (%p51_p3), %v187_v4  ;;  %190 = vst [vmem:[%s2283_s29 + $0x28] sm:$0xff] (%p51_p3), %v189_v5  ;;  %v191_v6 = vld [vmem:[%s2275_s28 + $0x180] sm:$0xff] (%p51_p3)  ;;  %v193_v7 = vld [vmem:[%s2275_s28 + $0x188] sm:$0xff] (%p51_p3) }
  0x15   : > { %v195_v8 = vld [vmem:[%s2275_s28 + $0x200] sm:$0xff]  ;;  %192 = vst [vmem:[%s2283_s29 + $0x30] sm:$0xff] %v191_v6  ;;  %194 = vst [vmem:[%s2283_s29 + $0x38] sm:$0xff] %v193_v7  ;;  %v197_v9 = vld [vmem:[%s2275_s28 + $0x208] sm:$0xff] }
  0x16   : > { %196 = vst [vmem:[%s2283_s29 + $0x40] sm:$0xff] %v195_v8  ;;  %v199_v10 = vld [vmem:[%s2275_s28 + $0x280] sm:$0xff]  ;;  %v201_v11 = vld [vmem:[%s2275_s28 + $0x288] sm:$0xff]  ;;  %198 = vst [vmem:[%s2283_s29 + $0x48] sm:$0xff] %v197_v9 }
  0x17   : > { %200 = vst [vmem:[%s2283_s29 + $0x50] sm:$0xff] %v199_v10  ;;  %202 = vst [vmem:[%s2283_s29 + $0x58] sm:$0xff] %v201_v11  ;;  %v203_v12 = vld [vmem:[%s2275_s28 + $0x300] sm:$0xff]  ;;  %v205_v13 = vld [vmem:[%s2275_s28 + $0x308] sm:$0xff] }
  0x18   : > { %v207_v14 = vld [vmem:[%s2275_s28 + $0x380] sm:$0xff]  ;;  %204 = vst [vmem:[%s2283_s29 + $0x60] sm:$0xff] %v203_v12  ;;  %206 = vst [vmem:[%s2283_s29 + $0x68] sm:$0xff] %v205_v13  ;;  %v209_v15 = vld [vmem:[%s2275_s28 + $0x388] sm:$0xff] }
  0x19   : > { %208 = vst [vmem:[%s2283_s29 + $0x70] sm:$0xff] %v207_v14  ;;  %v211_v16 = vld [vmem:[%s2275_s28 + $0x400] sm:$0xff]  ;;  %v213_v17 = vld [vmem:[%s2275_s28 + $0x408] sm:$0xff]  ;;  %210 = vst [vmem:[%s2283_s29 + $0x78] sm:$0xff] %v209_v15 }
  0x1a   : > { %212 = vst [vmem:[%s2283_s29 + $0x80] sm:$0xff] %v211_v16  ;;  %214 = vst [vmem:[%s2283_s29 + $0x88] sm:$0xff] %v213_v17  ;;  %v215_v18 = vld [vmem:[%s2275_s28 + $0x480] sm:$0xff]  ;;  %v217_v19 = vld [vmem:[%s2275_s28 + $0x488] sm:$0xff] }
  0x1b   : > { %v219_v20 = vld [vmem:[%s2275_s28 + $0x500] sm:$0xff]  ;;  %216 = vst [vmem:[%s2283_s29 + $0x90] sm:$0xff] %v215_v18  ;;  %218 = vst [vmem:[%s2283_s29 + $0x98] sm:$0xff] %v217_v19  ;;  %v221_v21 = vld [vmem:[%s2275_s28 + $0x508] sm:$0xff] }
  0x1c   : > { %220 = vst [vmem:[%s2283_s29 + $0xa0] sm:$0xff] %v219_v20  ;;  %v223_v22 = vld [vmem:[%s2275_s28 + $0x580] sm:$0xff]  ;;  %v225_v23 = vld [vmem:[%s2275_s28 + $0x588] sm:$0xff]  ;;  %222 = vst [vmem:[%s2283_s29 + $0xa8] sm:$0xff] %v221_v21 }
  0x1d   : > { %224 = vst [vmem:[%s2283_s29 + $0xb0] sm:$0xff] %v223_v22  ;;  %226 = vst [vmem:[%s2283_s29 + $0xb8] sm:$0xff] %v225_v23  ;;  %v227_v24 = vld [vmem:[%s2275_s28 + $0x600] sm:$0xff]  ;;  %v229_v25 = vld [vmem:[%s2275_s28 + $0x608] sm:$0xff] }
  0x1e   : > { %v231_v26 = vld [vmem:[%s2275_s28 + $0x680] sm:$0xff]  ;;  %228 = vst [vmem:[%s2283_s29 + $0xc0] sm:$0xff] %v227_v24  ;;  %230 = vst [vmem:[%s2283_s29 + $0xc8] sm:$0xff] %v229_v25  ;;  %v233_v27 = vld [vmem:[%s2275_s28 + $0x688] sm:$0xff] }
  0x1f   : > { %232 = vst [vmem:[%s2283_s29 + $0xd0] sm:$0xff] %v231_v26  ;;  %v235_v28 = vld [vmem:[%s2275_s28 + $0x700] sm:$0xff]  ;;  %v237_v29 = vld [vmem:[%s2275_s28 + $0x708] sm:$0xff]  ;;  %234 = vst [vmem:[%s2283_s29 + $0xd8] sm:$0xff] %v233_v27 }
  0x20   : > { %236 = vst [vmem:[%s2283_s29 + $0xe0] sm:$0xff] %v235_v28  ;;  %238 = vst [vmem:[%s2283_s29 + $0xe8] sm:$0xff] %v237_v29  ;;  %v239_v30 = vld [vmem:[%s2275_s28 + $0x780] sm:$0xff]  ;;  %v241_v31 = vld [vmem:[%s2275_s28 + $0x788] sm:$0xff] }
  0x21   : > { %v243_v32 = vld [vmem:[%s2275_s28 + $0x800] sm:$0xff]  ;;  %240 = vst [vmem:[%s2283_s29 + $0xf0] sm:$0xff] %v239_v30  ;;  %242 = vst [vmem:[%s2283_s29 + $0xf8] sm:$0xff] %v241_v31  ;;  %v245_v33 = vld [vmem:[%s2275_s28 + $0x808] sm:$0xff] }
  0x22   : > { %244 = vst [vmem:[%s2283_s29 + $0x100] sm:$0xff] %v243_v32  ;;  %v247_v34 = vld [vmem:[%s2275_s28 + $0x880] sm:$0xff]  ;;  %v249_v35 = vld [vmem:[%s2275_s28 + $0x888] sm:$0xff]  ;;  %246 = vst [vmem:[%s2283_s29 + $0x108] sm:$0xff] %v245_v33 }
  0x23   : > { %248 = vst [vmem:[%s2283_s29 + $0x110] sm:$0xff] %v247_v34  ;;  %250 = vst [vmem:[%s2283_s29 + $0x118] sm:$0xff] %v249_v35  ;;  %v251_v36 = vld [vmem:[%s2275_s28 + $0x900] sm:$0xff]  ;;  %v253_v37 = vld [vmem:[%s2275_s28 + $0x908] sm:$0xff] }
  0x24   : > { %v255_v38 = vld [vmem:[%s2275_s28 + $0x980] sm:$0xff]  ;;  %252 = vst [vmem:[%s2283_s29 + $0x120] sm:$0xff] %v251_v36  ;;  %254 = vst [vmem:[%s2283_s29 + $0x128] sm:$0xff] %v253_v37  ;;  %v257_v39 = vld [vmem:[%s2275_s28 + $0x988] sm:$0xff] }
  0x25   : > { %256 = vst [vmem:[%s2283_s29 + $0x130] sm:$0xff] %v255_v38  ;;  %v259_v40 = vld [vmem:[%s2275_s28 + $0xa00] sm:$0xff]  ;;  %v261_v41 = vld [vmem:[%s2275_s28 + $0xa08] sm:$0xff]  ;;  %258 = vst [vmem:[%s2283_s29 + $0x138] sm:$0xff] %v257_v39 }
  0x26   : > { %260 = vst [vmem:[%s2283_s29 + $0x140] sm:$0xff] %v259_v40  ;;  %262 = vst [vmem:[%s2283_s29 + $0x148] sm:$0xff] %v261_v41  ;;  %v263_v42 = vld [vmem:[%s2275_s28 + $0xa80] sm:$0xff]  ;;  %v265_v43 = vld [vmem:[%s2275_s28 + $0xa88] sm:$0xff] }
  0x27   : > { %v267_v44 = vld [vmem:[%s2275_s28 + $0xb00] sm:$0xff]  ;;  %264 = vst [vmem:[%s2283_s29 + $0x150] sm:$0xff] %v263_v42  ;;  %266 = vst [vmem:[%s2283_s29 + $0x158] sm:$0xff] %v265_v43  ;;  %v269_v45 = vld [vmem:[%s2275_s28 + $0xb08] sm:$0xff] }
  0x28   : > { %268 = vst [vmem:[%s2283_s29 + $0x160] sm:$0xff] %v267_v44  ;;  %v271_v46 = vld [vmem:[%s2275_s28 + $0xb80] sm:$0xff]  ;;  %v273_v47 = vld [vmem:[%s2275_s28 + $0xb88] sm:$0xff]  ;;  %270 = vst [vmem:[%s2283_s29 + $0x168] sm:$0xff] %v269_v45 }
  0x29   : > { %272 = vst [vmem:[%s2283_s29 + $0x170] sm:$0xff] %v271_v46  ;;  %274 = vst [vmem:[%s2283_s29 + $0x178] sm:$0xff] %v273_v47  ;;  %v275_v48 = vld [vmem:[%s2275_s28 + $0xc00] sm:$0xff]  ;;  %v277_v49 = vld [vmem:[%s2275_s28 + $0xc08] sm:$0xff] }
  0x2a   : > { %v279_v50 = vld [vmem:[%s2275_s28 + $0xc80] sm:$0xff]  ;;  %276 = vst [vmem:[%s2283_s29 + $0x180] sm:$0xff] %v275_v48  ;;  %278 = vst [vmem:[%s2283_s29 + $0x188] sm:$0xff] %v277_v49  ;;  %v281_v51 = vld [vmem:[%s2275_s28 + $0xc88] sm:$0xff] }
  0x2b   : > { %280 = vst [vmem:[%s2283_s29 + $0x190] sm:$0xff] %v279_v50  ;;  %v283_v52 = vld [vmem:[%s2275_s28 + $0xd00] sm:$0xff]  ;;  %v285_v53 = vld [vmem:[%s2275_s28 + $0xd08] sm:$0xff]  ;;  %282 = vst [vmem:[%s2283_s29 + $0x198] sm:$0xff] %v281_v51 }
  0x2c   : > { %284 = vst [vmem:[%s2283_s29 + $0x1a0] sm:$0xff] %v283_v52  ;;  %286 = vst [vmem:[%s2283_s29 + $0x1a8] sm:$0xff] %v285_v53  ;;  %v287_v54 = vld [vmem:[%s2275_s28 + $0xd80] sm:$0xff]  ;;  %v289_v55 = vld [vmem:[%s2275_s28 + $0xd88] sm:$0xff] }
  0x2d   : > { %v291_v56 = vld [vmem:[%s2275_s28 + $0xe00] sm:$0xff]  ;;  %288 = vst [vmem:[%s2283_s29 + $0x1b0] sm:$0xff] %v287_v54  ;;  %290 = vst [vmem:[%s2283_s29 + $0x1b8] sm:$0xff] %v289_v55  ;;  %v293_v57 = vld [vmem:[%s2275_s28 + $0xe08] sm:$0xff] }
  0x2e   : > { %292 = vst [vmem:[%s2283_s29 + $0x1c0] sm:$0xff] %v291_v56  ;;  %v295_v58 = vld [vmem:[%s2275_s28 + $0xe80] sm:$0xff]  ;;  %v297_v59 = vld [vmem:[%s2275_s28 + $0xe88] sm:$0xff]  ;;  %294 = vst [vmem:[%s2283_s29 + $0x1c8] sm:$0xff] %v293_v57 }
  0x2f   : > { %296 = vst [vmem:[%s2283_s29 + $0x1d0] sm:$0xff] %v295_v58  ;;  %298 = vst [vmem:[%s2283_s29 + $0x1d8] sm:$0xff] %v297_v59  ;;  %v299_v60 = vld [vmem:[%s2275_s28 + $0xf00] sm:$0xff]  ;;  %v301_v61 = vld [vmem:[%s2275_s28 + $0xf08] sm:$0xff] }
  0x30   : > { %v303_v62 = vld [vmem:[%s2275_s28 + $0xf80] sm:$0xff]  ;;  %300 = vst [vmem:[%s2283_s29 + $0x1e0] sm:$0xff] %v299_v60  ;;  %302 = vst [vmem:[%s2283_s29 + $0x1e8] sm:$0xff] %v301_v61  ;;  %v305_v63 = vld [vmem:[%s2275_s28 + $0xf88] sm:$0xff] }
  0x31   : > { %304 = vst [vmem:[%s2283_s29 + $0x1f0] sm:$0xff] %v303_v62  ;;  %v307_v0 = vld [vmem:[%s2275_s28 + $0x1000] sm:$0xff]  ;;  %v309_v1 = vld [vmem:[%s2275_s28 + $0x1008] sm:$0xff]  ;;  %306 = vst [vmem:[%s2283_s29 + $0x1f8] sm:$0xff] %v305_v63 }
  0x32   : > { %308 = vst [vmem:[%s2283_s29 + $0x200] sm:$0xff] %v307_v0  ;;  %310 = vst [vmem:[%s2283_s29 + $0x208] sm:$0xff] %v309_v1  ;;  %v311_v2 = vld [vmem:[%s2275_s28 + $0x1080] sm:$0xff]  ;;  %v313_v3 = vld [vmem:[%s2275_s28 + $0x1088] sm:$0xff] }
  0x33   : > { %v315_v4 = vld [vmem:[%s2275_s28 + $0x1100] sm:$0xff]  ;;  %312 = vst [vmem:[%s2283_s29 + $0x210] sm:$0xff] %v311_v2  ;;  %314 = vst [vmem:[%s2283_s29 + $0x218] sm:$0xff] %v313_v3  ;;  %v317_v5 = vld [vmem:[%s2275_s28 + $0x1108] sm:$0xff] }
  0x34   : > { %316 = vst [vmem:[%s2283_s29 + $0x220] sm:$0xff] %v315_v4  ;;  %v319_v6 = vld [vmem:[%s2275_s28 + $0x1180] sm:$0xff]  ;;  %v321_v7 = vld [vmem:[%s2275_s28 + $0x1188] sm:$0xff]  ;;  %318 = vst [vmem:[%s2283_s29 + $0x228] sm:$0xff] %v317_v5 }
  0x35   : > { %320 = vst [vmem:[%s2283_s29 + $0x230] sm:$0xff] %v319_v6  ;;  %322 = vst [vmem:[%s2283_s29 + $0x238] sm:$0xff] %v321_v7  ;;  %v323_v8 = vld [vmem:[%s2275_s28 + $0x1200] sm:$0xff]  ;;  %v325_v9 = vld [vmem:[%s2275_s28 + $0x1208] sm:$0xff] }
  0x36   : > { %v327_v10 = vld [vmem:[%s2275_s28 + $0x1280] sm:$0xff]  ;;  %324 = vst [vmem:[%s2283_s29 + $0x240] sm:$0xff] %v323_v8  ;;  %326 = vst [vmem:[%s2283_s29 + $0x248] sm:$0xff] %v325_v9  ;;  %v329_v11 = vld [vmem:[%s2275_s28 + $0x1288] sm:$0xff] }
  0x37   : > { %328 = vst [vmem:[%s2283_s29 + $0x250] sm:$0xff] %v327_v10  ;;  %v331_v12 = vld [vmem:[%s2275_s28 + $0x1300] sm:$0xff]  ;;  %v333_v13 = vld [vmem:[%s2275_s28 + $0x1308] sm:$0xff]  ;;  %330 = vst [vmem:[%s2283_s29 + $0x258] sm:$0xff] %v329_v11 }
  0x38   : > { %332 = vst [vmem:[%s2283_s29 + $0x260] sm:$0xff] %v331_v12  ;;  %334 = vst [vmem:[%s2283_s29 + $0x268] sm:$0xff] %v333_v13  ;;  %v335_v14 = vld [vmem:[%s2275_s28 + $0x1380] sm:$0xff]  ;;  %v337_v15 = vld [vmem:[%s2275_s28 + $0x1388] sm:$0xff] }
  0x39   : > { %v339_v16 = vld [vmem:[%s2275_s28 + $0x1400] sm:$0xff]  ;;  %336 = vst [vmem:[%s2283_s29 + $0x270] sm:$0xff] %v335_v14  ;;  %338 = vst [vmem:[%s2283_s29 + $0x278] sm:$0xff] %v337_v15  ;;  %v341_v17 = vld [vmem:[%s2275_s28 + $0x1408] sm:$0xff] }
  0x3a   : > { %340 = vst [vmem:[%s2283_s29 + $0x280] sm:$0xff] %v339_v16  ;;  %v343_v18 = vld [vmem:[%s2275_s28 + $0x1480] sm:$0xff]  ;;  %v345_v19 = vld [vmem:[%s2275_s28 + $0x1488] sm:$0xff]  ;;  %342 = vst [vmem:[%s2283_s29 + $0x288] sm:$0xff] %v341_v17 }
  0x3b   : > { %344 = vst [vmem:[%s2283_s29 + $0x290] sm:$0xff] %v343_v18  ;;  %346 = vst [vmem:[%s2283_s29 + $0x298] sm:$0xff] %v345_v19  ;;  %v347_v20 = vld [vmem:[%s2275_s28 + $0x1500] sm:$0xff]  ;;  %v349_v21 = vld [vmem:[%s2275_s28 + $0x1508] sm:$0xff] }
  0x3c   : > { %v351_v22 = vld [vmem:[%s2275_s28 + $0x1580] sm:$0xff]  ;;  %348 = vst [vmem:[%s2283_s29 + $0x2a0] sm:$0xff] %v347_v20  ;;  %350 = vst [vmem:[%s2283_s29 + $0x2a8] sm:$0xff] %v349_v21  ;;  %v353_v23 = vld [vmem:[%s2275_s28 + $0x1588] sm:$0xff] }
  0x3d   : > { %352 = vst [vmem:[%s2283_s29 + $0x2b0] sm:$0xff] %v351_v22  ;;  %v355_v24 = vld [vmem:[%s2275_s28 + $0x1600] sm:$0xff]  ;;  %v357_v25 = vld [vmem:[%s2275_s28 + $0x1608] sm:$0xff]  ;;  %354 = vst [vmem:[%s2283_s29 + $0x2b8] sm:$0xff] %v353_v23 }
  0x3e   : > { %356 = vst [vmem:[%s2283_s29 + $0x2c0] sm:$0xff] %v355_v24  ;;  %358 = vst [vmem:[%s2283_s29 + $0x2c8] sm:$0xff] %v357_v25  ;;  %v359_v26 = vld [vmem:[%s2275_s28 + $0x1680] sm:$0xff]  ;;  %v361_v27 = vld [vmem:[%s2275_s28 + $0x1688] sm:$0xff] }
  0x3f   : > { %v363_v28 = vld [vmem:[%s2275_s28 + $0x1700] sm:$0xff]  ;;  %360 = vst [vmem:[%s2283_s29 + $0x2d0] sm:$0xff] %v359_v26  ;;  %362 = vst [vmem:[%s2283_s29 + $0x2d8] sm:$0xff] %v361_v27  ;;  %v365_v29 = vld [vmem:[%s2275_s28 + $0x1708] sm:$0xff] }
  0x40   : > { %364 = vst [vmem:[%s2283_s29 + $0x2e0] sm:$0xff] %v363_v28  ;;  %v367_v30 = vld [vmem:[%s2275_s28 + $0x1780] sm:$0xff]  ;;  %v369_v31 = vld [vmem:[%s2275_s28 + $0x1788] sm:$0xff]  ;;  %366 = vst [vmem:[%s2283_s29 + $0x2e8] sm:$0xff] %v365_v29 }
  0x41   : > { %368 = vst [vmem:[%s2283_s29 + $0x2f0] sm:$0xff] %v367_v30  ;;  %370 = vst [vmem:[%s2283_s29 + $0x2f8] sm:$0xff] %v369_v31  ;;  %v371_v32 = vld [vmem:[%s2275_s28 + $0x1800] sm:$0xff]  ;;  %v373_v33 = vld [vmem:[%s2275_s28 + $0x1808] sm:$0xff] }
  0x42   : > { %v375_v34 = vld [vmem:[%s2275_s28 + $0x1880] sm:$0xff]  ;;  %372 = vst [vmem:[%s2283_s29 + $0x300] sm:$0xff] %v371_v32  ;;  %374 = vst [vmem:[%s2283_s29 + $0x308] sm:$0xff] %v373_v33  ;;  %v377_v35 = vld [vmem:[%s2275_s28 + $0x1888] sm:$0xff] }
  0x43   : > { %376 = vst [vmem:[%s2283_s29 + $0x310] sm:$0xff] %v375_v34  ;;  %v379_v36 = vld [vmem:[%s2275_s28 + $0x1900] sm:$0xff]  ;;  %v381_v37 = vld [vmem:[%s2275_s28 + $0x1908] sm:$0xff]  ;;  %378 = vst [vmem:[%s2283_s29 + $0x318] sm:$0xff] %v377_v35 }
  0x44   : > { %380 = vst [vmem:[%s2283_s29 + $0x320] sm:$0xff] %v379_v36  ;;  %382 = vst [vmem:[%s2283_s29 + $0x328] sm:$0xff] %v381_v37  ;;  %v383_v38 = vld [vmem:[%s2275_s28 + $0x1980] sm:$0xff]  ;;  %v385_v39 = vld [vmem:[%s2275_s28 + $0x1988] sm:$0xff] }
  0x45   : > { %v387_v40 = vld [vmem:[%s2275_s28 + $0x1a00] sm:$0xff]  ;;  %384 = vst [vmem:[%s2283_s29 + $0x330] sm:$0xff] %v383_v38  ;;  %386 = vst [vmem:[%s2283_s29 + $0x338] sm:$0xff] %v385_v39  ;;  %v389_v41 = vld [vmem:[%s2275_s28 + $0x1a08] sm:$0xff] }
  0x46   : > { %388 = vst [vmem:[%s2283_s29 + $0x340] sm:$0xff] %v387_v40  ;;  %v391_v42 = vld [vmem:[%s2275_s28 + $0x1a80] sm:$0xff]  ;;  %v393_v43 = vld [vmem:[%s2275_s28 + $0x1a88] sm:$0xff]  ;;  %390 = vst [vmem:[%s2283_s29 + $0x348] sm:$0xff] %v389_v41 }
  0x47   : > { %392 = vst [vmem:[%s2283_s29 + $0x350] sm:$0xff] %v391_v42  ;;  %394 = vst [vmem:[%s2283_s29 + $0x358] sm:$0xff] %v393_v43  ;;  %v395_v44 = vld [vmem:[%s2275_s28 + $0x1b00] sm:$0xff]  ;;  %v397_v45 = vld [vmem:[%s2275_s28 + $0x1b08] sm:$0xff] }
  0x48   : > { %v399_v46 = vld [vmem:[%s2275_s28 + $0x1b80] sm:$0xff]  ;;  %396 = vst [vmem:[%s2283_s29 + $0x360] sm:$0xff] %v395_v44  ;;  %398 = vst [vmem:[%s2283_s29 + $0x368] sm:$0xff] %v397_v45  ;;  %v401_v47 = vld [vmem:[%s2275_s28 + $0x1b88] sm:$0xff] }
  0x49   : > { %400 = vst [vmem:[%s2283_s29 + $0x370] sm:$0xff] %v399_v46  ;;  %v403_v48 = vld [vmem:[%s2275_s28 + $0x1c00] sm:$0xff]  ;;  %v405_v49 = vld [vmem:[%s2275_s28 + $0x1c08] sm:$0xff]  ;;  %402 = vst [vmem:[%s2283_s29 + $0x378] sm:$0xff] %v401_v47 }
  0x4a   : > { %404 = vst [vmem:[%s2283_s29 + $0x380] sm:$0xff] %v403_v48  ;;  %406 = vst [vmem:[%s2283_s29 + $0x388] sm:$0xff] %v405_v49  ;;  %v407_v50 = vld [vmem:[%s2275_s28 + $0x1c80] sm:$0xff]  ;;  %v409_v51 = vld [vmem:[%s2275_s28 + $0x1c88] sm:$0xff] }
  0x4b   : > { %v411_v52 = vld [vmem:[%s2275_s28 + $0x1d00] sm:$0xff]  ;;  %408 = vst [vmem:[%s2283_s29 + $0x390] sm:$0xff] %v407_v50  ;;  %410 = vst [vmem:[%s2283_s29 + $0x398] sm:$0xff] %v409_v51  ;;  %v413_v53 = vld [vmem:[%s2275_s28 + $0x1d08] sm:$0xff] }
  0x4c   : > { %412 = vst [vmem:[%s2283_s29 + $0x3a0] sm:$0xff] %v411_v52  ;;  %v415_v54 = vld [vmem:[%s2275_s28 + $0x1d80] sm:$0xff]  ;;  %v417_v55 = vld [vmem:[%s2275_s28 + $0x1d88] sm:$0xff]  ;;  %414 = vst [vmem:[%s2283_s29 + $0x3a8] sm:$0xff] %v413_v53 }
  0x4d   : > { %416 = vst [vmem:[%s2283_s29 + $0x3b0] sm:$0xff] %v415_v54  ;;  %418 = vst [vmem:[%s2283_s29 + $0x3b8] sm:$0xff] %v417_v55  ;;  %v419_v56 = vld [vmem:[%s2275_s28 + $0x1e00] sm:$0xff]  ;;  %v421_v57 = vld [vmem:[%s2275_s28 + $0x1e08] sm:$0xff] }
  0x4e   : > { %v423_v58 = vld [vmem:[%s2275_s28 + $0x1e80] sm:$0xff]  ;;  %420 = vst [vmem:[%s2283_s29 + $0x3c0] sm:$0xff] %v419_v56  ;;  %422 = vst [vmem:[%s2283_s29 + $0x3c8] sm:$0xff] %v421_v57  ;;  %v425_v59 = vld [vmem:[%s2275_s28 + $0x1e88] sm:$0xff] }
  0x4f   : > { %424 = vst [vmem:[%s2283_s29 + $0x3d0] sm:$0xff] %v423_v58  ;;  %v427_v60 = vld [vmem:[%s2275_s28 + $0x1f00] sm:$0xff]  ;;  %v429_v61 = vld [vmem:[%s2275_s28 + $0x1f08] sm:$0xff]  ;;  %426 = vst [vmem:[%s2283_s29 + $0x3d8] sm:$0xff] %v425_v59 }
  0x50   : > { %428 = vst [vmem:[%s2283_s29 + $0x3e0] sm:$0xff] %v427_v60  ;;  %430 = vst [vmem:[%s2283_s29 + $0x3e8] sm:$0xff] %v429_v61  ;;  %v431_v62 = vld [vmem:[%s2275_s28 + $0x1f80] sm:$0xff]  ;;  %v433_v63 = vld [vmem:[%s2275_s28 + $0x1f88] sm:$0xff] }
  0x51   : > { %v435_v0 = vld [vmem:[%s2275_s28 + $0x2000] sm:$0xff]  ;;  %432 = vst [vmem:[%s2283_s29 + $0x3f0] sm:$0xff] %v431_v62  ;;  %434 = vst [vmem:[%s2283_s29 + $0x3f8] sm:$0xff] %v433_v63  ;;  %v437_v1 = vld [vmem:[%s2275_s28 + $0x2008] sm:$0xff] }
  0x52   : > { %436 = vst [vmem:[%s2283_s29 + $0x400] sm:$0xff] %v435_v0  ;;  %v439_v2 = vld [vmem:[%s2275_s28 + $0x2080] sm:$0xff]  ;;  %v441_v3 = vld [vmem:[%s2275_s28 + $0x2088] sm:$0xff]  ;;  %438 = vst [vmem:[%s2283_s29 + $0x408] sm:$0xff] %v437_v1 }
  0x53   : > { %440 = vst [vmem:[%s2283_s29 + $0x410] sm:$0xff] %v439_v2  ;;  %442 = vst [vmem:[%s2283_s29 + $0x418] sm:$0xff] %v441_v3  ;;  %v443_v4 = vld [vmem:[%s2275_s28 + $0x2100] sm:$0xff]  ;;  %v445_v5 = vld [vmem:[%s2275_s28 + $0x2108] sm:$0xff] }
  0x54   : > { %v447_v6 = vld [vmem:[%s2275_s28 + $0x2180] sm:$0xff]  ;;  %444 = vst [vmem:[%s2283_s29 + $0x420] sm:$0xff] %v443_v4  ;;  %446 = vst [vmem:[%s2283_s29 + $0x428] sm:$0xff] %v445_v5  ;;  %v449_v7 = vld [vmem:[%s2275_s28 + $0x2188] sm:$0xff] }
  0x55   : > { %448 = vst [vmem:[%s2283_s29 + $0x430] sm:$0xff] %v447_v6  ;;  %v451_v8 = vld [vmem:[%s2275_s28 + $0x2200] sm:$0xff]  ;;  %v453_v9 = vld [vmem:[%s2275_s28 + $0x2208] sm:$0xff]  ;;  %450 = vst [vmem:[%s2283_s29 + $0x438] sm:$0xff] %v449_v7 }
  0x56   : > { %452 = vst [vmem:[%s2283_s29 + $0x440] sm:$0xff] %v451_v8  ;;  %454 = vst [vmem:[%s2283_s29 + $0x448] sm:$0xff] %v453_v9  ;;  %v455_v10 = vld [vmem:[%s2275_s28 + $0x2280] sm:$0xff]  ;;  %v457_v11 = vld [vmem:[%s2275_s28 + $0x2288] sm:$0xff] }
  0x57   : > { %v459_v12 = vld [vmem:[%s2275_s28 + $0x2300] sm:$0xff]  ;;  %456 = vst [vmem:[%s2283_s29 + $0x450] sm:$0xff] %v455_v10  ;;  %458 = vst [vmem:[%s2283_s29 + $0x458] sm:$0xff] %v457_v11  ;;  %v461_v13 = vld [vmem:[%s2275_s28 + $0x2308] sm:$0xff] }
  0x58   : > { %460 = vst [vmem:[%s2283_s29 + $0x460] sm:$0xff] %v459_v12  ;;  %v463_v14 = vld [vmem:[%s2275_s28 + $0x2380] sm:$0xff]  ;;  %v465_v15 = vld [vmem:[%s2275_s28 + $0x2388] sm:$0xff]  ;;  %462 = vst [vmem:[%s2283_s29 + $0x468] sm:$0xff] %v461_v13 }
  0x59   : > { %464 = vst [vmem:[%s2283_s29 + $0x470] sm:$0xff] %v463_v14  ;;  %466 = vst [vmem:[%s2283_s29 + $0x478] sm:$0xff] %v465_v15  ;;  %v467_v16 = vld [vmem:[%s2275_s28 + $0x2400] sm:$0xff]  ;;  %v469_v17 = vld [vmem:[%s2275_s28 + $0x2408] sm:$0xff] }
  0x5a   : > { %v471_v18 = vld [vmem:[%s2275_s28 + $0x2480] sm:$0xff]  ;;  %468 = vst [vmem:[%s2283_s29 + $0x480] sm:$0xff] %v467_v16  ;;  %470 = vst [vmem:[%s2283_s29 + $0x488] sm:$0xff] %v469_v17  ;;  %v473_v19 = vld [vmem:[%s2275_s28 + $0x2488] sm:$0xff] }
  0x5b   : > { %472 = vst [vmem:[%s2283_s29 + $0x490] sm:$0xff] %v471_v18  ;;  %v475_v20 = vld [vmem:[%s2275_s28 + $0x2500] sm:$0xff]  ;;  %v477_v21 = vld [vmem:[%s2275_s28 + $0x2508] sm:$0xff]  ;;  %474 = vst [vmem:[%s2283_s29 + $0x498] sm:$0xff] %v473_v19 }
  0x5c   : > { %476 = vst [vmem:[%s2283_s29 + $0x4a0] sm:$0xff] %v475_v20  ;;  %478 = vst [vmem:[%s2283_s29 + $0x4a8] sm:$0xff] %v477_v21  ;;  %v479_v22 = vld [vmem:[%s2275_s28 + $0x2580] sm:$0xff]  ;;  %v481_v23 = vld [vmem:[%s2275_s28 + $0x2588] sm:$0xff] }
  0x5d   : > { %v483_v24 = vld [vmem:[%s2275_s28 + $0x2600] sm:$0xff]  ;;  %480 = vst [vmem:[%s2283_s29 + $0x4b0] sm:$0xff] %v479_v22  ;;  %482 = vst [vmem:[%s2283_s29 + $0x4b8] sm:$0xff] %v481_v23  ;;  %v485_v25 = vld [vmem:[%s2275_s28 + $0x2608] sm:$0xff] }
  0x5e   : > { %484 = vst [vmem:[%s2283_s29 + $0x4c0] sm:$0xff] %v483_v24  ;;  %v487_v26 = vld [vmem:[%s2275_s28 + $0x2680] sm:$0xff]  ;;  %v489_v27 = vld [vmem:[%s2275_s28 + $0x2688] sm:$0xff]  ;;  %486 = vst [vmem:[%s2283_s29 + $0x4c8] sm:$0xff] %v485_v25 }
  0x5f   : > { %488 = vst [vmem:[%s2283_s29 + $0x4d0] sm:$0xff] %v487_v26  ;;  %490 = vst [vmem:[%s2283_s29 + $0x4d8] sm:$0xff] %v489_v27  ;;  %v491_v28 = vld [vmem:[%s2275_s28 + $0x2700] sm:$0xff]  ;;  %v493_v29 = vld [vmem:[%s2275_s28 + $0x2708] sm:$0xff] }
  0x60   : > { %v495_v30 = vld [vmem:[%s2275_s28 + $0x2780] sm:$0xff]  ;;  %492 = vst [vmem:[%s2283_s29 + $0x4e0] sm:$0xff] %v491_v28  ;;  %494 = vst [vmem:[%s2283_s29 + $0x4e8] sm:$0xff] %v493_v29  ;;  %v497_v31 = vld [vmem:[%s2275_s28 + $0x2788] sm:$0xff] }
  0x61   : > { %496 = vst [vmem:[%s2283_s29 + $0x4f0] sm:$0xff] %v495_v30  ;;  %v499_v32 = vld [vmem:[%s2275_s28 + $0x2800] sm:$0xff]  ;;  %v501_v33 = vld [vmem:[%s2275_s28 + $0x2808] sm:$0xff]  ;;  %498 = vst [vmem:[%s2283_s29 + $0x4f8] sm:$0xff] %v497_v31 }
  0x62   : > { %500 = vst [vmem:[%s2283_s29 + $0x500] sm:$0xff] %v499_v32  ;;  %502 = vst [vmem:[%s2283_s29 + $0x508] sm:$0xff] %v501_v33  ;;  %v503_v34 = vld [vmem:[%s2275_s28 + $0x2880] sm:$0xff]  ;;  %v505_v35 = vld [vmem:[%s2275_s28 + $0x2888] sm:$0xff] }
  0x63   : > { %v507_v36 = vld [vmem:[%s2275_s28 + $0x2900] sm:$0xff]  ;;  %504 = vst [vmem:[%s2283_s29 + $0x510] sm:$0xff] %v503_v34  ;;  %506 = vst [vmem:[%s2283_s29 + $0x518] sm:$0xff] %v505_v35  ;;  %v509_v37 = vld [vmem:[%s2275_s28 + $0x2908] sm:$0xff] }
  0x64   : > { %508 = vst [vmem:[%s2283_s29 + $0x520] sm:$0xff] %v507_v36  ;;  %v511_v38 = vld [vmem:[%s2275_s28 + $0x2980] sm:$0xff]  ;;  %v513_v39 = vld [vmem:[%s2275_s28 + $0x2988] sm:$0xff]  ;;  %510 = vst [vmem:[%s2283_s29 + $0x528] sm:$0xff] %v509_v37 }
  0x65   : > { %512 = vst [vmem:[%s2283_s29 + $0x530] sm:$0xff] %v511_v38  ;;  %514 = vst [vmem:[%s2283_s29 + $0x538] sm:$0xff] %v513_v39  ;;  %v515_v40 = vld [vmem:[%s2275_s28 + $0x2a00] sm:$0xff]  ;;  %v517_v41 = vld [vmem:[%s2275_s28 + $0x2a08] sm:$0xff] }
  0x66   : > { %v519_v42 = vld [vmem:[%s2275_s28 + $0x2a80] sm:$0xff]  ;;  %516 = vst [vmem:[%s2283_s29 + $0x540] sm:$0xff] %v515_v40  ;;  %518 = vst [vmem:[%s2283_s29 + $0x548] sm:$0xff] %v517_v41  ;;  %v521_v43 = vld [vmem:[%s2275_s28 + $0x2a88] sm:$0xff] }
  0x67   : > { %520 = vst [vmem:[%s2283_s29 + $0x550] sm:$0xff] %v519_v42  ;;  %v523_v44 = vld [vmem:[%s2275_s28 + $0x2b00] sm:$0xff]  ;;  %v525_v45 = vld [vmem:[%s2275_s28 + $0x2b08] sm:$0xff]  ;;  %522 = vst [vmem:[%s2283_s29 + $0x558] sm:$0xff] %v521_v43 }
  0x68   : > { %524 = vst [vmem:[%s2283_s29 + $0x560] sm:$0xff] %v523_v44  ;;  %526 = vst [vmem:[%s2283_s29 + $0x568] sm:$0xff] %v525_v45  ;;  %v527_v46 = vld [vmem:[%s2275_s28 + $0x2b80] sm:$0xff]  ;;  %v529_v47 = vld [vmem:[%s2275_s28 + $0x2b88] sm:$0xff] }
  0x69   : > { %v531_v48 = vld [vmem:[%s2275_s28 + $0x2c00] sm:$0xff]  ;;  %528 = vst [vmem:[%s2283_s29 + $0x570] sm:$0xff] %v527_v46  ;;  %530 = vst [vmem:[%s2283_s29 + $0x578] sm:$0xff] %v529_v47  ;;  %v533_v49 = vld [vmem:[%s2275_s28 + $0x2c08] sm:$0xff] }
  0x6a   : > { %532 = vst [vmem:[%s2283_s29 + $0x580] sm:$0xff] %v531_v48  ;;  %v535_v50 = vld [vmem:[%s2275_s28 + $0x2c80] sm:$0xff]  ;;  %v537_v51 = vld [vmem:[%s2275_s28 + $0x2c88] sm:$0xff]  ;;  %534 = vst [vmem:[%s2283_s29 + $0x588] sm:$0xff] %v533_v49 }
  0x6b   : > { %536 = vst [vmem:[%s2283_s29 + $0x590] sm:$0xff] %v535_v50  ;;  %538 = vst [vmem:[%s2283_s29 + $0x598] sm:$0xff] %v537_v51  ;;  %v539_v52 = vld [vmem:[%s2275_s28 + $0x2d00] sm:$0xff]  ;;  %v541_v53 = vld [vmem:[%s2275_s28 + $0x2d08] sm:$0xff] }
  0x6c   : > { %v543_v54 = vld [vmem:[%s2275_s28 + $0x2d80] sm:$0xff]  ;;  %540 = vst [vmem:[%s2283_s29 + $0x5a0] sm:$0xff] %v539_v52  ;;  %542 = vst [vmem:[%s2283_s29 + $0x5a8] sm:$0xff] %v541_v53  ;;  %v545_v55 = vld [vmem:[%s2275_s28 + $0x2d88] sm:$0xff] }
  0x6d   : > { %544 = vst [vmem:[%s2283_s29 + $0x5b0] sm:$0xff] %v543_v54  ;;  %v547_v56 = vld [vmem:[%s2275_s28 + $0x2e00] sm:$0xff]  ;;  %v549_v57 = vld [vmem:[%s2275_s28 + $0x2e08] sm:$0xff]  ;;  %546 = vst [vmem:[%s2283_s29 + $0x5b8] sm:$0xff] %v545_v55 }
  0x6e   : > { %548 = vst [vmem:[%s2283_s29 + $0x5c0] sm:$0xff] %v547_v56  ;;  %550 = vst [vmem:[%s2283_s29 + $0x5c8] sm:$0xff] %v549_v57  ;;  %v551_v58 = vld [vmem:[%s2275_s28 + $0x2e80] sm:$0xff]  ;;  %v553_v59 = vld [vmem:[%s2275_s28 + $0x2e88] sm:$0xff] }
  0x6f   : > { %v555_v60 = vld [vmem:[%s2275_s28 + $0x2f00] sm:$0xff]  ;;  %552 = vst [vmem:[%s2283_s29 + $0x5d0] sm:$0xff] %v551_v58  ;;  %554 = vst [vmem:[%s2283_s29 + $0x5d8] sm:$0xff] %v553_v59  ;;  %v557_v61 = vld [vmem:[%s2275_s28 + $0x2f08] sm:$0xff] }
  0x70   : > { %556 = vst [vmem:[%s2283_s29 + $0x5e0] sm:$0xff] %v555_v60  ;;  %v559_v62 = vld [vmem:[%s2275_s28 + $0x2f80] sm:$0xff]  ;;  %v561_v63 = vld [vmem:[%s2275_s28 + $0x2f88] sm:$0xff]  ;;  %558 = vst [vmem:[%s2283_s29 + $0x5e8] sm:$0xff] %v557_v61 }
  0x71   : > { %560 = vst [vmem:[%s2283_s29 + $0x5f0] sm:$0xff] %v559_v62  ;;  %562 = vst [vmem:[%s2283_s29 + $0x5f8] sm:$0xff] %v561_v63  ;;  %v563_v0 = vld [vmem:[%s2275_s28 + $0x3000] sm:$0xff]  ;;  %v565_v1 = vld [vmem:[%s2275_s28 + $0x3008] sm:$0xff] }
  0x72   : > { %v567_v2 = vld [vmem:[%s2275_s28 + $0x3080] sm:$0xff]  ;;  %564 = vst [vmem:[%s2283_s29 + $0x600] sm:$0xff] %v563_v0  ;;  %566 = vst [vmem:[%s2283_s29 + $0x608] sm:$0xff] %v565_v1  ;;  %v569_v3 = vld [vmem:[%s2275_s28 + $0x3088] sm:$0xff] }
  0x73   : > { %568 = vst [vmem:[%s2283_s29 + $0x610] sm:$0xff] %v567_v2  ;;  %570 = vst [vmem:[%s2283_s29 + $0x618] sm:$0xff] %v569_v3 }
  0x74 PF: > { %p2098_p5 = scmp.ge.s32.totalorder %s2211_s17, 1  ;;  %p591_p6 = scmp.lt.s32.totalorder %s2211_s17, 9 }
  0x76   : > { %p592_p7 = pnand %p2098_p5, %p591_p6 }
  0x77   : > { %s598_s30 = sand.u32 (!%p592_p7), 1, %s2203_s15   ;;  %v2213_v26 = vmov (!%p592_p7), 1966171168   ;;  %v1247_v28 = vlaneseq (!%p592_p7)  ;;  %v1236_v33 = vld [vmem:[%s3039_s0 + $0x8] sm:$0xff] (!%p592_p7)  ;;  %v2696_v43 = vld [vmem:[%s3039_s0] sm:$0xff] (!%p592_p7)  ;;  %vm1428_vm0 = vcmask (!%p592_p7), 523264  }
  0x78   : > { %595 = sbr.rel (%p592_p7) target bundleno = 754 (0x2f2), region = 55  ;;  %v1245_v27 = vunpack.c.l.s4 (!%p592_p7), %v2213_v26  ;;  %v1292_v40 = vcombine.high (!%p592_p7), %v1236_v33, %v1236_v33  ;;  %s2099_s21 = sshll.u32 (!%p592_p7), %s2092_s18, 1 }
  0x79   : > { %s2156_s5 = smul.u32 (!%p592_p7), 1568, %s598_s30  ;;  %v2691_v39 = vshrl.u32 (!%p592_p7), %v1247_v28, 7  ;;  %p632_p8 = scmp.lt.s32.totalorder (!%p592_p7), %s2099_s21, 15 }
  0x7a   : > { %v1246_v38 = vunpack.c.0.s8 (!%p592_p7), %v1245_v27 }
  0x7b   : > { %s2674_s6 = scalar_lea.vmem (!%p592_p7), [#allocation2], %s2156_s5 }
  0x7c   : > { %v648_v4 = vld [vmem:[%s2674_s6 + $0x8] sm:$0xff] (!%p592_p7)  ;;  %v647_v6 = vld [vmem:[%s2674_s6] sm:$0xff] (!%p592_p7)  ;;  %v650_v14 = vld [vmem:[%s2674_s6 + $0x18] sm:$0xff] (!%p592_p7)  ;;  %v2699_v46 = vsub.s32 (!%p592_p7), %v1246_v38, %v2691_v39 }
  0x7d   : > { %v744_v5 = vld [vmem:[%s2674_s6 + $0x308] sm:$0xff] (!%p592_p7)  ;;  %v844_v7 = vunpack.c.l.s8.bf16 (!%p592_p7), %v648_v4  ;;  %v846_v8 = vunpack.c.h.s8.bf16 (!%p592_p7), %v648_v4  ;;  %v743_v11 = vld [vmem:[%s2674_s6 + $0x300] sm:$0xff] (!%p592_p7)  ;;  %v843_v12 = vunpack.c.l.s8.bf16 (!%p592_p7), %v647_v6  ;;  %v746_v15 = vld [vmem:[%s2674_s6 + $0x318] sm:$0xff] (!%p592_p7)  ;;  %v845_v16 = vunpack.c.h.s8.bf16 (!%p592_p7), %v647_v6 }
  0x7e   : > { %v1036_v9 = vunpack.c.l.s8.bf16 (!%p592_p7), %v744_v5  ;;  %v1038_v10 = vunpack.c.h.s8.bf16 (!%p592_p7), %v744_v5  ;;  %v1035_v13 = vunpack.c.l.s8.bf16 (!%p592_p7), %v743_v11  ;;  %v1037_v17 = vunpack.c.h.s8.bf16 (!%p592_p7), %v743_v11  ;;  %v649_v20 = vld [vmem:[%s2674_s6 + $0x10] sm:$0xff] (!%p592_p7)  ;;  %v652_v29 = vld [vmem:[%s2674_s6 + $0x28] sm:$0xff] (!%p592_p7)  ;;  %v651_v36 = vld [vmem:[%s2674_s6 + $0x20] sm:$0xff] (!%p592_p7) }
  0x7f   : > { %1432 = vmatprep.subr.bf16.mxu1 %v844_v7  ;;  %v848_v18 = vunpack.c.l.s8.bf16 %v650_v14  ;;  %v1040_v19 = vunpack.c.l.s8.bf16 %v746_v15  ;;  %v745_v21 = vld [vmem:[%s2674_s6 + $0x310] sm:$0xff]  ;;  %v847_v22 = vunpack.c.l.s8.bf16 %v649_v20  ;;  %v850_v24 = vunpack.c.h.s8.bf16 %v650_v14  ;;  %v748_v30 = vld [vmem:[%s2674_s6 + $0x328] sm:$0xff]  ;;  %v747_v37 = vld [vmem:[%s2674_s6 + $0x320] sm:$0xff]  ;;  %s3048_s21 = smov (!%p632_p8, %s2099_s21), 15 }
  0x80   : > { %1678 = vmatprep.subr.bf16.mxu0 %v1036_v9  ;;  %1433 = vmatpush1.bf16.msra.mxu1 %v843_v12  ;;  %v1039_v23 = vunpack.c.l.s8.bf16 %v745_v21  ;;  %v1042_v25 = vunpack.c.h.s8.bf16 %v746_v15  ;;  %v849_v31 = vunpack.c.h.s8.bf16 %v649_v20  ;;  %v1041_v32 = vunpack.c.h.s8.bf16 %v745_v21  ;;  %v654_v47 = vld [vmem:[%s2674_s6 + $0x38] sm:$0xff]  ;;  %v653_v55 = vld [vmem:[%s2674_s6 + $0x30] sm:$0xff]  ;;  %v656_v1 = vld [vmem:[%s2674_s6 + $0x48] sm:$0xff]  ;;  %s634_s25 = scalar_lea.vmem %s3041_s2, %s3048_s21  ;;  %s639_s28 = scalar_lea.vmem %s3042_s3, %s3048_s21 }
  0x81   : > { %1679 = vmatpush1.bf16.msra.mxu0 %v1035_v13  ;;  %1434 = vmatprep.subr.bf16.mxu1 %v846_v8  ;;  %v852_v34 = vunpack.c.l.s8.bf16 %v652_v29  ;;  %v1044_v35 = vunpack.c.l.s8.bf16 %v748_v30  ;;  %v851_v41 = vunpack.c.l.s8.bf16 %v651_v36  ;;  %v1043_v42 = vunpack.c.l.s8.bf16 %v747_v37  ;;  %v750_v48 = vld [vmem:[%s2674_s6 + $0x338] sm:$0xff]  ;;  %v749_v56 = vld [vmem:[%s2674_s6 + $0x330] sm:$0xff]  ;;  %v752_v2 = vld [vmem:[%s2674_s6 + $0x348] sm:$0xff]  ;;  %s644_s29 = scalar_lea.vmem %s3043_s4, %s3048_s21 }
  0x82   : > { %1680 = vmatprep.subr.bf16.mxu0 %v1038_v10  ;;  %v854_v44 = vunpack.c.h.s8.bf16 %v652_v29  ;;  %v1046_v45 = vunpack.c.h.s8.bf16 %v748_v30  ;;  %v2705_v49 = vrot.slane %v2696_v43, %v2699_v46  ;;  %v2708_v50 = vrot.slane %v1292_v40, %v2699_v46  ;;  %v655_v7 = vld [vmem:[%s2674_s6 + $0x40] sm:$0xff]  ;;  %v658_v13 = vld [vmem:[%s2674_s6 + $0x58] sm:$0xff]  ;;  %v753_v20 = vld [vmem:[%s2674_s6 + $0x350] sm:$0xff] }
  0x83   : > { %v853_v51 = vunpack.c.h.s8.bf16 %v651_v36  ;;  %v1045_v52 = vunpack.c.h.s8.bf16 %v747_v37  ;;  %v856_v53 = vunpack.c.l.s8.bf16 %v654_v47  ;;  %v1048_v54 = vunpack.c.l.s8.bf16 %v750_v48  ;;  %v751_v8 = vld [vmem:[%s2674_s6 + $0x340] sm:$0xff]  ;;  %v754_v14 = vld [vmem:[%s2674_s6 + $0x358] sm:$0xff]  ;;  %v756_v26 = vld [vmem:[%s2674_s6 + $0x368] sm:$0xff] }
  0x84   : > { %1435 = vmatpush1.bf16.msra.mxu1 %v845_v16  ;;  %v1258_v57 = vcombine.high %v2705_v49, %v2705_v49  ;;  %v1308_v58 = vcombine.high %v2708_v50, %v2708_v50  ;;  %v855_v61 = vunpack.c.l.s8.bf16 %v653_v55  ;;  %v1047_v62 = vunpack.c.l.s8.bf16 %v749_v56  ;;  %v662_v37 = vld [vmem:[%s2674_s6 + $0x78] sm:$0xff] }
  0x85   : > { %1681 = vmatpush1.bf16.msra.mxu0 %v1037_v17  ;;  %1436 = vmatprep.subr.bf16.mxu1 %v848_v18  ;;  %v858_v63 = vunpack.c.h.s8.bf16 %v654_v47  ;;  %v1050_v0 = vunpack.c.h.s8.bf16 %v750_v48  ;;  %v857_v3 = vunpack.c.h.s8.bf16 %v653_v55  ;;  %v1049_v4 = vunpack.c.h.s8.bf16 %v749_v56  ;;  %v758_v38 = vld [vmem:[%s2674_s6 + $0x378] sm:$0xff]  ;;  %v757_v47 = vld [vmem:[%s2674_s6 + $0x370] sm:$0xff]  ;;  %v760_v55 = vld [vmem:[%s2674_s6 + $0x388] sm:$0xff] }
  0x86   : > { %1682 = vmatprep.subr.bf16.mxu0 %v1040_v19  ;;  %v2717_v59 = vrot.slane %v1258_v57, %v2699_v46  ;;  %v2720_v60 = vrot.slane %v1308_v58, %v2699_v46  ;;  %v860_v5 = vunpack.c.l.s8.bf16 %v656_v1  ;;  %v1052_v6 = vunpack.c.l.s8.bf16 %v752_v2  ;;  %v657_v19 = vld [vmem:[%s2674_s6 + $0x50] sm:$0xff] }
  0x87   : > { %v859_v9 = vunpack.c.l.s8.bf16 %v655_v7  ;;  %v1051_v10 = vunpack.c.l.s8.bf16 %v751_v8  ;;  %v862_v11 = vunpack.c.h.s8.bf16 %v656_v1  ;;  %v1054_v12 = vunpack.c.h.s8.bf16 %v752_v2 }
  0x88   : > { %1437 = vmatpush1.bf16.msra.mxu1 %v847_v22  ;;  %1464 = vmatprep.mubr.bf16.mxu1 %v2717_v59  ;;  %v861_v15 = vunpack.c.h.s8.bf16 %v655_v7  ;;  %v1053_v16 = vunpack.c.h.s8.bf16 %v751_v8  ;;  %v864_v17 = vunpack.c.l.s8.bf16 %v658_v13  ;;  %v1056_v18 = vunpack.c.l.s8.bf16 %v754_v14  ;;  %v666_v7 = vld [vmem:[%s2674_s6 + $0x98] sm:$0xff] }
  0x89   : > { %1683 = vmatpush1.bf16.msra.mxu0 %v1039_v23  ;;  %1438 = vmatprep.subr.bf16.mxu1 %v850_v24  ;;  %v863_v21 = vunpack.c.l.s8.bf16 %v657_v19  ;;  %v1055_v22 = vunpack.c.l.s8.bf16 %v753_v20  ;;  %v866_v23 = vunpack.c.h.s8.bf16 %v658_v13  ;;  %v1058_v24 = vunpack.c.h.s8.bf16 %v754_v14  ;;  %v762_v8 = vld [vmem:[%s2674_s6 + $0x398] sm:$0xff] }
  0x8a   : > { %1684 = vmatprep.subr.bf16.mxu0 %v1042_v25  ;;  %1710 = vmatprep.mubr.bf16.mxu0 %v2720_v60  ;;  %v660_v25 = vld [vmem:[%s2674_s6 + $0x68] sm:$0xff]  ;;  %v865_v27 = vunpack.c.h.s8.bf16 %v657_v19  ;;  %v1057_v28 = vunpack.c.h.s8.bf16 %v753_v20  ;;  %v1060_v30 = vunpack.c.l.s8.bf16 %v756_v26  ;;  %v1062_v36 = vunpack.c.h.s8.bf16 %v756_v26 }
  0x8b   : > { %v868_v29 = vunpack.c.l.s8.bf16 %v660_v25  ;;  %v1065_v57 = vunpack.c.h.s8.bf16 %v757_v47  ;;  %v2750_v1 = vrot.slane %v2708_v50, %v2699_v46  ;;  %v882_v14 = vunpack.c.h.s8.bf16 %v666_v7 }
  0x8c   : > { %1439 = vmatpush1.bf16.msra.mxu1 %v849_v31  ;;  %v659_v31 = vld [vmem:[%s2674_s6 + $0x60] sm:$0xff] }
  0x8d   : > { %1685 = vmatpush1.bf16.msra.mxu0 %v1041_v32  ;;  %1440 = vmatprep.subr.bf16.mxu1 %v852_v34  ;;  %v755_v32 = vld [vmem:[%s2674_s6 + $0x360] sm:$0xff]  ;;  %v867_v33 = vunpack.c.l.s8.bf16 %v659_v31  ;;  %v869_v40 = vunpack.c.h.s8.bf16 %v659_v31 }
  0x8e   : > { %1686 = vmatprep.subr.bf16.mxu0 %v1044_v35  ;;  %v1059_v34 = vunpack.c.l.s8.bf16 %v755_v32  ;;  %v870_v35 = vunpack.c.h.s8.bf16 %v660_v25 }
  0x90   : > { %1441 = vmatpush1.bf16.msra.mxu1 %v851_v41  ;;  %v1061_v41 = vunpack.c.h.s8.bf16 %v755_v32 }
  0x91   : > { %1687 = vmatpush1.bf16.msra.mxu0 %v1043_v42  ;;  %1442 = vmatprep.subr.bf16.mxu1 %v854_v44  ;;  %v872_v42 = vunpack.c.l.s8.bf16 %v662_v37  ;;  %v1064_v44 = vunpack.c.l.s8.bf16 %v758_v38 }
  0x92   : > { %1688 = vmatprep.subr.bf16.mxu0 %v1046_v45  ;;  %v661_v45 = vld [vmem:[%s2674_s6 + $0x70] sm:$0xff] }
  0x93   : > { %v871_v48 = vunpack.c.l.s8.bf16 %v661_v45  ;;  %v873_v56 = vunpack.c.h.s8.bf16 %v661_v45 }
  0x94   : > { %1443 = vmatpush1.bf16.msra.mxu1 %v853_v51  ;;  %v1063_v51 = vunpack.c.l.s8.bf16 %v757_v47 }
  0x95   : > { %1689 = vmatpush1.bf16.msra.mxu0 %v1045_v52  ;;  %1444 = vmatprep.subr.bf16.mxu1 %v856_v53  ;;  %v874_v52 = vunpack.c.h.s8.bf16 %v662_v37  ;;  %v1066_v53 = vunpack.c.h.s8.bf16 %v758_v38 }
  0x96   : > { %1690 = vmatprep.subr.bf16.mxu0 %v1048_v54  ;;  %v664_v54 = vld [vmem:[%s2674_s6 + $0x88] sm:$0xff] }
  0x97   : > { %v876_v58 = vunpack.c.l.s8.bf16 %v664_v54 }
  0x98   : > { %1445 = vmatpush1.bf16.msra.mxu1 %v855_v61  ;;  %v1068_v61 = vunpack.c.l.s8.bf16 %v760_v55 }
  0x99   : > { %1691 = vmatpush1.bf16.msra.mxu0 %v1047_v62  ;;  %1446 = vmatprep.subr.bf16.mxu1 %v858_v63  ;;  %v663_v62 = vld [vmem:[%s2674_s6 + $0x80] sm:$0xff] }
  0x9a   : > { %1692 = vmatprep.subr.bf16.mxu0 %v1050_v0  ;;  %v759_v63 = vld [vmem:[%s2674_s6 + $0x380] sm:$0xff]  ;;  %v2746_v0 = vrot.slane %v2705_v49, %v2699_v46  ;;  %v875_v2 = vunpack.c.l.s8.bf16 %v663_v62  ;;  %v1340_v49 = vcombine.high %v2720_v60, %v2720_v60  ;;  %v877_v50 = vunpack.c.h.s8.bf16 %v663_v62 }
  0x9c   : > { %1447 = vmatpush1.bf16.msra.mxu1 %v857_v3  ;;  %v1067_v3 = vunpack.c.l.s8.bf16 %v759_v63 }
  0x9d   : > { %1693 = vmatpush1.bf16.msra.mxu0 %v1049_v4  ;;  %1448 = vmatprep.subr.bf16.mxu1 %v860_v5  ;;  %v878_v4 = vunpack.c.h.s8.bf16 %v664_v54  ;;  %v1070_v5 = vunpack.c.h.s8.bf16 %v760_v55 }
  0x9e   : > { %1694 = vmatprep.subr.bf16.mxu0 %v1052_v6  ;;  %v1290_v6 = vcombine.high %v2717_v59, %v2717_v59  ;;  %v665_v59 = vld [vmem:[%s2674_s6 + $0x90] sm:$0xff] }
  0x9f   : > { %v879_v60 = vunpack.c.l.s8.bf16 %v665_v59 }
  0xa0   : > { %1449 = vmatpush1.bf16.msra.mxu1 %v859_v9  ;;  %v1069_v9 = vunpack.c.h.s8.bf16 %v759_v63 }
  0xa1   : > { %1695 = vmatpush1.bf16.msra.mxu0 %v1051_v10  ;;  %1450 = vmatprep.subr.bf16.mxu1 %v862_v11  ;;  %v880_v10 = vunpack.c.l.s8.bf16 %v666_v7  ;;  %v1072_v11 = vunpack.c.l.s8.bf16 %v762_v8 }
  0xa2   : > { %1696 = vmatprep.subr.bf16.mxu0 %v1054_v12  ;;  %v761_v12 = vld [vmem:[%s2674_s6 + $0x390] sm:$0xff] }
  0xa3   : > { %v1071_v13 = vunpack.c.l.s8.bf16 %v761_v12  ;;  %v1073_v19 = vunpack.c.h.s8.bf16 %v761_v12  ;;  %v675_v12 = vld [vmem:[%s2674_s6 + $0xe0] sm:$0xff] }
  0xa4   : > { %1451 = vmatpush1.bf16.msra.mxu1 %v861_v15  ;;  %v1074_v15 = vunpack.c.h.s8.bf16 %v762_v8  ;;  %v676_v8 = vld [vmem:[%s2674_s6 + $0xe8] sm:$0xff] }
  0xa5   : > { %1697 = vmatpush1.bf16.msra.mxu0 %v1053_v16  ;;  %1452 = vmatprep.subr.bf16.mxu1 %v864_v17  ;;  %v668_v16 = vld [vmem:[%s2674_s6 + $0xa8] sm:$0xff] }
  0xa6   : > { %1698 = vmatprep.subr.bf16.mxu0 %v1056_v18  ;;  %v764_v17 = vld [vmem:[%s2674_s6 + $0x3a8] sm:$0xff]  ;;  %v881_v18 = vunpack.c.h.s8.bf16 %v665_v59  ;;  %v884_v20 = vunpack.c.l.s8.bf16 %v668_v16  ;;  %v886_v26 = vunpack.c.h.s8.bf16 %v668_v16 }
  0xa8   : > { %1453 = vmatpush1.bf16.msra.mxu1 %v863_v21  ;;  %v1076_v21 = vunpack.c.l.s8.bf16 %v764_v17 }
  0xa9   : > { %1699 = vmatpush1.bf16.msra.mxu0 %v1055_v22  ;;  %1454 = vmatprep.subr.bf16.mxu1 %v866_v23  ;;  %v667_v22 = vld [vmem:[%s2674_s6 + $0xa0] sm:$0xff] }
  0xaa   : > { %1700 = vmatprep.subr.bf16.mxu0 %v1058_v24  ;;  %v763_v23 = vld [vmem:[%s2674_s6 + $0x3a0] sm:$0xff]  ;;  %v883_v24 = vunpack.c.l.s8.bf16 %v667_v22 }
  0xab   : > { %v1075_v25 = vunpack.c.l.s8.bf16 %v763_v23  ;;  %v1077_v31 = vunpack.c.h.s8.bf16 %v763_v23  ;;  %v677_v23 = vld [vmem:[%s2674_s6 + $0xf0] sm:$0xff] }
  0xac   : > { %1455 = vmatpush1.bf16.msra.mxu1 %v865_v27  ;;  %v1078_v27 = vunpack.c.h.s8.bf16 %v764_v17  ;;  %v678_v17 = vld [vmem:[%s2674_s6 + $0xf8] sm:$0xff] }
  0xad   : > { %1701 = vmatpush1.bf16.msra.mxu0 %v1057_v28  ;;  %1456 = vmatprep.subr.bf16.mxu1 %v868_v29  ;;  %v670_v28 = vld [vmem:[%s2674_s6 + $0xb8] sm:$0xff] }
  0xae   : > { %1702 = vmatprep.subr.bf16.mxu0 %v1060_v30  ;;  %v766_v29 = vld [vmem:[%s2674_s6 + $0x3b8] sm:$0xff]  ;;  %v885_v30 = vunpack.c.h.s8.bf16 %v667_v22  ;;  %v888_v32 = vunpack.c.l.s8.bf16 %v670_v28  ;;  %v890_v38 = vunpack.c.h.s8.bf16 %v670_v28 }
  0xb0   : > { %1457 = vmatpush1.bf16.msra.mxu1 %v867_v33  ;;  %v1080_v33 = vunpack.c.l.s8.bf16 %v766_v29 }
  0xb1   : > { %1703 = vmatpush1.bf16.msra.mxu0 %v1059_v34  ;;  %1458 = vmatprep.subr.bf16.mxu1 %v870_v35  ;;  %v669_v34 = vld [vmem:[%s2674_s6 + $0xb0] sm:$0xff] }
  0xb2   : > { %1704 = vmatprep.subr.bf16.mxu0 %v1062_v36  ;;  %v765_v35 = vld [vmem:[%s2674_s6 + $0x3b0] sm:$0xff]  ;;  %v887_v36 = vunpack.c.l.s8.bf16 %v669_v34 }
  0xb3   : > { %v1079_v37 = vunpack.c.l.s8.bf16 %v765_v35  ;;  %v1081_v45 = vunpack.c.h.s8.bf16 %v765_v35 }
  0xb4   : > { %1459 = vmatpush1.bf16.msra.mxu1 %v869_v40  ;;  %v1082_v40 = vunpack.c.h.s8.bf16 %v766_v29  ;;  %v906_v29 = vunpack.c.h.s8.bf16 %v678_v17 }
  0xb5   : > { %1705 = vmatpush1.bf16.msra.mxu0 %v1061_v41  ;;  %1460 = vmatprep.subr.bf16.mxu1 %v872_v42  ;;  %v672_v41 = vld [vmem:[%s2674_s6 + $0xc8] sm:$0xff] }
  0xb6   : > { %1706 = vmatprep.subr.bf16.mxu0 %v1064_v44  ;;  %v768_v42 = vld [vmem:[%s2674_s6 + $0x3c8] sm:$0xff]  ;;  %v889_v44 = vunpack.c.h.s8.bf16 %v669_v34  ;;  %v892_v47 = vunpack.c.l.s8.bf16 %v672_v41  ;;  %v894_v55 = vunpack.c.h.s8.bf16 %v672_v41  ;;  %v905_v34 = vunpack.c.h.s8.bf16 %v677_v23 }
  0xb8   : > { %1461 = vmatpush1.bf16.msra.mxu1 %v871_v48  ;;  %v1084_v48 = vunpack.c.l.s8.bf16 %v768_v42 }
  0xb9   : > { %1707 = vmatpush1.bf16.msra.mxu0 %v1063_v51  ;;  %1462 = vmatprep.subr.bf16.mxu1 %v874_v52  ;;  %v671_v51 = vld [vmem:[%s2674_s6 + $0xc0] sm:$0xff] }
  0xba   : > { %1708 = vmatprep.subr.bf16.mxu0 %v1066_v53  ;;  %v767_v52 = vld [vmem:[%s2674_s6 + $0x3c0] sm:$0xff]  ;;  %v891_v53 = vunpack.c.l.s8.bf16 %v671_v51 }
  0xbb   : > { %v1083_v54 = vunpack.c.l.s8.bf16 %v767_v52  ;;  %v1085_v62 = vunpack.c.h.s8.bf16 %v767_v52 }
  0xbc   : > { %1463 = vmatpush1.bf16.msra.mxu1 %v873_v56  ;;  %v1086_v56 = vunpack.c.h.s8.bf16 %v768_v42 }
  0xbd   : > { %1709 = vmatpush1.bf16.msra.mxu0 %v1065_v57  ;;  %1473 = vmatprep.subr.bf16.mxu1 %v876_v58  ;;  %v674_v57 = vld [vmem:[%s2674_s6 + $0xd8] sm:$0xff] }
  0xbe   : > { %1719 = vmatprep.subr.bf16.mxu0 %v1068_v61  ;;  %v770_v58 = vld [vmem:[%s2674_s6 + $0x3d8] sm:$0xff]  ;;  %v893_v61 = vunpack.c.h.s8.bf16 %v671_v51  ;;  %v896_v63 = vunpack.c.l.s8.bf16 %v674_v57 }
  0xbf   : > { %1465 = vmatmul.mubr.bf16.vlgmr.msra.gmra.mrb[0].mxu1 %v2746_v0  ;;  %v1090_v7 = vunpack.c.h.s8.bf16 %v770_v58 }
  0xc0   : > { %1711 = vmatmul.mubr.bf16.vlgmr.msra.gmra.mrb[0].mxu0 %v2750_v1  ;;  %1474 = vmatpush1.bf16.msra.mxu1 %v875_v2  ;;  %v1088_v2 = vunpack.c.l.s8.bf16 %v770_v58 }
  0xc1   : > { %1720 = vmatpush1.bf16.msra.mxu0 %v1067_v3  ;;  %1475 = vmatprep.subr.bf16.mxu1 %v878_v4  ;;  %v673_v3 = vld [vmem:[%s2674_s6 + $0xd0] sm:$0xff] }
  0xc2   : > { %1721 = vmatprep.subr.bf16.mxu0 %v1070_v5  ;;  %1505 = vmatprep.mubr.bf16.mxu1 %v1290_v6  ;;  %v769_v4 = vld [vmem:[%s2674_s6 + $0x3d0] sm:$0xff]  ;;  %v895_v5 = vunpack.c.l.s8.bf16 %v673_v3 }
  0xc3   : > { %1751 = vmatprep.mubr.bf16.mxu0 %v1340_v49  ;;  %v1087_v6 = vunpack.c.l.s8.bf16 %v769_v4  ;;  %v898_v49 = vunpack.c.h.s8.bf16 %v674_v57 }
  0xc4   : > { %1476 = vmatpush1.bf16.msra.mxu1 %v877_v50  ;;  %v772_v50 = vld [vmem:[%s2674_s6 + $0x3e8] sm:$0xff] }
  0xc5   : > { %1722 = vmatpush1.bf16.msra.mxu0 %v1069_v9  ;;  %1477 = vmatprep.subr.bf16.mxu1 %v880_v10  ;;  %v897_v9 = vunpack.c.h.s8.bf16 %v673_v3  ;;  %v1089_v10 = vunpack.c.h.s8.bf16 %v769_v4  ;;  %v1092_v59 = vunpack.c.l.s8.bf16 %v772_v50  ;;  %v1094_v16 = vunpack.c.h.s8.bf16 %v772_v50 }
  0xc6   : > { %1723 = vmatprep.subr.bf16.mxu0 %v1072_v11  ;;  %v900_v11 = vunpack.c.l.s8.bf16 %v676_v8 }
  0xc8   : > { %1478 = vmatpush1.bf16.msra.mxu1 %v879_v60  ;;  %v771_v60 = vld [vmem:[%s2674_s6 + $0x3e0] sm:$0xff] }
  0xc9   : > { %1724 = vmatpush1.bf16.msra.mxu0 %v1071_v13  ;;  %1479 = vmatprep.subr.bf16.mxu1 %v882_v14  ;;  %v899_v13 = vunpack.c.l.s8.bf16 %v675_v12  ;;  %v1091_v14 = vunpack.c.l.s8.bf16 %v771_v60 }
  0xca   : > { %1725 = vmatprep.subr.bf16.mxu0 %v1074_v15  ;;  %v902_v15 = vunpack.c.h.s8.bf16 %v676_v8 }
  0xcc   : > { %1480 = vmatpush1.bf16.msra.mxu1 %v881_v18  ;;  %v774_v18 = vld [vmem:[%s2674_s6 + $0x3f8] sm:$0xff] }
  0xcd   : > { %1726 = vmatpush1.bf16.msra.mxu0 %v1073_v19  ;;  %1481 = vmatprep.subr.bf16.mxu1 %v884_v20  ;;  %v901_v19 = vunpack.c.h.s8.bf16 %v675_v12  ;;  %v1093_v20 = vunpack.c.h.s8.bf16 %v771_v60  ;;  %v1096_v22 = vunpack.c.l.s8.bf16 %v774_v18 }
  0xce   : > { %1727 = vmatprep.subr.bf16.mxu0 %v1076_v21  ;;  %v904_v21 = vunpack.c.l.s8.bf16 %v678_v17 }
  0xd0   : > { %1482 = vmatpush1.bf16.msra.mxu1 %v883_v24  ;;  %v773_v24 = vld [vmem:[%s2674_s6 + $0x3f0] sm:$0xff] }
  0xd1   : > { %1728 = vmatpush1.bf16.msra.mxu0 %v1075_v25  ;;  %1483 = vmatprep.subr.bf16.mxu1 %v886_v26  ;;  %v1243_v25 = vcombine.high %v2696_v43, %v2696_v43  ;;  %v2791_v26 = vld [vmem:[%s3039_s0 + $0x10] sm:$0xff]  ;;  %v1095_v28 = vunpack.c.l.s8.bf16 %v773_v24  ;;  %v1097_v35 = vunpack.c.h.s8.bf16 %v773_v24 }
  0xd2   : > { %1729 = vmatprep.subr.bf16.mxu0 %v1078_v27  ;;  %v903_v27 = vunpack.c.l.s8.bf16 %v677_v23  ;;  %v2800_v43 = vrot.slane %v2791_v26, %v2699_v46 }
  0xd4   : > { %1484 = vmatpush1.bf16.msra.mxu1 %v885_v30  ;;  %v1098_v30 = vunpack.c.h.s8.bf16 %v774_v18  ;;  %v1356_v42 = vcombine.high %v2800_v43, %v2800_v43 }
  0xd5   : > { %1730 = vmatpush1.bf16.msra.mxu0 %v1077_v31  ;;  %1485 = vmatprep.subr.bf16.mxu1 %v888_v32  ;;  %v680_v31 = vld [vmem:[%s2674_s6 + $0x108] sm:$0xff] }
  0xd6   : > { %1731 = vmatprep.subr.bf16.mxu0 %v1080_v33  ;;  %v776_v32 = vld [vmem:[%s2674_s6 + $0x408] sm:$0xff]  ;;  %v2796_v33 = vrot.slane %v1243_v25, %v2699_v46  ;;  %v910_v51 = vunpack.c.h.s8.bf16 %v680_v31 }
  0xd7   : > { %v1102_v52 = vunpack.c.h.s8.bf16 %v776_v32  ;;  %v688_v25 = vld [vmem:[%s2674_s6 + $0x148] sm:$0xff] }
  0xd8   : > { %1486 = vmatpush1.bf16.msra.mxu1 %v887_v36  ;;  %v908_v36 = vunpack.c.l.s8.bf16 %v680_v31  ;;  %v1259_v41 = vcombine.high %v2796_v33, %v2796_v33 }
  0xd9   : > { %1732 = vmatpush1.bf16.msra.mxu0 %v1079_v37  ;;  %1487 = vmatprep.subr.bf16.mxu1 %v890_v38  ;;  %v1100_v37 = vunpack.c.l.s8.bf16 %v776_v32  ;;  %v679_v38 = vld [vmem:[%s2674_s6 + $0x100] sm:$0xff] }
  0xda   : > { %1733 = vmatprep.subr.bf16.mxu0 %v1082_v40  ;;  %v775_v40 = vld [vmem:[%s2674_s6 + $0x400] sm:$0xff] }
  0xdb   : > { %v687_v32 = vld [vmem:[%s2674_s6 + $0x140] sm:$0xff] }
  0xdc   : > { %1488 = vmatpush1.bf16.msra.mxu1 %v889_v44  ;;  %v1288_v44 = vcombine.high %v2746_v0, %v2746_v0  ;;  %v2818_v0 = vrot.slane %v1356_v42, %v2699_v46  ;;  %v925_v42 = vunpack.c.h.s8.bf16 %v687_v32 }
  0xdd   : > { %1734 = vmatpush1.bf16.msra.mxu0 %v1081_v45  ;;  %1489 = vmatprep.subr.bf16.mxu1 %v892_v47  ;;  %v1338_v45 = vcombine.high %v2750_v1, %v2750_v1  ;;  %v907_v47 = vunpack.c.l.s8.bf16 %v679_v38  ;;  %v909_v1 = vunpack.c.h.s8.bf16 %v679_v38 }
  0xde   : > { %1735 = vmatprep.subr.bf16.mxu0 %v1084_v48  ;;  %v1099_v48 = vunpack.c.l.s8.bf16 %v775_v40 }
  0xe0   : > { %1490 = vmatpush1.bf16.msra.mxu1 %v891_v53  ;;  %v682_v53 = vld [vmem:[%s2674_s6 + $0x118] sm:$0xff] }
  0xe1   : > { %1736 = vmatpush1.bf16.msra.mxu0 %v1083_v54  ;;  %1491 = vmatprep.subr.bf16.mxu1 %v894_v55  ;;  %v778_v54 = vld [vmem:[%s2674_s6 + $0x418] sm:$0xff]  ;;  %v2815_v55 = vrot.slane %v1259_v41, %v2699_v46  ;;  %v912_v57 = vunpack.c.l.s8.bf16 %v682_v53  ;;  %v914_v3 = vunpack.c.h.s8.bf16 %v682_v53 }
  0xe2   : > { %1737 = vmatprep.subr.bf16.mxu0 %v1086_v56  ;;  %v1101_v56 = vunpack.c.h.s8.bf16 %v775_v40  ;;  %v1104_v58 = vunpack.c.l.s8.bf16 %v778_v54  ;;  %v1106_v4 = vunpack.c.h.s8.bf16 %v778_v54  ;;  %v690_v40 = vld [vmem:[%s2674_s6 + $0x158] sm:$0xff] }
  0xe3   : > { %v786_v41 = vld [vmem:[%s2674_s6 + $0x458] sm:$0xff]  ;;  %v930_v54 = vunpack.c.h.s8.bf16 %v690_v40 }
  0xe4   : > { %1492 = vmatpush1.bf16.msra.mxu1 %v893_v61  ;;  %v681_v61 = vld [vmem:[%s2674_s6 + $0x110] sm:$0xff] }
  0xe5   : > { %1738 = vmatpush1.bf16.msra.mxu0 %v1085_v62  ;;  %1493 = vmatprep.subr.bf16.mxu1 %v896_v63  ;;  %v777_v62 = vld [vmem:[%s2674_s6 + $0x410] sm:$0xff]  ;;  %v911_v63 = vunpack.c.l.s8.bf16 %v681_v61 }
  0xe6   : > { %1739 = vmatprep.subr.bf16.mxu0 %v1088_v2  ;;  %v1103_v2 = vunpack.c.l.s8.bf16 %v777_v62 }
  0xe8   : > { %1494 = vmatpush1.bf16.msra.mxu1 %v895_v5  ;;  %v684_v5 = vld [vmem:[%s2674_s6 + $0x128] sm:$0xff] }
  0xe9   : > { %1740 = vmatpush1.bf16.msra.mxu0 %v1087_v6  ;;  %1495 = vmatprep.subr.bf16.mxu1 %v898_v49  ;;  %v780_v6 = vld [vmem:[%s2674_s6 + $0x428] sm:$0xff]  ;;  %v913_v49 = vunpack.c.h.s8.bf16 %v681_v61  ;;  %v916_v8 = vunpack.c.l.s8.bf16 %v684_v5  ;;  %v918_v12 = vunpack.c.h.s8.bf16 %v684_v5 }
  0xea   : > { %1741 = vmatprep.subr.bf16.mxu0 %v1090_v7  ;;  %v1105_v7 = vunpack.c.h.s8.bf16 %v777_v62  ;;  %v1108_v50 = vunpack.c.l.s8.bf16 %v780_v6  ;;  %v1110_v60 = vunpack.c.h.s8.bf16 %v780_v6 }
  0xec   : > { %1496 = vmatpush1.bf16.msra.mxu1 %v897_v9  ;;  %v683_v9 = vld [vmem:[%s2674_s6 + $0x120] sm:$0xff] }
  0xed   : > { %1742 = vmatpush1.bf16.msra.mxu0 %v1089_v10  ;;  %1497 = vmatprep.subr.bf16.mxu1 %v900_v11  ;;  %v779_v10 = vld [vmem:[%s2674_s6 + $0x420] sm:$0xff]  ;;  %v915_v11 = vunpack.c.l.s8.bf16 %v683_v9 }
  0xee   : > { %1743 = vmatprep.subr.bf16.mxu0 %v1092_v59  ;;  %v1107_v59 = vunpack.c.l.s8.bf16 %v779_v10 }
  0xf0   : > { %1498 = vmatpush1.bf16.msra.mxu1 %v899_v13  ;;  %v686_v13 = vld [vmem:[%s2674_s6 + $0x138] sm:$0xff] }
  0xf1   : > { %1744 = vmatpush1.bf16.msra.mxu0 %v1091_v14  ;;  %1499 = vmatprep.subr.bf16.mxu1 %v902_v15  ;;  %v782_v14 = vld [vmem:[%s2674_s6 + $0x438] sm:$0xff]  ;;  %v917_v15 = vunpack.c.h.s8.bf16 %v683_v9  ;;  %v920_v17 = vunpack.c.l.s8.bf16 %v686_v13  ;;  %v922_v23 = vunpack.c.h.s8.bf16 %v686_v13 }
  0xf2   : > { %1745 = vmatprep.subr.bf16.mxu0 %v1094_v16  ;;  %v1109_v16 = vunpack.c.h.s8.bf16 %v779_v10  ;;  %v1112_v18 = vunpack.c.l.s8.bf16 %v782_v14  ;;  %v1114_v24 = vunpack.c.h.s8.bf16 %v782_v14 }
  0xf4   : > { %1500 = vmatpush1.bf16.msra.mxu1 %v901_v19  ;;  %v685_v19 = vld [vmem:[%s2674_s6 + $0x130] sm:$0xff] }
  0xf5   : > { %1746 = vmatpush1.bf16.msra.mxu0 %v1093_v20  ;;  %1501 = vmatprep.subr.bf16.mxu1 %v904_v21  ;;  %v781_v20 = vld [vmem:[%s2674_s6 + $0x430] sm:$0xff]  ;;  %v919_v21 = vunpack.c.l.s8.bf16 %v685_v19 }
  0xf6   : > { %1747 = vmatprep.subr.bf16.mxu0 %v1096_v22  ;;  %v1111_v22 = vunpack.c.l.s8.bf16 %v781_v20 }
  0xf8   : > { %1502 = vmatpush1.bf16.msra.mxu1 %v903_v27  ;;  %v784_v27 = vld [vmem:[%s2674_s6 + $0x448] sm:$0xff] }
  0xf9   : > { %1748 = vmatpush1.bf16.msra.mxu0 %v1095_v28  ;;  %1503 = vmatprep.subr.bf16.mxu1 %v906_v29  ;;  %v921_v28 = vunpack.c.h.s8.bf16 %v685_v19  ;;  %v1113_v29 = vunpack.c.h.s8.bf16 %v781_v20  ;;  %v1116_v31 = vunpack.c.l.s8.bf16 %v784_v27  ;;  %v1118_v38 = vunpack.c.h.s8.bf16 %v784_v27 }
  0xfa   : > { %1749 = vmatprep.subr.bf16.mxu0 %v1098_v30  ;;  %v924_v30 = vunpack.c.l.s8.bf16 %v688_v25 }
  0xfc   : > { %1504 = vmatpush1.bf16.msra.mxu1 %v905_v34  ;;  %v783_v34 = vld [vmem:[%s2674_s6 + $0x440] sm:$0xff] }
  0xfd   : > { %1750 = vmatpush1.bf16.msra.mxu0 %v1097_v35  ;;  %1514 = vmatprep.subr.bf16.mxu1 %v908_v36  ;;  %v923_v35 = vunpack.c.l.s8.bf16 %v687_v32  ;;  %v1115_v36 = vunpack.c.l.s8.bf16 %v783_v34  ;;  %v794_v32 = vld [vmem:[%s2674_s6 + $0x498] sm:$0xff] }
  0xfe   : > { %1760 = vmatprep.subr.bf16.mxu0 %v1100_v37  ;;  %v926_v37 = vunpack.c.h.s8.bf16 %v688_v25  ;;  %v2858_v25 = vrot.slane %v2800_v43, %v2699_v46 }
  0xff   : > { %1506 = vmatmul.mubr.bf16.vlgmr.msra.gmra.mrb[0].mxu1 %v1288_v44  ;;  %v1117_v44 = vunpack.c.h.s8.bf16 %v783_v34  ;;  %v1388_v34 = vcombine.high %v2818_v0, %v2818_v0 }
 0x100   : > { %1752 = vmatmul.mubr.bf16.vlgmr.msra.gmra.mrb[0].mxu0 %v1338_v45  ;;  %1515 = vmatpush1.bf16.msra.mxu1 %v907_v47  ;;  %v928_v45 = vunpack.c.l.s8.bf16 %v690_v40  ;;  %v1120_v47 = vunpack.c.l.s8.bf16 %v786_v41  ;;  %v793_v40 = vld [vmem:[%s2674_s6 + $0x490] sm:$0xff] }
 0x101   : > { %1761 = vmatpush1.bf16.msra.mxu0 %v1099_v48  ;;  %1516 = vmatprep.subr.bf16.mxu1 %v910_v51  ;;  %v689_v48 = vld [vmem:[%s2674_s6 + $0x150] sm:$0xff] }
 0x102   : > { %1762 = vmatprep.subr.bf16.mxu0 %v1102_v52  ;;  %1546 = vmatprep.mubr.bf16.mxu1 %v2815_v55  ;;  %v785_v51 = vld [vmem:[%s2674_s6 + $0x450] sm:$0xff]  ;;  %v927_v52 = vunpack.c.l.s8.bf16 %v689_v48 }
 0x103   : > { %1792 = vmatprep.mubr.bf16.mxu0 %v2818_v0  ;;  %v1119_v53 = vunpack.c.l.s8.bf16 %v785_v51  ;;  %v1121_v61 = vunpack.c.h.s8.bf16 %v785_v51  ;;  %v1135_v0 = vunpack.c.l.s8.bf16 %v793_v40 }
 0x104   : > { %1517 = vmatpush1.bf16.msra.mxu1 %v909_v1  ;;  %v1122_v1 = vunpack.c.h.s8.bf16 %v786_v41 }
 0x105   : > { %1763 = vmatpush1.bf16.msra.mxu0 %v1101_v56  ;;  %1518 = vmatprep.subr.bf16.mxu1 %v912_v57  ;;  %v692_v56 = vld [vmem:[%s2674_s6 + $0x168] sm:$0xff] }
 0x106   : > { %1764 = vmatprep.subr.bf16.mxu0 %v1104_v58  ;;  %v788_v57 = vld [vmem:[%s2674_s6 + $0x468] sm:$0xff]  ;;  %v929_v58 = vunpack.c.h.s8.bf16 %v689_v48  ;;  %v932_v62 = vunpack.c.l.s8.bf16 %v692_v56  ;;  %v934_v6 = vunpack.c.h.s8.bf16 %v692_v56  ;;  %v1137_v48 = vunpack.c.h.s8.bf16 %v793_v40  ;;  %v707_v40 = vld [vmem:[%s2674_s6 + $0x1e0] sm:$0xff] }
 0x108   : > { %1519 = vmatpush1.bf16.msra.mxu1 %v911_v63  ;;  %v1124_v63 = vunpack.c.l.s8.bf16 %v788_v57 }
 0x109   : > { %1765 = vmatpush1.bf16.msra.mxu0 %v1103_v2  ;;  %1520 = vmatprep.subr.bf16.mxu1 %v914_v3  ;;  %v691_v2 = vld [vmem:[%s2674_s6 + $0x160] sm:$0xff] }
 0x10a   : > { %1766 = vmatprep.subr.bf16.mxu0 %v1106_v4  ;;  %v787_v3 = vld [vmem:[%s2674_s6 + $0x460] sm:$0xff]  ;;  %v931_v4 = vunpack.c.l.s8.bf16 %v691_v2 }
 0x10b   : > { %v1123_v5 = vunpack.c.l.s8.bf16 %v787_v3  ;;  %v1125_v9 = vunpack.c.h.s8.bf16 %v787_v3 }
 0x10c   : > { %1521 = vmatpush1.bf16.msra.mxu1 %v913_v49  ;;  %v1126_v49 = vunpack.c.h.s8.bf16 %v788_v57 }
 0x10d   : > { %1767 = vmatpush1.bf16.msra.mxu0 %v1105_v7  ;;  %1522 = vmatprep.subr.bf16.mxu1 %v916_v8  ;;  %v694_v7 = vld [vmem:[%s2674_s6 + $0x178] sm:$0xff] }
 0x10e   : > { %1768 = vmatprep.subr.bf16.mxu0 %v1108_v50  ;;  %v790_v8 = vld [vmem:[%s2674_s6 + $0x478] sm:$0xff]  ;;  %v933_v50 = vunpack.c.h.s8.bf16 %v691_v2  ;;  %v936_v10 = vunpack.c.l.s8.bf16 %v694_v7  ;;  %v938_v14 = vunpack.c.h.s8.bf16 %v694_v7 }
 0x110   : > { %1523 = vmatpush1.bf16.msra.mxu1 %v915_v11  ;;  %v1128_v11 = vunpack.c.l.s8.bf16 %v790_v8 }
 0x111   : > { %1769 = vmatpush1.bf16.msra.mxu0 %v1107_v59  ;;  %1524 = vmatprep.subr.bf16.mxu1 %v918_v12  ;;  %v693_v59 = vld [vmem:[%s2674_s6 + $0x170] sm:$0xff] }
 0x112   : > { %1770 = vmatprep.subr.bf16.mxu0 %v1110_v60  ;;  %v789_v12 = vld [vmem:[%s2674_s6 + $0x470] sm:$0xff]  ;;  %v935_v60 = vunpack.c.l.s8.bf16 %v693_v59 }
 0x113   : > { %v1127_v13 = vunpack.c.l.s8.bf16 %v789_v12  ;;  %v1129_v19 = vunpack.c.h.s8.bf16 %v789_v12 }
 0x114   : > { %1525 = vmatpush1.bf16.msra.mxu1 %v917_v15  ;;  %v1130_v15 = vunpack.c.h.s8.bf16 %v790_v8 }
 0x115   : > { %1771 = vmatpush1.bf16.msra.mxu0 %v1109_v16  ;;  %1526 = vmatprep.subr.bf16.mxu1 %v920_v17  ;;  %v696_v16 = vld [vmem:[%s2674_s6 + $0x188] sm:$0xff] }
 0x116   : > { %1772 = vmatprep.subr.bf16.mxu0 %v1112_v18  ;;  %v792_v17 = vld [vmem:[%s2674_s6 + $0x488] sm:$0xff]  ;;  %v937_v18 = vunpack.c.h.s8.bf16 %v693_v59  ;;  %v940_v20 = vunpack.c.l.s8.bf16 %v696_v16 }
 0x118   : > { %1527 = vmatpush1.bf16.msra.mxu1 %v919_v21  ;;  %v1132_v21 = vunpack.c.l.s8.bf16 %v792_v17 }
 0x119   : > { %1773 = vmatpush1.bf16.msra.mxu0 %v1111_v22  ;;  %1528 = vmatprep.subr.bf16.mxu1 %v922_v23  ;;  %v695_v22 = vld [vmem:[%s2674_s6 + $0x180] sm:$0xff] }
 0x11a   : > { %1774 = vmatprep.subr.bf16.mxu0 %v1114_v24  ;;  %v791_v23 = vld [vmem:[%s2674_s6 + $0x480] sm:$0xff]  ;;  %v2854_v24 = vrot.slane %v2796_v33, %v2699_v46  ;;  %v939_v27 = vunpack.c.l.s8.bf16 %v695_v22  ;;  %v1291_v33 = vcombine.high %v2815_v55, %v2815_v55  ;;  %v941_v43 = vunpack.c.h.s8.bf16 %v695_v22 }
 0x11c   : > { %1529 = vmatpush1.bf16.msra.mxu1 %v921_v28  ;;  %v1131_v28 = vunpack.c.l.s8.bf16 %v791_v23 }
 0x11d   : > { %1775 = vmatpush1.bf16.msra.mxu0 %v1113_v29  ;;  %1530 = vmatprep.subr.bf16.mxu1 %v924_v30  ;;  %v942_v29 = vunpack.c.h.s8.bf16 %v696_v16  ;;  %v1134_v30 = vunpack.c.h.s8.bf16 %v792_v17 }
 0x11e   : > { %1776 = vmatprep.subr.bf16.mxu0 %v1116_v31  ;;  %v698_v31 = vld [vmem:[%s2674_s6 + $0x198] sm:$0xff] }
 0x11f   : > { %v946_v41 = vunpack.c.h.s8.bf16 %v698_v31 }
 0x120   : > { %1531 = vmatpush1.bf16.msra.mxu1 %v923_v35  ;;  %v1133_v35 = vunpack.c.h.s8.bf16 %v791_v23 }
 0x121   : > { %1777 = vmatpush1.bf16.msra.mxu0 %v1115_v36  ;;  %1532 = vmatprep.subr.bf16.mxu1 %v926_v37  ;;  %v944_v36 = vunpack.c.l.s8.bf16 %v698_v31  ;;  %v1136_v37 = vunpack.c.l.s8.bf16 %v794_v32 }
 0x122   : > { %1778 = vmatprep.subr.bf16.mxu0 %v1118_v38  ;;  %v697_v38 = vld [vmem:[%s2674_s6 + $0x190] sm:$0xff] }
 0x123   : > { %v943_v55 = vunpack.c.l.s8.bf16 %v697_v38 }
 0x124   : > { %1533 = vmatpush1.bf16.msra.mxu1 %v925_v42  ;;  %v1138_v42 = vunpack.c.h.s8.bf16 %v794_v32 }
 0x125   : > { %1779 = vmatpush1.bf16.msra.mxu0 %v1117_v44  ;;  %1534 = vmatprep.subr.bf16.mxu1 %v928_v45  ;;  %v700_v44 = vld [vmem:[%s2674_s6 + $0x1a8] sm:$0xff] }
 0x126   : > { %1780 = vmatprep.subr.bf16.mxu0 %v1120_v47  ;;  %v796_v45 = vld [vmem:[%s2674_s6 + $0x4a8] sm:$0xff]  ;;  %v945_v47 = vunpack.c.h.s8.bf16 %v697_v38  ;;  %v948_v51 = vunpack.c.l.s8.bf16 %v700_v44  ;;  %v950_v57 = vunpack.c.h.s8.bf16 %v700_v44 }
 0x128   : > { %1535 = vmatpush1.bf16.msra.mxu1 %v927_v52  ;;  %v1140_v52 = vunpack.c.l.s8.bf16 %v796_v45 }
 0x129   : > { %1781 = vmatpush1.bf16.msra.mxu0 %v1119_v53  ;;  %1536 = vmatprep.subr.bf16.mxu1 %v930_v54  ;;  %v699_v53 = vld [vmem:[%s2674_s6 + $0x1a0] sm:$0xff] }
 0x12a   : > { %1782 = vmatprep.subr.bf16.mxu0 %v1122_v1  ;;  %v795_v54 = vld [vmem:[%s2674_s6 + $0x4a0] sm:$0xff]  ;;  %v947_v1 = vunpack.c.l.s8.bf16 %v699_v53 }
 0x12b   : > { %v1139_v56 = vunpack.c.l.s8.bf16 %v795_v54  ;;  %v1141_v2 = vunpack.c.h.s8.bf16 %v795_v54  ;;  %v709_v54 = vld [vmem:[%s2674_s6 + $0x1f0] sm:$0xff] }
 0x12c   : > { %1537 = vmatpush1.bf16.msra.mxu1 %v929_v58  ;;  %v1142_v58 = vunpack.c.h.s8.bf16 %v796_v45  ;;  %v710_v45 = vld [vmem:[%s2674_s6 + $0x1f8] sm:$0xff] }
 0x12d   : > { %1783 = vmatpush1.bf16.msra.mxu0 %v1121_v61  ;;  %1538 = vmatprep.subr.bf16.mxu1 %v932_v62  ;;  %v702_v61 = vld [vmem:[%s2674_s6 + $0x1b8] sm:$0xff] }
 0x12e   : > { %1784 = vmatprep.subr.bf16.mxu0 %v1124_v63  ;;  %v798_v62 = vld [vmem:[%s2674_s6 + $0x4b8] sm:$0xff]  ;;  %v949_v63 = vunpack.c.h.s8.bf16 %v699_v53  ;;  %v952_v3 = vunpack.c.l.s8.bf16 %v702_v61  ;;  %v954_v8 = vunpack.c.h.s8.bf16 %v702_v61  ;;  %v970_v61 = vunpack.c.h.s8.bf16 %v710_v45 }
 0x130   : > { %1539 = vmatpush1.bf16.msra.mxu1 %v931_v4  ;;  %v1144_v4 = vunpack.c.l.s8.bf16 %v798_v62 }
 0x131   : > { %1785 = vmatpush1.bf16.msra.mxu0 %v1123_v5  ;;  %1540 = vmatprep.subr.bf16.mxu1 %v934_v6  ;;  %v701_v5 = vld [vmem:[%s2674_s6 + $0x1b0] sm:$0xff] }
 0x132   : > { %1786 = vmatprep.subr.bf16.mxu0 %v1126_v49  ;;  %v797_v6 = vld [vmem:[%s2674_s6 + $0x4b0] sm:$0xff]  ;;  %v951_v49 = vunpack.c.l.s8.bf16 %v701_v5 }
 0x133   : > { %v1143_v7 = vunpack.c.l.s8.bf16 %v797_v6  ;;  %v1145_v59 = vunpack.c.h.s8.bf16 %v797_v6 }
 0x134   : > { %1541 = vmatpush1.bf16.msra.mxu1 %v933_v50  ;;  %v1146_v50 = vunpack.c.h.s8.bf16 %v798_v62 }
 0x135   : > { %1787 = vmatpush1.bf16.msra.mxu0 %v1125_v9  ;;  %1542 = vmatprep.subr.bf16.mxu1 %v936_v10  ;;  %v704_v9 = vld [vmem:[%s2674_s6 + $0x1c8] sm:$0xff] }
 0x136   : > { %1788 = vmatprep.subr.bf16.mxu0 %v1128_v11  ;;  %v800_v10 = vld [vmem:[%s2674_s6 + $0x4c8] sm:$0xff]  ;;  %v953_v11 = vunpack.c.h.s8.bf16 %v701_v5  ;;  %v956_v12 = vunpack.c.l.s8.bf16 %v704_v9  ;;  %v958_v17 = vunpack.c.h.s8.bf16 %v704_v9 }
 0x138   : > { %1543 = vmatpush1.bf16.msra.mxu1 %v935_v60  ;;  %v1148_v60 = vunpack.c.l.s8.bf16 %v800_v10 }
 0x139   : > { %1789 = vmatpush1.bf16.msra.mxu0 %v1127_v13  ;;  %1544 = vmatprep.subr.bf16.mxu1 %v938_v14  ;;  %v703_v13 = vld [vmem:[%s2674_s6 + $0x1c0] sm:$0xff] }
 0x13a   : > { %1790 = vmatprep.subr.bf16.mxu0 %v1130_v15  ;;  %v799_v14 = vld [vmem:[%s2674_s6 + $0x4c0] sm:$0xff]  ;;  %v955_v15 = vunpack.c.l.s8.bf16 %v703_v13 }
 0x13b   : > { %v1147_v16 = vunpack.c.l.s8.bf16 %v799_v14  ;;  %v1149_v22 = vunpack.c.h.s8.bf16 %v799_v14  ;;  %v714_v14 = vld [vmem:[%s2674_s6 + $0x218] sm:$0xff] }
 0x13c   : > { %1545 = vmatpush1.bf16.msra.mxu1 %v937_v18  ;;  %v1150_v18 = vunpack.c.h.s8.bf16 %v800_v10  ;;  %v1289_v10 = vcombine.high %v2854_v24, %v2854_v24 }
 0x13d   : > { %1791 = vmatpush1.bf16.msra.mxu0 %v1129_v19  ;;  %1555 = vmatprep.subr.bf16.mxu1 %v940_v20  ;;  %v706_v19 = vld [vmem:[%s2674_s6 + $0x1d8] sm:$0xff] }
 0x13e   : > { %1801 = vmatprep.subr.bf16.mxu0 %v1132_v21  ;;  %v802_v20 = vld [vmem:[%s2674_s6 + $0x4d8] sm:$0xff]  ;;  %v957_v21 = vunpack.c.h.s8.bf16 %v703_v13  ;;  %v960_v23 = vunpack.c.l.s8.bf16 %v706_v19  ;;  %v962_v32 = vunpack.c.h.s8.bf16 %v706_v19 }
 0x13f   : > { %1547 = vmatmul.mubr.bf16.vlgmr.msra.gmra.mrb[0].mxu1 %v2854_v24 }
 0x140   : > { %1793 = vmatmul.mubr.bf16.vlgmr.msra.gmra.mrb[0].mxu0 %v2858_v25  ;;  %1556 = vmatpush1.bf16.msra.mxu1 %v939_v27  ;;  %v1152_v27 = vunpack.c.l.s8.bf16 %v802_v20 }
 0x141   : > { %1802 = vmatpush1.bf16.msra.mxu0 %v1131_v28  ;;  %1557 = vmatprep.subr.bf16.mxu1 %v942_v29  ;;  %v705_v28 = vld [vmem:[%s2674_s6 + $0x1d0] sm:$0xff] }
 0x142   : > { %1803 = vmatprep.subr.bf16.mxu0 %v1134_v30  ;;  %1587 = vmatprep.mubr.bf16.mxu1 %v1291_v33  ;;  %v801_v29 = vld [vmem:[%s2674_s6 + $0x4d0] sm:$0xff]  ;;  %v959_v30 = vunpack.c.l.s8.bf16 %v705_v28  ;;  %v1154_v33 = vunpack.c.h.s8.bf16 %v802_v20 }
 0x143   : > { %1833 = vmatprep.mubr.bf16.mxu0 %v1388_v34  ;;  %v1151_v31 = vunpack.c.l.s8.bf16 %v801_v29  ;;  %v708_v34 = vld [vmem:[%s2674_s6 + $0x1e8] sm:$0xff]  ;;  %v713_v20 = vld [vmem:[%s2674_s6 + $0x210] sm:$0xff] }
 0x144   : > { %1558 = vmatpush1.bf16.msra.mxu1 %v941_v43  ;;  %v804_v43 = vld [vmem:[%s2674_s6 + $0x4e8] sm:$0xff] }
 0x145   : > { %1804 = vmatpush1.bf16.msra.mxu0 %v1133_v35  ;;  %1559 = vmatprep.subr.bf16.mxu1 %v944_v36  ;;  %v961_v35 = vunpack.c.h.s8.bf16 %v705_v28  ;;  %v1153_v36 = vunpack.c.h.s8.bf16 %v801_v29  ;;  %v1156_v38 = vunpack.c.l.s8.bf16 %v804_v43  ;;  %v1158_v44 = vunpack.c.h.s8.bf16 %v804_v43  ;;  %v716_v29 = vld [vmem:[%s2674_s6 + $0x228] sm:$0xff]  ;;  %v715_v43 = vld [vmem:[%s2674_s6 + $0x220] sm:$0xff] }
 0x146   : > { %1805 = vmatprep.subr.bf16.mxu0 %v1136_v37  ;;  %v964_v37 = vunpack.c.l.s8.bf16 %v708_v34 }
 0x148   : > { %1560 = vmatpush1.bf16.msra.mxu1 %v943_v55  ;;  %v803_v55 = vld [vmem:[%s2674_s6 + $0x4e0] sm:$0xff] }
 0x149   : > { %1806 = vmatpush1.bf16.msra.mxu0 %v1135_v0  ;;  %1561 = vmatprep.subr.bf16.mxu1 %v946_v41  ;;  %v963_v0 = vunpack.c.l.s8.bf16 %v707_v40  ;;  %v1155_v41 = vunpack.c.l.s8.bf16 %v803_v55 }
 0x14a   : > { %1807 = vmatprep.subr.bf16.mxu0 %v1138_v42  ;;  %v966_v42 = vunpack.c.h.s8.bf16 %v708_v34 }
 0x14c   : > { %1562 = vmatpush1.bf16.msra.mxu1 %v945_v47  ;;  %v806_v47 = vld [vmem:[%s2674_s6 + $0x4f8] sm:$0xff] }
 0x14d   : > { %1808 = vmatpush1.bf16.msra.mxu0 %v1137_v48  ;;  %1563 = vmatprep.subr.bf16.mxu1 %v948_v51  ;;  %v965_v48 = vunpack.c.h.s8.bf16 %v707_v40  ;;  %v1157_v51 = vunpack.c.h.s8.bf16 %v803_v55  ;;  %v1160_v53 = vunpack.c.l.s8.bf16 %v806_v47  ;;  %v1162_v62 = vunpack.c.h.s8.bf16 %v806_v47  ;;  %v718_v55 = vld [vmem:[%s2674_s6 + $0x238] sm:$0xff]  ;;  %v717_v47 = vld [vmem:[%s2674_s6 + $0x230] sm:$0xff] }
 0x14e   : > { %1809 = vmatprep.subr.bf16.mxu0 %v1140_v52  ;;  %v968_v52 = vunpack.c.l.s8.bf16 %v710_v45 }
 0x150   : > { %1564 = vmatpush1.bf16.msra.mxu1 %v947_v1  ;;  %v805_v1 = vld [vmem:[%s2674_s6 + $0x4f0] sm:$0xff] }
 0x151   : > { %1810 = vmatpush1.bf16.msra.mxu0 %v1139_v56  ;;  %1565 = vmatprep.subr.bf16.mxu1 %v950_v57  ;;  %v1341_v56 = vcombine.high %v2791_v26, %v2791_v26  ;;  %v967_v57 = vunpack.c.l.s8.bf16 %v709_v54  ;;  %v969_v26 = vunpack.c.h.s8.bf16 %v709_v54  ;;  %v1161_v5 = vunpack.c.h.s8.bf16 %v805_v1 }
 0x152   : > { %1811 = vmatprep.subr.bf16.mxu0 %v1142_v58  ;;  %v1159_v58 = vunpack.c.l.s8.bf16 %v805_v1  ;;  %v720_v1 = vld [vmem:[%s2674_s6 + $0x248] sm:$0xff] }
 0x154   : > { %1566 = vmatpush1.bf16.msra.mxu1 %v949_v63  ;;  %v712_v63 = vld [vmem:[%s2674_s6 + $0x208] sm:$0xff] }
 0x155   : > { %1812 = vmatpush1.bf16.msra.mxu0 %v1141_v2  ;;  %1567 = vmatprep.subr.bf16.mxu1 %v952_v3  ;;  %v808_v2 = vld [vmem:[%s2674_s6 + $0x508] sm:$0xff]  ;;  %v972_v6 = vunpack.c.l.s8.bf16 %v712_v63 }
 0x156   : > { %1813 = vmatprep.subr.bf16.mxu0 %v1144_v4  ;;  %v2901_v3 = vld.sshfl [vmem:[%s3039_s0 + $0x8] sm:$0xff pattern:$0x75316420]  ;;  %v2904_v4 = vrot.slane %v1341_v56, %v2699_v46  ;;  %v1166_v13 = vunpack.c.h.s8.bf16 %v808_v2 }
 0x157   : > { %v816_v56 = vld [vmem:[%s2674_s6 + $0x548] sm:$0xff] }
 0x158   : > { %1568 = vmatpush1.bf16.msra.mxu1 %v951_v49  ;;  %v1164_v49 = vunpack.c.l.s8.bf16 %v808_v2  ;;  %v1357_v9 = vcombine.high %v2904_v4, %v2904_v4  ;;  %v815_v2 = vld [vmem:[%s2674_s6 + $0x540] sm:$0xff] }
 0x159   : > { %1814 = vmatpush1.bf16.msra.mxu0 %v1143_v7  ;;  %1569 = vmatprep.subr.bf16.mxu1 %v954_v8  ;;  %v711_v7 = vld [vmem:[%s2674_s6 + $0x200] sm:$0xff] }
 0x15a   : > { %1815 = vmatprep.subr.bf16.mxu0 %v1146_v50  ;;  %v807_v8 = vld [vmem:[%s2674_s6 + $0x500] sm:$0xff]  ;;  %v1307_v50 = vcombine.high %v2901_v3, %v2901_v3  ;;  %v2922_v24 = vrot.slane %v1357_v9, %v2699_v46  ;;  %v1181_v9 = vunpack.c.h.s8.bf16 %v815_v2 }
 0x15c   : > { %1570 = vmatpush1.bf16.msra.mxu1 %v953_v11  ;;  %v1386_v11 = vcombine.high %v2858_v25, %v2858_v25  ;;  %v973_v25 = vunpack.c.h.s8.bf16 %v711_v7 }
 0x15d   : > { %1816 = vmatpush1.bf16.msra.mxu0 %v1145_v59  ;;  %1571 = vmatprep.subr.bf16.mxu1 %v956_v12  ;;  %v971_v59 = vunpack.c.l.s8.bf16 %v711_v7  ;;  %v1163_v12 = vunpack.c.l.s8.bf16 %v807_v8  ;;  %v722_v7 = vld [vmem:[%s2674_s6 + $0x258] sm:$0xff] }
 0x15e   : > { %1817 = vmatprep.subr.bf16.mxu0 %v1148_v60  ;;  %v974_v60 = vunpack.c.h.s8.bf16 %v712_v63  ;;  %v719_v63 = vld [vmem:[%s2674_s6 + $0x240] sm:$0xff] }
 0x160   : > { %1572 = vmatpush1.bf16.msra.mxu1 %v955_v15  ;;  %v810_v15 = vld [vmem:[%s2674_s6 + $0x518] sm:$0xff] }
 0x161   : > { %1818 = vmatpush1.bf16.msra.mxu0 %v1147_v16  ;;  %1573 = vmatprep.subr.bf16.mxu1 %v958_v17  ;;  %v2919_v16 = vrot.slane %v1307_v50, %v2699_v46  ;;  %v1165_v17 = vunpack.c.h.s8.bf16 %v807_v8  ;;  %v1168_v19 = vunpack.c.l.s8.bf16 %v810_v15  ;;  %v1170_v28 = vunpack.c.h.s8.bf16 %v810_v15  ;;  %v818_v8 = vld [vmem:[%s2674_s6 + $0x558] sm:$0xff] }
 0x162   : > { %1819 = vmatprep.subr.bf16.mxu0 %v1150_v18  ;;  %v976_v18 = vunpack.c.l.s8.bf16 %v714_v14  ;;  %v989_v50 = vunpack.c.h.s8.bf16 %v719_v63  ;;  %v1186_v15 = vunpack.c.h.s8.bf16 %v818_v8 }
 0x164   : > { %1574 = vmatpush1.bf16.msra.mxu1 %v957_v21  ;;  %v809_v21 = vld [vmem:[%s2674_s6 + $0x510] sm:$0xff] }
 0x165   : > { %1820 = vmatpush1.bf16.msra.mxu0 %v1149_v22  ;;  %1575 = vmatprep.subr.bf16.mxu1 %v960_v23  ;;  %v975_v22 = vunpack.c.l.s8.bf16 %v713_v20  ;;  %v1167_v23 = vunpack.c.l.s8.bf16 %v809_v21 }
 0x166   : > { %1821 = vmatprep.subr.bf16.mxu0 %v1152_v27  ;;  %v978_v27 = vunpack.c.h.s8.bf16 %v714_v14  ;;  %v994_v14 = vunpack.c.h.s8.bf16 %v722_v7 }
 0x168   : > { %1576 = vmatpush1.bf16.msra.mxu1 %v959_v30  ;;  %v812_v30 = vld [vmem:[%s2674_s6 + $0x528] sm:$0xff] }
 0x169   : > { %1822 = vmatpush1.bf16.msra.mxu0 %v1151_v31  ;;  %1577 = vmatprep.subr.bf16.mxu1 %v962_v32  ;;  %v977_v31 = vunpack.c.h.s8.bf16 %v713_v20  ;;  %v1169_v32 = vunpack.c.h.s8.bf16 %v809_v21  ;;  %v1172_v34 = vunpack.c.l.s8.bf16 %v812_v30  ;;  %v1174_v40 = vunpack.c.h.s8.bf16 %v812_v30 }
 0x16a   : > { %1823 = vmatprep.subr.bf16.mxu0 %v1154_v33  ;;  %v980_v33 = vunpack.c.l.s8.bf16 %v716_v29 }
 0x16c   : > { %1578 = vmatpush1.bf16.msra.mxu1 %v961_v35  ;;  %v811_v35 = vld [vmem:[%s2674_s6 + $0x520] sm:$0xff] }
 0x16d   : > { %1824 = vmatpush1.bf16.msra.mxu0 %v1153_v36  ;;  %1579 = vmatprep.subr.bf16.mxu1 %v964_v37  ;;  %v979_v36 = vunpack.c.l.s8.bf16 %v715_v43  ;;  %v1171_v37 = vunpack.c.l.s8.bf16 %v811_v35 }
 0x16e   : > { %1825 = vmatprep.subr.bf16.mxu0 %v1156_v38  ;;  %v982_v38 = vunpack.c.h.s8.bf16 %v716_v29 }
 0x170   : > { %1580 = vmatpush1.bf16.msra.mxu1 %v963_v0  ;;  %v814_v0 = vld [vmem:[%s2674_s6 + $0x538] sm:$0xff] }
 0x171   : > { %1826 = vmatpush1.bf16.msra.mxu0 %v1155_v41  ;;  %1581 = vmatprep.subr.bf16.mxu1 %v966_v42  ;;  %v981_v41 = vunpack.c.h.s8.bf16 %v715_v43  ;;  %v1173_v42 = vunpack.c.h.s8.bf16 %v811_v35  ;;  %v1176_v45 = vunpack.c.l.s8.bf16 %v814_v0  ;;  %v1178_v54 = vunpack.c.h.s8.bf16 %v814_v0 }
 0x172   : > { %1827 = vmatprep.subr.bf16.mxu0 %v1158_v44  ;;  %v984_v44 = vunpack.c.l.s8.bf16 %v718_v55 }
 0x174   : > { %1582 = vmatpush1.bf16.msra.mxu1 %v965_v48  ;;  %v813_v48 = vld [vmem:[%s2674_s6 + $0x530] sm:$0xff] }
 0x175   : > { %1828 = vmatpush1.bf16.msra.mxu0 %v1157_v51  ;;  %1583 = vmatprep.subr.bf16.mxu1 %v968_v52  ;;  %v983_v51 = vunpack.c.l.s8.bf16 %v717_v47  ;;  %v1175_v52 = vunpack.c.l.s8.bf16 %v813_v48 }
 0x176   : > { %1829 = vmatprep.subr.bf16.mxu0 %v1160_v53  ;;  %v986_v53 = vunpack.c.h.s8.bf16 %v718_v55 }
 0x178   : > { %1584 = vmatpush1.bf16.msra.mxu1 %v967_v57  ;;  %v985_v57 = vunpack.c.h.s8.bf16 %v717_v47 }
 0x179   : > { %1830 = vmatpush1.bf16.msra.mxu0 %v1159_v58  ;;  %1585 = vmatprep.subr.bf16.mxu1 %v970_v61  ;;  %v1177_v58 = vunpack.c.h.s8.bf16 %v813_v48  ;;  %v988_v61 = vunpack.c.l.s8.bf16 %v720_v1 }
 0x17a   : > { %1831 = vmatprep.subr.bf16.mxu0 %v1162_v62  ;;  %v1180_v62 = vunpack.c.l.s8.bf16 %v816_v56 }
 0x17c   : > { %1586 = vmatpush1.bf16.msra.mxu1 %v969_v26  ;;  %v987_v26 = vunpack.c.l.s8.bf16 %v719_v63  ;;  %v1389_v63 = vcombine.high %v2922_v24, %v2922_v24 }
 0x17d   : > { %1832 = vmatpush1.bf16.msra.mxu0 %v1161_v5  ;;  %1596 = vmatprep.subr.bf16.mxu1 %v972_v6  ;;  %v1179_v5 = vunpack.c.l.s8.bf16 %v815_v2  ;;  %v990_v6 = vunpack.c.h.s8.bf16 %v720_v1 }
 0x17e   : > { %1842 = vmatprep.subr.bf16.mxu0 %v1164_v49  ;;  %v1182_v49 = vunpack.c.h.s8.bf16 %v816_v56 }
 0x17f   : > { %1588 = vmatmul.mubr.bf16.vlgmr.msra.gmra.mrb[0].mxu1 %v1289_v10  ;;  %v992_v10 = vunpack.c.l.s8.bf16 %v722_v7 }
 0x180   : > { %1834 = vmatmul.mubr.bf16.vlgmr.msra.gmra.mrb[0].mxu0 %v1386_v11  ;;  %1597 = vmatpush1.bf16.msra.mxu1 %v971_v59  ;;  %v1184_v11 = vunpack.c.l.s8.bf16 %v818_v8  ;;  %v721_v59 = vld [vmem:[%s2674_s6 + $0x250] sm:$0xff] }
 0x181   : > { %1843 = vmatpush1.bf16.msra.mxu0 %v1163_v12  ;;  %1598 = vmatprep.subr.bf16.mxu1 %v974_v60  ;;  %v817_v12 = vld [vmem:[%s2674_s6 + $0x550] sm:$0xff]  ;;  %v991_v60 = vunpack.c.l.s8.bf16 %v721_v59 }
 0x182   : > { %1844 = vmatprep.subr.bf16.mxu0 %v1166_v13  ;;  %1628 = vmatprep.mubr.bf16.mxu1 %v2919_v16  ;;  %v1183_v13 = vunpack.c.l.s8.bf16 %v817_v12 }
 0x183   : > { %1874 = vmatprep.mubr.bf16.mxu0 %v2922_v24 }
 0x184   : > { %1599 = vmatpush1.bf16.msra.mxu1 %v973_v25  ;;  %v724_v25 = vld [vmem:[%s2674_s6 + $0x268] sm:$0xff] }
 0x185   : > { %1845 = vmatpush1.bf16.msra.mxu0 %v1165_v17  ;;  %1600 = vmatprep.subr.bf16.mxu1 %v976_v18  ;;  %v820_v17 = vld [vmem:[%s2674_s6 + $0x568] sm:$0xff]  ;;  %v993_v18 = vunpack.c.h.s8.bf16 %v721_v59  ;;  %v996_v20 = vunpack.c.l.s8.bf16 %v724_v25  ;;  %v998_v29 = vunpack.c.h.s8.bf16 %v724_v25 }
 0x186   : > { %1846 = vmatprep.subr.bf16.mxu0 %v1168_v19  ;;  %v1185_v19 = vunpack.c.h.s8.bf16 %v817_v12  ;;  %v1188_v21 = vunpack.c.l.s8.bf16 %v820_v17  ;;  %v1190_v30 = vunpack.c.h.s8.bf16 %v820_v17 }
 0x188   : > { %1601 = vmatpush1.bf16.msra.mxu1 %v975_v22  ;;  %v723_v22 = vld [vmem:[%s2674_s6 + $0x260] sm:$0xff] }
 0x189   : > { %1847 = vmatpush1.bf16.msra.mxu0 %v1167_v23  ;;  %1602 = vmatprep.subr.bf16.mxu1 %v978_v27  ;;  %v819_v23 = vld [vmem:[%s2674_s6 + $0x560] sm:$0xff]  ;;  %v995_v27 = vunpack.c.l.s8.bf16 %v723_v22 }
 0x18a   : > { %1848 = vmatprep.subr.bf16.mxu0 %v1170_v28  ;;  %v1187_v28 = vunpack.c.l.s8.bf16 %v819_v23 }
 0x18c   : > { %1603 = vmatpush1.bf16.msra.mxu1 %v977_v31  ;;  %v726_v31 = vld [vmem:[%s2674_s6 + $0x278] sm:$0xff] }
 0x18d   : > { %1849 = vmatpush1.bf16.msra.mxu0 %v1169_v32  ;;  %1604 = vmatprep.subr.bf16.mxu1 %v980_v33  ;;  %v822_v32 = vld [vmem:[%s2674_s6 + $0x578] sm:$0xff]  ;;  %v997_v33 = vunpack.c.h.s8.bf16 %v723_v22  ;;  %v1000_v43 = vunpack.c.l.s8.bf16 %v726_v31  ;;  %v1002_v55 = vunpack.c.h.s8.bf16 %v726_v31 }
 0x18e   : > { %1850 = vmatprep.subr.bf16.mxu0 %v1172_v34  ;;  %v1189_v34 = vunpack.c.h.s8.bf16 %v819_v23  ;;  %v1192_v35 = vunpack.c.l.s8.bf16 %v822_v32  ;;  %v1194_v0 = vunpack.c.h.s8.bf16 %v822_v32 }
 0x190   : > { %1605 = vmatpush1.bf16.msra.mxu1 %v979_v36  ;;  %v725_v36 = vld [vmem:[%s2674_s6 + $0x270] sm:$0xff] }
 0x191   : > { %1851 = vmatpush1.bf16.msra.mxu0 %v1171_v37  ;;  %1606 = vmatprep.subr.bf16.mxu1 %v982_v38  ;;  %v821_v37 = vld [vmem:[%s2674_s6 + $0x570] sm:$0xff]  ;;  %v999_v38 = vunpack.c.l.s8.bf16 %v725_v36 }
 0x192   : > { %1852 = vmatprep.subr.bf16.mxu0 %v1174_v40  ;;  %v1191_v40 = vunpack.c.l.s8.bf16 %v821_v37 }
 0x194   : > { %1607 = vmatpush1.bf16.msra.mxu1 %v981_v41  ;;  %v728_v41 = vld [vmem:[%s2674_s6 + $0x288] sm:$0xff] }
 0x195   : > { %1853 = vmatpush1.bf16.msra.mxu0 %v1173_v42  ;;  %1608 = vmatprep.subr.bf16.mxu1 %v984_v44  ;;  %v824_v42 = vld [vmem:[%s2674_s6 + $0x588] sm:$0xff]  ;;  %v1001_v44 = vunpack.c.h.s8.bf16 %v725_v36  ;;  %v1004_v47 = vunpack.c.l.s8.bf16 %v728_v41 }
 0x196   : > { %1854 = vmatprep.subr.bf16.mxu0 %v1176_v45  ;;  %v1193_v45 = vunpack.c.h.s8.bf16 %v821_v37  ;;  %v1196_v48 = vunpack.c.l.s8.bf16 %v824_v42 }
 0x198   : > { %1609 = vmatpush1.bf16.msra.mxu1 %v983_v51  ;;  %v727_v51 = vld [vmem:[%s2674_s6 + $0x280] sm:$0xff] }
 0x199   : > { %1855 = vmatpush1.bf16.msra.mxu0 %v1175_v52  ;;  %1610 = vmatprep.subr.bf16.mxu1 %v986_v53  ;;  %v823_v52 = vld [vmem:[%s2674_s6 + $0x580] sm:$0xff]  ;;  %v2958_v53 = vrot.slane %v2901_v3, %v2699_v46  ;;  %v1003_v1 = vunpack.c.l.s8.bf16 %v727_v51  ;;  %v1339_v3 = vcombine.high %v2919_v16, %v2919_v16 }
 0x19a   : > { %1856 = vmatprep.subr.bf16.mxu0 %v1178_v54  ;;  %v2962_v54 = vrot.slane %v2904_v4, %v2699_v46  ;;  %v1195_v56 = vunpack.c.l.s8.bf16 %v823_v52  ;;  %v1005_v4 = vunpack.c.h.s8.bf16 %v727_v51  ;;  %v1197_v2 = vunpack.c.h.s8.bf16 %v823_v52 }
 0x19c   : > { %1611 = vmatpush1.bf16.msra.mxu1 %v985_v57  ;;  %v1006_v57 = vunpack.c.h.s8.bf16 %v728_v41 }
 0x19d   : > { %1857 = vmatpush1.bf16.msra.mxu0 %v1177_v58  ;;  %1612 = vmatprep.subr.bf16.mxu1 %v988_v61  ;;  %v1198_v58 = vunpack.c.h.s8.bf16 %v824_v42  ;;  %v730_v61 = vld [vmem:[%s2674_s6 + $0x298] sm:$0xff] }
 0x19e   : > { %1858 = vmatprep.subr.bf16.mxu0 %v1180_v62  ;;  %v826_v62 = vld [vmem:[%s2674_s6 + $0x598] sm:$0xff]  ;;  %v1010_v7 = vunpack.c.h.s8.bf16 %v730_v61 }
 0x19f   : > { %v1202_v8 = vunpack.c.h.s8.bf16 %v826_v62 }
 0x1a0   : > { %1613 = vmatpush1.bf16.msra.mxu1 %v987_v26  ;;  %v1008_v26 = vunpack.c.l.s8.bf16 %v730_v61 }
 0x1a1   : > { %1859 = vmatpush1.bf16.msra.mxu0 %v1179_v5  ;;  %1614 = vmatprep.subr.bf16.mxu1 %v990_v6  ;;  %v1200_v5 = vunpack.c.l.s8.bf16 %v826_v62  ;;  %v729_v6 = vld [vmem:[%s2674_s6 + $0x290] sm:$0xff] }
 0x1a2   : > { %1860 = vmatprep.subr.bf16.mxu0 %v1182_v49  ;;  %v825_v49 = vld [vmem:[%s2674_s6 + $0x590] sm:$0xff]  ;;  %v1007_v16 = vunpack.c.l.s8.bf16 %v729_v6 }
 0x1a3   : > { %v1199_v24 = vunpack.c.l.s8.bf16 %v825_v49 }
 0x1a4   : > { %1615 = vmatpush1.bf16.msra.mxu1 %v989_v50  ;;  %v732_v50 = vld [vmem:[%s2674_s6 + $0x2a8] sm:$0xff] }
 0x1a5   : > { %1861 = vmatpush1.bf16.msra.mxu0 %v1181_v9  ;;  %1616 = vmatprep.subr.bf16.mxu1 %v992_v10  ;;  %v828_v9 = vld [vmem:[%s2674_s6 + $0x5a8] sm:$0xff]  ;;  %v1009_v10 = vunpack.c.h.s8.bf16 %v729_v6  ;;  %v1012_v59 = vunpack.c.l.s8.bf16 %v732_v50  ;;  %v1014_v25 = vunpack.c.h.s8.bf16 %v732_v50  ;;  %v739_v6 = vld [vmem:[%s2674_s6 + $0x2e0] sm:$0xff]  ;;  %v742_v50 = vld [vmem:[%s2674_s6 + $0x2f8] sm:$0xff] }
 0x1a6   : > { %1862 = vmatprep.subr.bf16.mxu0 %v1184_v11  ;;  %v1201_v11 = vunpack.c.h.s8.bf16 %v825_v49  ;;  %v1204_v12 = vunpack.c.l.s8.bf16 %v828_v9  ;;  %v1206_v17 = vunpack.c.h.s8.bf16 %v828_v9  ;;  %v835_v49 = vld [vmem:[%s2674_s6 + $0x5e0] sm:$0xff]  ;;  %v838_v9 = vld [vmem:[%s2674_s6 + $0x5f8] sm:$0xff] }
 0x1a8   : > { %1617 = vmatpush1.bf16.msra.mxu1 %v991_v60  ;;  %v731_v60 = vld [vmem:[%s2674_s6 + $0x2a0] sm:$0xff] }
 0x1a9   : > { %1863 = vmatpush1.bf16.msra.mxu0 %v1183_v13  ;;  %1618 = vmatprep.subr.bf16.mxu1 %v994_v14  ;;  %v827_v13 = vld [vmem:[%s2674_s6 + $0x5a0] sm:$0xff]  ;;  %v1011_v14 = vunpack.c.l.s8.bf16 %v731_v60 }
 0x1aa   : > { %1864 = vmatprep.subr.bf16.mxu0 %v1186_v15  ;;  %v1203_v15 = vunpack.c.l.s8.bf16 %v827_v13 }
 0x1ac   : > { %1619 = vmatpush1.bf16.msra.mxu1 %v993_v18  ;;  %v734_v18 = vld [vmem:[%s2674_s6 + $0x2b8] sm:$0xff] }
 0x1ad   : > { %1865 = vmatpush1.bf16.msra.mxu0 %v1185_v19  ;;  %1620 = vmatprep.subr.bf16.mxu1 %v996_v20  ;;  %v830_v19 = vld [vmem:[%s2674_s6 + $0x5b8] sm:$0xff]  ;;  %v1013_v20 = vunpack.c.h.s8.bf16 %v731_v60  ;;  %v1016_v22 = vunpack.c.l.s8.bf16 %v734_v18  ;;  %v1018_v31 = vunpack.c.h.s8.bf16 %v734_v18  ;;  %v741_v60 = vld [vmem:[%s2674_s6 + $0x2f0] sm:$0xff]  ;;  %v840_v18 = vld [vmem:[%s2674_s6 + $0x608] sm:$0xff] }
 0x1ae   : > { %1866 = vmatprep.subr.bf16.mxu0 %v1188_v21  ;;  %v1205_v21 = vunpack.c.h.s8.bf16 %v827_v13  ;;  %v1208_v23 = vunpack.c.l.s8.bf16 %v830_v19  ;;  %v1210_v32 = vunpack.c.h.s8.bf16 %v830_v19  ;;  %v837_v13 = vld [vmem:[%s2674_s6 + $0x5f0] sm:$0xff]  ;;  %v1033_v19 = vunpack.c.h.s8.bf16 %v741_v60 }
 0x1b0   : > { %1621 = vmatpush1.bf16.msra.mxu1 %v995_v27  ;;  %v733_v27 = vld [vmem:[%s2674_s6 + $0x2b0] sm:$0xff] }
 0x1b1   : > { %1867 = vmatpush1.bf16.msra.mxu0 %v1187_v28  ;;  %1622 = vmatprep.subr.bf16.mxu1 %v998_v29  ;;  %v829_v28 = vld [vmem:[%s2674_s6 + $0x5b0] sm:$0xff]  ;;  %v1015_v29 = vunpack.c.l.s8.bf16 %v733_v27 }
 0x1b2   : > { %1868 = vmatprep.subr.bf16.mxu0 %v1190_v30  ;;  %v1207_v30 = vunpack.c.l.s8.bf16 %v829_v28 }
 0x1b4   : > { %1623 = vmatpush1.bf16.msra.mxu1 %v997_v33  ;;  %v736_v33 = vld [vmem:[%s2674_s6 + $0x2c8] sm:$0xff] }
 0x1b5   : > { %1869 = vmatpush1.bf16.msra.mxu0 %v1189_v34  ;;  %1624 = vmatprep.subr.bf16.mxu1 %v1000_v43  ;;  %v832_v34 = vld [vmem:[%s2674_s6 + $0x5c8] sm:$0xff]  ;;  %v1017_v43 = vunpack.c.h.s8.bf16 %v733_v27  ;;  %v1020_v36 = vunpack.c.l.s8.bf16 %v736_v33  ;;  %v1022_v41 = vunpack.c.h.s8.bf16 %v736_v33  ;;  %v1387_v27 = vcombine.high %v2962_v54, %v2962_v54 }
 0x1b6   : > { %1870 = vmatprep.subr.bf16.mxu0 %v1192_v35  ;;  %v1209_v35 = vunpack.c.h.s8.bf16 %v829_v28  ;;  %v1212_v37 = vunpack.c.l.s8.bf16 %v832_v34  ;;  %v1214_v42 = vunpack.c.h.s8.bf16 %v832_v34 }
 0x1b8   : > { %1625 = vmatpush1.bf16.msra.mxu1 %v999_v38  ;;  %v735_v38 = vld [vmem:[%s2674_s6 + $0x2c0] sm:$0xff] }
 0x1b9   : > { %1871 = vmatpush1.bf16.msra.mxu0 %v1191_v40  ;;  %1626 = vmatprep.subr.bf16.mxu1 %v1002_v55  ;;  %v831_v40 = vld [vmem:[%s2674_s6 + $0x5c0] sm:$0xff]  ;;  %v1019_v55 = vunpack.c.l.s8.bf16 %v735_v38 }
 0x1ba   : > { %1872 = vmatprep.subr.bf16.mxu0 %v1194_v0  ;;  %v1211_v0 = vunpack.c.l.s8.bf16 %v831_v40 }
 0x1bc   : > { %1627 = vmatpush1.bf16.msra.mxu1 %v1001_v44  ;;  %v738_v44 = vld [vmem:[%s2674_s6 + $0x2d8] sm:$0xff] }
 0x1bd   : > { %1873 = vmatpush1.bf16.msra.mxu0 %v1193_v45  ;;  %1637 = vmatprep.subr.bf16.mxu1 %v1004_v47  ;;  %v834_v45 = vld [vmem:[%s2674_s6 + $0x5d8] sm:$0xff]  ;;  %v1021_v47 = vunpack.c.h.s8.bf16 %v735_v38  ;;  %v1024_v51 = vunpack.c.l.s8.bf16 %v738_v44  ;;  %v1026_v61 = vunpack.c.h.s8.bf16 %v738_v44  ;;  %v1979_v44 = vld [vmem:[%s639_s28] sm:$0x3] }
 0x1be   : > { %1883 = vmatprep.subr.bf16.mxu0 %v1196_v48  ;;  %v1213_v48 = vunpack.c.h.s8.bf16 %v831_v40  ;;  %v1216_v52 = vunpack.c.l.s8.bf16 %v834_v45  ;;  %v1218_v62 = vunpack.c.h.s8.bf16 %v834_v45 }
 0x1bf   : > { %1629 = vmatmul.mubr.bf16.vlgmr.msra.gmra.mrb[0].mxu1 %v2958_v53 }
 0x1c0   : > { %1875 = vmatmul.mubr.bf16.vlgmr.msra.gmra.mrb[0].mxu0 %v2962_v54  ;;  %1638 = vmatpush1.bf16.msra.mxu1 %v1003_v1  ;;  %v737_v1 = vld [vmem:[%s2674_s6 + $0x2d0] sm:$0xff] }
 0x1c1   : > { %1884 = vmatpush1.bf16.msra.mxu0 %v1195_v56  ;;  %1639 = vmatprep.subr.bf16.mxu1 %v1006_v57  ;;  %v833_v56 = vld [vmem:[%s2674_s6 + $0x5d0] sm:$0xff]  ;;  %v1023_v57 = vunpack.c.l.s8.bf16 %v737_v1 }
 0x1c2   : > { %1885 = vmatprep.subr.bf16.mxu0 %v1198_v58  ;;  %1669 = vmatprep.mubr.bf16.mxu1 %v1339_v3  ;;  %v1215_v58 = vunpack.c.l.s8.bf16 %v833_v56  ;;  %v740_v3 = vld [vmem:[%s2674_s6 + $0x2e8] sm:$0xff] }
 0x1c3   : > { %1915 = vmatprep.mubr.bf16.mxu0 %v1389_v63  ;;  %v836_v63 = vld [vmem:[%s2674_s6 + $0x5e8] sm:$0xff] }
 0x1c4   : > { %1640 = vmatpush1.bf16.msra.mxu1 %v1005_v4  ;;  %v1025_v4 = vunpack.c.h.s8.bf16 %v737_v1 }
 0x1c5   : > { %1886 = vmatpush1.bf16.msra.mxu0 %v1197_v2  ;;  %1641 = vmatprep.subr.bf16.mxu1 %v1008_v26  ;;  %v1217_v2 = vunpack.c.h.s8.bf16 %v833_v56  ;;  %v1028_v26 = vunpack.c.l.s8.bf16 %v740_v3 }
 0x1c6   : > { %1887 = vmatprep.subr.bf16.mxu0 %v1200_v5  ;;  %v1220_v5 = vunpack.c.l.s8.bf16 %v836_v63 }
 0x1c8   : > { %1642 = vmatpush1.bf16.msra.mxu1 %v1007_v16  ;;  %v1027_v16 = vunpack.c.l.s8.bf16 %v739_v6 }
 0x1c9   : > { %1888 = vmatpush1.bf16.msra.mxu0 %v1199_v24  ;;  %1643 = vmatprep.subr.bf16.mxu1 %v1010_v7  ;;  %v1219_v24 = vunpack.c.l.s8.bf16 %v835_v49  ;;  %v1030_v7 = vunpack.c.h.s8.bf16 %v740_v3 }
 0x1ca   : > { %1889 = vmatprep.subr.bf16.mxu0 %v1202_v8  ;;  %v1222_v8 = vunpack.c.h.s8.bf16 %v836_v63 }
 0x1cc   : > { %1644 = vmatpush1.bf16.msra.mxu1 %v1009_v10  ;;  %v1029_v10 = vunpack.c.h.s8.bf16 %v739_v6 }
 0x1cd   : > { %1890 = vmatpush1.bf16.msra.mxu0 %v1201_v11  ;;  %1645 = vmatprep.subr.bf16.mxu1 %v1012_v59  ;;  %v1221_v11 = vunpack.c.h.s8.bf16 %v835_v49  ;;  %v1032_v59 = vunpack.c.l.s8.bf16 %v742_v50 }
 0x1ce   : > { %1891 = vmatprep.subr.bf16.mxu0 %v1204_v12  ;;  %v1224_v12 = vunpack.c.l.s8.bf16 %v838_v9 }
 0x1d0   : > { %1646 = vmatpush1.bf16.msra.mxu1 %v1011_v14  ;;  %v1031_v14 = vunpack.c.l.s8.bf16 %v741_v60 }
 0x1d1   : > { %1892 = vmatpush1.bf16.msra.mxu0 %v1203_v15  ;;  %1647 = vmatprep.subr.bf16.mxu1 %v1014_v25  ;;  %v1223_v15 = vunpack.c.l.s8.bf16 %v837_v13  ;;  %v1034_v25 = vunpack.c.h.s8.bf16 %v742_v50 }
 0x1d2   : > { %1893 = vmatprep.subr.bf16.mxu0 %v1206_v17  ;;  %v1226_v17 = vunpack.c.h.s8.bf16 %v838_v9 }
 0x1d4   : > { %1648 = vmatpush1.bf16.msra.mxu1 %v1013_v20  ;;  %v1225_v20 = vunpack.c.h.s8.bf16 %v837_v13 }
 0x1d5   : > { %1894 = vmatpush1.bf16.msra.mxu0 %v1205_v21  ;;  %1649 = vmatprep.subr.bf16.mxu1 %v1016_v22  ;;  %v1228_v21 = vunpack.c.l.s8.bf16 %v840_v18  ;;  %v839_v22 = vld [vmem:[%s2674_s6 + $0x600] sm:$0xff] }
 0x1d6   : > { %1895 = vmatprep.subr.bf16.mxu0 %v1208_v23  ;;  %v1337_v23 = vcombine.high %v2958_v53, %v2958_v53  ;;  %v1227_v28 = vunpack.c.l.s8.bf16 %v839_v22  ;;  %v841_v53 = vld [vmem:[%s2674_s6 + $0x610] sm:$0xff] }
 0x1d7   : > { %v1231_v34 = vunpack.c.l.s8.bf16 %v841_v53 }
 0x1d8   : > { %1650 = vmatpush1.bf16.msra.mxu1 %v1015_v29  ;;  %v1230_v29 = vunpack.c.h.s8.bf16 %v840_v18 }
 0x1d9   : > { %1896 = vmatpush1.bf16.msra.mxu0 %v1207_v30  ;;  %1651 = vmatprep.subr.bf16.mxu1 %v1018_v31  ;;  %v842_v30 = vld [vmem:[%s2674_s6 + $0x618] sm:$0xff]  ;;  %v1229_v31 = vunpack.c.h.s8.bf16 %v839_v22 }
 0x1da   : > { %1897 = vmatprep.subr.bf16.mxu0 %v1210_v32  ;;  %v2214_v32 = vmov 0   ;;  %v1232_v33 = vunpack.c.l.s8.bf16 %v842_v30  ;;  %v1234_v54 = vunpack.c.h.s8.bf16 %v842_v30 }
 0x1dc   : > { %1652 = vmatpush1.bf16.msra.mxu1 %v1017_v43  ;;  %v1233_v43 = vunpack.c.h.s8.bf16 %v841_v53 }
 0x1dd   : > { %1898 = vmatpush1.bf16.msra.mxu0 %v1209_v35  ;;  %1653 = vmatprep.subr.bf16.mxu1 %v1020_v36  ;;  %v2102_v35 = vld.sshfl [vmem:[%s3039_s0 + $0x18] sm:$0x1 pattern:$0x75316420] }
 0x1de   : > { %1899 = vmatprep.subr.bf16.mxu0 %v1212_v37  ;;  %v1403_v36 = vrot.slane %v2102_v35, %v2699_v46 }
 0x1e0   : > { %1654 = vmatpush1.bf16.msra.mxu1 %v1019_v55 }
 0x1e1   : > { %1900 = vmatpush1.bf16.msra.mxu0 %v1211_v0  ;;  %1655 = vmatprep.subr.bf16.mxu1 %v1022_v41  ;;  %v1969_v0 = vsub.s32 0, %v2691_v39  ;;  %v1965_v41 = vld [vmem:[%s634_s25] sm:$0x3] }
 0x1e2   : > { %1901 = vmatprep.subr.bf16.mxu0 %v1214_v42  ;;  %v1973_v42 = vsub.s32 1, %v2691_v39 }
 0x1e3   : > { %v1970_v45 = vrot.slane %v1965_v41, %v1969_v0 }
 0x1e4   : > { %1656 = vmatpush1.bf16.msra.mxu1 %v1021_v47 }
 0x1e5   : > { %1902 = vmatpush1.bf16.msra.mxu0 %v1213_v48  ;;  %1657 = vmatprep.subr.bf16.mxu1 %v1024_v51  ;;  %v1974_v48 = vrot.slane %v1965_v41, %v1973_v42 }
 0x1e6   : > { %1903 = vmatprep.subr.bf16.mxu0 %v1216_v52  ;;  %v1984_v52 = vrot.slane %v1979_v44, %v1969_v0 }
 0x1e8   : > { %1658 = vmatpush1.bf16.msra.mxu1 %v1023_v57  ;;  %v1988_v57 = vrot.slane %v1979_v44, %v1973_v42 }
 0x1e9   : > { %1904 = vmatpush1.bf16.msra.mxu0 %v1215_v58  ;;  %1659 = vmatprep.subr.bf16.mxu1 %v1026_v61 }
 0x1ea   : > { %1905 = vmatprep.subr.bf16.mxu0 %v1218_v62 }
 0x1ec   : > { %1660 = vmatpush1.bf16.msra.mxu1 %v1025_v4 }
 0x1ed   : > { %1906 = vmatpush1.bf16.msra.mxu0 %v1217_v2  ;;  %1661 = vmatprep.subr.bf16.mxu1 %v1028_v26  ;;  %v2215_v2 = vmov -1.0  }
 0x1ee   : > { %1907 = vmatprep.subr.bf16.mxu0 %v1220_v5 }
 0x1f0   : > { %1662 = vmatpush1.bf16.msra.mxu1 %v1027_v16 }
 0x1f1   : > { %1908 = vmatpush1.bf16.msra.mxu0 %v1219_v24  ;;  %1663 = vmatprep.subr.bf16.mxu1 %v1030_v7 }
 0x1f2   : > { %1909 = vmatprep.subr.bf16.mxu0 %v1222_v8 }
 0x1f4   : > { %1664 = vmatpush1.bf16.msra.mxu1 %v1029_v10 }
 0x1f5   : > { %1910 = vmatpush1.bf16.msra.mxu0 %v1221_v11  ;;  %1665 = vmatprep.subr.bf16.mxu1 %v1032_v59 }
 0x1f6   : > { %1911 = vmatprep.subr.bf16.mxu0 %v1224_v12 }
 0x1f8   : > { %1666 = vmatpush1.bf16.msra.mxu1 %v1031_v14 }
 0x1f9   : > { %1912 = vmatpush1.bf16.msra.mxu0 %v1223_v15  ;;  %1667 = vmatprep.subr.bf16.mxu1 %v1034_v25 }
 0x1fa   : > { %1913 = vmatprep.subr.bf16.mxu0 %v1226_v17 }
 0x1fc   : > { %1668 = vmatpush1.bf16.msra.mxu1 %v1033_v19 }
 0x1fd   : > { %1914 = vmatpush1.bf16.msra.mxu0 %v1225_v20 }
 0x1fe   : > { %1924 = vmatprep.subr.bf16.mxu0 %v1228_v21 }
 0x1ff   : > { %1670 = vmatmul.mubr.bf16.vlgmr.msra.gmra.mrb[0].mxu1 %v1337_v23 }
 0x200   : > { %1916 = vmatmul.mubr.bf16.vlgmr.msra.gmra.mrb[0].mxu0 %v1387_v27 }
 0x201   : > { %1925 = vmatpush1.bf16.msra.mxu0 %v1227_v28  ;;  %1956 = vmatprep.mubr.bf16.mxu0 %v2214_v32 }
 0x202   : > { %1926 = vmatprep.subr.bf16.mxu0 %v1230_v29 }
 0x205   : > { %1927 = vmatpush1.bf16.msra.mxu0 %v1229_v31 }
 0x206   : > { %1928 = vmatprep.subr.bf16.mxu0 %v1232_v33 }
 0x209   : > { %1929 = vmatpush1.bf16.msra.mxu0 %v1231_v34 }
 0x20a   : > { %1930 = vmatprep.subr.bf16.mxu0 %v1234_v54 }
 0x20d   : > { %1931 = vmatpush1.bf16.msra.mxu0 %v1233_v43 }
 0x210   : > { %2103 = vmatmul.mubr.msk.bf16.vlgmr.msra.gmra.mrb[0].mxu0 %vm1428_vm0, %v1403_v36 }
 0x2d2   : > { %v1671_v37 = vpop.f32.mrb[0].mxu1 }
 0x2d3   : > { %v1673_v38 = vpop.f32.mrb[1].mxu1 }
 0x2d4   : > { %v1675_v40 = vpop.f32.mrb[2].mxu1 }
 0x2d5   : > { %v1676_v55 = vpop.f32.mrb[3].mxu1 }
 0x2e3   : > { %v1958_v47 = vpop.f32.mrb[0].mxu0 }
 0x2e4   : > { %v2109_v51 = vadd.f32 %v1958_v47, %v1671_v37  ;;  %v1960_v1 = vpop.f32.mrb[1].mxu0 }
 0x2e5   : > { %v2110_v56 = vadd.f32 %v1960_v1, %v1673_v38  ;;  %v1962_v58 = vpop.f32.mrb[2].mxu0 }
 0x2e6   : > { %v1977_v61 = vmul.f32 %v2109_v51, %v1970_v45  ;;  %v1963_v62 = vpop.f32.mrb[3].mxu0 }
 0x2e7   : > { %v1978_v3 = vmul.f32 %v2110_v56, %v1974_v48 }
 0x2e8   : > { %v1991_v63 = vadd.f32 %v1984_v52, %v1977_v61 }
 0x2e9   : > { %v1992_v4 = vadd.f32 %v1988_v57, %v1978_v3 }
 0x2ea   : > { %vm1993_vm1 = vcmp.ge.f32.partialorder %v1991_v63, 0.0 }
 0x2eb   : > { %v1995_v26 = vsel %vm1993_vm1, 1.0, %v2215_v2  ;;  %vm1994_vm2 = vcmp.ge.f32.partialorder %v1992_v4, 0.0 }
 0x2ec   : > { %v1996_v39 = vsel %vm1994_vm2, 1.0, %v2215_v2 }
 0x2ed   : > { %v2104_v5 = vpack.c.bf16 %v1996_v39, %v1995_v26 }
 0x2ef   : > { %v2008_v6 = vrot.slane %v2104_v5, %v2699_v46 }
 0x2f1   : > { %2105 = vst.sshfl [vmem:[%s644_s29] sm:$0x5 pattern:$0x73625140] %v2008_v6 }
 0x2f2 PF: > { %p11_p9 = scmp.ge.s32.totalorder %s2258_s19, 10   ;;  %s3044_s15 = smov %s2207_s16 }
 0x2f3   : > { %s3045_s16 = smov %s2267_s22  ;;  %s3046_s17 = smov %s2258_s19 }
 0x2f4   :  { %13 = sbr.rel (!%p11_p9) target bundleno = 2 (0x2), region = 100 }

// kernel: bnn_fmnist_forward.5
= control target key start
LH: loop header
LB: loop body
LE: loop exit
PB: predicated region body
PF: predicated region fallthrough
CT: control target
= control target key end

     0   :  { %vm430_vm0 = vcmask 523264   ;;  %vm1676_vm2 = vcmask 519168   ;;  %vm1683_vm8 = vcmask 516096   ;;  %vm1684_vm9 = vsmask.f32 256  ;;  %s6061_s4 = inlined_call_operand.vmem [shape: bf16[576,64], index: 4, kind: input, shape index: {}]   ;;  %s6062_s0 = inlined_call_operand.vmem [shape: bf16[2,49,576], index: 0, kind: input, shape index: {}]   ;;  %s6063_s1 = inlined_call_operand.vmem [shape: bf16[2,49,576], index: 1, kind: input, shape index: {}]   ;;  %s6064_s2 = inlined_call_operand.vmem [shape: bf16[2,49,576], index: 2, kind: input, shape index: {}]   ;;  %s6065_s3 = inlined_call_operand.vmem [shape: bf16[2,49,576], index: 3, kind: input, shape index: {}]   ;;  %s6066_s5 = inlined_call_operand.vmem [shape: f32[1,64], index: 5, kind: input, shape index: {}]   ;;  %s6067_s6 = inlined_call_operand.vmem [shape: f32[1,64], index: 6, kind: input, shape index: {}]   ;;  %s6068_s7 = inlined_call_operand.vmem [shape: bf16[2,49,64], index: 7, kind: output, shape index: {}]  }
   0x1   :  { %v4560_v0 = vld [vmem:[%s6061_s4 + $0x40] sm:$0xff]   ;;  %v4583_v4 = vld [vmem:[%s6061_s4 + $0x48] sm:$0xff]   ;;  %v4607_v8 = vld [vmem:[%s6061_s4 + $0x50] sm:$0xff]  }
   0x2   :  { %v4565_v1 = vld [vmem:[%s6061_s4 + $0xc0] sm:$0xff]   ;;  %3403 = vmatprep.subr.bf16.mxu0 %v4560_v0  ;;  %v4589_v5 = vld [vmem:[%s6061_s4 + $0xc8] sm:$0xff]   ;;  %v4613_v9 = vld [vmem:[%s6061_s4 + $0xd0] sm:$0xff]  }
   0x3   :  { %v4571_v2 = vld [vmem:[%s6061_s4] sm:$0xff]   ;;  %3443 = vmatprep.subr.bf16.mxu1 %v4565_v1  ;;  %v4595_v6 = vld [vmem:[%s6061_s4 + $0x8] sm:$0xff]   ;;  %v4619_v10 = vld [vmem:[%s6061_s4 + $0x10] sm:$0xff]  }
   0x4   :  { %v4577_v3 = vld [vmem:[%s6061_s4 + $0x80] sm:$0xff]   ;;  %3404 = vmatpush3.bf16.msra.mxu0 %v4571_v2  ;;  %v4601_v7 = vld [vmem:[%s6061_s4 + $0x88] sm:$0xff]   ;;  %v4625_v11 = vld [vmem:[%s6061_s4 + $0x90] sm:$0xff]  }
   0x5   :  { %3444 = vmatpush3.bf16.msra.mxu1 %v4577_v3  ;;  %3405 = vmatprep.subr.bf16.mxu0 %v4583_v4  ;;  %v4631_v12 = vld [vmem:[%s6061_s4 + $0x58] sm:$0xff]   ;;  %v4655_v16 = vld [vmem:[%s6061_s4 + $0x60] sm:$0xff]   ;;  %v4679_v20 = vld [vmem:[%s6061_s4 + $0x68] sm:$0xff]  }
   0x6   :  { %3445 = vmatprep.subr.bf16.mxu1 %v4589_v5  ;;  %v4637_v13 = vld [vmem:[%s6061_s4 + $0xd8] sm:$0xff]   ;;  %v4661_v17 = vld [vmem:[%s6061_s4 + $0xe0] sm:$0xff]   ;;  %v4685_v21 = vld [vmem:[%s6061_s4 + $0xe8] sm:$0xff]  }
   0x7   :  { %v4643_v14 = vld [vmem:[%s6061_s4 + $0x18] sm:$0xff]   ;;  %v4667_v18 = vld [vmem:[%s6061_s4 + $0x20] sm:$0xff]   ;;  %v4691_v22 = vld [vmem:[%s6061_s4 + $0x28] sm:$0xff]  }
   0x8   :  { %3406 = vmatpush3.bf16.msra.mxu0 %v4595_v6  ;;  %v4649_v15 = vld [vmem:[%s6061_s4 + $0x98] sm:$0xff]   ;;  %v4673_v19 = vld [vmem:[%s6061_s4 + $0xa0] sm:$0xff]   ;;  %v4697_v23 = vld [vmem:[%s6061_s4 + $0xa8] sm:$0xff]  }
   0x9   :  { %3446 = vmatpush3.bf16.msra.mxu1 %v4601_v7  ;;  %3407 = vmatprep.subr.bf16.mxu0 %v4607_v8  ;;  %v4703_v24 = vld [vmem:[%s6061_s4 + $0x70] sm:$0xff]   ;;  %v4727_v28 = vld [vmem:[%s6061_s4 + $0x78] sm:$0xff]   ;;  %v4273_v35 = vld [vmem:[%s6062_s0 + $0xc] ss:$20 sps:$4 sm:$0xff]  }
   0xa   :  { %3447 = vmatprep.subr.bf16.mxu1 %v4613_v9  ;;  %v4709_v25 = vld [vmem:[%s6061_s4 + $0xf0] sm:$0xff]   ;;  %v4733_v29 = vld [vmem:[%s6061_s4 + $0xf8] sm:$0xff]   ;;  %v4765_v36 = vld [vmem:[%s6061_s4 + $0x100] sm:$0xff]   ;;  %539 = vmatprep.mubr.bf16.mxu1 %v4273_v35 }
   0xb   :  { %v4715_v26 = vld [vmem:[%s6061_s4 + $0x30] sm:$0xff]   ;;  %v4739_v30 = vld [vmem:[%s6061_s4 + $0x38] sm:$0xff]   ;;  %v4275_v37 = vld [vmem:[%s6062_s0 + $0x2c] ss:$20 sps:$4 sm:$0xff]  }
   0xc   :  { %3408 = vmatpush3.bf16.msra.mxu0 %v4619_v10  ;;  %v4721_v27 = vld [vmem:[%s6061_s4 + $0xb0] sm:$0xff]   ;;  %v4745_v31 = vld [vmem:[%s6061_s4 + $0xb8] sm:$0xff]   ;;  %v4780_v39 = vld [vmem:[%s6061_s4 + $0x108] sm:$0xff]  }
   0xd   :  { %3448 = vmatpush3.bf16.msra.mxu1 %v4625_v11  ;;  %3409 = vmatprep.subr.bf16.mxu0 %v4631_v12  ;;  %v4268_v32 = vld [vmem:[%s6062_s0] ss:$20 sps:$4 sm:$0xff]   ;;  %v4270_v33 = vld [vmem:[%s6062_s0 + $0x4] ss:$20 sps:$4 sm:$0xff]   ;;  %v4271_v34 = vld [vmem:[%s6062_s0 + $0x8] ss:$20 sps:$4 sm:$0xff]  }
   0xe   :  { %3449 = vmatprep.subr.bf16.mxu1 %v4637_v13  ;;  %475 = vmatprep.mubr.bf16.mxu0 %v4270_v33  ;;  %v4277_v38 = vld [vmem:[%s6062_s0 + $0x34] ss:$20 sps:$4 sm:$0xff]   ;;  %v4280_v41 = vld [vmem:[%s6062_s0 + $0x30] ss:$20 sps:$4 sm:$0xff]   ;;  %v4807_v45 = vld [vmem:[%s6061_s4 + $0x118] sm:$0xff]  }
   0xf   :  { %v4279_v40 = vld [vmem:[%s6062_s0 + $0x28] ss:$20 sps:$4 sm:$0xff]   ;;  %v4800_v44 = vld [vmem:[%s6061_s4 + $0x110] sm:$0xff]   ;;  %v120_v47 = vld [vmem:[%s6062_s0 + $0x80] sm:$0x11] }
  0x10   :  { %3410 = vmatpush3.bf16.msra.mxu0 %v4643_v14  ;;  %v4282_v42 = vld [vmem:[%s6062_s0 + $0x54] ss:$20 sps:$4 sm:$0xff]   ;;  %v4284_v43 = vld [vmem:[%s6062_s0 + $0x5c] ss:$20 sps:$4 sm:$0xff]   ;;  %v4287_v49 = vld [vmem:[%s6062_s0 + $0x58] ss:$20 sps:$4 sm:$0xff]   ;;  %v3071_v51 = vcombine.high %v120_v47, %v120_v47  ;;  %v3070_v53 = vcombine.low %v120_v47, %v120_v47 }
  0x11   :  { %3450 = vmatpush3.bf16.msra.mxu1 %v4649_v15  ;;  %3411 = vmatprep.subr.bf16.mxu0 %v4655_v16  ;;  %v119_v46 = vld [vmem:[%s6062_s0 + $0x78] sm:$0x11]  ;;  %v4286_v48 = vld [vmem:[%s6062_s0 + $0x50] ss:$20 sps:$4 sm:$0xff]   ;;  %v4295_v57 = vld [vmem:[%s6063_s1] ss:$20 sps:$4 sm:$0xff]  }
  0x12   :  { %3451 = vmatprep.subr.bf16.mxu1 %v4661_v17  ;;  %v3069_v50 = vcombine.high %v119_v46, %v119_v46  ;;  %v3068_v52 = vcombine.low %v119_v46, %v119_v46  ;;  %v4294_v54 = vld [vmem:[%s6062_s0 + $0x10] ss:$20 sps:$4 sm:$0xff]   ;;  %v4298_v56 = vld [vmem:[%s6062_s0 + $0x38] ss:$20 sps:$4 sm:$0xff]   ;;  %v4299_v58 = vld [vmem:[%s6062_s0 + $0x60] ss:$20 sps:$4 sm:$0xff]  }
  0x13   :  { %v4297_v55 = vld [vmem:[%s6063_s1 + $0x4] ss:$20 sps:$4 sm:$0xff]   ;;  %v4300_v59 = vld [vmem:[%s6063_s1 + $0x2c] ss:$20 sps:$4 sm:$0xff]   ;;  %v4303_v61 = vld [vmem:[%s6063_s1 + $0x28] ss:$20 sps:$4 sm:$0xff]  }
  0x14   :  { %3412 = vmatpush3.bf16.msra.mxu0 %v4667_v18  ;;  %v4302_v60 = vld [vmem:[%s6062_s0 + $0x88] ss:$0 sps:$4 sm:$0x11]   ;;  %v4311_v63 = vld [vmem:[%s6063_s1 + $0xc] ss:$20 sps:$4 sm:$0xff]   ;;  %vm5912_vm11 = vmand %vm1683_vm8, %vm1684_vm9 }
  0x15   :  { %3452 = vmatpush3.bf16.msra.mxu1 %v4673_v19  ;;  %3413 = vmatprep.subr.bf16.mxu0 %v4679_v20  ;;  %v4304_v62 = vld [vmem:[%s6063_s1 + $0x54] ss:$20 sps:$4 sm:$0xff]   ;;  %v4306_v33 = vld [vmem:[%s6063_s1 + $0x50] ss:$20 sps:$4 sm:$0xff]   ;;  %v4329_v47 = vld [vmem:[%s6064_s2 + $0xc] ss:$20 sps:$4 sm:$0xff]  }
  0x16   :  { %3453 = vmatprep.subr.bf16.mxu1 %v4685_v21  ;;  %v4317_v46 = vld [vmem:[%s6063_s1 + $0x5c] ss:$20 sps:$4 sm:$0xff]  }
  0x18   :  { %3414 = vmatpush3.bf16.msra.mxu0 %v4691_v22 }
  0x19   :  { %3454 = vmatpush3.bf16.msra.mxu1 %v4697_v23  ;;  %3415 = vmatprep.subr.bf16.mxu0 %v4703_v24 }
  0x1a   :  { %3455 = vmatprep.subr.bf16.mxu1 %v4709_v25 }
  0x1c   :  { %3416 = vmatpush3.bf16.msra.mxu0 %v4715_v26 }
  0x1d   :  { %3456 = vmatpush3.bf16.msra.mxu1 %v4721_v27  ;;  %3417 = vmatprep.subr.bf16.mxu0 %v4727_v28 }
  0x1e   :  { %3457 = vmatprep.subr.bf16.mxu1 %v4733_v29 }
  0x20   :  { %3418 = vmatpush3.bf16.msra.mxu0 %v4739_v30 }
  0x21   :  { %3458 = vmatpush3.bf16.msra.mxu1 %v4745_v31  ;;  %4107 = vmatprep.subr.bf16.mxu0 %v4765_v36 }
  0x22   :  { %3491 = vmatprep.subr.bf16.mxu1 %v4560_v0 }
  0x23   :  { %476 = vmatmul.mubr.bf16.vlgmr.msra.gmra.mrb[0].mxu0 %v4268_v32  ;;  %v653_v32 = vld [vmem:[%s6063_s1 + $0x78] sm:$0x11] }
  0x24   :  { %540 = vmatmul.mubr.bf16.vlgmr.msra.gmra.mrb[0].mxu1 %v4271_v34  ;;  %4108 = vmatpush3.bf16.msra.mxu0 %v4765_v36  ;;  %v3129_v34 = vcombine.high %v653_v32, %v653_v32  ;;  %v3128_v35 = vcombine.low %v653_v32, %v653_v32  ;;  %v5139_v32 = vld [vmem:[%s6061_s4 + $0x48] sm:$0xff]  }
  0x25   :  { %3492 = vmatpush3.bf16.msra.mxu1 %v4571_v2  ;;  %483 = vmatprep.mubr.bf16.mxu0 %v4275_v37  ;;  %v4312_v37 = vld [vmem:[%s6063_s1 + $0x10] ss:$20 sps:$4 sm:$0xff]  }
  0x26   :  { %3493 = vmatprep.subr.bf16.mxu1 %v4583_v4  ;;  %547 = vmatprep.mubr.bf16.mxu1 %v4277_v38  ;;  %v4309_v38 = vld [vmem:[%s6063_s1 + $0x8] ss:$20 sps:$4 sm:$0xff]  }
  0x27   :  { %4109 = vmatprep.subr.bf16.mxu0 %v4780_v39 }
  0x28   :  { %4110 = vmatpush3.bf16.msra.mxu0 %v4780_v39 }
  0x29   :  { %3494 = vmatpush3.bf16.msra.mxu1 %v4595_v6  ;;  %4111 = vmatprep.subr.bf16.mxu0 %v4800_v44 }
  0x2a   :  { %3495 = vmatprep.subr.bf16.mxu1 %v4607_v8 }
  0x2b   :  { %484 = vmatmul.mubr.bf16.gmra.mrb[4].mxu0 %v4279_v40  ;;  %v4313_v40 = vld [vmem:[%s6063_s1 + $0x38] ss:$20 sps:$4 sm:$0xff]  }
  0x2c   :  { %548 = vmatmul.mubr.bf16.gmra.mrb[4].mxu1 %v4280_v41  ;;  %491 = vmatprep.mubr.bf16.mxu0 %v4282_v42  ;;  %v4314_v41 = vld [vmem:[%s6063_s1 + $0x34] ss:$20 sps:$4 sm:$0xff]  }
  0x2d   :  { %3496 = vmatpush3.bf16.msra.mxu1 %v4619_v10  ;;  %555 = vmatprep.mubr.bf16.mxu1 %v4284_v43  ;;  %v4320_v42 = vld [vmem:[%s6063_s1 + $0x60] ss:$20 sps:$4 sm:$0xff]   ;;  %v4316_v43 = vld [vmem:[%s6063_s1 + $0x30] ss:$20 sps:$4 sm:$0xff]  }
  0x2e   :  { %3497 = vmatprep.subr.bf16.mxu1 %v4631_v12  ;;  %4112 = vmatpush3.bf16.msra.mxu0 %v4800_v44 }
  0x2f   :  { %4113 = vmatprep.subr.bf16.mxu0 %v4807_v45 }
  0x31   :  { %3498 = vmatpush3.bf16.msra.mxu1 %v4643_v14 }
  0x32   :  { %3499 = vmatprep.subr.bf16.mxu1 %v4655_v16  ;;  %4114 = vmatpush3.bf16.msra.mxu0 %v4807_v45 }
  0x33   :  { %492 = vmatmul.mubr.bf16.gmra.mrb[8].mxu0 %v4286_v48  ;;  %3531 = vmatprep.subr.bf16.mxu0 %v4565_v1  ;;  %v654_v48 = vld [vmem:[%s6063_s1 + $0x80] sm:$0x11] }
  0x34   :  { %556 = vmatmul.mubr.bf16.gmra.mrb[8].mxu1 %v4287_v49  ;;  %499 = vmatprep.mubr.bf16.mxu0 %v3069_v50  ;;  %v4319_v49 = vld [vmem:[%s6063_s1 + $0x58] ss:$20 sps:$4 sm:$0xff]   ;;  %v3131_v50 = vcombine.high %v654_v48, %v654_v48 }
  0x35   :  { %3500 = vmatpush3.bf16.msra.mxu1 %v4667_v18  ;;  %563 = vmatprep.mubr.bf16.mxu1 %v3071_v51  ;;  %v3130_v51 = vcombine.low %v654_v48, %v654_v48  ;;  %v1302_v48 = vld [vmem:[%s6065_s3 + $0x80] sm:$0x11] }
  0x36   :  { %3501 = vmatprep.subr.bf16.mxu1 %v4679_v20 }
  0x39   :  { %3502 = vmatpush3.bf16.msra.mxu1 %v4691_v22 }
  0x3a   :  { %3503 = vmatprep.subr.bf16.mxu1 %v4703_v24 }
  0x3b   :  { %500 = vmatmul.mubr.bf16.gmra.mrb[12].mxu0 %v3068_v52  ;;  %v4326_v52 = vld [vmem:[%s6064_s2 + $0x4] ss:$20 sps:$4 sm:$0xff]  }
  0x3c   :  { %564 = vmatmul.mubr.bf16.gmra.mrb[12].mxu1 %v3070_v53  ;;  %4115 = vmatprep.mubr.msk.bf16.mxu0 %vm430_vm0, %v4294_v54  ;;  %v4324_v53 = vld [vmem:[%s6064_s2] ss:$20 sps:$4 sm:$0xff]   ;;  %v4327_v54 = vld [vmem:[%s6064_s2 + $0x8] ss:$20 sps:$4 sm:$0xff]  }
  0x3d   :  { %3504 = vmatpush3.bf16.msra.mxu1 %v4715_v26  ;;  %792 = vmatprep.mubr.bf16.mxu1 %v4297_v55  ;;  %v4330_v55 = vld [vmem:[%s6064_s2 + $0x2c] ss:$20 sps:$4 sm:$0xff]  }
  0x3e   :  { %3505 = vmatprep.subr.bf16.mxu1 %v4727_v28 }
  0x41   :  { %3506 = vmatpush3.bf16.msra.mxu1 %v4739_v30 }
  0x42   :  { %4123 = vmatprep.subr.bf16.mxu1 %v4765_v36 }
  0x43   :  { %4116 = vmatmul.mubr.msk.bf16.vlgmr.msra.gmra.mrb[16].mxu0 %vm430_vm0, %v4298_v56  ;;  %v4332_v56 = vld [vmem:[%s6064_s2 + $0x34] ss:$20 sps:$4 sm:$0xff]  }
  0x44   :  { %793 = vmatmul.mubr.bf16.vlgmr.msra.gmra.mrb[16].mxu1 %v4295_v57  ;;  %3532 = vmatpush3.bf16.msra.mxu0 %v4577_v3  ;;  %v4334_v57 = vld [vmem:[%s6064_s2 + $0x28] ss:$20 sps:$4 sm:$0xff]  }
  0x45   :  { %3533 = vmatprep.subr.bf16.mxu0 %v4589_v5  ;;  %4119 = vmatprep.mubr.msk.bf16.mxu0 %vm430_vm0, %v4299_v58  ;;  %v977_v58 = vld [vmem:[%s6064_s2 + $0x78] sm:$0x11] }
  0x46   :  { %800 = vmatprep.mubr.bf16.mxu1 %v4300_v59  ;;  %4124 = vmatpush3.bf16.msra.mxu1 %v4765_v36  ;;  %v3153_v59 = vcombine.high %v977_v58, %v977_v58 }
  0x47   :  { %4125 = vmatprep.subr.bf16.mxu1 %v4780_v39 }
  0x48   :  { %3534 = vmatpush3.bf16.msra.mxu0 %v4601_v7 }
  0x49   :  { %3535 = vmatprep.subr.bf16.mxu0 %v4613_v9 }
  0x4a   :  { %4126 = vmatpush3.bf16.msra.mxu1 %v4780_v39 }
  0x4b   :  { %4120 = vmatmul.mubr.msk.bf16.gmra.mrb[20].mxu0 %vm430_vm0, %v4302_v60  ;;  %4127 = vmatprep.subr.bf16.mxu1 %v4800_v44  ;;  %v3152_v60 = vcombine.low %v977_v58, %v977_v58  ;;  %v5267_v58 = vld [vmem:[%s6061_s4 + $0x28] sm:$0xff]  }
  0x4c   :  { %801 = vmatmul.mubr.bf16.gmra.mrb[20].mxu1 %v4303_v61  ;;  %3536 = vmatpush3.bf16.msra.mxu0 %v4625_v11 }
  0x4d   :  { %3537 = vmatprep.subr.bf16.mxu0 %v4637_v13  ;;  %808 = vmatprep.mubr.bf16.mxu1 %v4304_v62  ;;  %v4363_v62 = vld [vmem:[%s6065_s3 + $0xc] ss:$20 sps:$4 sm:$0xff]  }
  0x4e   :  { %4128 = vmatpush3.bf16.msra.mxu1 %v4800_v44  ;;  %856 = vmatprep.mubr.bf16.mxu0 %v4311_v63  ;;  %v5132_v63 = vld [vmem:[%s6061_s4] sm:$0xff]  }
  0x4f   :  { %4129 = vmatprep.subr.bf16.mxu1 %v4807_v45 }
  0x50   :  { %3538 = vmatpush3.bf16.msra.mxu0 %v4649_v15 }
  0x51   :  { %3539 = vmatprep.subr.bf16.mxu0 %v4661_v17 }
  0x52   :  { %4130 = vmatpush3.bf16.msra.mxu1 %v4807_v45 }
  0x53   :  { %3619 = vmatprep.subr.bf16.mxu1 %v4565_v1 }
  0x54   :  { %809 = vmatmul.mubr.bf16.gmra.mrb[24].mxu1 %v4306_v33  ;;  %3540 = vmatpush3.bf16.msra.mxu0 %v4673_v19  ;;  %v5145_v33 = vld [vmem:[%s6061_s4 + $0xc8] sm:$0xff]  }
  0x55   :  { %3541 = vmatprep.subr.bf16.mxu0 %v4685_v21  ;;  %816 = vmatprep.mubr.bf16.mxu1 %v3129_v34  ;;  %v4368_v34 = vld [vmem:[%s6065_s3 + $0x30] ss:$20 sps:$4 sm:$0xff]  }
  0x58   :  { %3542 = vmatpush3.bf16.msra.mxu0 %v4697_v23 }
  0x59   :  { %3543 = vmatprep.subr.bf16.mxu0 %v4709_v25 }
  0x5c   :  { %817 = vmatmul.mubr.bf16.gmra.mrb[28].mxu1 %v3128_v35  ;;  %3544 = vmatpush3.bf16.msra.mxu0 %v4721_v27  ;;  %v5155_v35 = vld [vmem:[%s6061_s4 + $0x8] sm:$0xff]  }
  0x5d   :  { %3545 = vmatprep.subr.bf16.mxu0 %v4733_v29  ;;  %4131 = vmatprep.mubr.msk.bf16.mxu1 %vm430_vm0, %v4312_v37  ;;  %v4369_v37 = vld [vmem:[%s6065_s3 + $0x5c] ss:$20 sps:$4 sm:$0xff]  }
  0x60   :  { %3546 = vmatpush3.bf16.msra.mxu0 %v4745_v31 }
  0x61   :  { %3579 = vmatprep.subr.bf16.mxu0 %v4560_v0 }
  0x63   :  { %857 = vmatmul.mubr.bf16.vlgmr.msra.gmra.mrb[24].mxu0 %v4309_v38  ;;  %v5164_v38 = vld [vmem:[%s6061_s4 + $0x88] sm:$0xff]  }
  0x64   :  { %4132 = vmatmul.mubr.msk.bf16.vlgmr.msra.gmra.mrb[32].mxu1 %vm430_vm0, %v4313_v40  ;;  %3580 = vmatpush3.bf16.msra.mxu0 %v4571_v2  ;;  %v5170_v40 = vld [vmem:[%s6061_s4 + $0x50] sm:$0xff]  }
  0x65   :  { %3620 = vmatpush3.bf16.msra.mxu1 %v4577_v3  ;;  %3581 = vmatprep.subr.bf16.mxu0 %v4583_v4  ;;  %v4321_v3 = vld [vmem:[%s6063_s1 + $0x88] ss:$0 sps:$4 sm:$0x11]  }
  0x66   :  { %3621 = vmatprep.subr.bf16.mxu1 %v4589_v5  ;;  %864 = vmatprep.mubr.bf16.mxu0 %v4314_v41  ;;  %v5176_v41 = vld [vmem:[%s6061_s4 + $0xd0] sm:$0xff]  }
  0x67   :  { %4135 = vmatprep.mubr.msk.bf16.mxu1 %vm430_vm0, %v4320_v42  ;;  %v4373_v42 = vld [vmem:[%s6065_s3 + $0x88] ss:$0 sps:$4 sm:$0x11]  }
  0x68   :  { %3582 = vmatpush3.bf16.msra.mxu0 %v4595_v6 }
  0x69   :  { %3622 = vmatpush3.bf16.msra.mxu1 %v4601_v7  ;;  %3583 = vmatprep.subr.bf16.mxu0 %v4607_v8 }
  0x6a   :  { %3623 = vmatprep.subr.bf16.mxu1 %v4613_v9 }
  0x6b   :  { %865 = vmatmul.mubr.bf16.gmra.mrb[28].mxu0 %v4316_v43  ;;  %v4381_v43 = vld [vmem:[%s6062_s0 + $0x98] ss:$20 sps:$4 sm:$0xff]  }
  0x6c   :  { %3584 = vmatpush3.bf16.msra.mxu0 %v4619_v10  ;;  %872 = vmatprep.mubr.bf16.mxu0 %v4317_v46  ;;  %v5188_v46 = vld [vmem:[%s6061_s4 + $0x10] sm:$0xff]  }
  0x6d   :  { %3624 = vmatpush3.bf16.msra.mxu1 %v4625_v11  ;;  %3585 = vmatprep.subr.bf16.mxu0 %v4631_v12 }
  0x6e   :  { %3625 = vmatprep.subr.bf16.mxu1 %v4637_v13  ;;  %4136 = vmatmul.mubr.msk.bf16.gmra.mrb[36].mxu1 %vm430_vm0, %v4321_v3  ;;  %v5194_v3 = vld [vmem:[%s6061_s4 + $0x90] sm:$0xff]  }
  0x6f   :  { %1180 = vmatprep.mubr.bf16.mxu1 %v4329_v47  ;;  %v5200_v47 = vld [vmem:[%s6061_s4 + $0x58] sm:$0xff]  }
  0x70   :  { %3586 = vmatpush3.bf16.msra.mxu0 %v4643_v14 }
  0x71   :  { %3626 = vmatpush3.bf16.msra.mxu1 %v4649_v15  ;;  %3587 = vmatprep.subr.bf16.mxu0 %v4655_v16 }
  0x72   :  { %3627 = vmatprep.subr.bf16.mxu1 %v4661_v17 }
  0x73   :  { %873 = vmatmul.mubr.bf16.gmra.mrb[32].mxu0 %v4319_v49  ;;  %v5209_v49 = vld [vmem:[%s6061_s4 + $0xd8] sm:$0xff]  }
  0x74   :  { %3588 = vmatpush3.bf16.msra.mxu0 %v4667_v18  ;;  %880 = vmatprep.mubr.bf16.mxu0 %v3131_v50  ;;  %v4371_v50 = vld [vmem:[%s6065_s3 + $0x58] ss:$20 sps:$4 sm:$0xff]  }
  0x75   :  { %3628 = vmatpush3.bf16.msra.mxu1 %v4673_v19  ;;  %3589 = vmatprep.subr.bf16.mxu0 %v4679_v20 }
  0x76   :  { %3629 = vmatprep.subr.bf16.mxu1 %v4685_v21 }
  0x78   :  { %3590 = vmatpush3.bf16.msra.mxu0 %v4691_v22 }
  0x79   :  { %3630 = vmatpush3.bf16.msra.mxu1 %v4697_v23  ;;  %3591 = vmatprep.subr.bf16.mxu0 %v4703_v24 }
  0x7a   :  { %3631 = vmatprep.subr.bf16.mxu1 %v4709_v25 }
  0x7b   :  { %881 = vmatmul.mubr.bf16.gmra.mrb[36].mxu0 %v3130_v51  ;;  %v5219_v51 = vld [vmem:[%s6061_s4 + $0x18] sm:$0xff]  }
  0x7c   :  { %3592 = vmatpush3.bf16.msra.mxu0 %v4715_v26  ;;  %1116 = vmatprep.mubr.bf16.mxu0 %v4326_v52  ;;  %v3179_v52 = vcombine.high %v1302_v48, %v1302_v48 }
  0x7d   :  { %3632 = vmatpush3.bf16.msra.mxu1 %v4721_v27  ;;  %3593 = vmatprep.subr.bf16.mxu0 %v4727_v28 }
  0x7e   :  { %3633 = vmatprep.subr.bf16.mxu1 %v4733_v29 }
  0x80   :  { %3594 = vmatpush3.bf16.msra.mxu0 %v4739_v30 }
  0x81   :  { %3634 = vmatpush3.bf16.msra.mxu1 %v4745_v31  ;;  %4139 = vmatprep.subr.bf16.mxu0 %v4765_v36 }
  0x82   :  { %3667 = vmatprep.subr.bf16.mxu1 %v4560_v0  ;;  %v4335_v0 = vld [vmem:[%s6064_s2 + $0x30] ss:$20 sps:$4 sm:$0xff]  }
  0x83   :  { %1117 = vmatmul.mubr.bf16.vlgmr.msra.gmra.mrb[40].mxu0 %v4324_v53  ;;  %v5225_v53 = vld [vmem:[%s6061_s4 + $0x98] sm:$0xff]  }
  0x84   :  { %1181 = vmatmul.mubr.bf16.vlgmr.msra.gmra.mrb[40].mxu1 %v4327_v54  ;;  %4140 = vmatpush3.bf16.msra.mxu0 %v4765_v36  ;;  %v5231_v54 = vld [vmem:[%s6061_s4 + $0x60] sm:$0xff]  }
  0x85   :  { %3668 = vmatpush3.bf16.msra.mxu1 %v4571_v2  ;;  %1124 = vmatprep.mubr.bf16.mxu0 %v4330_v55  ;;  %v4336_v2 = vld [vmem:[%s6064_s2 + $0x54] ss:$20 sps:$4 sm:$0xff]   ;;  %v5237_v55 = vld [vmem:[%s6061_s4 + $0xe0] sm:$0xff]  }
  0x86   :  { %3669 = vmatprep.subr.bf16.mxu1 %v4583_v4  ;;  %1188 = vmatprep.mubr.bf16.mxu1 %v4332_v56  ;;  %v4338_v4 = vld [vmem:[%s6064_s2 + $0x5c] ss:$20 sps:$4 sm:$0xff]   ;;  %v5243_v56 = vld [vmem:[%s6061_s4 + $0x20] sm:$0xff]  }
  0x87   :  { %4141 = vmatprep.subr.bf16.mxu0 %v4780_v39 }
  0x88   :  { %4142 = vmatpush3.bf16.msra.mxu0 %v4780_v39 }
  0x89   :  { %3670 = vmatpush3.bf16.msra.mxu1 %v4595_v6  ;;  %4143 = vmatprep.subr.bf16.mxu0 %v4800_v44  ;;  %v978_v6 = vld [vmem:[%s6064_s2 + $0x80] sm:$0x11] }
  0x8a   :  { %3671 = vmatprep.subr.bf16.mxu1 %v4607_v8  ;;  %v4340_v8 = vld [vmem:[%s6064_s2 + $0x50] ss:$20 sps:$4 sm:$0xff]   ;;  %v3154_v61 = vcombine.low %v978_v6, %v978_v6 }
  0x8b   :  { %1125 = vmatmul.mubr.bf16.gmra.mrb[44].mxu0 %v4334_v57  ;;  %v5249_v57 = vld [vmem:[%s6061_s4 + $0xa0] sm:$0xff]  }
  0x8c   :  { %1189 = vmatmul.mubr.bf16.gmra.mrb[44].mxu1 %v4335_v0  ;;  %1132 = vmatprep.mubr.bf16.mxu0 %v4336_v2  ;;  %v5255_v0 = vld [vmem:[%s6061_s4 + $0x68] sm:$0xff]  }
  0x8d   :  { %3672 = vmatpush3.bf16.msra.mxu1 %v4619_v10  ;;  %1196 = vmatprep.mubr.bf16.mxu1 %v4338_v4  ;;  %v4341_v10 = vld [vmem:[%s6064_s2 + $0x58] ss:$20 sps:$4 sm:$0xff]   ;;  %v3178_v4 = vcombine.low %v1302_v48, %v1302_v48 }
  0x8e   :  { %3673 = vmatprep.subr.bf16.mxu1 %v4631_v12  ;;  %4144 = vmatpush3.bf16.msra.mxu0 %v4800_v44  ;;  %v3155_v12 = vcombine.high %v978_v6, %v978_v6  ;;  %v5261_v2 = vld [vmem:[%s6061_s4 + $0xe8] sm:$0xff]   ;;  %v4378_v6 = vld [vmem:[%s6062_s0 + $0x90] ss:$20 sps:$4 sm:$0xff]  }
  0x8f   :  { %4145 = vmatprep.subr.bf16.mxu0 %v4807_v45 }
  0x91   :  { %3674 = vmatpush3.bf16.msra.mxu1 %v4643_v14  ;;  %v4346_v14 = vld [vmem:[%s6064_s2 + $0x10] ss:$20 sps:$4 sm:$0xff]  }
  0x92   :  { %3675 = vmatprep.subr.bf16.mxu1 %v4655_v16  ;;  %4146 = vmatpush3.bf16.msra.mxu0 %v4807_v45  ;;  %v4349_v16 = vld [vmem:[%s6065_s3 + $0x4] ss:$20 sps:$4 sm:$0xff]  }
  0x93   :  { %1133 = vmatmul.mubr.bf16.gmra.mrb[48].mxu0 %v4340_v8  ;;  %3707 = vmatprep.subr.bf16.mxu0 %v4565_v1  ;;  %v4350_v1 = vld [vmem:[%s6064_s2 + $0x38] ss:$20 sps:$4 sm:$0xff]  }
  0x94   :  { %1197 = vmatmul.mubr.bf16.gmra.mrb[48].mxu1 %v4341_v10  ;;  %1140 = vmatprep.mubr.bf16.mxu0 %v3153_v59  ;;  %v5276_v8 = vld [vmem:[%s6061_s4 + $0xa8] sm:$0xff]   ;;  %v5282_v10 = vld [vmem:[%s6061_s4 + $0x70] sm:$0xff]  }
  0x95   :  { %3676 = vmatpush3.bf16.msra.mxu1 %v4667_v18  ;;  %1204 = vmatprep.mubr.bf16.mxu1 %v3155_v12  ;;  %v4347_v18 = vld [vmem:[%s6065_s3] ss:$20 sps:$4 sm:$0xff]  }
  0x96   :  { %3677 = vmatprep.subr.bf16.mxu1 %v4679_v20  ;;  %v4351_v20 = vld [vmem:[%s6064_s2 + $0x60] ss:$20 sps:$4 sm:$0xff]  }
  0x97   :  { %v5288_v59 = vld [vmem:[%s6061_s4 + $0xf0] sm:$0xff]  }
  0x98   :  { %v5294_v12 = vld [vmem:[%s6061_s4 + $0x30] sm:$0xff]  }
  0x99   :  { %3678 = vmatpush3.bf16.msra.mxu1 %v4691_v22  ;;  %v4352_v22 = vld [vmem:[%s6065_s3 + $0x2c] ss:$20 sps:$4 sm:$0xff]  }
  0x9a   :  { %3679 = vmatprep.subr.bf16.mxu1 %v4703_v24  ;;  %v5056_v24 = vld [vmem:[%s6061_s4 + $0x80] sm:$0xff]  }
  0x9b   :  { %1141 = vmatmul.mubr.bf16.gmra.mrb[52].mxu0 %v3152_v60  ;;  %v5300_v60 = vld [vmem:[%s6061_s4 + $0xb0] sm:$0xff]  }
  0x9c   :  { %1205 = vmatmul.mubr.bf16.gmra.mrb[52].mxu1 %v3154_v61  ;;  %4147 = vmatprep.mubr.msk.bf16.mxu0 %vm430_vm0, %v4346_v14  ;;  %6072 = vst [vmem:[#allocation2_spill] sm:$0xff] %v5300_v60  ;;  %v5306_v61 = vld [vmem:[%s6061_s4 + $0x78] sm:$0xff]   ;;  %v4376_v14 = vld [vmem:[%s6062_s0 + $0x8c] ss:$20 sps:$4 sm:$0xff]  }
  0x9d   :  { %3680 = vmatpush3.bf16.msra.mxu1 %v4715_v26  ;;  %1440 = vmatprep.mubr.bf16.mxu1 %v4349_v16  ;;  %v4354_v26 = vld [vmem:[%s6064_s2 + $0x88] ss:$0 sps:$4 sm:$0x11]  }
  0x9e   :  { %3681 = vmatprep.subr.bf16.mxu1 %v4727_v28  ;;  %v4355_v28 = vld [vmem:[%s6065_s3 + $0x28] ss:$20 sps:$4 sm:$0xff]  }
  0x9f   :  { %v4379_v16 = vld [vmem:[%s6062_s0 + $0x94] ss:$20 sps:$4 sm:$0xff]  }
  0xa1   :  { %3682 = vmatpush3.bf16.msra.mxu1 %v4739_v30 }
  0xa2   :  { %4155 = vmatprep.subr.bf16.mxu1 %v4765_v36 }
  0xa3   :  { %4148 = vmatmul.mubr.msk.bf16.vlgmr.msra.gmra.mrb[56].mxu0 %vm430_vm0, %v4350_v1  ;;  %v4382_v1 = vld [vmem:[%s6062_s0 + $0xb8] ss:$20 sps:$4 sm:$0xff]  }
  0xa4   :  { %1441 = vmatmul.mubr.bf16.vlgmr.msra.gmra.mrb[56].mxu1 %v4347_v18  ;;  %3708 = vmatpush3.bf16.msra.mxu0 %v5056_v24  ;;  %v4390_v18 = vld [vmem:[%s6062_s0 + $0xe8] ss:$20 sps:$4 sm:$0xff]  }
  0xa5   :  { %3709 = vmatprep.subr.bf16.mxu0 %v4589_v5  ;;  %4151 = vmatprep.mubr.msk.bf16.mxu0 %vm430_vm0, %v4351_v20  ;;  %v4356_v5 = vld [vmem:[%s6065_s3 + $0x54] ss:$20 sps:$4 sm:$0xff]   ;;  %v3213_v20 = vld [vmem:[%s6062_s0 + $0x10c] sm:$0x11] }
  0xa6   :  { %1448 = vmatprep.mubr.bf16.mxu1 %v4352_v22  ;;  %4156 = vmatpush3.bf16.msra.mxu1 %v4765_v36  ;;  %v4392_v22 = vld [vmem:[%s6062_s0 + $0xdc] ss:$20 sps:$4 sm:$0xff]  }
  0xa7   :  { %4157 = vmatprep.subr.bf16.mxu1 %v4780_v39 }
  0xa8   :  { %3710 = vmatpush3.bf16.msra.mxu0 %v4601_v7  ;;  %v1301_v7 = vld [vmem:[%s6065_s3 + $0x78] sm:$0x11] }
  0xa9   :  { %3711 = vmatprep.subr.bf16.mxu0 %v4613_v9  ;;  %v4358_v9 = vld [vmem:[%s6065_s3 + $0x50] ss:$20 sps:$4 sm:$0xff]  }
  0xaa   :  { %4158 = vmatpush3.bf16.msra.mxu1 %v4780_v39 }
  0xab   :  { %4152 = vmatmul.mubr.msk.bf16.gmra.mrb[60].mxu0 %vm430_vm0, %v4354_v26  ;;  %4159 = vmatprep.subr.bf16.mxu1 %v4800_v44  ;;  %v4393_v26 = vld [vmem:[%s6062_s0 + $0xe4] ss:$20 sps:$4 sm:$0xff]  }
  0xac   :  { %1449 = vmatmul.mubr.bf16.gmra.mrb[60].mxu1 %v4355_v28  ;;  %3712 = vmatpush3.bf16.msra.mxu0 %v4625_v11  ;;  %v3177_v11 = vcombine.high %v1301_v7, %v1301_v7 }
  0xad   :  { %3713 = vmatprep.subr.bf16.mxu0 %v4637_v13  ;;  %1456 = vmatprep.mubr.bf16.mxu1 %v4356_v5  ;;  %v5096_v13 = vld [vmem:[%s6061_s4 + $0xc0] sm:$0xff]   ;;  %v3233_v5 = vcombine.high %v3213_v20, %v3213_v20 }
  0xae   :  { %4160 = vmatpush3.bf16.msra.mxu1 %v4800_v44  ;;  %1504 = vmatprep.mubr.bf16.mxu0 %v4363_v62 }
  0xaf   :  { %4161 = vmatprep.subr.bf16.mxu1 %v4807_v45 }
  0xb0   :  { %3714 = vmatpush3.bf16.msra.mxu0 %v4649_v15  ;;  %v3176_v15 = vcombine.low %v1301_v7, %v1301_v7 }
  0xb1   :  { %3715 = vmatprep.subr.bf16.mxu0 %v4661_v17  ;;  %v4364_v17 = vld [vmem:[%s6065_s3 + $0x10] ss:$20 sps:$4 sm:$0xff]  }
  0xb2   :  { %4162 = vmatpush3.bf16.msra.mxu1 %v4807_v45 }
  0xb3   :  { %3795 = vmatprep.subr.bf16.mxu1 %v5096_v13 }
  0xb4   :  { %1457 = vmatmul.mubr.bf16.gmra.mrb[64].mxu1 %v4358_v9  ;;  %3716 = vmatpush3.bf16.msra.mxu0 %v4673_v19  ;;  %v4361_v19 = vld [vmem:[%s6065_s3 + $0x8] ss:$20 sps:$4 sm:$0xff]  }
  0xb5   :  { %3717 = vmatprep.subr.bf16.mxu0 %v4685_v21  ;;  %1464 = vmatprep.mubr.bf16.mxu1 %v3177_v11  ;;  %v4365_v21 = vld [vmem:[%s6065_s3 + $0x38] ss:$20 sps:$4 sm:$0xff]  }
  0xb8   :  { %3718 = vmatpush3.bf16.msra.mxu0 %v4697_v23  ;;  %v5119_v23 = vld [vmem:[%s6061_s4 + $0x40] sm:$0xff]  }
  0xb9   :  { %3719 = vmatprep.subr.bf16.mxu0 %v4709_v25  ;;  %v4366_v25 = vld [vmem:[%s6065_s3 + $0x34] ss:$20 sps:$4 sm:$0xff]  }
  0xbc   :  { %1465 = vmatmul.mubr.bf16.gmra.mrb[68].mxu1 %v3176_v15  ;;  %3720 = vmatpush3.bf16.msra.mxu0 %v4721_v27  ;;  %v4372_v27 = vld [vmem:[%s6065_s3 + $0x60] ss:$20 sps:$4 sm:$0xff]  }
  0xbd   :  { %3721 = vmatprep.subr.bf16.mxu0 %v4733_v29  ;;  %4163 = vmatprep.mubr.msk.bf16.mxu1 %vm430_vm0, %v4364_v17 }
  0xc0   :  { %3722 = vmatpush3.bf16.msra.mxu0 %v4745_v31 }
  0xc1   :  { %3755 = vmatprep.subr.bf16.mxu0 %v5119_v23 }
  0xc3   :  { %1505 = vmatmul.mubr.bf16.vlgmr.msra.gmra.mrb[64].mxu0 %v4361_v19  ;;  %v3232_v19 = vcombine.low %v3213_v20, %v3213_v20  ;;  %v4403_v20 = vld [vmem:[%s6062_s0 + $0xec] ss:$20 sps:$4 sm:$0xff]  }
  0xc4   :  { %4164 = vmatmul.mubr.msk.bf16.vlgmr.msra.gmra.mrb[72].mxu1 %vm430_vm0, %v4365_v21  ;;  %3756 = vmatpush3.bf16.msra.mxu0 %v5132_v63 }
  0xc5   :  { %3796 = vmatpush3.bf16.msra.mxu1 %v5056_v24  ;;  %3757 = vmatprep.subr.bf16.mxu0 %v5139_v32 }
  0xc6   :  { %3797 = vmatprep.subr.bf16.mxu1 %v5145_v33  ;;  %1512 = vmatprep.mubr.bf16.mxu0 %v4366_v25 }
  0xc7   :  { %4167 = vmatprep.mubr.msk.bf16.mxu1 %vm430_vm0, %v4372_v27 }
  0xc8   :  { %3758 = vmatpush3.bf16.msra.mxu0 %v5155_v35 }
  0xc9   :  { %3798 = vmatpush3.bf16.msra.mxu1 %v5164_v38  ;;  %3759 = vmatprep.subr.bf16.mxu0 %v5170_v40 }
  0xca   :  { %3799 = vmatprep.subr.bf16.mxu1 %v5176_v41 }
  0xcb   :  { %1513 = vmatmul.mubr.bf16.gmra.mrb[68].mxu0 %v4368_v34  ;;  %v4401_v34 = vld [vmem:[%s6063_s1 + $0x90] ss:$20 sps:$4 sm:$0xff]  }
  0xcc   :  { %3760 = vmatpush3.bf16.msra.mxu0 %v5188_v46  ;;  %1520 = vmatprep.mubr.bf16.mxu0 %v4369_v37 }
  0xcd   :  { %3800 = vmatpush3.bf16.msra.mxu1 %v5194_v3  ;;  %3761 = vmatprep.subr.bf16.mxu0 %v5200_v47 }
  0xce   :  { %3801 = vmatprep.subr.bf16.mxu1 %v5209_v49  ;;  %4168 = vmatmul.mubr.msk.bf16.gmra.mrb[76].mxu1 %vm430_vm0, %v4373_v42 }
  0xcf   :  { %1911 = vmatprep.mubr.bf16.mxu1 %v4381_v43 }
  0xd0   :  { %3762 = vmatpush3.bf16.msra.mxu0 %v5219_v51 }
  0xd1   :  { %3802 = vmatpush3.bf16.msra.mxu1 %v5225_v53  ;;  %3763 = vmatprep.subr.bf16.mxu0 %v5231_v54 }
  0xd2   :  { %3803 = vmatprep.subr.bf16.mxu1 %v5237_v55 }
  0xd3   :  { %1521 = vmatmul.mubr.bf16.gmra.mrb[72].mxu0 %v4371_v50 }
  0xd4   :  { %3764 = vmatpush3.bf16.msra.mxu0 %v5243_v56  ;;  %1528 = vmatprep.mubr.bf16.mxu0 %v3179_v52 }
  0xd5   :  { %3804 = vmatpush3.bf16.msra.mxu1 %v5249_v57  ;;  %3765 = vmatprep.subr.bf16.mxu0 %v5255_v0 }
  0xd6   :  { %3805 = vmatprep.subr.bf16.mxu1 %v5261_v2 }
  0xd8   :  { %3766 = vmatpush3.bf16.msra.mxu0 %v5267_v58 }
  0xd9   :  { %3806 = vmatpush3.bf16.msra.mxu1 %v5276_v8  ;;  %3767 = vmatprep.subr.bf16.mxu0 %v5282_v10 }
  0xda   :  { %3807 = vmatprep.subr.bf16.mxu1 %v5288_v59 }
  0xdb   :  { %1529 = vmatmul.mubr.bf16.gmra.mrb[76].mxu0 %v3178_v4 }
  0xdc   :  { %3768 = vmatpush3.bf16.msra.mxu0 %v5294_v12  ;;  %1847 = vmatprep.mubr.bf16.mxu0 %v4378_v6 }
  0xdd   :  { %3808 = vmatpush3.bf16.msra.mxu1 %v5300_v60  ;;  %3769 = vmatprep.subr.bf16.mxu0 %v5306_v61 }
  0xde   :  { %3809 = vmatprep.subr.bf16.mxu1 %v4733_v29  ;;  %v4384_v29 = vld [vmem:[%s6062_s0 + $0xc0] ss:$20 sps:$4 sm:$0xff]  }
  0xe0   :  { %3770 = vmatpush3.bf16.msra.mxu0 %v4739_v30  ;;  %v4386_v30 = vld [vmem:[%s6062_s0 + $0xb4] ss:$20 sps:$4 sm:$0xff]  }
  0xe1   :  { %3810 = vmatpush3.bf16.msra.mxu1 %v4745_v31  ;;  %4171 = vmatprep.subr.bf16.mxu0 %v4765_v36  ;;  %v4387_v31 = vld [vmem:[%s6062_s0 + $0xbc] ss:$20 sps:$4 sm:$0xff]  }
  0xe2   :  { %3843 = vmatprep.subr.bf16.mxu1 %v5119_v23 }
  0xe3   :  { %1848 = vmatmul.mubr.bf16.vlgmr.msra.gmra.mrb[80].mxu0 %v4376_v14  ;;  %v4402_v14 = vld [vmem:[%s6062_s0 + $0xc4] ss:$20 sps:$4 sm:$0xff]  }
  0xe4   :  { %1912 = vmatmul.mubr.bf16.vlgmr.msra.gmra.mrb[80].mxu1 %v4379_v16  ;;  %4172 = vmatpush3.bf16.msra.mxu0 %v4765_v36  ;;  %v4388_v36 = vld [vmem:[%s6062_s0 + $0xe0] ss:$20 sps:$4 sm:$0xff]  }
  0xe5   :  { %3844 = vmatpush3.bf16.msra.mxu1 %v5132_v63  ;;  %1855 = vmatprep.mubr.bf16.mxu0 %v4382_v1 }
  0xe6   :  { %3845 = vmatprep.subr.bf16.mxu1 %v5139_v32  ;;  %1919 = vmatprep.mubr.bf16.mxu1 %v4384_v29 }
  0xe7   :  { %4173 = vmatprep.subr.bf16.mxu0 %v4780_v39 }
  0xe8   :  { %4174 = vmatpush3.bf16.msra.mxu0 %v4780_v39  ;;  %v3212_v39 = vld [vmem:[%s6062_s0 + $0x104] sm:$0x11] }
  0xe9   :  { %3846 = vmatpush3.bf16.msra.mxu1 %v5155_v35  ;;  %4175 = vmatprep.subr.bf16.mxu0 %v4800_v44  ;;  %v3231_v28 = vcombine.high %v3212_v39, %v3212_v39  ;;  %v3230_v9 = vcombine.low %v3212_v39, %v3212_v39 }
  0xea   :  { %3847 = vmatprep.subr.bf16.mxu1 %v5170_v40 }
  0xeb   :  { %1856 = vmatmul.mubr.bf16.gmra.mrb[84].mxu0 %v4386_v30  ;;  %v4399_v30 = vld [vmem:[%s6063_s1 + $0x8c] ss:$20 sps:$4 sm:$0xff]  }
  0xec   :  { %1920 = vmatmul.mubr.bf16.gmra.mrb[84].mxu1 %v4387_v31  ;;  %1863 = vmatprep.mubr.bf16.mxu0 %v4388_v36  ;;  %v5392_v31 = vld [vmem:[%s6061_s4 + $0x38] sm:$0xff]  }
  0xed   :  { %3848 = vmatpush3.bf16.msra.mxu1 %v5188_v46  ;;  %1927 = vmatprep.mubr.bf16.mxu1 %v4390_v18 }
  0xee   :  { %3849 = vmatprep.subr.bf16.mxu1 %v5200_v47  ;;  %4176 = vmatpush3.bf16.msra.mxu0 %v4800_v44 }
  0xef   :  { %4177 = vmatprep.subr.bf16.mxu0 %v4807_v45 }
  0xf1   :  { %3850 = vmatpush3.bf16.msra.mxu1 %v5219_v51 }
  0xf2   :  { %3851 = vmatprep.subr.bf16.mxu1 %v5231_v54  ;;  %4178 = vmatpush3.bf16.msra.mxu0 %v4807_v45  ;;  %v4398_v45 = vld [vmem:[%s6062_s0 + $0x9c] ss:$20 sps:$4 sm:$0xff]  }
  0xf3   :  { %1864 = vmatmul.mubr.bf16.gmra.mrb[88].mxu0 %v4392_v22  ;;  %3883 = vmatprep.subr.bf16.mxu0 %v5096_v13 }
  0xf4   :  { %1928 = vmatmul.mubr.bf16.gmra.mrb[88].mxu1 %v4393_v26  ;;  %1871 = vmatprep.mubr.bf16.mxu0 %v3231_v28  ;;  %v4404_v28 = vld [vmem:[%s6063_s1 + $0xb8] ss:$20 sps:$4 sm:$0xff]  }
  0xf5   :  { %3852 = vmatpush3.bf16.msra.mxu1 %v5243_v56  ;;  %1935 = vmatprep.mubr.bf16.mxu1 %v3233_v5  ;;  %v5404_v5 = vld [vmem:[%s6061_s4 + $0x100] sm:$0xff]  }
  0xf6   :  { %3853 = vmatprep.subr.bf16.mxu1 %v5255_v0  ;;  %v3419_v44 = vpop.f32.mrb[0].mxu0 }
  0xf7   :  { %v3459_v62 = vpop.f32.mrb[0].mxu1  ;;  %v3420_v7 = vpop.f32.mrb[1].mxu0 }
  0xf8   :  { %v3421_v11 = vadd.f32 %v3420_v7, %v3419_v44  ;;  %v3460_v15 = vpop.f32.mrb[1].mxu1  ;;  %v3422_v17 = vpop.f32.mrb[2].mxu0 }
  0xf9   :  { %3854 = vmatpush3.bf16.msra.mxu1 %v5267_v58  ;;  %v3461_v21 = vadd.f32 %v3460_v15, %v3459_v62  ;;  %v3462_v25 = vpop.f32.mrb[2].mxu1  ;;  %v3423_v27 = vpop.f32.mrb[3].mxu0 }
  0xfa   :  { %v3424_v37 = vadd.f32 %v3423_v27, %v3422_v17  ;;  %v3463_v42 = vpop.f32.mrb[3].mxu1  ;;  %3855 = vmatprep.subr.bf16.mxu1 %v5282_v10  ;;  %v4406_v17 = vld [vmem:[%s6062_s0 + $0x114] ss:$0 sps:$4 sm:$0x11]  }
  0xfb   :  { %v3464_v43 = vadd.f32 %v3463_v42, %v3462_v25  ;;  %1872 = vmatmul.mubr.bf16.gmra.mrb[92].mxu0 %v3230_v9  ;;  %v5376_v48 = vadd.f32 %v3461_v21, %v3421_v11  ;;  %v4407_v27 = vld [vmem:[%s6063_s1 + $0xb4] ss:$20 sps:$4 sm:$0xff]  }
  0xfc   :  { %1936 = vmatmul.mubr.bf16.gmra.mrb[92].mxu1 %v3232_v19  ;;  %4179 = vmatprep.mubr.msk.bf16.mxu0 %vm430_vm0, %v4398_v45  ;;  %v5422_v19 = vld [vmem:[%s6061_s4 + $0x108] sm:$0xff]  }
  0xfd   :  { %3856 = vmatpush3.bf16.msra.mxu1 %v5294_v12  ;;  %2165 = vmatprep.mubr.bf16.mxu1 %v4401_v34  ;;  %v5380_v50 = vadd.f32 %v3464_v43, %v3424_v37  ;;  %v4408_v43 = vld [vmem:[%s6063_s1 + $0xe0] ss:$20 sps:$4 sm:$0xff]  }
  0xfe   :  { %3857 = vmatprep.subr.bf16.mxu1 %v5306_v61  ;;  %v3425_v52 = vpop.f32.mrb[4].mxu0 }
  0xff   :  { %v3465_v4 = vpop.f32.mrb[4].mxu1  ;;  %v3426_v6 = vpop.f32.mrb[5].mxu0 }
 0x100   :  { %v3427_v16 = vadd.f32 %v3426_v6, %v3425_v52  ;;  %v3466_v1 = vpop.f32.mrb[5].mxu1  ;;  %v3428_v29 = vpop.f32.mrb[6].mxu0  ;;  %v4415_v6 = vld [vmem:[%s6063_s1 + $0x98] ss:$20 sps:$4 sm:$0xff]  }
 0x101   :  { %3858 = vmatpush3.bf16.msra.mxu1 %v5392_v31  ;;  %v3467_v36 = vadd.f32 %v3466_v1, %v3465_v4  ;;  %v3468_v18 = vpop.f32.mrb[6].mxu1  ;;  %v3429_v39 = vpop.f32.mrb[7].mxu0 }
 0x102   :  { %v3430_v22 = vadd.f32 %v3429_v39, %v3428_v29  ;;  %v3469_v26 = vpop.f32.mrb[7].mxu1  ;;  %4187 = vmatprep.subr.bf16.mxu1 %v5404_v5 }
 0x103   :  { %v3470_v44 = vadd.f32 %v3469_v26, %v3468_v18  ;;  %4180 = vmatmul.mubr.msk.bf16.vlgmr.msra.gmra.mrb[96].mxu0 %vm430_vm0, %v4402_v14  ;;  %v5408_v62 = vadd.f32 %v3467_v36, %v3427_v16  ;;  %v5441_v16 = vld [vmem:[%s6061_s4 + $0x110] sm:$0xff]   ;;  %v3257_v36 = vld [vmem:[%s6063_s1 + $0x104] sm:$0x11] }
 0x104   :  { %2166 = vmatmul.mubr.bf16.vlgmr.msra.gmra.mrb[96].mxu1 %v4399_v30  ;;  %3884 = vmatpush3.bf16.msra.mxu0 %v5056_v24 }
 0x105   :  { %3885 = vmatprep.subr.bf16.mxu0 %v5145_v33  ;;  %4183 = vmatprep.mubr.msk.bf16.mxu0 %vm430_vm0, %v4403_v20  ;;  %v5413_v7 = vadd.f32 %v3470_v44, %v3430_v22  ;;  %v5455_v20 = vld [vmem:[%s6061_s4 + $0x118] sm:$0xff]  }
 0x106   :  { %v3431_v9 = vpop.f32.mrb[8].mxu0  ;;  %2173 = vmatprep.mubr.bf16.mxu1 %v4404_v28  ;;  %4188 = vmatpush3.bf16.msra.mxu1 %v5404_v5  ;;  %v4410_v44 = vld [vmem:[%s6063_s1 + $0xdc] ss:$20 sps:$4 sm:$0xff]  }
 0x107   :  { %v3471_v11 = vpop.f32.mrb[8].mxu1  ;;  %v3432_v15 = vpop.f32.mrb[9].mxu0  ;;  %4189 = vmatprep.subr.bf16.mxu1 %v5422_v19 }
 0x108   :  { %3886 = vmatpush3.bf16.msra.mxu0 %v5164_v38  ;;  %v3433_v45 = vadd.f32 %v3432_v15, %v3431_v9  ;;  %v3472_v21 = vpop.f32.mrb[9].mxu1  ;;  %v3434_v25 = vpop.f32.mrb[10].mxu0  ;;  %v3276_v15 = vcombine.high %v3257_v36, %v3257_v36 }
 0x109   :  { %v3473_v34 = vadd.f32 %v3472_v21, %v3471_v11  ;;  %v3474_v37 = vpop.f32.mrb[10].mxu1  ;;  %3887 = vmatprep.subr.bf16.mxu0 %v5176_v41  ;;  %v3435_v42 = vpop.f32.mrb[11].mxu0 }
 0x10a   :  { %v3436_v52 = vadd.f32 %v3435_v42, %v3434_v25  ;;  %v3475_v4 = vpop.f32.mrb[11].mxu1  ;;  %4190 = vmatpush3.bf16.msra.mxu1 %v5422_v19 }
 0x10b   :  { %v3476_v14 = vadd.f32 %v3475_v4, %v3474_v37  ;;  %4184 = vmatmul.mubr.msk.bf16.gmra.mrb[100].mxu0 %vm430_vm0, %v4406_v17  ;;  %4191 = vmatprep.subr.bf16.mxu1 %v5441_v16  ;;  %v558_v1 = vadd.f32 %v3473_v34, %v3433_v45 }
 0x10c   :  { %2174 = vmatmul.mubr.bf16.gmra.mrb[100].mxu1 %v4407_v27  ;;  %3888 = vmatpush3.bf16.msra.mxu0 %v5194_v3 }
 0x10d   :  { %3889 = vmatprep.subr.bf16.mxu0 %v5209_v49  ;;  %2181 = vmatprep.mubr.bf16.mxu1 %v4408_v43  ;;  %v5446_v29 = vadd.f32 %v3476_v14, %v3436_v52  ;;  %v3275_v52 = vcombine.low %v3257_v36, %v3257_v36 }
 0x10e   :  { %v3437_v30 = vpop.f32.mrb[12].mxu0  ;;  %4192 = vmatpush3.bf16.msra.mxu1 %v5441_v16  ;;  %2229 = vmatprep.mubr.bf16.mxu0 %v4415_v6 }
 0x10f   :  { %v3477_v18 = vpop.f32.mrb[12].mxu1  ;;  %v3438_v39 = vpop.f32.mrb[13].mxu0  ;;  %4193 = vmatprep.subr.bf16.mxu1 %v5455_v20 }
 0x110   :  { %3890 = vmatpush3.bf16.msra.mxu0 %v5225_v53  ;;  %v3439_v22 = vadd.f32 %v3438_v39, %v3437_v30  ;;  %v3478_v26 = vpop.f32.mrb[13].mxu1  ;;  %v3440_v28 = vpop.f32.mrb[14].mxu0 }
 0x111   :  { %v3479_v9 = vadd.f32 %v3478_v26, %v3477_v18  ;;  %3891 = vmatprep.subr.bf16.mxu0 %v5237_v55  ;;  %v3441_v11 = vpop.f32.mrb[15].mxu0  ;;  %v3480_v17 = vpop.f32.mrb[14].mxu1  ;;  %v4413_v28 = vld [vmem:[%s6063_s1 + $0x94] ss:$20 sps:$4 sm:$0xff]  }
 0x112   :  { %4194 = vmatpush3.bf16.msra.mxu1 %v5455_v20  ;;  %v3481_v45 = vpop.f32.mrb[15].mxu1  ;;  %v4417_v17 = vld [vmem:[%s6063_s1 + $0xc4] ss:$20 sps:$4 sm:$0xff]  }
 0x113   :  { %v566_v21 = vadd.f32 %v3479_v9, %v3439_v22  ;;  %3971 = vmatprep.subr.bf16.mxu1 %v5096_v13  ;;  %v5504_v9 = vld [vmem:[%s6061_s4 + $0xb8] sm:$0xff]  }
 0x114   :  { %2182 = vmatmul.mubr.bf16.gmra.mrb[104].mxu1 %v4410_v44  ;;  %3892 = vmatpush3.bf16.msra.mxu0 %v5249_v57  ;;  %6074 = vst [vmem:[#allocation4_spill] sm:$0xff] %v5504_v9 }
 0x115   :  { %3893 = vmatprep.subr.bf16.mxu0 %v5261_v2  ;;  %2189 = vmatprep.mubr.bf16.mxu1 %v3276_v15 }
 0x116   :  { %v4117_v25 = vpop.f32.mrb[16].mxu0 }
 0x117   :  { %v5468_v27 = vadd.f32 %v4117_v25, %v5408_v62  ;;  %v605_v34 = vpop.f32.mrb[17].mxu0  ;;  %v3507_v37 = vpop.f32.mrb[16].mxu1  ;;  %v4416_v62 = vld [vmem:[%s6063_s1 + $0x9c] ss:$20 sps:$4 sm:$0xff]  }
 0x118   :  { %3894 = vmatpush3.bf16.msra.mxu0 %v5276_v8  ;;  %v5472_v42 = vadd.f32 %v605_v34, %v5376_v48  ;;  %v4118_v43 = vpop.f32.mrb[18].mxu0  ;;  %v3508_v4 = vpop.f32.mrb[17].mxu1 }
 0x119   :  { %v5475_v6 = vadd.f32 %v4118_v43, %v5413_v7  ;;  %3895 = vmatprep.subr.bf16.mxu0 %v5288_v59  ;;  %v608_v14 = vpop.f32.mrb[19].mxu0  ;;  %v5481_v30 = vadd.f32 %v3508_v4, %v3507_v37  ;;  %v3510_v18 = vpop.f32.mrb[18].mxu1  ;;  %v5492_v7 = vld [vmem:[%s6061_s4 + $0xf8] sm:$0xff]   ;;  %v4424_v4 = vld [vmem:[%s6063_s1 + $0xec] ss:$20 sps:$4 sm:$0xff]  }
 0x11a   :  { %v5484_v39 = vadd.f32 %v608_v14, %v5380_v50  ;;  %v3511_v48 = vpop.f32.mrb[19].mxu1  ;;  %6073 = vst [vmem:[#allocation3_spill] sm:$0xff] %v5492_v7 }
 0x11b   :  { %v5486_v22 = vadd.f32 %v3511_v48, %v3510_v18 }
 0x11c   :  { %2190 = vmatmul.mubr.bf16.gmra.mrb[108].mxu1 %v3275_v52  ;;  %3896 = vmatpush3.bf16.msra.mxu0 %v5300_v60 }
 0x11d   :  { %3897 = vmatprep.subr.bf16.mxu0 %v5492_v7  ;;  %4195 = vmatprep.mubr.msk.bf16.mxu1 %vm430_vm0, %v4416_v62  ;;  %v4421_v62 = vld [vmem:[%s6063_s1 + $0xe8] ss:$20 sps:$4 sm:$0xff]  }
 0x11e   :  { %v4121_v36 = vpop.f32.mrb[20].mxu0 }
 0x11f   :  { %v5496_v26 = vadd.f32 %v4121_v36, %v566_v21  ;;  %v621_v50 = vpop.f32.mrb[21].mxu0  ;;  %v3513_v44 = vpop.f32.mrb[20].mxu1 }
 0x120   :  { %3898 = vmatpush3.bf16.msra.mxu0 %v5504_v9  ;;  %v5507_v11 = vadd.f32 %v621_v50, %v558_v1  ;;  %v4122_v15 = vpop.f32.mrb[22].mxu0  ;;  %v3514_v45 = vpop.f32.mrb[21].mxu1  ;;  %v4418_v1 = vld [vmem:[%s6063_s1 + $0xc0] ss:$20 sps:$4 sm:$0xff]  }
 0x121   :  { %3931 = vmatprep.subr.bf16.mxu0 %v5119_v23  ;;  %v624_v21 = vpop.f32.mrb[23].mxu0  ;;  %v5513_v25 = vadd.f32 %v3514_v45, %v3513_v44  ;;  %v3516_v34 = vpop.f32.mrb[22].mxu1  ;;  %v4433_v15 = vld [vmem:[%s6064_s2 + $0x98] ss:$20 sps:$4 sm:$0xff]  }
 0x122   :  { %v5516_v37 = vadd.f32 %v624_v21, %v5446_v29  ;;  %v3517_v43 = vpop.f32.mrb[23].mxu1  ;;  %v4420_v29 = vld [vmem:[%s6063_s1 + $0xbc] ss:$20 sps:$4 sm:$0xff]   ;;  %v4423_v45 = vld [vmem:[%s6063_s1 + $0xe4] ss:$20 sps:$4 sm:$0xff]  }
 0x123   :  { %2230 = vmatmul.mubr.bf16.vlgmr.msra.gmra.mrb[104].mxu0 %v4413_v28  ;;  %v5521_v52 = vadd.f32 %v3517_v43, %v3516_v34  ;;  %v4425_v28 = vld [vmem:[%s6063_s1 + $0x114] ss:$0 sps:$4 sm:$0x11]  }
 0x124   :  { %4196 = vmatmul.mubr.msk.bf16.vlgmr.msra.gmra.mrb[112].mxu1 %vm430_vm0, %v4417_v17  ;;  %3932 = vmatpush3.bf16.msra.mxu0 %v5132_v63  ;;  %v3258_v17 = vld [vmem:[%s6063_s1 + $0x10c] sm:$0x11] }
 0x125   :  { %3972 = vmatpush3.bf16.msra.mxu1 %v5056_v24  ;;  %3933 = vmatprep.subr.bf16.mxu0 %v5139_v32 }
 0x126   :  { %3973 = vmatprep.subr.bf16.mxu1 %v5145_v33  ;;  %2237 = vmatprep.mubr.bf16.mxu0 %v4418_v1  ;;  %v3278_v1 = vcombine.high %v3258_v17, %v3258_v17 }
 0x127   :  { %v3519_v14 = vpop.f32.mrb[24].mxu1  ;;  %4199 = vmatprep.mubr.msk.bf16.mxu1 %vm430_vm0, %v4424_v4 }
 0x128   :  { %3934 = vmatpush3.bf16.msra.mxu0 %v5155_v35  ;;  %v3520_v18 = vpop.f32.mrb[25].mxu1 }
 0x129   :  { %3974 = vmatpush3.bf16.msra.mxu1 %v5164_v38  ;;  %3935 = vmatprep.subr.bf16.mxu0 %v5170_v40  ;;  %v5541_v48 = vadd.f32 %v3520_v18, %v3519_v14  ;;  %v3522_v36 = vpop.f32.mrb[26].mxu1  ;;  %v3277_v18 = vcombine.low %v3258_v17, %v3258_v17 }
 0x12a   :  { %3975 = vmatprep.subr.bf16.mxu1 %v5176_v41  ;;  %v3523_v50 = vpop.f32.mrb[27].mxu1 }
 0x12b   :  { %2238 = vmatmul.mubr.bf16.gmra.mrb[108].mxu0 %v4420_v29  ;;  %v5547_v44 = vadd.f32 %v3523_v50, %v3522_v36 }
 0x12c   :  { %3936 = vmatpush3.bf16.msra.mxu0 %v5188_v46  ;;  %2245 = vmatprep.mubr.bf16.mxu0 %v4421_v62 }
 0x12d   :  { %3976 = vmatpush3.bf16.msra.mxu1 %v5194_v3  ;;  %3937 = vmatprep.subr.bf16.mxu0 %v5200_v47 }
 0x12e   :  { %3977 = vmatprep.subr.bf16.mxu1 %v5209_v49  ;;  %4200 = vmatmul.mubr.msk.bf16.gmra.mrb[116].mxu1 %vm430_vm0, %v4425_v28 }
 0x12f   :  { %v3525_v21 = vpop.f32.mrb[28].mxu1  ;;  %2554 = vmatprep.mubr.bf16.mxu1 %v4433_v15 }
 0x130   :  { %3938 = vmatpush3.bf16.msra.mxu0 %v5219_v51  ;;  %v3526_v34 = vpop.f32.mrb[29].mxu1 }
 0x131   :  { %3978 = vmatpush3.bf16.msra.mxu1 %v5225_v53  ;;  %3939 = vmatprep.subr.bf16.mxu0 %v5231_v54  ;;  %v5566_v43 = vadd.f32 %v3526_v34, %v3525_v21  ;;  %v3528_v4 = vpop.f32.mrb[30].mxu1 }
 0x132   :  { %3979 = vmatprep.subr.bf16.mxu1 %v5237_v55  ;;  %v3529_v29 = vpop.f32.mrb[31].mxu1 }
 0x133   :  { %2246 = vmatmul.mubr.bf16.gmra.mrb[112].mxu0 %v4423_v45  ;;  %v4430_v45 = vld [vmem:[%s6064_s2 + $0x90] ss:$20 sps:$4 sm:$0xff]  }
 0x134   :  { %3940 = vmatpush3.bf16.msra.mxu0 %v5243_v56  ;;  %2253 = vmatprep.mubr.bf16.mxu0 %v3278_v1 }
 0x135   :  { %3980 = vmatpush3.bf16.msra.mxu1 %v5249_v57  ;;  %3941 = vmatprep.subr.bf16.mxu0 %v5255_v0 }
 0x136   :  { %3981 = vmatprep.subr.bf16.mxu1 %v5261_v2  ;;  %v3547_v14 = vpop.f32.mrb[24].mxu0 }
 0x137   :  { %v3548_v62 = vpop.f32.mrb[25].mxu0  ;;  %v4133_v36 = vpop.f32.mrb[32].mxu1 }
 0x138   :  { %3942 = vmatpush3.bf16.msra.mxu0 %v5267_v58  ;;  %v3549_v50 = vadd.f32 %v3548_v62, %v3547_v14  ;;  %v3550_v28 = vpop.f32.mrb[26].mxu0  ;;  %v922_v15 = vpop.f32.mrb[33].mxu1 }
 0x139   :  { %3982 = vmatpush3.bf16.msra.mxu1 %v5276_v8  ;;  %v3551_v21 = vpop.f32.mrb[27].mxu0  ;;  %3943 = vmatprep.subr.bf16.mxu0 %v5282_v10  ;;  %v4134_v34 = vpop.f32.mrb[34].mxu1 }
 0x13a   :  { %v3552_v1 = vadd.f32 %v3551_v21, %v3550_v28  ;;  %3983 = vmatprep.subr.bf16.mxu1 %v5288_v59  ;;  %v859_v17 = vadd.f32 %v3549_v50, %v5481_v30  ;;  %v925_v4 = vpop.f32.mrb[35].mxu1  ;;  %v4428_v50 = vld [vmem:[%s6064_s2 + $0x8c] ss:$20 sps:$4 sm:$0xff]   ;;  %v4431_v21 = vld [vmem:[%s6064_s2 + $0x94] ss:$20 sps:$4 sm:$0xff]  }
 0x13b   :  { %2254 = vmatmul.mubr.bf16.gmra.mrb[116].mxu0 %v3277_v18 }
 0x13c   :  { %3944 = vmatpush3.bf16.msra.mxu0 %v5294_v12  ;;  %v5582_v29 = vadd.f32 %v922_v15, %v859_v17  ;;  %v862_v14 = vadd.f32 %v3552_v1, %v5486_v22  ;;  %2490 = vmatprep.mubr.bf16.mxu0 %v4430_v45  ;;  %v4434_v17 = vld [vmem:[%s6064_s2 + $0xb8] ss:$20 sps:$4 sm:$0xff]  }
 0x13d   :  { %3984 = vmatpush3.bf16.msra.mxu1 %v5300_v60  ;;  %3945 = vmatprep.subr.bf16.mxu0 %v5306_v61 }
 0x13e   :  { %v5589_v28 = vadd.f32 %v925_v4, %v862_v14  ;;  %3985 = vmatprep.subr.bf16.mxu1 %v5492_v7  ;;  %v3553_v30 = vpop.f32.mrb[28].mxu0 }
 0x13f   :  { %v3554_v18 = vpop.f32.mrb[29].mxu0 }
 0x140   :  { %3946 = vmatpush3.bf16.msra.mxu0 %v5392_v31  ;;  %v3555_v15 = vadd.f32 %v3554_v18, %v3553_v30  ;;  %v3556_v45 = vpop.f32.mrb[30].mxu0  ;;  %v4436_v30 = vld [vmem:[%s6064_s2 + $0xc0] ss:$20 sps:$4 sm:$0xff]  }
 0x141   :  { %3986 = vmatpush3.bf16.msra.mxu1 %v5504_v9  ;;  %v3557_v1 = vpop.f32.mrb[31].mxu0  ;;  %4203 = vmatprep.subr.bf16.mxu0 %v5404_v5  ;;  %v5606_v4 = vpop.f32.mrb[36].mxu1 }
 0x142   :  { %v867_v14 = vadd.f32 %v3555_v15, %v5513_v25  ;;  %v3558_v22 = vadd.f32 %v3557_v1, %v3556_v45  ;;  %4019 = vmatprep.subr.bf16.mxu1 %v5119_v23  ;;  %v938_v18 = vpop.f32.mrb[37].mxu1  ;;  %v4442_v15 = vld [vmem:[%s6064_s2 + $0xe8] ss:$20 sps:$4 sm:$0xff]  }
 0x143   :  { %2491 = vmatmul.mubr.bf16.vlgmr.msra.gmra.mrb[120].mxu0 %v4428_v50  ;;  %v4138_v62 = vpop.f32.mrb[38].mxu1 }
 0x144   :  { %v5613_v9 = vadd.f32 %v4133_v36, %v867_v14  ;;  %v870_v7 = vadd.f32 %v3558_v22, %v5521_v52  ;;  %2555 = vmatmul.mubr.bf16.vlgmr.msra.gmra.mrb[120].mxu1 %v4431_v21  ;;  %4204 = vmatpush3.bf16.msra.mxu0 %v5404_v5  ;;  %v941_v60 = vpop.f32.mrb[39].mxu1  ;;  %v4438_v52 = vld [vmem:[%s6064_s2 + $0xb4] ss:$20 sps:$4 sm:$0xff]  }
 0x145   :  { %4020 = vmatpush3.bf16.msra.mxu1 %v5132_v63  ;;  %2498 = vmatprep.mubr.bf16.mxu0 %v4434_v17  ;;  %v4439_v63 = vld [vmem:[%s6064_s2 + $0xbc] ss:$20 sps:$4 sm:$0xff]  }
 0x146   :  { %v5618_v25 = vadd.f32 %v4134_v34, %v870_v7  ;;  %v3559_v23 = vpop.f32.mrb[32].mxu0  ;;  %2562 = vmatprep.mubr.bf16.mxu1 %v4436_v30  ;;  %4021 = vmatprep.subr.bf16.mxu1 %v5139_v32  ;;  %v954_v62 = vmax.f32 %v5468_v27, %v5613_v9  ;;  %v4440_v32 = vld [vmem:[%s6064_s2 + $0xe0] ss:$20 sps:$4 sm:$0xff]   ;;  %v4444_v30 = vld [vmem:[%s6064_s2 + $0xdc] ss:$20 sps:$4 sm:$0xff]  }
 0x147   :  { %v3560_v36 = vpop.f32.mrb[33].mxu0  ;;  %4205 = vmatprep.subr.bf16.mxu0 %v5422_v19 }
 0x148   :  { %v3561_v50 = vadd.f32 %v3560_v36, %v3559_v23  ;;  %v3562_v22 = vpop.f32.mrb[34].mxu0  ;;  %4206 = vmatpush3.bf16.msra.mxu0 %v5422_v19  ;;  %v955_v7 = vmax.f32 %v5475_v6, %v5618_v25  ;;  %v4465_v6 = vld [vmem:[%s6065_s3 + $0x94] ss:$20 sps:$4 sm:$0xff]  }
 0x149   :  { %v3563_v34 = vpop.f32.mrb[35].mxu0  ;;  %4022 = vmatpush3.bf16.msra.mxu1 %v5155_v35  ;;  %4207 = vmatprep.subr.bf16.mxu0 %v5441_v16  ;;  %v3302_v35 = vld [vmem:[%s6064_s2 + $0x104] sm:$0x11] }
 0x14a   :  { %v3564_v45 = vadd.f32 %v3563_v34, %v3562_v22  ;;  %v875_v21 = vadd.f32 %v3561_v50, %v5541_v48  ;;  %4023 = vmatprep.subr.bf16.mxu1 %v5170_v40  ;;  %v3321_v36 = vcombine.high %v3302_v35, %v3302_v35  ;;  %v3320_v34 = vcombine.low %v3302_v35, %v3302_v35 }
 0x14b   :  { %2499 = vmatmul.mubr.bf16.gmra.mrb[124].mxu0 %v4438_v52 }
 0x14c   :  { %2563 = vmatmul.mubr.bf16.gmra.mrb[124].mxu1 %v4439_v63  ;;  %v5643_v1 = vadd.f32 %v938_v18, %v875_v21  ;;  %v878_v17 = vadd.f32 %v3564_v45, %v5547_v44  ;;  %2506 = vmatprep.mubr.bf16.mxu0 %v4440_v32  ;;  %v3303_v44 = vld [vmem:[%s6064_s2 + $0x10c] sm:$0x11] }
 0x14d   :  { %4024 = vmatpush3.bf16.msra.mxu1 %v5188_v46  ;;  %2570 = vmatprep.mubr.bf16.mxu1 %v4442_v15  ;;  %v3323_v50 = vcombine.high %v3303_v44, %v3303_v44  ;;  %v3322_v21 = vcombine.low %v3303_v44, %v3303_v44 }
 0x14e   :  { %v956_v14 = vmax.f32 %v5507_v11, %v5643_v1  ;;  %v5652_v48 = vadd.f32 %v941_v60, %v878_v17  ;;  %v3565_v40 = vpop.f32.mrb[36].mxu0  ;;  %4025 = vmatprep.subr.bf16.mxu1 %v5200_v47  ;;  %4208 = vmatpush3.bf16.msra.mxu0 %v5441_v16  ;;  %v4445_v47 = vld [vmem:[%s6064_s2 + $0xe4] ss:$20 sps:$4 sm:$0xff]   ;;  %v4472_v11 = vld [vmem:[%s6065_s3 + $0xbc] ss:$20 sps:$4 sm:$0xff]  }
 0x14f   :  { %v3566_v46 = vpop.f32.mrb[37].mxu0  ;;  %4209 = vmatprep.subr.bf16.mxu0 %v5455_v20 }
 0x150   :  { %v957_v60 = vmax.f32 %v5516_v37, %v5652_v48  ;;  %v3567_v18 = vadd.f32 %v3566_v46, %v3565_v40  ;;  %v3568_v23 = vpop.f32.mrb[38].mxu0  ;;  %v4477_v37 = vld [vmem:[%s6065_s3 + $0x114] ss:$0 sps:$4 sm:$0x11]  }
 0x151   :  { %v3569_v52 = vpop.f32.mrb[39].mxu0  ;;  %4026 = vmatpush3.bf16.msra.mxu1 %v5219_v51 }
 0x152   :  { %v883_v22 = vadd.f32 %v3567_v18, %v5566_v43  ;;  %4027 = vmatprep.subr.bf16.mxu1 %v5231_v54  ;;  %4210 = vmatpush3.bf16.msra.mxu0 %v5455_v20 }
 0x153   :  { %2507 = vmatmul.mubr.bf16.gmra.mrb[128].mxu0 %v4444_v30  ;;  %4059 = vmatprep.subr.bf16.mxu0 %v5096_v13 }
 0x154   :  { %v5674_v63 = vadd.f32 %v5606_v4, %v883_v22  ;;  %2571 = vmatmul.mubr.bf16.gmra.mrb[128].mxu1 %v4445_v47  ;;  %2514 = vmatprep.mubr.bf16.mxu0 %v3321_v36  ;;  %v4450_v4 = vld [vmem:[%s6064_s2 + $0x9c] ss:$20 sps:$4 sm:$0xff]   ;;  %v4452_v22 = vld [vmem:[%s6065_s3 + $0x8c] ss:$20 sps:$4 sm:$0xff]  }
 0x155   :  { %4028 = vmatpush3.bf16.msra.mxu1 %v5243_v56  ;;  %2578 = vmatprep.mubr.bf16.mxu1 %v3323_v50 }
 0x156   :  { %v3595_v32 = vpop.f32.mrb[40].mxu0  ;;  %4029 = vmatprep.subr.bf16.mxu1 %v5255_v0  ;;  %v958_v51 = vmax.f32 %v5496_v26, %v5674_v63  ;;  %v4454_v0 = vld [vmem:[%s6065_s3 + $0x90] ss:$20 sps:$4 sm:$0xff]  }
 0x157   :  { %v3635_v54 = vpop.f32.mrb[40].mxu1  ;;  %v3596_v43 = vpop.f32.mrb[41].mxu0 }
 0x158   :  { %v3597_v15 = vadd.f32 %v3596_v43, %v3595_v32  ;;  %v3636_v45 = vpop.f32.mrb[41].mxu1  ;;  %v3598_v13 = vpop.f32.mrb[42].mxu0 }
 0x159   :  { %v3637_v17 = vadd.f32 %v3636_v45, %v3635_v54  ;;  %v3638_v56 = vpop.f32.mrb[42].mxu1  ;;  %v3599_v40 = vpop.f32.mrb[43].mxu0  ;;  %4030 = vmatpush3.bf16.msra.mxu1 %v5267_v58 }
 0x15a   :  { %v3600_v46 = vadd.f32 %v3599_v40, %v3598_v13  ;;  %v3639_v30 = vpop.f32.mrb[43].mxu1  ;;  %4031 = vmatprep.subr.bf16.mxu1 %v5282_v10  ;;  %v4451_v10 = vld [vmem:[%s6064_s2 + $0xc4] ss:$20 sps:$4 sm:$0xff]  }
 0x15b   :  { %v3640_v35 = vadd.f32 %v3639_v30, %v3638_v56  ;;  %2515 = vmatmul.mubr.bf16.gmra.mrb[132].mxu0 %v3320_v34  ;;  %v5688_v44 = vadd.f32 %v3637_v17, %v3597_v15  ;;  %v4457_v15 = vld [vmem:[%s6065_s3 + $0xb8] ss:$20 sps:$4 sm:$0xff]   ;;  %v4456_v56 = vld [vmem:[%s6064_s2 + $0x114] ss:$0 sps:$4 sm:$0x11]  }
 0x15c   :  { %2579 = vmatmul.mubr.bf16.gmra.mrb[132].mxu1 %v3322_v21  ;;  %4211 = vmatprep.mubr.msk.bf16.mxu0 %vm430_vm0, %v4450_v4 }
 0x15d   :  { %4032 = vmatpush3.bf16.msra.mxu1 %v5294_v12  ;;  %2815 = vmatprep.mubr.bf16.mxu1 %v4454_v0  ;;  %v5692_v18 = vadd.f32 %v3640_v35, %v3600_v46  ;;  %v4459_v0 = vld [vmem:[%s6065_s3 + $0xb4] ss:$20 sps:$4 sm:$0xff]  }
 0x15e   :  { %v3601_v58 = vpop.f32.mrb[44].mxu0  ;;  %4033 = vmatprep.subr.bf16.mxu1 %v5306_v61  ;;  %v4455_v61 = vld [vmem:[%s6064_s2 + $0xec] ss:$20 sps:$4 sm:$0xff]  }
 0x15f   :  { %v3641_v23 = vpop.f32.mrb[44].mxu1  ;;  %v3602_v47 = vpop.f32.mrb[45].mxu0  ;;  %v4460_v35 = vld [vmem:[%s6065_s3 + $0xe0] ss:$20 sps:$4 sm:$0xff]  }
 0x160   :  { %v3603_v36 = vadd.f32 %v3602_v47, %v3601_v58  ;;  %v3642_v52 = vpop.f32.mrb[45].mxu1  ;;  %v3604_v50 = vpop.f32.mrb[46].mxu0 }
 0x161   :  { %v3643_v12 = vadd.f32 %v3642_v52, %v3641_v23  ;;  %v3644_v32 = vpop.f32.mrb[46].mxu1  ;;  %v3605_v54 = vpop.f32.mrb[47].mxu0  ;;  %4034 = vmatpush3.bf16.msra.mxu1 %v5392_v31 }
 0x162   :  { %v3606_v43 = vadd.f32 %v3605_v54, %v3604_v50  ;;  %v3645_v34 = vpop.f32.mrb[47].mxu1  ;;  %4219 = vmatprep.subr.bf16.mxu1 %v5404_v5 }
 0x163   :  { %v3646_v45 = vadd.f32 %v3645_v34, %v3644_v32  ;;  %4212 = vmatmul.mubr.msk.bf16.vlgmr.msra.gmra.mrb[136].mxu0 %vm430_vm0, %v4451_v10  ;;  %v1191_v13 = vadd.f32 %v3643_v12, %v3603_v36  ;;  %v4462_v12 = vld [vmem:[%s6065_s3 + $0xdc] ss:$20 sps:$4 sm:$0xff]  }
 0x164   :  { %4060 = vmatpush3.bf16.msra.mxu0 %v5056_v24  ;;  %2816 = vmatmul.mubr.bf16.vlgmr.msra.gmra.mrb[136].mxu1 %v4452_v22 }
 0x165   :  { %4061 = vmatprep.subr.bf16.mxu0 %v5145_v33  ;;  %4215 = vmatprep.mubr.msk.bf16.mxu0 %vm430_vm0, %v4455_v61  ;;  %v5713_v31 = vadd.f32 %v3646_v45, %v3606_v43 }
 0x166   :  { %v3607_v21 = vpop.f32.mrb[48].mxu0  ;;  %2823 = vmatprep.mubr.bf16.mxu1 %v4457_v15  ;;  %4220 = vmatpush3.bf16.msra.mxu1 %v5404_v5 }
 0x167   :  { %v3647_v4 = vpop.f32.mrb[48].mxu1  ;;  %v3608_v17 = vpop.f32.mrb[49].mxu0  ;;  %4221 = vmatprep.subr.bf16.mxu1 %v5422_v19 }
 0x168   :  { %4062 = vmatpush3.bf16.msra.mxu0 %v5164_v38  ;;  %v3609_v24 = vadd.f32 %v3608_v17, %v3607_v21  ;;  %v3648_v33 = vpop.f32.mrb[49].mxu1  ;;  %v3610_v40 = vpop.f32.mrb[50].mxu0  ;;  %v4467_v38 = vld [vmem:[%s6065_s3 + $0x98] ss:$20 sps:$4 sm:$0xff]  }
 0x169   :  { %v3649_v46 = vadd.f32 %v3648_v33, %v3647_v4  ;;  %v3650_v30 = vpop.f32.mrb[50].mxu1  ;;  %4063 = vmatprep.subr.bf16.mxu0 %v5176_v41  ;;  %v3611_v5 = vpop.f32.mrb[51].mxu0 }
 0x16a   :  { %v3612_v58 = vadd.f32 %v3611_v5, %v3610_v40  ;;  %v3651_v23 = vpop.f32.mrb[51].mxu1  ;;  %4222 = vmatpush3.bf16.msra.mxu1 %v5422_v19  ;;  %v3347_v19 = vld [vmem:[%s6065_s3 + $0x104] sm:$0x11]  ;;  %v4470_v5 = vld [vmem:[%s6065_s3 + $0xc0] ss:$20 sps:$4 sm:$0xff]  }
 0x16b   :  { %v3652_v47 = vadd.f32 %v3651_v23, %v3650_v30  ;;  %4216 = vmatmul.mubr.msk.bf16.gmra.mrb[140].mxu0 %vm430_vm0, %v4456_v56  ;;  %4223 = vmatprep.subr.bf16.mxu1 %v5441_v16  ;;  %v1199_v10 = vadd.f32 %v3649_v46, %v3609_v24  ;;  %v3366_v61 = vcombine.high %v3347_v19, %v3347_v19  ;;  %v4469_v30 = vld [vmem:[%s6065_s3 + $0xc4] ss:$20 sps:$4 sm:$0xff]  }
 0x16c   :  { %4064 = vmatpush3.bf16.msra.mxu0 %v5194_v3  ;;  %2824 = vmatmul.mubr.bf16.gmra.mrb[140].mxu1 %v4459_v0  ;;  %v3365_v17 = vcombine.low %v3347_v19, %v3347_v19  ;;  %v6075_v24 = vmax.f32 %v5472_v42, %v5582_v29  ;;  %v6077_v0 = vld [vmem:[#allocation2_spill] sm:$0xff]  ;;  %v6078_v42 = vld [vmem:[#allocation3_spill] sm:$0xff] }
 0x16d   :  { %4065 = vmatprep.subr.bf16.mxu0 %v5209_v49  ;;  %2831 = vmatprep.mubr.bf16.mxu1 %v4460_v35  ;;  %v5736_v41 = vadd.f32 %v3652_v47, %v3612_v58 }
 0x16e   :  { %v3613_v36 = vpop.f32.mrb[52].mxu0  ;;  %4224 = vmatpush3.bf16.msra.mxu1 %v5441_v16  ;;  %2879 = vmatprep.mubr.bf16.mxu0 %v4467_v38 }
 0x16f   :  { %v3653_v52 = vpop.f32.mrb[52].mxu1  ;;  %v3614_v50 = vpop.f32.mrb[53].mxu0  ;;  %4225 = vmatprep.subr.bf16.mxu1 %v5455_v20 }
 0x170   :  { %4066 = vmatpush3.bf16.msra.mxu0 %v5225_v53  ;;  %v3615_v3 = vadd.f32 %v3614_v50, %v3613_v36  ;;  %v3654_v22 = vpop.f32.mrb[53].mxu1  ;;  %v3616_v49 = vpop.f32.mrb[54].mxu0 }
 0x171   :  { %v3655_v32 = vadd.f32 %v3654_v22, %v3653_v52  ;;  %4067 = vmatprep.subr.bf16.mxu0 %v5237_v55  ;;  %v3617_v54 = vpop.f32.mrb[55].mxu0  ;;  %v3656_v16 = vpop.f32.mrb[54].mxu1  ;;  %v4475_v22 = vld [vmem:[%s6065_s3 + $0xe4] ss:$20 sps:$4 sm:$0xff]  }
 0x172   :  { %v3657_v43 = vpop.f32.mrb[55].mxu1  ;;  %4226 = vmatpush3.bf16.msra.mxu1 %v5455_v20 }
 0x173   :  { %v1207_v34 = vadd.f32 %v3655_v32, %v3615_v3  ;;  %v3348_v3 = vld [vmem:[%s6065_s3 + $0x10c] sm:$0x11] }
 0x174   :  { %4068 = vmatpush3.bf16.msra.mxu0 %v5249_v57  ;;  %2832 = vmatmul.mubr.bf16.gmra.mrb[144].mxu1 %v4462_v12  ;;  %v3368_v32 = vcombine.high %v3348_v3, %v3348_v3 }
 0x175   :  { %4069 = vmatprep.subr.bf16.mxu0 %v5261_v2  ;;  %2839 = vmatprep.mubr.bf16.mxu1 %v3366_v61 }
 0x176   :  { %v4149_v53 = vpop.f32.mrb[56].mxu0 }
 0x177   :  { %v1255_v15 = vadd.f32 %v4149_v53, %v1191_v13  ;;  %v1246_v45 = vpop.f32.mrb[57].mxu0  ;;  %v3683_v21 = vpop.f32.mrb[56].mxu1  ;;  %v4468_v13 = vld [vmem:[%s6065_s3 + $0x9c] ss:$20 sps:$4 sm:$0xff]   ;;  %v3367_v53 = vcombine.low %v3348_v3, %v3348_v3 }
 0x178   :  { %4070 = vmatpush3.bf16.msra.mxu0 %v5276_v8  ;;  %v1247_v55 = vadd.f32 %v1246_v45, %v5688_v44  ;;  %v4150_v4 = vpop.f32.mrb[58].mxu0  ;;  %v3684_v56 = vpop.f32.mrb[57].mxu1 }
 0x179   :  { %v5756_v20 = vmax.f32 %v954_v62, %v1255_v15  ;;  %v1258_v57 = vadd.f32 %v4150_v4, %v5713_v31  ;;  %4071 = vmatprep.subr.bf16.mxu0 %v5288_v59  ;;  %v1249_v2 = vpop.f32.mrb[59].mxu0  ;;  %v5763_v8 = vadd.f32 %v3684_v56, %v3683_v21  ;;  %v3686_v44 = vpop.f32.mrb[58].mxu1  ;;  %v6076_v31 = vmax.f32 %v5484_v39, %v5589_v28 }
 0x17a   :  { %v5768_v33 = vmax.f32 %v6075_v24, %v1247_v55  ;;  %v1250_v27 = vadd.f32 %v1249_v2, %v5692_v18  ;;  %v3687_v9 = vpop.f32.mrb[59].mxu1  ;;  %v5848_v24 = vld [vmem:[%s6066_s5] ss:$0 sm:$0xff] }
 0x17b   :  { %v5774_v59 = vmax.f32 %v955_v7, %v1258_v57  ;;  %v5776_v62 = vadd.f32 %v3687_v9, %v3686_v44  ;;  %v6079_v7 = vld [vmem:[#allocation4_spill] sm:$0xff] }
 0x17c   :  { %v5781_v40 = vmax.f32 %v6076_v31, %v1250_v27  ;;  %4072 = vmatpush3.bf16.msra.mxu0 %v6077_v0  ;;  %2840 = vmatmul.mubr.bf16.gmra.mrb[148].mxu1 %v3365_v17  ;;  %v5854_v0 = vld [vmem:[%s6067_s6] ss:$0 sm:$0xff] }
 0x17d   :  { %4073 = vmatprep.subr.bf16.mxu0 %v6078_v42  ;;  %4227 = vmatprep.mubr.msk.bf16.mxu1 %vm430_vm0, %v4468_v13 }
 0x17e   :  { %v4153_v29 = vpop.f32.mrb[60].mxu0 }
 0x17f   :  { %v1271_v18 = vadd.f32 %v4153_v29, %v1207_v34  ;;  %v1262_v46 = vpop.f32.mrb[61].mxu0  ;;  %v3689_v25 = vpop.f32.mrb[60].mxu1 }
 0x180   :  { %4074 = vmatpush3.bf16.msra.mxu0 %v6079_v7  ;;  %v1263_v39 = vadd.f32 %v1262_v46, %v1199_v10  ;;  %v4154_v28 = vpop.f32.mrb[62].mxu0  ;;  %v3690_v35 = vpop.f32.mrb[61].mxu1  ;;  %v4476_v10 = vld [vmem:[%s6065_s3 + $0xec] ss:$20 sps:$4 sm:$0xff]  }
 0x181   :  { %v5799_v58 = vmax.f32 %v958_v51, %v1271_v18  ;;  %v1265_v23 = vpop.f32.mrb[63].mxu0  ;;  %v5801_v38 = vadd.f32 %v3690_v35, %v3689_v25  ;;  %v3692_v47 = vpop.f32.mrb[62].mxu1 }
 0x182   :  { %v5809_v36 = vmax.f32 %v956_v14, %v1263_v39  ;;  %v1266_v19 = vadd.f32 %v1265_v23, %v5736_v41  ;;  %v3693_v52 = vpop.f32.mrb[63].mxu1  ;;  %v4473_v14 = vld [vmem:[%s6065_s3 + $0xe8] ss:$20 sps:$4 sm:$0xff]  }
 0x183   :  { %2880 = vmatmul.mubr.bf16.vlgmr.msra.gmra.mrb[144].mxu0 %v4465_v6  ;;  %v5812_v26 = vadd.f32 %v3693_v52, %v3692_v47  ;;  %v4516_v47 = vmov -1.0  }
 0x184   :  { %v5817_v63 = vmax.f32 %v957_v60, %v1266_v19  ;;  %4228 = vmatmul.mubr.msk.bf16.vlgmr.msra.gmra.mrb[152].mxu1 %vm430_vm0, %v4469_v30  ;;  %2887 = vmatprep.mubr.bf16.mxu0 %v4470_v5 }
 0x185   :  { %4231 = vmatprep.mubr.msk.bf16.mxu1 %vm430_vm0, %v4476_v10 }
 0x187   :  { %v3695_v1 = vpop.f32.mrb[64].mxu1 }
 0x188   :  { %v3696_v51 = vpop.f32.mrb[65].mxu1 }
 0x189   :  { %v5830_v48 = vadd.f32 %v3696_v51, %v3695_v1  ;;  %v3698_v60 = vpop.f32.mrb[66].mxu1 }
 0x18a   :  { %v3699_v41 = vpop.f32.mrb[67].mxu1 }
 0x18b   :  { %2888 = vmatmul.mubr.bf16.gmra.mrb[148].mxu0 %v4472_v11  ;;  %v5832_v50 = vadd.f32 %v3699_v41, %v3698_v60 }
 0x18c   :  { %2895 = vmatprep.mubr.bf16.mxu0 %v4473_v14  ;;  %4232 = vmatmul.mubr.msk.bf16.gmra.mrb[156].mxu1 %vm430_vm0, %v4477_v37 }
 0x18f   :  { %v3701_v49 = vpop.f32.mrb[68].mxu1 }
 0x190   :  { %v3702_v12 = vpop.f32.mrb[69].mxu1 }
 0x191   :  { %v5841_v54 = vadd.f32 %v3702_v12, %v3701_v49  ;;  %v3704_v61 = vpop.f32.mrb[70].mxu1 }
 0x192   :  { %v3705_v16 = vpop.f32.mrb[71].mxu1 }
 0x193   :  { %2896 = vmatmul.mubr.bf16.gmra.mrb[152].mxu0 %v4475_v22 }
 0x194   :  { %2903 = vmatprep.mubr.bf16.mxu0 %v3368_v32 }
 0x196   :  { %v3723_v43 = vpop.f32.mrb[64].mxu0 }
 0x197   :  { %v3724_v34 = vpop.f32.mrb[65].mxu0  ;;  %v4165_v15 = vpop.f32.mrb[72].mxu1 }
 0x198   :  { %v3725_v45 = vadd.f32 %v3724_v34, %v3723_v43  ;;  %v3726_v21 = vpop.f32.mrb[66].mxu0  ;;  %v1570_v55 = vpop.f32.mrb[73].mxu1 }
 0x199   :  { %v3727_v4 = vpop.f32.mrb[67].mxu0  ;;  %v4166_v17 = vpop.f32.mrb[74].mxu1 }
 0x19a   :  { %v3728_v56 = vadd.f32 %v3727_v4, %v3726_v21  ;;  %v1507_v57 = vadd.f32 %v3725_v45, %v5763_v8  ;;  %v1573_v2 = vpop.f32.mrb[75].mxu1 }
 0x19b   :  { %2904 = vmatmul.mubr.bf16.gmra.mrb[156].mxu0 %v3367_v53 }
 0x19c   :  { %v1571_v13 = vadd.f32 %v1570_v55, %v1507_v57  ;;  %v1510_v44 = vadd.f32 %v3728_v56, %v5776_v62 }
 0x19e   :  { %v1600_v27 = vmax.f32 %v5768_v33, %v1571_v13  ;;  %v1574_v9 = vadd.f32 %v1573_v2, %v1510_v44  ;;  %v3729_v31 = vpop.f32.mrb[68].mxu0 }
 0x19f   :  { %v3730_v8 = vpop.f32.mrb[69].mxu0 }
 0x1a0   :  { %v1613_v42 = vmul.f32 %v5848_v24, %v1600_v27  ;;  %v1601_v29 = vmax.f32 %v5781_v40, %v1574_v9  ;;  %v3731_v62 = vadd.f32 %v3730_v8, %v3729_v31  ;;  %v3732_v18 = vpop.f32.mrb[70].mxu0 }
 0x1a1   :  { %v3733_v46 = vpop.f32.mrb[71].mxu0  ;;  %v4169_v6 = vpop.f32.mrb[76].mxu1 }
 0x1a2   :  { %v1626_v25 = vadd.f32 %v5854_v0, %v1613_v42  ;;  %v1614_v33 = vmul.f32 %v5848_v24, %v1601_v29  ;;  %v1515_v7 = vadd.f32 %v3731_v62, %v5801_v38  ;;  %v3734_v39 = vadd.f32 %v3733_v46, %v3732_v18  ;;  %v1586_v28 = vpop.f32.mrb[77].mxu1 }
 0x1a3   :  { %v4170_v30 = vpop.f32.mrb[78].mxu1 }
 0x1a4   :  { %vm1633_vm1 = vcmp.ge.f32.partialorder %v1626_v25, 0.0  ;;  %v1627_v5 = vadd.f32 %v5854_v0, %v1614_v33  ;;  %v1579_v35 = vadd.f32 %v4165_v15, %v1515_v7  ;;  %v1518_v23 = vadd.f32 %v3734_v39, %v5812_v26  ;;  %v1589_v40 = vpop.f32.mrb[79].mxu1 }
 0x1a5   :  { %v1640_v10 = vsel %vm1633_vm1, 1.0, %v4516_v47 }
 0x1a6   :  { %v3389_v19 = vpack.c.bf16 %v1640_v10, %v1640_v10  ;;  %vm1634_vm3 = vcmp.ge.f32.partialorder %v1627_v5, 0.0  ;;  %v1602_v52 = vmax.f32 %v5756_v20, %v1579_v35  ;;  %v1582_v11 = vadd.f32 %v4166_v17, %v1518_v23  ;;  %v3735_v38 = vpop.f32.mrb[72].mxu0 }
 0x1a7   :  { %v1641_v1 = vsel %vm1634_vm3, 1.0, %v4516_v47  ;;  %v3736_v14 = vpop.f32.mrb[73].mxu0 }
 0x1a8   :  { %1677 = vst.msk [vmem:[%s6068_s7] sm:$0xf] %vm1676_vm2, %v3389_v19  ;;  %v3390_v26 = vpack.c.bf16 %v1641_v1, %v1641_v1  ;;  %v1615_v51 = vmul.f32 %v5848_v24, %v1602_v52  ;;  %v1603_v37 = vmax.f32 %v5774_v59, %v1582_v11  ;;  %v3737_v60 = vadd.f32 %v3736_v14, %v3735_v38  ;;  %v3738_v41 = vpop.f32.mrb[74].mxu0 }
 0x1a9   :  { %v3739_v3 = vpop.f32.mrb[75].mxu0 }
 0x1aa   :  { %1678 = vst.msk [vmem:[%s6068_s7 + $0x4] sm:$0xf] %vm1676_vm2, %v3390_v26  ;;  %v1628_v20 = vadd.f32 %v5854_v0, %v1615_v51  ;;  %v1616_v22 = vmul.f32 %v5848_v24, %v1603_v37  ;;  %v3740_v49 = vadd.f32 %v3739_v3, %v3738_v41  ;;  %v1523_v12 = vadd.f32 %v3737_v60, %v5830_v48 }
 0x1ac   :  { %vm1635_vm4 = vcmp.ge.f32.partialorder %v1628_v20, 0.0  ;;  %v1629_v32 = vadd.f32 %v5854_v0, %v1616_v22  ;;  %v1587_v61 = vadd.f32 %v1586_v28, %v1523_v12  ;;  %v1526_v59 = vadd.f32 %v3740_v49, %v5832_v50 }
 0x1ad   :  { %v1642_v16 = vsel %vm1635_vm4, 1.0, %v4516_v47 }
 0x1ae   :  { %v3391_v43 = vpack.c.bf16 %v1642_v16, %v1642_v16  ;;  %vm1636_vm5 = vcmp.ge.f32.partialorder %v1629_v32, 0.0  ;;  %v1604_v34 = vmax.f32 %v5809_v36, %v1587_v61  ;;  %v1590_v53 = vadd.f32 %v1589_v40, %v1526_v59  ;;  %v3741_v15 = vpop.f32.mrb[76].mxu0  ;;  %v1686_v40 = vld [vmem:[%s6068_s7 + $0x18] sm:$0x1] }
 0x1af   :  { %v1643_v45 = vsel %vm1636_vm5, 1.0, %v4516_v47  ;;  %v3742_v21 = vpop.f32.mrb[77].mxu0 }
 0x1b0   :  { %1679 = vst.msk [vmem:[%s6068_s7 + $0x8] sm:$0xf] %vm1676_vm2, %v3391_v43  ;;  %v3392_v48 = vpack.c.bf16 %v1643_v45, %v1643_v45  ;;  %v1617_v55 = vmul.f32 %v5848_v24, %v1604_v34  ;;  %v1605_v50 = vmax.f32 %v5817_v63, %v1590_v53  ;;  %v3743_v4 = vadd.f32 %v3742_v21, %v3741_v15  ;;  %v3744_v17 = vpop.f32.mrb[78].mxu0 }
 0x1b1   :  { %v3745_v56 = vpop.f32.mrb[79].mxu0 }
 0x1b2   :  { %1680 = vst.msk [vmem:[%s6068_s7 + $0xc] sm:$0xf] %vm1676_vm2, %v3392_v48  ;;  %v1630_v36 = vadd.f32 %v5854_v0, %v1617_v55  ;;  %v1618_v57 = vmul.f32 %v5848_v24, %v1605_v50  ;;  %v1531_v2 = vadd.f32 %v3743_v4, %v5841_v54 }
 0x1b4   :  { %vm1637_vm6 = vcmp.ge.f32.partialorder %v1630_v36, 0.0  ;;  %v1631_v13 = vadd.f32 %v5854_v0, %v1618_v57  ;;  %v1595_v44 = vadd.f32 %v4169_v6, %v1531_v2 }
 0x1b5   :  { %v1644_v63 = vsel %vm1637_vm6, 1.0, %v4516_v47 }
 0x1b6   :  { %v3393_v27 = vpack.c.bf16 %v1644_v63, %v1644_v63  ;;  %vm1638_vm7 = vcmp.ge.f32.partialorder %v1631_v13, 0.0  ;;  %v1606_v9 = vmax.f32 %v5799_v58, %v1595_v44  ;;  %v3771_v31 = vpop.f32.mrb[80].mxu0 }
 0x1b7   :  { %v1645_v8 = vsel %vm1638_vm7, 1.0, %v4516_v47  ;;  %v3811_v42 = vpop.f32.mrb[80].mxu1  ;;  %v3772_v29 = vpop.f32.mrb[81].mxu0 }
 0x1b8   :  { %1681 = vst.msk [vmem:[%s6068_s7 + $0x10] sm:$0xf] %vm1676_vm2, %v3393_v27  ;;  %v3394_v54 = vpack.c.bf16 %v1645_v8, %v1645_v8  ;;  %v1619_v62 = vmul.f32 %v5848_v24, %v1606_v9  ;;  %v3773_v18 = vadd.f32 %v3772_v29, %v3771_v31  ;;  %v3812_v46 = vpop.f32.mrb[81].mxu1  ;;  %v3774_v6 = vpop.f32.mrb[82].mxu0 }
 0x1b9   :  { %v3813_v25 = vadd.f32 %v3812_v46, %v3811_v42  ;;  %v3814_v33 = vpop.f32.mrb[82].mxu1  ;;  %v3775_v7 = vpop.f32.mrb[83].mxu0 }
 0x1ba   :  { %1682 = vst.msk [vmem:[%s6068_s7 + $0x14] sm:$0xf] %vm1676_vm2, %v3394_v54  ;;  %v1632_v58 = vadd.f32 %v5854_v0, %v1619_v62  ;;  %v3776_v39 = vadd.f32 %v3775_v7, %v3774_v6  ;;  %v3815_v28 = vpop.f32.mrb[83].mxu1 }
 0x1bb   :  { %v3816_v30 = vadd.f32 %v3815_v28, %v3814_v33  ;;  %v1914_v5 = vadd.f32 %v3813_v25, %v3773_v18 }
 0x1bc   :  { %vm1639_vm10 = vcmp.ge.f32.partialorder %v1632_v58, 0.0 }
 0x1bd   :  { %v1646_v35 = vsel %vm1639_vm10, 1.0, %v4516_v47  ;;  %v1917_v10 = vadd.f32 %v3816_v30, %v3776_v39 }
 0x1be   :  { %v3395_v19 = vpack.c.bf16 %v1646_v35, %v1646_v35  ;;  %v3777_v52 = vpop.f32.mrb[84].mxu0 }
 0x1bf   :  { %v3817_v11 = vpop.f32.mrb[84].mxu1  ;;  %v3778_v38 = vpop.f32.mrb[85].mxu0 }
 0x1c0   :  { %v1687_v1 = vsel %vm5912_vm11, %v3395_v19, %v1686_v40  ;;  %v3779_v14 = vadd.f32 %v3778_v38, %v3777_v52  ;;  %v3818_v26 = vpop.f32.mrb[85].mxu1  ;;  %v3780_v51 = vpop.f32.mrb[86].mxu0 }
 0x1c1   :  { %1688 = vst [vmem:[%s6068_s7 + $0x18] sm:$0x1] %v1687_v1  ;;  %v3819_v37 = vadd.f32 %v3818_v26, %v3817_v11  ;;  %v3820_v60 = vpop.f32.mrb[86].mxu1  ;;  %v3781_v41 = vpop.f32.mrb[87].mxu0 }
 0x1c2   :  { %v3782_v3 = vadd.f32 %v3781_v41, %v3780_v51  ;;  %v3821_v20 = vpop.f32.mrb[87].mxu1 }
 0x1c3   :  { %v3822_v22 = vadd.f32 %v3821_v20, %v3820_v60  ;;  %v1922_v49 = vadd.f32 %v3819_v37, %v3779_v14 }
 0x1c5   :  { %v1925_v12 = vadd.f32 %v3822_v22, %v3782_v3 }
 0x1c6   :  { %v3783_v32 = vpop.f32.mrb[88].mxu0 }
 0x1c7   :  { %v3823_v61 = vpop.f32.mrb[88].mxu1  ;;  %v3784_v59 = vpop.f32.mrb[89].mxu0 }
 0x1c8   :  { %v3785_v16 = vadd.f32 %v3784_v59, %v3783_v32  ;;  %v3824_v43 = vpop.f32.mrb[89].mxu1  ;;  %v3786_v34 = vpop.f32.mrb[90].mxu0 }
 0x1c9   :  { %v3825_v53 = vadd.f32 %v3824_v43, %v3823_v61  ;;  %v3826_v15 = vpop.f32.mrb[90].mxu1  ;;  %v3787_v45 = vpop.f32.mrb[91].mxu0 }
 0x1ca   :  { %v3788_v21 = vadd.f32 %v3787_v45, %v3786_v34  ;;  %v3827_v48 = vpop.f32.mrb[91].mxu1 }
 0x1cb   :  { %v3828_v55 = vadd.f32 %v3827_v48, %v3826_v15  ;;  %v1930_v50 = vadd.f32 %v3825_v53, %v3785_v16 }
 0x1cd   :  { %v1933_v4 = vadd.f32 %v3828_v55, %v3788_v21 }
 0x1ce   :  { %v3789_v17 = vpop.f32.mrb[92].mxu0 }
 0x1cf   :  { %v3829_v56 = vpop.f32.mrb[92].mxu1  ;;  %v3790_v36 = vpop.f32.mrb[93].mxu0 }
 0x1d0   :  { %v3791_v57 = vadd.f32 %v3790_v36, %v3789_v17  ;;  %v3830_v2 = vpop.f32.mrb[93].mxu1  ;;  %v3792_v13 = vpop.f32.mrb[94].mxu0 }
 0x1d1   :  { %v3831_v44 = vadd.f32 %v3830_v2, %v3829_v56  ;;  %v3793_v63 = vpop.f32.mrb[95].mxu0  ;;  %v3832_v27 = vpop.f32.mrb[94].mxu1 }
 0x1d2   :  { %v3833_v9 = vpop.f32.mrb[95].mxu1 }
 0x1d3   :  { %v1938_v31 = vadd.f32 %v3831_v44, %v3791_v57 }
 0x1d6   :  { %v4181_v8 = vpop.f32.mrb[96].mxu0 }
 0x1d7   :  { %v5924_v42 = vadd.f32 %v4181_v8, %v1922_v49  ;;  %v1977_v29 = vpop.f32.mrb[97].mxu0  ;;  %v3859_v54 = vpop.f32.mrb[96].mxu1 }
 0x1d8   :  { %v5926_v62 = vadd.f32 %v1977_v29, %v1914_v5  ;;  %v4182_v18 = vpop.f32.mrb[98].mxu0  ;;  %v3860_v46 = vpop.f32.mrb[97].mxu1 }
 0x1d9   :  { %v5928_v6 = vadd.f32 %v4182_v18, %v1925_v12  ;;  %v1980_v25 = vpop.f32.mrb[99].mxu0  ;;  %v3861_v33 = vadd.f32 %v3860_v46, %v3859_v54  ;;  %v3862_v7 = vpop.f32.mrb[98].mxu1 }
 0x1da   :  { %v5930_v58 = vadd.f32 %v1980_v25, %v1917_v10  ;;  %v3863_v39 = vpop.f32.mrb[99].mxu1 }
 0x1db   :  { %v3864_v28 = vadd.f32 %v3863_v39, %v3862_v7 }
 0x1de   :  { %v4185_v30 = vpop.f32.mrb[100].mxu0 }
 0x1df   :  { %v5932_v35 = vadd.f32 %v4185_v30, %v1938_v31  ;;  %v1993_v40 = vpop.f32.mrb[101].mxu0  ;;  %v3865_v19 = vpop.f32.mrb[100].mxu1 }
 0x1e0   :  { %v5934_v52 = vadd.f32 %v1993_v40, %v1930_v50  ;;  %v4186_v5 = vpop.f32.mrb[102].mxu0  ;;  %v3866_v11 = vpop.f32.mrb[101].mxu1 }
 0x1e1   :  { %v1996_v38 = vpop.f32.mrb[103].mxu0  ;;  %v3867_v1 = vadd.f32 %v3866_v11, %v3865_v19  ;;  %v3868_v14 = vpop.f32.mrb[102].mxu1 }
 0x1e2   :  { %v5936_v26 = vadd.f32 %v1996_v38, %v1933_v4  ;;  %v3869_v51 = vpop.f32.mrb[103].mxu1 }
 0x1e3   :  { %v3870_v37 = vadd.f32 %v3869_v51, %v3868_v14 }
 0x1e7   :  { %v3871_v10 = vpop.f32.mrb[104].mxu1 }
 0x1e8   :  { %v3872_v60 = vpop.f32.mrb[105].mxu1 }
 0x1e9   :  { %v3873_v41 = vadd.f32 %v3872_v60, %v3871_v10  ;;  %v3874_v3 = vpop.f32.mrb[106].mxu1 }
 0x1ea   :  { %v3875_v20 = vpop.f32.mrb[107].mxu1 }
 0x1eb   :  { %v3876_v22 = vadd.f32 %v3875_v20, %v3874_v3 }
 0x1ef   :  { %v3877_v49 = vpop.f32.mrb[108].mxu1 }
 0x1f0   :  { %v3878_v12 = vpop.f32.mrb[109].mxu1 }
 0x1f1   :  { %v3879_v32 = vadd.f32 %v3878_v12, %v3877_v49  ;;  %v3880_v61 = vpop.f32.mrb[110].mxu1 }
 0x1f2   :  { %v3881_v59 = vpop.f32.mrb[111].mxu1 }
 0x1f6   :  { %v3899_v16 = vpop.f32.mrb[104].mxu0 }
 0x1f7   :  { %v3900_v43 = vpop.f32.mrb[105].mxu0  ;;  %v4197_v34 = vpop.f32.mrb[112].mxu1 }
 0x1f8   :  { %v3901_v53 = vadd.f32 %v3900_v43, %v3899_v16  ;;  %v3902_v15 = vpop.f32.mrb[106].mxu0  ;;  %v2295_v45 = vpop.f32.mrb[113].mxu1 }
 0x1f9   :  { %v3903_v21 = vpop.f32.mrb[107].mxu0  ;;  %v4198_v48 = vpop.f32.mrb[114].mxu1 }
 0x1fa   :  { %v3904_v55 = vadd.f32 %v3903_v21, %v3902_v15  ;;  %v2232_v50 = vadd.f32 %v3901_v53, %v3861_v33  ;;  %v2298_v4 = vpop.f32.mrb[115].mxu1 }
 0x1fc   :  { %v5938_v17 = vadd.f32 %v2295_v45, %v2232_v50  ;;  %v2235_v56 = vadd.f32 %v3904_v55, %v3864_v28 }
 0x1fe   :  { %v2325_v36 = vmax.f32 %v5926_v62, %v5938_v17  ;;  %v5942_v57 = vadd.f32 %v2298_v4, %v2235_v56  ;;  %v3905_v2 = vpop.f32.mrb[108].mxu0 }
 0x1ff   :  { %v3906_v13 = vpop.f32.mrb[109].mxu0 }
 0x200   :  { %v2326_v44 = vmax.f32 %v5930_v58, %v5942_v57  ;;  %v3907_v63 = vadd.f32 %v3906_v13, %v3905_v2  ;;  %v3908_v27 = vpop.f32.mrb[110].mxu0 }
 0x201   :  { %v3909_v9 = vpop.f32.mrb[111].mxu0  ;;  %v4201_v31 = vpop.f32.mrb[116].mxu1 }
 0x202   :  { %v2240_v8 = vadd.f32 %v3907_v63, %v3867_v1  ;;  %v3910_v29 = vadd.f32 %v3909_v9, %v3908_v27  ;;  %v2311_v54 = vpop.f32.mrb[117].mxu1 }
 0x203   :  { %v4202_v18 = vpop.f32.mrb[118].mxu1 }
 0x204   :  { %v5946_v46 = vadd.f32 %v4197_v34, %v2240_v8  ;;  %v2243_v25 = vadd.f32 %v3910_v29, %v3870_v37  ;;  %v2314_v33 = vpop.f32.mrb[119].mxu1 }
 0x206   :  { %v5948_v7 = vadd.f32 %v4198_v48, %v2243_v25  ;;  %v3911_v39 = vpop.f32.mrb[112].mxu0  ;;  %v2327_v28 = vmax.f32 %v5924_v42, %v5946_v46 }
 0x207   :  { %v3912_v30 = vpop.f32.mrb[113].mxu0 }
 0x208   :  { %v3913_v40 = vadd.f32 %v3912_v30, %v3911_v39  ;;  %v3914_v19 = vpop.f32.mrb[114].mxu0  ;;  %v2328_v5 = vmax.f32 %v5928_v6, %v5948_v7 }
 0x209   :  { %v3915_v11 = vpop.f32.mrb[115].mxu0 }
 0x20a   :  { %v3916_v38 = vadd.f32 %v3915_v11, %v3914_v19  ;;  %v2248_v1 = vadd.f32 %v3913_v40, %v3873_v41 }
 0x20c   :  { %v5954_v14 = vadd.f32 %v2311_v54, %v2248_v1  ;;  %v2251_v51 = vadd.f32 %v3916_v38, %v3876_v22 }
 0x20e   :  { %v2329_v37 = vmax.f32 %v5934_v52, %v5954_v14  ;;  %v5958_v10 = vadd.f32 %v2314_v33, %v2251_v51  ;;  %v3917_v60 = vpop.f32.mrb[116].mxu0 }
 0x20f   :  { %v3918_v3 = vpop.f32.mrb[117].mxu0 }
 0x210   :  { %v2330_v20 = vmax.f32 %v5936_v26, %v5958_v10  ;;  %v3919_v49 = vadd.f32 %v3918_v3, %v3917_v60  ;;  %v3920_v12 = vpop.f32.mrb[118].mxu0 }
 0x211   :  { %v3921_v61 = vpop.f32.mrb[119].mxu0 }
 0x212   :  { %v2256_v59 = vadd.f32 %v3919_v49, %v3879_v32 }
 0x214   :  { %v5962_v16 = vadd.f32 %v4201_v31, %v2256_v59 }
 0x216   :  { %v3947_v41 = vpop.f32.mrb[120].mxu0  ;;  %v2331_v22 = vmax.f32 %v5932_v35, %v5962_v16 }
 0x217   :  { %v3987_v43 = vpop.f32.mrb[120].mxu1  ;;  %v3948_v34 = vpop.f32.mrb[121].mxu0 }
 0x218   :  { %v3949_v53 = vadd.f32 %v3948_v34, %v3947_v41  ;;  %v3988_v15 = vpop.f32.mrb[121].mxu1  ;;  %v3950_v45 = vpop.f32.mrb[122].mxu0 }
 0x219   :  { %v3989_v21 = vadd.f32 %v3988_v15, %v3987_v43  ;;  %v3990_v48 = vpop.f32.mrb[122].mxu1  ;;  %v3951_v55 = vpop.f32.mrb[123].mxu0 }
 0x21a   :  { %v3952_v50 = vadd.f32 %v3951_v55, %v3950_v45  ;;  %v3991_v4 = vpop.f32.mrb[123].mxu1 }
 0x21b   :  { %v3992_v56 = vadd.f32 %v3991_v4, %v3990_v48  ;;  %v2557_v2 = vadd.f32 %v3989_v21, %v3949_v53 }
 0x21d   :  { %v2560_v13 = vadd.f32 %v3992_v56, %v3952_v50 }
 0x21e   :  { %v3953_v32 = vpop.f32.mrb[124].mxu0 }
 0x21f   :  { %v3993_v63 = vpop.f32.mrb[124].mxu1  ;;  %v3954_v27 = vpop.f32.mrb[125].mxu0 }
 0x220   :  { %v3955_v9 = vadd.f32 %v3954_v27, %v3953_v32  ;;  %v3994_v31 = vpop.f32.mrb[125].mxu1  ;;  %v3956_v8 = vpop.f32.mrb[126].mxu0 }
 0x221   :  { %v3995_v29 = vadd.f32 %v3994_v31, %v3993_v63  ;;  %v3996_v54 = vpop.f32.mrb[126].mxu1  ;;  %v3957_v18 = vpop.f32.mrb[127].mxu0 }
 0x222   :  { %v3958_v25 = vadd.f32 %v3957_v18, %v3956_v8  ;;  %v3997_v33 = vpop.f32.mrb[127].mxu1 }
 0x223   :  { %v3998_v39 = vadd.f32 %v3997_v33, %v3996_v54  ;;  %v2565_v30 = vadd.f32 %v3995_v29, %v3955_v9 }
 0x225   :  { %v2568_v40 = vadd.f32 %v3998_v39, %v3958_v25 }
 0x226   :  { %v3959_v19 = vpop.f32.mrb[128].mxu0 }
 0x227   :  { %v3999_v11 = vpop.f32.mrb[128].mxu1  ;;  %v3960_v38 = vpop.f32.mrb[129].mxu0 }
 0x228   :  { %v3961_v1 = vadd.f32 %v3960_v38, %v3959_v19  ;;  %v4000_v51 = vpop.f32.mrb[129].mxu1  ;;  %v3962_v60 = vpop.f32.mrb[130].mxu0 }
 0x229   :  { %v4001_v3 = vadd.f32 %v4000_v51, %v3999_v11  ;;  %v4002_v49 = vpop.f32.mrb[130].mxu1  ;;  %v3963_v12 = vpop.f32.mrb[131].mxu0 }
 0x22a   :  { %v3964_v61 = vadd.f32 %v3963_v12, %v3962_v60  ;;  %v4003_v59 = vpop.f32.mrb[131].mxu1 }
 0x22b   :  { %v4004_v41 = vadd.f32 %v4003_v59, %v4002_v49  ;;  %v2573_v43 = vadd.f32 %v4001_v3, %v3961_v1 }
 0x22d   :  { %v2576_v34 = vadd.f32 %v4004_v41, %v3964_v61 }
 0x22e   :  { %v3965_v53 = vpop.f32.mrb[132].mxu0 }
 0x22f   :  { %v4005_v15 = vpop.f32.mrb[132].mxu1  ;;  %v3966_v45 = vpop.f32.mrb[133].mxu0 }
 0x230   :  { %v3967_v21 = vadd.f32 %v3966_v45, %v3965_v53  ;;  %v4006_v48 = vpop.f32.mrb[133].mxu1  ;;  %v3968_v55 = vpop.f32.mrb[134].mxu0 }
 0x231   :  { %v4007_v50 = vadd.f32 %v4006_v48, %v4005_v15  ;;  %v3969_v4 = vpop.f32.mrb[135].mxu0  ;;  %v4008_v56 = vpop.f32.mrb[134].mxu1 }
 0x232   :  { %v4009_v32 = vpop.f32.mrb[135].mxu1 }
 0x233   :  { %v2581_v63 = vadd.f32 %v4007_v50, %v3967_v21 }
 0x236   :  { %v4213_v27 = vpop.f32.mrb[136].mxu0 }
 0x237   :  { %v2629_v9 = vadd.f32 %v4213_v27, %v2565_v30  ;;  %v2620_v31 = vpop.f32.mrb[137].mxu0  ;;  %v4035_v8 = vpop.f32.mrb[136].mxu1 }
 0x238   :  { %v2621_v29 = vadd.f32 %v2620_v31, %v2557_v2  ;;  %v4214_v54 = vpop.f32.mrb[138].mxu0  ;;  %v4036_v18 = vpop.f32.mrb[137].mxu1 }
 0x239   :  { %v5969_v25 = vmax.f32 %v2327_v28, %v2629_v9  ;;  %v2632_v33 = vadd.f32 %v4214_v54, %v2568_v40  ;;  %v2623_v39 = vpop.f32.mrb[139].mxu0  ;;  %v4037_v19 = vadd.f32 %v4036_v18, %v4035_v8  ;;  %v4038_v11 = vpop.f32.mrb[138].mxu1 }
 0x23a   :  { %v2650_v38 = vmax.f32 %v2325_v36, %v2621_v29  ;;  %v2624_v1 = vadd.f32 %v2623_v39, %v2560_v13  ;;  %v4039_v30 = vpop.f32.mrb[139].mxu1 }
 0x23b   :  { %v5977_v2 = vmax.f32 %v2328_v5, %v2632_v33  ;;  %v4040_v51 = vadd.f32 %v4039_v30, %v4038_v11 }
 0x23c   :  { %v2651_v42 = vmax.f32 %v2326_v44, %v2624_v1 }
 0x23e   :  { %v4217_v46 = vpop.f32.mrb[140].mxu0 }
 0x23f   :  { %v2645_v28 = vadd.f32 %v4217_v46, %v2581_v63  ;;  %v2636_v40 = vpop.f32.mrb[141].mxu0  ;;  %v4041_v60 = vpop.f32.mrb[140].mxu1 }
 0x240   :  { %v2637_v3 = vadd.f32 %v2636_v40, %v2573_v43  ;;  %v4218_v49 = vpop.f32.mrb[142].mxu0  ;;  %v4042_v62 = vpop.f32.mrb[141].mxu1 }
 0x241   :  { %v5985_v17 = vmax.f32 %v2331_v22, %v2645_v28  ;;  %v2639_v6 = vpop.f32.mrb[143].mxu0  ;;  %v4043_v36 = vadd.f32 %v4042_v62, %v4041_v60  ;;  %v4044_v7 = vpop.f32.mrb[142].mxu1 }
 0x242   :  { %v5990_v58 = vmax.f32 %v2329_v37, %v2637_v3  ;;  %v2640_v57 = vadd.f32 %v2639_v6, %v2576_v34  ;;  %v4045_v44 = vpop.f32.mrb[143].mxu1 }
 0x243   :  { %v4046_v5 = vadd.f32 %v4045_v44, %v4044_v7 }
 0x244   :  { %v5995_v13 = vmax.f32 %v2330_v20, %v2640_v57 }
 0x247   :  { %v4047_v12 = vpop.f32.mrb[144].mxu1 }
 0x248   :  { %v4048_v35 = vpop.f32.mrb[145].mxu1 }
 0x249   :  { %v4049_v16 = vadd.f32 %v4048_v35, %v4047_v12  ;;  %v4050_v22 = vpop.f32.mrb[146].mxu1 }
 0x24a   :  { %v4051_v61 = vpop.f32.mrb[147].mxu1 }
 0x24b   :  { %v5997_v59 = vadd.f32 %v4051_v61, %v4050_v22 }
 0x24f   :  { %v4053_v41 = vpop.f32.mrb[148].mxu1 }
 0x250   :  { %v4054_v43 = vpop.f32.mrb[149].mxu1 }
 0x251   :  { %v5999_v52 = vadd.f32 %v4054_v43, %v4053_v41  ;;  %v4056_v14 = vpop.f32.mrb[150].mxu1 }
 0x252   :  { %v4057_v37 = vpop.f32.mrb[151].mxu1 }
 0x256   :  { %v4075_v34 = vpop.f32.mrb[144].mxu0 }
 0x257   :  { %v4076_v53 = vpop.f32.mrb[145].mxu0  ;;  %v4229_v15 = vpop.f32.mrb[152].mxu1 }
 0x258   :  { %v4077_v45 = vadd.f32 %v4076_v53, %v4075_v34  ;;  %v4078_v26 = vpop.f32.mrb[146].mxu0  ;;  %v2945_v10 = vpop.f32.mrb[153].mxu1 }
 0x259   :  { %v4079_v20 = vpop.f32.mrb[147].mxu0  ;;  %v4230_v21 = vpop.f32.mrb[154].mxu1 }
 0x25a   :  { %v4080_v48 = vadd.f32 %v4079_v20, %v4078_v26  ;;  %v2882_v55 = vadd.f32 %v4077_v45, %v4037_v19  ;;  %v2948_v50 = vpop.f32.mrb[155].mxu1 }
 0x25c   :  { %v2946_v4 = vadd.f32 %v2945_v10, %v2882_v55  ;;  %v2885_v56 = vadd.f32 %v4080_v48, %v4040_v51 }
 0x25e   :  { %v2975_v32 = vmax.f32 %v2650_v38, %v2946_v4  ;;  %v2949_v63 = vadd.f32 %v2948_v50, %v2885_v56  ;;  %v4081_v27 = vpop.f32.mrb[148].mxu0 }
 0x25f   :  { %v4082_v9 = vpop.f32.mrb[149].mxu0  ;;  %v4233_v31 = vpop.f32.mrb[156].mxu1 }
 0x260   :  { %v2982_v8 = vmul.f32 %v5848_v24, %v2975_v32  ;;  %v2976_v29 = vmax.f32 %v2651_v42, %v2949_v63  ;;  %v4083_v54 = vadd.f32 %v4082_v9, %v4081_v27  ;;  %v4084_v18 = vpop.f32.mrb[150].mxu0  ;;  %v2961_v33 = vpop.f32.mrb[157].mxu1 }
 0x261   :  { %v4085_v39 = vpop.f32.mrb[151].mxu0  ;;  %v4234_v11 = vpop.f32.mrb[158].mxu1 }
 0x262   :  { %v2989_v1 = vadd.f32 %v5854_v0, %v2982_v8  ;;  %v2983_v19 = vmul.f32 %v5848_v24, %v2976_v29  ;;  %v2890_v30 = vadd.f32 %v4083_v54, %v4043_v36  ;;  %v4086_v46 = vadd.f32 %v4085_v39, %v4084_v18  ;;  %v2964_v51 = vpop.f32.mrb[159].mxu1  ;;  %v3387_v29 = vld [vmem:[%s6068_s7 + $0x34] sm:$0x1] }
 0x264   :  { %vm2996_vm12 = vcmp.ge.f32.partialorder %v2989_v1, 0.0  ;;  %v2990_v38 = vadd.f32 %v5854_v0, %v2983_v19  ;;  %v2954_v28 = vadd.f32 %v4229_v15, %v2890_v30  ;;  %v2893_v40 = vadd.f32 %v4086_v46, %v4046_v5 }
 0x265   :  { %v3003_v60 = vsel %vm2996_vm12, 1.0, %v4516_v47 }
 0x266   :  { %v3396_v42 = vpack.c.bf16 %v3003_v60, %v3003_v60  ;;  %vm2997_vm13 = vcmp.ge.f32.partialorder %v2990_v38, 0.0  ;;  %v2977_v3 = vmax.f32 %v5969_v25, %v2954_v28  ;;  %v2957_v49 = vadd.f32 %v4230_v21, %v2893_v40  ;;  %v4087_v62 = vpop.f32.mrb[152].mxu0 }
 0x267   :  { %v3004_v6 = vsel %vm2997_vm13, 1.0, %v4516_v47  ;;  %v4088_v7 = vpop.f32.mrb[153].mxu0 }
 0x268   :  { %3381 = vst.msk [vmem:[%s6068_s7 + $0x1c] sm:$0xf] %vm1676_vm2, %v3396_v42  ;;  %v3397_v36 = vpack.c.bf16 %v3004_v6, %v3004_v6  ;;  %v2984_v57 = vmul.f32 %v5848_v24, %v2977_v3  ;;  %v2978_v44 = vmax.f32 %v5977_v2, %v2957_v49  ;;  %v4089_v5 = vadd.f32 %v4088_v7, %v4087_v62  ;;  %v4090_v12 = vpop.f32.mrb[154].mxu0 }
 0x269   :  { %v4091_v35 = vpop.f32.mrb[155].mxu0 }
 0x26a   :  { %3382 = vst.msk [vmem:[%s6068_s7 + $0x20] sm:$0xf] %vm1676_vm2, %v3397_v36  ;;  %v2991_v25 = vadd.f32 %v5854_v0, %v2984_v57  ;;  %v2985_v22 = vmul.f32 %v5848_v24, %v2978_v44  ;;  %v4092_v61 = vadd.f32 %v4091_v35, %v4090_v12  ;;  %v2898_v41 = vadd.f32 %v4089_v5, %v4049_v16 }
 0x26c   :  { %vm2998_vm14 = vcmp.ge.f32.partialorder %v2991_v25, 0.0  ;;  %v2992_v43 = vadd.f32 %v5854_v0, %v2985_v22  ;;  %v2962_v14 = vadd.f32 %v2961_v33, %v2898_v41  ;;  %v2901_v2 = vadd.f32 %v4092_v61, %v5997_v59 }
 0x26d   :  { %v3005_v37 = vsel %vm2998_vm14, 1.0, %v4516_v47 }
 0x26e   :  { %v3398_v34 = vpack.c.bf16 %v3005_v37, %v3005_v37  ;;  %vm2999_vm15 = vcmp.ge.f32.partialorder %v2992_v43, 0.0  ;;  %v2979_v53 = vmax.f32 %v5990_v58, %v2962_v14  ;;  %v2965_v15 = vadd.f32 %v2964_v51, %v2901_v2  ;;  %v4093_v45 = vpop.f32.mrb[156].mxu0 }
 0x26f   :  { %v3006_v26 = vsel %vm2999_vm15, 1.0, %v4516_v47  ;;  %v4094_v10 = vpop.f32.mrb[157].mxu0 }
 0x270   :  { %3383 = vst.msk [vmem:[%s6068_s7 + $0x24] sm:$0xf] %vm1676_vm2, %v3398_v34  ;;  %v3399_v16 = vpack.c.bf16 %v3006_v26, %v3006_v26  ;;  %v2986_v20 = vmul.f32 %v5848_v24, %v2979_v53  ;;  %v2980_v59 = vmax.f32 %v5995_v13, %v2965_v15  ;;  %v4095_v21 = vadd.f32 %v4094_v10, %v4093_v45  ;;  %v4096_v48 = vpop.f32.mrb[158].mxu0 }
 0x271   :  { %v4097_v55 = vpop.f32.mrb[159].mxu0 }
 0x272   :  { %3384 = vst.msk [vmem:[%s6068_s7 + $0x28] sm:$0xf] %vm1676_vm2, %v3399_v16  ;;  %v2993_v58 = vadd.f32 %v5854_v0, %v2986_v20  ;;  %v2987_v50 = vmul.f32 %v5848_v24, %v2980_v59  ;;  %v2906_v4 = vadd.f32 %v4095_v21, %v5999_v52 }
 0x274   :  { %vm3000_vm0 = vcmp.ge.f32.partialorder %v2993_v58, 0.0  ;;  %v2994_v56 = vadd.f32 %v5854_v0, %v2987_v50  ;;  %v2970_v32 = vadd.f32 %v4233_v31, %v2906_v4 }
 0x275   :  { %v3007_v13 = vsel %vm3000_vm0, 1.0, %v4516_v47 }
 0x276   :  { %v3400_v63 = vpack.c.bf16 %v3007_v13, %v3007_v13  ;;  %vm3001_vm1 = vcmp.ge.f32.partialorder %v2994_v56, 0.0  ;;  %v2981_v27 = vmax.f32 %v5985_v17, %v2970_v32 }
 0x277   :  { %v3008_v9 = vsel %vm3001_vm1, 1.0, %v4516_v47 }
 0x278   :  { %3385 = vst.msk [vmem:[%s6068_s7 + $0x2c] sm:$0xf] %vm1676_vm2, %v3400_v63  ;;  %v3401_v8 = vpack.c.bf16 %v3008_v9, %v3008_v9  ;;  %v2988_v52 = vmul.f32 %v5848_v24, %v2981_v27 }
 0x27a   :  { %3386 = vst.msk [vmem:[%s6068_s7 + $0x30] sm:$0xf] %vm1676_vm2, %v3401_v8  ;;  %v2995_v31 = vadd.f32 %v5854_v0, %v2988_v52 }
 0x27c   :  { %vm3002_vm3 = vcmp.ge.f32.partialorder %v2995_v31, 0.0 }
 0x27d   :  { %v3009_v17 = vsel %vm3002_vm3, 1.0, %v4516_v47 }
 0x27e   :  { %v3402_v54 = vpack.c.bf16 %v3009_v17, %v3009_v17 }
 0x280   :  { %v3047_v18 = vsel %vm5912_vm11, %v3402_v54, %v3387_v29 }
 0x281   :  { %3388 = vst [vmem:[%s6068_s7 + $0x34] sm:$0x1] %v3047_v18 }

// kernel: bnn_fmnist_forward.7
= control target key start
LH: loop header
LB: loop body
LE: loop exit
PB: predicated region body
PF: predicated region fallthrough
CT: control target
= control target key end

     0   :  { %s2961_s0 = inlined_call_operand.vmem [shape: bf16[2,2048], index: 0, kind: input, shape index: {}]   ;;  %s2962_s1 = inlined_call_operand.vmem [shape: s8[2048,10], index: 1, kind: input, shape index: {}]   ;;  %s2963_s2 = inlined_call_operand.vmem [shape: f32[1,10], index: 2, kind: input, shape index: {}]   ;;  %s2964_s3 = inlined_call_operand.vmem [shape: f32[1,10], index: 3, kind: input, shape index: {}]   ;;  %s2965_s4 = inlined_call_operand.hbm [shape: f32[2,10], index: 4, kind: output, shape index: {}]  }
   0x1   :  { %v35_v0 = vld [vmem:[%s2962_s1 + $0x20] sm:$0x3]  ;;  %v36_v1 = vld [vmem:[%s2962_s1 + $0x22] sm:$0x3]  ;;  %v37_v14 = vld [vmem:[%s2962_s1 + $0x24] sm:$0x3] }
   0x2   :  { %v67_v2 = vld [vmem:[%s2962_s1 + $0x60] sm:$0x3]  ;;  %v291_v3 = vunpack.c.l.s8.bf16 %v35_v0  ;;  %v292_v4 = vunpack.c.l.s8.bf16 %v36_v1  ;;  %v68_v5 = vld [vmem:[%s2962_s1 + $0x62] sm:$0x3]  ;;  %v38_v18 = vld [vmem:[%s2962_s1 + $0x26] sm:$0x3]  ;;  %v293_v19 = vunpack.c.l.s8.bf16 %v37_v14 }
   0x3   :  { %v323_v6 = vunpack.c.l.s8.bf16 %v67_v2  ;;  %v19_v7 = vld [vmem:[%s2962_s1] sm:$0x3]  ;;  %v20_v8 = vld [vmem:[%s2962_s1 + $0x2] sm:$0x3]  ;;  %v324_v9 = vunpack.c.l.s8.bf16 %v68_v5  ;;  %v69_v20 = vld [vmem:[%s2962_s1 + $0x64] sm:$0x3]  ;;  %v294_v24 = vunpack.c.l.s8.bf16 %v38_v18 }
   0x4   :  { %v275_v10 = vunpack.c.l.s8.bf16 %v19_v7  ;;  %v276_v11 = vunpack.c.l.s8.bf16 %v20_v8  ;;  %v51_v12 = vld [vmem:[%s2962_s1 + $0x40] sm:$0x3]  ;;  %v52_v13 = vld [vmem:[%s2962_s1 + $0x42] sm:$0x3]  ;;  %v1777_v15 = vcombine.low %v291_v3, %v292_v4  ;;  %v70_v21 = vld [vmem:[%s2962_s1 + $0x66] sm:$0x3]  ;;  %v325_v25 = vunpack.c.l.s8.bf16 %v69_v20 }
   0x5   :  { %v307_v16 = vunpack.c.l.s8.bf16 %v51_v12  ;;  %v308_v17 = vunpack.c.l.s8.bf16 %v52_v13  ;;  %v1793_v22 = vcombine.low %v323_v6, %v324_v9  ;;  %v21_v26 = vld [vmem:[%s2962_s1 + $0x4] sm:$0x3]  ;;  %v22_v27 = vld [vmem:[%s2962_s1 + $0x6] sm:$0x3]  ;;  %v326_v30 = vunpack.c.l.s8.bf16 %v70_v21  ;;  %v39_v34 = vld [vmem:[%s2962_s1 + $0x28] sm:$0x3] }
   0x6   :  { %v1769_v23 = vcombine.low %v275_v10, %v276_v11  ;;  %v53_v28 = vld [vmem:[%s2962_s1 + $0x44] sm:$0x3]  ;;  %1899 = vmatprep.subr.bf16.mxu0 %v1777_v15  ;;  %v277_v31 = vunpack.c.l.s8.bf16 %v21_v26  ;;  %v278_v32 = vunpack.c.l.s8.bf16 %v22_v27  ;;  %v54_v33 = vld [vmem:[%s2962_s1 + $0x46] sm:$0x3]  ;;  %v40_v35 = vld [vmem:[%s2962_s1 + $0x2a] sm:$0x3]  ;;  %v1778_v36 = vcombine.low %v293_v19, %v294_v24 }
   0x7   :  { %v1785_v29 = vcombine.low %v307_v16, %v308_v17  ;;  %1921 = vmatprep.subr.bf16.mxu1 %v1793_v22  ;;  %v309_v37 = vunpack.c.l.s8.bf16 %v53_v28  ;;  %v310_v38 = vunpack.c.l.s8.bf16 %v54_v33  ;;  %v295_v39 = vunpack.c.l.s8.bf16 %v39_v34  ;;  %v71_v40 = vld [vmem:[%s2962_s1 + $0x68] sm:$0x3]  ;;  %v72_v41 = vld [vmem:[%s2962_s1 + $0x6a] sm:$0x3]  ;;  %v41_v54 = vld [vmem:[%s2962_s1 + $0x2c] sm:$0x3] }
   0x8   :  { %1900 = vmatpush3.bf16.msra.mxu0 %v1769_v23  ;;  %v23_v42 = vld [vmem:[%s2962_s1 + $0x8] sm:$0x3]  ;;  %v1794_v43 = vcombine.low %v325_v25, %v326_v30  ;;  %v1770_v44 = vcombine.low %v277_v31, %v278_v32  ;;  %v296_v45 = vunpack.c.l.s8.bf16 %v40_v35  ;;  %v327_v46 = vunpack.c.l.s8.bf16 %v71_v40  ;;  %v24_v47 = vld [vmem:[%s2962_s1 + $0xa] sm:$0x3]  ;;  %v42_v55 = vld [vmem:[%s2962_s1 + $0x2e] sm:$0x3] }
   0x9   :  { %1922 = vmatpush3.bf16.msra.mxu1 %v1785_v29  ;;  %v55_v48 = vld [vmem:[%s2962_s1 + $0x48] sm:$0x3]  ;;  %v56_v49 = vld [vmem:[%s2962_s1 + $0x4a] sm:$0x3]  ;;  %1901 = vmatprep.subr.bf16.mxu0 %v1778_v36  ;;  %v1786_v50 = vcombine.low %v309_v37, %v310_v38  ;;  %v328_v51 = vunpack.c.l.s8.bf16 %v72_v41  ;;  %v279_v52 = vunpack.c.l.s8.bf16 %v23_v42  ;;  %v280_v53 = vunpack.c.l.s8.bf16 %v24_v47  ;;  %v73_v56 = vld [vmem:[%s2962_s1 + $0x6c] sm:$0x3] }
   0xa   :  { %1923 = vmatprep.subr.bf16.mxu1 %v1794_v43  ;;  %v1779_v57 = vcombine.low %v295_v39, %v296_v45  ;;  %v311_v58 = vunpack.c.l.s8.bf16 %v55_v48  ;;  %v312_v59 = vunpack.c.l.s8.bf16 %v56_v49  ;;  %v297_v60 = vunpack.c.l.s8.bf16 %v41_v54  ;;  %v74_v61 = vld [vmem:[%s2962_s1 + $0x6e] sm:$0x3]  ;;  %v25_v62 = vld [vmem:[%s2962_s1 + $0xc] sm:$0x3]  ;;  %v43_v6 = vld [vmem:[%s2962_s1 + $0x30] sm:$0x3] }
   0xb   :  { %v26_v63 = vld [vmem:[%s2962_s1 + $0xe] sm:$0x3]  ;;  %v1795_v0 = vcombine.low %v327_v46, %v328_v51  ;;  %v1771_v1 = vcombine.low %v279_v52, %v280_v53  ;;  %v298_v2 = vunpack.c.l.s8.bf16 %v42_v55  ;;  %v329_v3 = vunpack.c.l.s8.bf16 %v73_v56  ;;  %v57_v4 = vld [vmem:[%s2962_s1 + $0x4c] sm:$0x3]  ;;  %v44_v11 = vld [vmem:[%s2962_s1 + $0x32] sm:$0x3] }
   0xc   :  { %1902 = vmatpush3.bf16.msra.mxu0 %v1770_v44  ;;  %v58_v5 = vld [vmem:[%s2962_s1 + $0x4e] sm:$0x3]  ;;  %v1787_v7 = vcombine.low %v311_v58, %v312_v59  ;;  %v330_v8 = vunpack.c.l.s8.bf16 %v74_v61  ;;  %v281_v9 = vunpack.c.l.s8.bf16 %v25_v62  ;;  %v282_v10 = vunpack.c.l.s8.bf16 %v26_v63  ;;  %v75_v12 = vld [vmem:[%s2962_s1 + $0x70] sm:$0x3]  ;;  %v76_v13 = vld [vmem:[%s2962_s1 + $0x72] sm:$0x3] }
   0xd   :  { %1924 = vmatpush3.bf16.msra.mxu1 %v1786_v50  ;;  %1903 = vmatprep.subr.bf16.mxu0 %v1779_v57  ;;  %v1780_v14 = vcombine.low %v297_v60, %v298_v2  ;;  %v313_v15 = vunpack.c.l.s8.bf16 %v57_v4  ;;  %v314_v16 = vunpack.c.l.s8.bf16 %v58_v5  ;;  %v299_v17 = vunpack.c.l.s8.bf16 %v43_v6  ;;  %v27_v18 = vld [vmem:[%s2962_s1 + $0x10] sm:$0x3]  ;;  %v28_v19 = vld [vmem:[%s2962_s1 + $0x12] sm:$0x3]  ;;  %v45_v26 = vld [vmem:[%s2962_s1 + $0x34] sm:$0x3] }
   0xe   :  { %1925 = vmatprep.subr.bf16.mxu1 %v1795_v0  ;;  %v59_v20 = vld [vmem:[%s2962_s1 + $0x50] sm:$0x3]  ;;  %v1796_v21 = vcombine.low %v329_v3, %v330_v8  ;;  %v1772_v22 = vcombine.low %v281_v9, %v282_v10  ;;  %v300_v23 = vunpack.c.l.s8.bf16 %v44_v11  ;;  %v331_v24 = vunpack.c.l.s8.bf16 %v75_v12  ;;  %v60_v25 = vld [vmem:[%s2962_s1 + $0x52] sm:$0x3]  ;;  %v46_v27 = vld [vmem:[%s2962_s1 + $0x36] sm:$0x3] }
   0xf   :  { %v1788_v28 = vcombine.low %v313_v15, %v314_v16  ;;  %v332_v29 = vunpack.c.l.s8.bf16 %v76_v13  ;;  %v283_v30 = vunpack.c.l.s8.bf16 %v27_v18  ;;  %v284_v31 = vunpack.c.l.s8.bf16 %v28_v19  ;;  %v77_v32 = vld [vmem:[%s2962_s1 + $0x74] sm:$0x3]  ;;  %v78_v33 = vld [vmem:[%s2962_s1 + $0x76] sm:$0x3]  ;;  %v47_v45 = vld [vmem:[%s2962_s1 + $0x38] sm:$0x3] }
  0x10   :  { %1904 = vmatpush3.bf16.msra.mxu0 %v1771_v1  ;;  %v1781_v34 = vcombine.low %v299_v17, %v300_v23  ;;  %v315_v35 = vunpack.c.l.s8.bf16 %v59_v20  ;;  %v316_v36 = vunpack.c.l.s8.bf16 %v60_v25  ;;  %v301_v37 = vunpack.c.l.s8.bf16 %v45_v26  ;;  %v29_v38 = vld [vmem:[%s2962_s1 + $0x14] sm:$0x3]  ;;  %v30_v39 = vld [vmem:[%s2962_s1 + $0x16] sm:$0x3]  ;;  %v48_v46 = vld [vmem:[%s2962_s1 + $0x3a] sm:$0x3] }
  0x11   :  { %1926 = vmatpush3.bf16.msra.mxu1 %v1787_v7  ;;  %1905 = vmatprep.subr.bf16.mxu0 %v1780_v14  ;;  %v61_v40 = vld [vmem:[%s2962_s1 + $0x54] sm:$0x3]  ;;  %v1797_v41 = vcombine.low %v331_v24, %v332_v29  ;;  %v302_v42 = vunpack.c.l.s8.bf16 %v46_v27  ;;  %v333_v43 = vunpack.c.l.s8.bf16 %v77_v32  ;;  %v62_v44 = vld [vmem:[%s2962_s1 + $0x56] sm:$0x3]  ;;  %v1773_v47 = vcombine.low %v283_v30, %v284_v31  ;;  %v79_v49 = vld [vmem:[%s2962_s1 + $0x78] sm:$0x3] }
  0x12   :  { %1927 = vmatprep.subr.bf16.mxu1 %v1796_v21  ;;  %v334_v48 = vunpack.c.l.s8.bf16 %v78_v33  ;;  %v80_v50 = vld [vmem:[%s2962_s1 + $0x7a] sm:$0x3]  ;;  %v31_v51 = vld [vmem:[%s2962_s1 + $0x18] sm:$0x3]  ;;  %v1789_v52 = vcombine.low %v315_v35, %v316_v36  ;;  %v285_v54 = vunpack.c.l.s8.bf16 %v29_v38  ;;  %v286_v55 = vunpack.c.l.s8.bf16 %v30_v39  ;;  %v49_v63 = vld [vmem:[%s2962_s1 + $0x3c] sm:$0x3] }
  0x13   :  { %v1782_v53 = vcombine.low %v301_v37, %v302_v42  ;;  %v32_v56 = vld [vmem:[%s2962_s1 + $0x1a] sm:$0x3]  ;;  %v63_v57 = vld [vmem:[%s2962_s1 + $0x58] sm:$0x3]  ;;  %v317_v59 = vunpack.c.l.s8.bf16 %v61_v40  ;;  %v318_v60 = vunpack.c.l.s8.bf16 %v62_v44  ;;  %v303_v61 = vunpack.c.l.s8.bf16 %v47_v45  ;;  %v50_v0 = vld [vmem:[%s2962_s1 + $0x3e] sm:$0x3] }
  0x14   :  { %1906 = vmatpush3.bf16.msra.mxu0 %v1772_v22  ;;  %v64_v58 = vld [vmem:[%s2962_s1 + $0x5a] sm:$0x3]  ;;  %v304_v62 = vunpack.c.l.s8.bf16 %v48_v46  ;;  %v1798_v1 = vcombine.low %v333_v43, %v334_v48  ;;  %v335_v2 = vunpack.c.l.s8.bf16 %v79_v49  ;;  %v336_v3 = vunpack.c.l.s8.bf16 %v80_v50  ;;  %v81_v8 = vld [vmem:[%s2962_s1 + $0x7c] sm:$0x3]  ;;  %v82_v9 = vld [vmem:[%s2962_s1 + $0x7e] sm:$0x3] }
  0x15   :  { %1928 = vmatpush3.bf16.msra.mxu1 %v1788_v28  ;;  %1907 = vmatprep.subr.bf16.mxu0 %v1781_v34  ;;  %v287_v4 = vunpack.c.l.s8.bf16 %v31_v51  ;;  %v288_v5 = vunpack.c.l.s8.bf16 %v32_v56  ;;  %v319_v6 = vunpack.c.l.s8.bf16 %v63_v57  ;;  %v320_v7 = vunpack.c.l.s8.bf16 %v64_v58  ;;  %v33_v13 = vld [vmem:[%s2962_s1 + $0x1c] sm:$0x3]  ;;  %v34_v17 = vld [vmem:[%s2962_s1 + $0x1e] sm:$0x3]  ;;  %v99_v23 = vld [vmem:[%s2962_s1 + $0xa0] sm:$0x3] }
  0x16   :  { %1929 = vmatprep.subr.bf16.mxu1 %v1797_v41  ;;  %v1774_v10 = vcombine.low %v285_v54, %v286_v55  ;;  %v305_v11 = vunpack.c.l.s8.bf16 %v49_v63  ;;  %v306_v12 = vunpack.c.l.s8.bf16 %v50_v0  ;;  %v539_v14 = vlaneseq  ;;  %v65_v18 = vld [vmem:[%s2962_s1 + $0x5c] sm:$0x3]  ;;  %v66_v22 = vld [vmem:[%s2962_s1 + $0x5e] sm:$0x3]  ;;  %v100_v24 = vld [vmem:[%s2962_s1 + $0xa2] sm:$0x3] }
  0x17   :  { %v1790_v15 = vcombine.low %v317_v59, %v318_v60  ;;  %v1783_v16 = vcombine.low %v303_v61, %v304_v62  ;;  %v1799_v19 = vcombine.low %v335_v2, %v336_v3  ;;  %v337_v20 = vunpack.c.l.s8.bf16 %v81_v8  ;;  %v131_v28 = vld [vmem:[%s2962_s1 + $0xe0] sm:$0x3]  ;;  %v132_v29 = vld [vmem:[%s2962_s1 + $0xe2] sm:$0x3]  ;;  %v101_v48 = vld [vmem:[%s2962_s1 + $0xa4] sm:$0x3] }
  0x18   :  { %1908 = vmatpush3.bf16.msra.mxu0 %v1773_v47  ;;  %v338_v21 = vunpack.c.l.s8.bf16 %v82_v9  ;;  %v1775_v25 = vcombine.low %v287_v4, %v288_v5  ;;  %v1791_v26 = vcombine.low %v319_v6, %v320_v7  ;;  %v289_v27 = vunpack.c.l.s8.bf16 %v33_v13  ;;  %v2337_v43 = vld [vmem:[%s2961_s0] sm:$0xff]  ;;  %v103_v4 = vld [vmem:[%s2962_s1 + $0xa8] sm:$0x3]  ;;  %v104_v5 = vld [vmem:[%s2962_s1 + $0xaa] sm:$0x3] }
  0x19   :  { %1930 = vmatpush3.bf16.msra.mxu1 %v1789_v52  ;;  %1909 = vmatprep.subr.bf16.mxu0 %v1782_v53  ;;  %v1784_v30 = vcombine.low %v305_v11, %v306_v12  ;;  %v290_v31 = vunpack.c.l.s8.bf16 %v34_v17  ;;  %v2103_v32 = vmov 1966171168   ;;  %v540_v34 = vshrl.u32 %v539_v14, 7  ;;  %v83_v44 = vld [vmem:[%s2962_s1 + $0x80] sm:$0x3] }
  0x1a   :  { %1931 = vmatprep.subr.bf16.mxu1 %v1798_v1  ;;  %v537_v33 = vunpack.c.l.s4 %v2103_v32  ;;  %v321_v35 = vunpack.c.l.s8.bf16 %v65_v18  ;;  %v322_v36 = vunpack.c.l.s8.bf16 %v66_v22  ;;  %v355_v37 = vunpack.c.l.s8.bf16 %v99_v23  ;;  %v84_v45 = vld [vmem:[%s2962_s1 + $0x82] sm:$0x3]  ;;  %v102_v49 = vld [vmem:[%s2962_s1 + $0xa6] sm:$0x3]  ;;  %v115_v52 = vld [vmem:[%s2962_s1 + $0xc0] sm:$0x3] }
  0x1b   :  { %v356_v38 = vunpack.c.l.s8.bf16 %v100_v24  ;;  %v1800_v39 = vcombine.low %v337_v20, %v338_v21  ;;  %v387_v41 = vunpack.c.l.s8.bf16 %v131_v28  ;;  %v388_v42 = vunpack.c.l.s8.bf16 %v132_v29  ;;  %v116_v53 = vld [vmem:[%s2962_s1 + $0xc2] sm:$0x3]  ;;  %v133_v58 = vld [vmem:[%s2962_s1 + $0xe4] sm:$0x3]  ;;  %v134_v59 = vld [vmem:[%s2962_s1 + $0xe6] sm:$0x3] }
  0x1c   :  { %1910 = vmatpush3.bf16.msra.mxu0 %v1774_v10  ;;  %v538_v40 = vunpack.c.0.s8 %v537_v33  ;;  %v1776_v46 = vcombine.low %v289_v27, %v290_v31  ;;  %v1792_v50 = vcombine.low %v321_v35, %v322_v36  ;;  %v339_v56 = vunpack.c.l.s8.bf16 %v83_v44  ;;  %v85_v62 = vld [vmem:[%s2962_s1 + $0x84] sm:$0x3]  ;;  %v86_v63 = vld [vmem:[%s2962_s1 + $0x86] sm:$0x3]  ;;  %v135_v14 = vld [vmem:[%s2962_s1 + $0xe8] sm:$0x3] }
  0x1d   :  { %1932 = vmatpush3.bf16.msra.mxu1 %v1790_v15  ;;  %1911 = vmatprep.subr.bf16.mxu0 %v1783_v16  ;;  %v1809_v51 = vcombine.low %v355_v37, %v356_v38  ;;  %v1825_v55 = vcombine.low %v387_v41, %v388_v42  ;;  %v340_v57 = vunpack.c.l.s8.bf16 %v84_v45  ;;  %v357_v60 = vunpack.c.l.s8.bf16 %v101_v48  ;;  %v117_v8 = vld [vmem:[%s2962_s1 + $0xc4] sm:$0x3]  ;;  %v118_v9 = vld [vmem:[%s2962_s1 + $0xc6] sm:$0x3]  ;;  %v136_v15 = vld [vmem:[%s2962_s1 + $0xea] sm:$0x3] }
  0x1e   :  { %1933 = vmatprep.subr.bf16.mxu1 %v1799_v19  ;;  %v2345_v47 = vsub.s32 %v538_v40, %v540_v34  ;;  %v358_v61 = vunpack.c.l.s8.bf16 %v102_v49  ;;  %v371_v2 = vunpack.c.l.s8.bf16 %v115_v52  ;;  %v372_v3 = vunpack.c.l.s8.bf16 %v116_v53  ;;  %v87_v20 = vld [vmem:[%s2962_s1 + $0x88] sm:$0x3]  ;;  %v88_v21 = vld [vmem:[%s2962_s1 + $0x8a] sm:$0x3]  ;;  %v106_v27 = vld [vmem:[%s2962_s1 + $0xae] sm:$0x3] }
  0x1f   :  { %v389_v6 = vunpack.c.l.s8.bf16 %v133_v58  ;;  %v390_v7 = vunpack.c.l.s8.bf16 %v134_v59  ;;  %v1801_v11 = vcombine.low %v339_v56, %v340_v57  ;;  %v341_v12 = vunpack.c.l.s8.bf16 %v85_v62  ;;  %v119_v31 = vld [vmem:[%s2962_s1 + $0xc8] sm:$0x3]  ;;  %v120_v32 = vld [vmem:[%s2962_s1 + $0xca] sm:$0x3]  ;;  %v137_v36 = vld [vmem:[%s2962_s1 + $0xec] sm:$0x3] }
  0x20   :  { %1912 = vmatpush3.bf16.msra.mxu0 %v1775_v25  ;;  %v542_v54 = vrot.slane %v2337_v43, %v2345_v47  ;;  %v342_v13 = vunpack.c.l.s8.bf16 %v86_v63  ;;  %v1810_v17 = vcombine.low %v357_v60, %v358_v61  ;;  %v359_v18 = vunpack.c.l.s8.bf16 %v103_v4  ;;  %v138_v37 = vld [vmem:[%s2962_s1 + $0xee] sm:$0x3]  ;;  %v89_v41 = vld [vmem:[%s2962_s1 + $0x8c] sm:$0x3]  ;;  %v107_v48 = vld [vmem:[%s2962_s1 + $0xb0] sm:$0x3] }
  0x21   :  { %1934 = vmatpush3.bf16.msra.mxu1 %v1791_v26  ;;  %1913 = vmatprep.subr.bf16.mxu0 %v1784_v30  ;;  %v360_v19 = vunpack.c.l.s8.bf16 %v104_v5  ;;  %v1817_v23 = vcombine.low %v371_v2, %v372_v3  ;;  %v373_v24 = vunpack.c.l.s8.bf16 %v117_v8  ;;  %v374_v25 = vunpack.c.l.s8.bf16 %v118_v9  ;;  %v105_v26 = vld [vmem:[%s2962_s1 + $0xac] sm:$0x3]  ;;  %v90_v42 = vld [vmem:[%s2962_s1 + $0x8e] sm:$0x3]  ;;  %v108_v49 = vld [vmem:[%s2962_s1 + $0xb2] sm:$0x3] }
  0x22   :  { %1935 = vmatprep.subr.bf16.mxu1 %v1800_v39  ;;  %v550_v0 = vcombine.high %v542_v54, %v542_v54  ;;  %v558_v1 = vrot.slane %v542_v54, %v2345_v47  ;;  %v1826_v28 = vcombine.low %v389_v6, %v390_v7  ;;  %v391_v29 = vunpack.c.l.s8.bf16 %v135_v14  ;;  %v121_v53 = vld [vmem:[%s2962_s1 + $0xcc] sm:$0x3]  ;;  %v122_v54 = vld [vmem:[%s2962_s1 + $0xce] sm:$0x3]  ;;  %v139_v58 = vld [vmem:[%s2962_s1 + $0xf0] sm:$0x3] }
  0x23   :  { %v392_v30 = vunpack.c.l.s8.bf16 %v136_v15  ;;  %v1802_v33 = vcombine.low %v341_v12, %v342_v13  ;;  %v343_v34 = vunpack.c.l.s8.bf16 %v87_v20  ;;  %v344_v35 = vunpack.c.l.s8.bf16 %v88_v21  ;;  %v140_v59 = vld [vmem:[%s2962_s1 + $0xf2] sm:$0x3]  ;;  %v91_v63 = vld [vmem:[%s2962_s1 + $0x90] sm:$0x3]  ;;  %v109_v4 = vld [vmem:[%s2962_s1 + $0xb4] sm:$0x3] }
  0x24   :  { %1914 = vmatpush3.bf16.msra.mxu0 %v1776_v46  ;;  %v572_v10 = vrot.slane %v550_v0, %v2345_v47  ;;  %v580_v16 = vcombine.high %v558_v1, %v558_v1  ;;  %v1811_v38 = vcombine.low %v359_v18, %v360_v19  ;;  %v361_v39 = vunpack.c.l.s8.bf16 %v105_v26  ;;  %v92_v0 = vld [vmem:[%s2962_s1 + $0x92] sm:$0x3]  ;;  %v110_v5 = vld [vmem:[%s2962_s1 + $0xb6] sm:$0x3]  ;;  %v93_v19 = vld [vmem:[%s2962_s1 + $0x94] sm:$0x3] }
  0x25   :  { %1936 = vmatpush3.bf16.msra.mxu1 %v1792_v50  ;;  %1943 = vmatprep.subr.bf16.mxu0 %v1809_v51  ;;  %v362_v40 = vunpack.c.l.s8.bf16 %v106_v27  ;;  %v1818_v44 = vcombine.low %v373_v24, %v374_v25  ;;  %v375_v45 = vunpack.c.l.s8.bf16 %v119_v31  ;;  %v376_v46 = vunpack.c.l.s8.bf16 %v120_v32  ;;  %v142_v15 = vld [vmem:[%s2962_s1 + $0xf6] sm:$0x3]  ;;  %v111_v24 = vld [vmem:[%s2962_s1 + $0xb8] sm:$0x3]  ;;  %v112_v25 = vld [vmem:[%s2962_s1 + $0xba] sm:$0x3] }
  0x26   :  { %1965 = vmatprep.subr.bf16.mxu1 %v1825_v55  ;;  %1449 = vmatprep.mubr.bf16.mxu0 %v572_v10  ;;  %v582_v22 = vcombine.high %v572_v10, %v572_v10  ;;  %v1827_v50 = vcombine.low %v391_v29, %v392_v30  ;;  %v393_v51 = vunpack.c.l.s8.bf16 %v137_v36  ;;  %v394_v52 = vunpack.c.l.s8.bf16 %v138_v37  ;;  %v123_v10 = vld [vmem:[%s2962_s1 + $0xd0] sm:$0x3]  ;;  %v94_v20 = vld [vmem:[%s2962_s1 + $0x96] sm:$0x3]  ;;  %v125_v29 = vld [vmem:[%s2962_s1 + $0xd4] sm:$0x3] }
  0x27   :  { %1450 = vmatmul.mubr.bf16.vlgmr.msra.gmra.mrb[0].mxu0 %v558_v1  ;;  %v1803_v55 = vcombine.low %v343_v34, %v344_v35  ;;  %v345_v56 = vunpack.c.l.s8.bf16 %v89_v41  ;;  %v346_v57 = vunpack.c.l.s8.bf16 %v90_v42  ;;  %v1812_v60 = vcombine.low %v361_v39, %v362_v40  ;;  %v126_v30 = vld [vmem:[%s2962_s1 + $0xd6] sm:$0x3]  ;;  %v143_v35 = vld [vmem:[%s2962_s1 + $0xf8] sm:$0x3]  ;;  %v144_v36 = vld [vmem:[%s2962_s1 + $0xfa] sm:$0x3] }
  0x28   :  { %1489 = vmatprep.mubr.bf16.mxu1 %v582_v22  ;;  %1944 = vmatpush3.bf16.msra.mxu0 %v1801_v11  ;;  %v363_v61 = vunpack.c.l.s8.bf16 %v107_v48  ;;  %v364_v62 = vunpack.c.l.s8.bf16 %v108_v49  ;;  %v1819_v1 = vcombine.low %v375_v45, %v376_v46  ;;  %v377_v2 = vunpack.c.l.s8.bf16 %v121_v53  ;;  %v124_v11 = vld [vmem:[%s2962_s1 + $0xd2] sm:$0x3]  ;;  %v95_v40 = vld [vmem:[%s2962_s1 + $0x98] sm:$0x3]  ;;  %v96_v41 = vld [vmem:[%s2962_s1 + $0x9a] sm:$0x3] }
  0x29   :  { %1490 = vmatmul.mubr.bf16.vlgmr.msra.gmra.mrb[0].mxu1 %v580_v16  ;;  %1945 = vmatprep.subr.bf16.mxu0 %v1810_v17  ;;  %v378_v3 = vunpack.c.l.s8.bf16 %v122_v54  ;;  %v535_v6 = vcombine.high %v2337_v43, %v2337_v43  ;;  %v1828_v7 = vcombine.low %v393_v51, %v394_v52  ;;  %v395_v8 = vunpack.c.l.s8.bf16 %v139_v58  ;;  %v141_v43 = vld [vmem:[%s2962_s1 + $0xf4] sm:$0x3]  ;;  %v113_v48 = vld [vmem:[%s2962_s1 + $0xbc] sm:$0x3]  ;;  %v114_v49 = vld [vmem:[%s2962_s1 + $0xbe] sm:$0x3] }
  0x2a   :  { %1966 = vmatpush3.bf16.msra.mxu1 %v1817_v23  ;;  %v396_v9 = vunpack.c.l.s8.bf16 %v140_v59  ;;  %v1804_v12 = vcombine.low %v345_v56, %v346_v57  ;;  %v347_v13 = vunpack.c.l.s8.bf16 %v91_v63  ;;  %v348_v14 = vunpack.c.l.s8.bf16 %v92_v0  ;;  %v127_v53 = vld [vmem:[%s2962_s1 + $0xd8] sm:$0x3]  ;;  %v128_v54 = vld [vmem:[%s2962_s1 + $0xda] sm:$0x3]  ;;  %v145_v59 = vld [vmem:[%s2962_s1 + $0xfc] sm:$0x3] }
  0x2b   :  { %1967 = vmatprep.subr.bf16.mxu1 %v1826_v28  ;;  %v1813_v16 = vcombine.low %v363_v61, %v364_v62  ;;  %v365_v17 = vunpack.c.l.s8.bf16 %v109_v4  ;;  %v366_v18 = vunpack.c.l.s8.bf16 %v110_v5  ;;  %v1820_v21 = vcombine.low %v377_v2, %v378_v3  ;;  %v97_v0 = vld [vmem:[%s2962_s1 + $0x9c] sm:$0x3] }
  0x2c   :  { %1946 = vmatpush3.bf16.msra.mxu0 %v1802_v33  ;;  %v379_v22 = vunpack.c.l.s8.bf16 %v123_v10  ;;  %v380_v23 = vunpack.c.l.s8.bf16 %v124_v11  ;;  %v1829_v26 = vcombine.low %v395_v8, %v396_v9  ;;  %v397_v27 = vunpack.c.l.s8.bf16 %v141_v43  ;;  %v129_v11 = vld [vmem:[%s2962_s1 + $0xdc] sm:$0x3] }
  0x2d   :  { %1947 = vmatprep.subr.bf16.mxu0 %v1811_v38  ;;  %v398_v28 = vunpack.c.l.s8.bf16 %v142_v15  ;;  %v2486_v31 = vrot.slane %v535_v6, %v2345_v47  ;;  %v1805_v32 = vcombine.low %v347_v13, %v348_v14  ;;  %v349_v33 = vunpack.c.l.s8.bf16 %v93_v19  ;;  %v163_v6 = vld [vmem:[%s2962_s1 + $0x120] sm:$0x3] }
  0x2e   :  { %1968 = vmatpush3.bf16.msra.mxu1 %v1818_v44  ;;  %v350_v34 = vunpack.c.l.s8.bf16 %v94_v20  ;;  %v1814_v37 = vcombine.low %v365_v17, %v366_v18  ;;  %v367_v38 = vunpack.c.l.s8.bf16 %v111_v24  ;;  %v368_v39 = vunpack.c.l.s8.bf16 %v112_v25  ;;  %v195_v15 = vld [vmem:[%s2962_s1 + $0x160] sm:$0x3]  ;;  %v165_v25 = vld [vmem:[%s2962_s1 + $0x124] sm:$0x3] }
  0x2f   :  { %1969 = vmatprep.subr.bf16.mxu1 %v1827_v50  ;;  %v551_v42 = vcombine.high %v2486_v31, %v2486_v31  ;;  %v1821_v44 = vcombine.low %v379_v22, %v380_v23  ;;  %v381_v45 = vunpack.c.l.s8.bf16 %v125_v29  ;;  %v382_v46 = vunpack.c.l.s8.bf16 %v126_v30  ;;  %v147_v20 = vld [vmem:[%s2962_s1 + $0x100] sm:$0x3] }
  0x30   :  { %1948 = vmatpush3.bf16.msra.mxu0 %v1803_v55  ;;  %v1830_v50 = vcombine.low %v397_v27, %v398_v28  ;;  %v399_v51 = vunpack.c.l.s8.bf16 %v143_v35  ;;  %v400_v52 = vunpack.c.l.s8.bf16 %v144_v36  ;;  %v1806_v56 = vcombine.low %v349_v33, %v350_v34  ;;  %v179_v30 = vld [vmem:[%s2962_s1 + $0x140] sm:$0x3]  ;;  %v197_v36 = vld [vmem:[%s2962_s1 + $0x164] sm:$0x3] }
  0x31   :  { %1949 = vmatprep.subr.bf16.mxu0 %v1812_v60  ;;  %v579_v55 = vrot.slane %v551_v42, %v2345_v47  ;;  %v351_v57 = vunpack.c.l.s8.bf16 %v95_v40  ;;  %v352_v58 = vunpack.c.l.s8.bf16 %v96_v41  ;;  %v146_v60 = vld [vmem:[%s2962_s1 + $0xfe] sm:$0x3]  ;;  %v1815_v61 = vcombine.low %v367_v38, %v368_v39  ;;  %v149_v42 = vld [vmem:[%s2962_s1 + $0x104] sm:$0x3] }
  0x32   :  { %1970 = vmatpush3.bf16.msra.mxu1 %v1819_v1  ;;  %v369_v62 = vunpack.c.l.s8.bf16 %v113_v48  ;;  %v370_v63 = vunpack.c.l.s8.bf16 %v114_v49  ;;  %v98_v1 = vld [vmem:[%s2962_s1 + $0x9e] sm:$0x3]  ;;  %v1822_v3 = vcombine.low %v381_v45, %v382_v46  ;;  %v383_v4 = vunpack.c.l.s8.bf16 %v127_v53  ;;  %v167_v49 = vld [vmem:[%s2962_s1 + $0x128] sm:$0x3]  ;;  %v181_v53 = vld [vmem:[%s2962_s1 + $0x144] sm:$0x3] }
  0x33   :  { %1971 = vmatprep.subr.bf16.mxu1 %v1828_v7  ;;  %1529 = vmatprep.mubr.bf16.mxu0 %v579_v55  ;;  %v583_v2 = vcombine.high %v579_v55, %v579_v55  ;;  %v384_v5 = vunpack.c.l.s8.bf16 %v128_v54  ;;  %v164_v7 = vld [vmem:[%s2962_s1 + $0x122] sm:$0x3]  ;;  %v1831_v8 = vcombine.low %v399_v51, %v400_v52  ;;  %v401_v9 = vunpack.c.l.s8.bf16 %v145_v59  ;;  %v182_v54 = vld [vmem:[%s2962_s1 + $0x146] sm:$0x3]  ;;  %v200_v59 = vld [vmem:[%s2962_s1 + $0x16a] sm:$0x3] }
  0x34   :  { %1950 = vmatpush3.bf16.msra.mxu0 %v1804_v12  ;;  %v402_v10 = vunpack.c.l.s8.bf16 %v146_v60  ;;  %v130_v12 = vld [vmem:[%s2962_s1 + $0xde] sm:$0x3]  ;;  %v1807_v13 = vcombine.low %v351_v57, %v352_v58  ;;  %v353_v14 = vunpack.c.l.s8.bf16 %v97_v0  ;;  %v354_v43 = vunpack.c.l.s8.bf16 %v98_v1  ;;  %v199_v58 = vld [vmem:[%s2962_s1 + $0x168] sm:$0x3]  ;;  %v152_v1 = vld [vmem:[%s2962_s1 + $0x10a] sm:$0x3] }
  0x35   :  { %1951 = vmatprep.subr.bf16.mxu0 %v1813_v16  ;;  %1569 = vmatprep.mubr.bf16.mxu1 %v583_v2  ;;  %v196_v16 = vld [vmem:[%s2962_s1 + $0x162] sm:$0x3]  ;;  %v1816_v17 = vcombine.low %v369_v62, %v370_v63  ;;  %v419_v18 = vunpack.c.l.s8.bf16 %v163_v6  ;;  %v420_v19 = vunpack.c.l.s8.bf16 %v164_v7  ;;  %v1823_v22 = vcombine.low %v383_v4, %v384_v5  ;;  %v151_v0 = vld [vmem:[%s2962_s1 + $0x108] sm:$0x3]  ;;  %v169_v5 = vld [vmem:[%s2962_s1 + $0x12c] sm:$0x3] }
  0x36   :  { %1972 = vmatpush3.bf16.msra.mxu1 %v1820_v21  ;;  %v148_v21 = vld [vmem:[%s2962_s1 + $0x102] sm:$0x3]  ;;  %v385_v23 = vunpack.c.l.s8.bf16 %v129_v11  ;;  %v386_v24 = vunpack.c.l.s8.bf16 %v130_v12  ;;  %v1832_v27 = vcombine.low %v401_v9, %v402_v10  ;;  %v451_v28 = vunpack.c.l.s8.bf16 %v195_v15  ;;  %v170_v6 = vld [vmem:[%s2962_s1 + $0x12e] sm:$0x3]  ;;  %v183_v10 = vld [vmem:[%s2962_s1 + $0x148] sm:$0x3] }
  0x37   :  { %1973 = vmatprep.subr.bf16.mxu1 %v1829_v26  ;;  %v166_v26 = vld [vmem:[%s2962_s1 + $0x126] sm:$0x3]  ;;  %v452_v29 = vunpack.c.l.s8.bf16 %v196_v16  ;;  %v1808_v33 = vcombine.low %v353_v14, %v354_v43  ;;  %v403_v34 = vunpack.c.l.s8.bf16 %v147_v20  ;;  %v404_v35 = vunpack.c.l.s8.bf16 %v148_v21  ;;  %v184_v11 = vld [vmem:[%s2962_s1 + $0x14a] sm:$0x3]  ;;  %v201_v43 = vld [vmem:[%s2962_s1 + $0x16c] sm:$0x3] }
  0x38   :  { %1952 = vmatpush3.bf16.msra.mxu0 %v1805_v32  ;;  %v180_v32 = vld [vmem:[%s2962_s1 + $0x142] sm:$0x3]  ;;  %v565_v38 = vrot.slane %v2486_v31, %v2345_v47  ;;  %v1841_v39 = vcombine.low %v419_v18, %v420_v19  ;;  %v421_v40 = vunpack.c.l.s8.bf16 %v165_v25  ;;  %v422_v41 = vunpack.c.l.s8.bf16 %v166_v26  ;;  %v168_v31 = vld [vmem:[%s2962_s1 + $0x12a] sm:$0x3]  ;;  %v202_v15 = vld [vmem:[%s2962_s1 + $0x16e] sm:$0x3] }
  0x39   :  { %1953 = vmatprep.subr.bf16.mxu0 %v1814_v37  ;;  %v198_v37 = vld [vmem:[%s2962_s1 + $0x166] sm:$0x3]  ;;  %v1824_v45 = vcombine.low %v385_v23, %v386_v24  ;;  %v435_v46 = vunpack.c.l.s8.bf16 %v179_v30  ;;  %v436_v48 = vunpack.c.l.s8.bf16 %v180_v32  ;;  %v453_v51 = vunpack.c.l.s8.bf16 %v197_v36  ;;  %v153_v19 = vld [vmem:[%s2962_s1 + $0x10c] sm:$0x3]  ;;  %v154_v20 = vld [vmem:[%s2962_s1 + $0x10e] sm:$0x3] }
  0x3a   :  { %1974 = vmatpush3.bf16.msra.mxu1 %v1821_v44  ;;  %v150_v44 = vld [vmem:[%s2962_s1 + $0x106] sm:$0x3]  ;;  %v454_v52 = vunpack.c.l.s8.bf16 %v198_v37  ;;  %v1833_v55 = vcombine.low %v403_v34, %v404_v35  ;;  %v581_v60 = vcombine.high %v565_v38, %v565_v38  ;;  %v423_v62 = vunpack.c.l.s8.bf16 %v167_v49  ;;  %v171_v24 = vld [vmem:[%s2962_s1 + $0x130] sm:$0x3]  ;;  %v172_v25 = vld [vmem:[%s2962_s1 + $0x132] sm:$0x3] }
  0x3b   :  { %1975 = vmatprep.subr.bf16.mxu1 %v1830_v50  ;;  %v1857_v50 = vcombine.low %v451_v28, %v452_v29  ;;  %v406_v57 = vunpack.c.l.s8.bf16 %v150_v44  ;;  %v424_v63 = vunpack.c.l.s8.bf16 %v168_v31  ;;  %v1849_v2 = vcombine.low %v435_v46, %v436_v48  ;;  %v2634_v26 = vld [vmem:[%s2961_s0 + $0x8] sm:$0xff]  ;;  %v203_v36 = vld [vmem:[%s2962_s1 + $0x170] sm:$0x3]  ;;  %v204_v37 = vld [vmem:[%s2962_s1 + $0x172] sm:$0x3] }
  0x3c   :  { %1954 = vmatpush3.bf16.msra.mxu0 %v1806_v56  ;;  %v405_v56 = vunpack.c.l.s8.bf16 %v149_v42  ;;  %v438_v4 = vunpack.c.l.s8.bf16 %v182_v54  ;;  %v1858_v7 = vcombine.low %v453_v51, %v454_v52  ;;  %v456_v9 = vunpack.c.l.s8.bf16 %v200_v59  ;;  %v185_v30 = vld [vmem:[%s2962_s1 + $0x14c] sm:$0x3]  ;;  %v186_v32 = vld [vmem:[%s2962_s1 + $0x14e] sm:$0x3]  ;;  %v156_v42 = vld [vmem:[%s2962_s1 + $0x112] sm:$0x3] }
  0x3d   :  { %1955 = vmatprep.subr.bf16.mxu0 %v1815_v61  ;;  %v1842_v61 = vcombine.low %v421_v40, %v422_v41  ;;  %v408_v14 = vunpack.c.l.s8.bf16 %v152_v1  ;;  %v1843_v16 = vcombine.low %v423_v62, %v424_v63  ;;  %v426_v18 = vunpack.c.l.s8.bf16 %v170_v6  ;;  %v155_v41 = vld [vmem:[%s2962_s1 + $0x110] sm:$0x3]  ;;  %v173_v49 = vld [vmem:[%s2962_s1 + $0x134] sm:$0x3]  ;;  %v174_v31 = vld [vmem:[%s2962_s1 + $0x136] sm:$0x3] }
  0x3e   :  { %1976 = vmatpush3.bf16.msra.mxu1 %v1822_v3  ;;  %v437_v3 = vunpack.c.l.s8.bf16 %v181_v53  ;;  %v1834_v12 = vcombine.low %v405_v56, %v406_v57  ;;  %v440_v23 = vunpack.c.l.s8.bf16 %v184_v11  ;;  %v457_v28 = vunpack.c.l.s8.bf16 %v201_v43  ;;  %v187_v53 = vld [vmem:[%s2962_s1 + $0x150] sm:$0x3]  ;;  %v188_v54 = vld [vmem:[%s2962_s1 + $0x152] sm:$0x3]  ;;  %v205_v59 = vld [vmem:[%s2962_s1 + $0x174] sm:$0x3] }
  0x3f   :  { %1977 = vmatprep.subr.bf16.mxu1 %v1831_v8  ;;  %v455_v8 = vunpack.c.l.s8.bf16 %v199_v58  ;;  %v458_v29 = vunpack.c.l.s8.bf16 %v202_v15  ;;  %v409_v34 = vunpack.c.l.s8.bf16 %v153_v19  ;;  %v410_v35 = vunpack.c.l.s8.bf16 %v154_v20  ;;  %v158_v1 = vld [vmem:[%s2962_s1 + $0x116] sm:$0x3]  ;;  %v175_v6 = vld [vmem:[%s2962_s1 + $0x138] sm:$0x3]  ;;  %v189_v11 = vld [vmem:[%s2962_s1 + $0x154] sm:$0x3] }
  0x40   :  { %1956 = vmatpush3.bf16.msra.mxu0 %v1807_v13  ;;  %v407_v13 = vunpack.c.l.s8.bf16 %v151_v0  ;;  %v1850_v21 = vcombine.low %v437_v3, %v438_v4  ;;  %v428_v40 = vunpack.c.l.s8.bf16 %v172_v25  ;;  %v2656_v44 = vrot.slane %v2634_v26, %v2345_v47  ;;  %v157_v0 = vld [vmem:[%s2962_s1 + $0x114] sm:$0x3] }
  0x41   :  { %1957 = vmatprep.subr.bf16.mxu0 %v1816_v17  ;;  %v425_v17 = vunpack.c.l.s8.bf16 %v169_v5  ;;  %v441_v46 = vunpack.c.l.s8.bf16 %v185_v30  ;;  %v442_v48 = vunpack.c.l.s8.bf16 %v186_v32  ;;  %v459_v51 = vunpack.c.l.s8.bf16 %v203_v36 }
  0x42   :  { %1978 = vmatpush3.bf16.msra.mxu1 %v1823_v22  ;;  %v439_v22 = vunpack.c.l.s8.bf16 %v183_v10  ;;  %v460_v52 = vunpack.c.l.s8.bf16 %v204_v37  ;;  %v1836_v56 = vcombine.low %v409_v34, %v410_v35  ;;  %v411_v57 = vunpack.c.l.s8.bf16 %v155_v41 }
  0x43   :  { %1979 = vmatprep.subr.bf16.mxu1 %v1832_v27  ;;  %v1859_v27 = vcombine.low %v455_v8, %v456_v9  ;;  %v412_v58 = vunpack.c.l.s8.bf16 %v156_v42  ;;  %v429_v62 = vunpack.c.l.s8.bf16 %v173_v49  ;;  %v430_v63 = vunpack.c.l.s8.bf16 %v174_v31 }
  0x44   :  { %1958 = vmatpush3.bf16.msra.mxu0 %v1808_v33  ;;  %v1835_v33 = vcombine.low %v407_v13, %v408_v14  ;;  %v1852_v3 = vcombine.low %v441_v46, %v442_v48  ;;  %v443_v4 = vunpack.c.l.s8.bf16 %v187_v53  ;;  %v444_v5 = vunpack.c.l.s8.bf16 %v188_v54 }
  0x45   :  { %1987 = vmatprep.subr.bf16.mxu0 %v1841_v39  ;;  %v427_v39 = vunpack.c.l.s8.bf16 %v171_v24  ;;  %v1861_v8 = vcombine.low %v459_v51, %v460_v52  ;;  %v461_v9 = vunpack.c.l.s8.bf16 %v205_v59  ;;  %v1837_v14 = vcombine.low %v411_v57, %v412_v58 }
  0x46   :  { %1980 = vmatpush3.bf16.msra.mxu1 %v1824_v45  ;;  %v1851_v45 = vcombine.low %v439_v22, %v440_v23  ;;  %v413_v43 = vunpack.c.l.s8.bf16 %v157_v0  ;;  %v414_v15 = vunpack.c.l.s8.bf16 %v158_v1  ;;  %v431_v19 = vunpack.c.l.s8.bf16 %v175_v6  ;;  %v160_v22 = vld [vmem:[%s2962_s1 + $0x11a] sm:$0x3] }
  0x47   :  { %1530 = vmatmul.mubr.bf16.vlgmr.msra.gmra.mrb[4].mxu0 %v565_v38  ;;  %2009 = vmatprep.subr.bf16.mxu1 %v1857_v50  ;;  %v1844_v38 = vcombine.low %v425_v17, %v426_v18  ;;  %v1860_v50 = vcombine.low %v457_v28, %v458_v29  ;;  %v208_v17 = vld [vmem:[%s2962_s1 + $0x17a] sm:$0x3]  ;;  %v1846_v18 = vcombine.low %v429_v62, %v430_v63  ;;  %v445_v24 = vunpack.c.l.s8.bf16 %v189_v11  ;;  %v178_v28 = vld [vmem:[%s2962_s1 + $0x13e] sm:$0x3] }
  0x48   :  { %1988 = vmatpush3.bf16.msra.mxu0 %v1833_v55  ;;  %v599_v55 = vcombine.high %v2656_v44, %v2656_v44  ;;  %v1853_v23 = vcombine.low %v443_v4, %v444_v5 }
  0x49   :  { %1570 = vmatmul.mubr.bf16.vlgmr.msra.gmra.mrb[4].mxu1 %v581_v60  ;;  %1989 = vmatprep.subr.bf16.mxu0 %v1842_v61  ;;  %v206_v60 = vld [vmem:[%s2962_s1 + $0x176] sm:$0x3]  ;;  %v1845_v61 = vcombine.low %v427_v39, %v428_v40 }
  0x4a   :  { %2010 = vmatpush3.bf16.msra.mxu1 %v1849_v2  ;;  %v621_v2 = vrot.slane %v599_v55, %v2345_v47  ;;  %v462_v10 = vunpack.c.l.s8.bf16 %v206_v60 }
  0x4b   :  { %2011 = vmatprep.subr.bf16.mxu1 %v1858_v7  ;;  %v176_v7 = vld [vmem:[%s2962_s1 + $0x13a] sm:$0x3] }
  0x4c   :  { %1990 = vmatpush3.bf16.msra.mxu0 %v1834_v12  ;;  %v190_v12 = vld [vmem:[%s2962_s1 + $0x156] sm:$0x3]  ;;  %1609 = vmatprep.mubr.bf16.mxu0 %v621_v2  ;;  %v631_v13 = vcombine.high %v621_v2, %v621_v2  ;;  %v432_v20 = vunpack.c.l.s8.bf16 %v176_v7 }
  0x4d   :  { %1991 = vmatprep.subr.bf16.mxu0 %v1843_v16  ;;  %v207_v16 = vld [vmem:[%s2962_s1 + $0x178] sm:$0x3]  ;;  %v446_v25 = vunpack.c.l.s8.bf16 %v190_v12 }
  0x4e   :  { %2012 = vmatpush3.bf16.msra.mxu1 %v1850_v21  ;;  %v159_v21 = vld [vmem:[%s2962_s1 + $0x118] sm:$0x3]  ;;  %1649 = vmatprep.mubr.bf16.mxu1 %v631_v13 }
  0x4f   :  { %2013 = vmatprep.subr.bf16.mxu1 %v1859_v27  ;;  %v177_v27 = vld [vmem:[%s2962_s1 + $0x13c] sm:$0x3] }
  0x50   :  { %1992 = vmatpush3.bf16.msra.mxu0 %v1835_v33 }
  0x51   :  { %1993 = vmatprep.subr.bf16.mxu0 %v1844_v38 }
  0x52   :  { %2014 = vmatpush3.bf16.msra.mxu1 %v1851_v45 }
  0x53   :  { %2015 = vmatprep.subr.bf16.mxu1 %v1860_v50 }
  0x54   :  { %1994 = vmatpush3.bf16.msra.mxu0 %v1836_v56 }
  0x55   :  { %1995 = vmatprep.subr.bf16.mxu0 %v1845_v61 }
  0x56   :  { %2016 = vmatpush3.bf16.msra.mxu1 %v1852_v3 }
  0x57   :  { %9 = vsyncpa [#allocation3], 0  ;;  %2017 = vmatprep.subr.bf16.mxu1 %v1861_v8  ;;  %v1862_v29 = vcombine.low %v461_v9, %v462_v10  ;;  %v463_v30 = vunpack.c.l.s8.bf16 %v207_v16  ;;  %v464_v32 = vunpack.c.l.s8.bf16 %v208_v17  ;;  %v191_v33 = vld [vmem:[%s2962_s1 + $0x158] sm:$0x3]  ;;  %v192_v34 = vld [vmem:[%s2962_s1 + $0x15a] sm:$0x3]  ;;  %v1838_v35 = vcombine.low %v413_v43, %v414_v15 }
  0x58   :  { %1996 = vmatpush3.bf16.msra.mxu0 %v1837_v14  ;;  %v415_v36 = vunpack.c.l.s8.bf16 %v159_v21  ;;  %v416_v37 = vunpack.c.l.s8.bf16 %v160_v22  ;;  %v209_v38 = vld [vmem:[%s2962_s1 + $0x17c] sm:$0x3]  ;;  %v210_v39 = vld [vmem:[%s2962_s1 + $0x17e] sm:$0x3]  ;;  %v1847_v40 = vcombine.low %v431_v19, %v432_v20  ;;  %v433_v41 = vunpack.c.l.s8.bf16 %v177_v27  ;;  %v227_v50 = vld [vmem:[%s2962_s1 + $0x1a0] sm:$0x3] }
  0x59   :  { %1997 = vmatprep.subr.bf16.mxu0 %v1846_v18  ;;  %v434_v42 = vunpack.c.l.s8.bf16 %v178_v28  ;;  %v161_v45 = vld [vmem:[%s2962_s1 + $0x11c] sm:$0x3]  ;;  %v162_v46 = vld [vmem:[%s2962_s1 + $0x11e] sm:$0x3]  ;;  %v1854_v48 = vcombine.low %v445_v24, %v446_v25  ;;  %v447_v49 = vunpack.c.l.s8.bf16 %v191_v33  ;;  %v448_v31 = vunpack.c.l.s8.bf16 %v192_v34  ;;  %v228_v51 = vld [vmem:[%s2962_s1 + $0x1a2] sm:$0x3] }
  0x5a   :  { %2018 = vmatpush3.bf16.msra.mxu1 %v1853_v23  ;;  %v1863_v52 = vcombine.low %v463_v30, %v464_v32  ;;  %v465_v53 = vunpack.c.l.s8.bf16 %v209_v38  ;;  %v466_v54 = vunpack.c.l.s8.bf16 %v210_v39  ;;  %v193_v55 = vld [vmem:[%s2962_s1 + $0x15c] sm:$0x3]  ;;  %v194_v56 = vld [vmem:[%s2962_s1 + $0x15e] sm:$0x3]  ;;  %v1839_v57 = vcombine.low %v415_v36, %v416_v37  ;;  %v259_v60 = vld [vmem:[%s2962_s1 + $0x1e0] sm:$0x3] }
  0x5b   :  { %2019 = vmatprep.subr.bf16.mxu1 %v1862_v29  ;;  %v417_v58 = vunpack.c.l.s8.bf16 %v161_v45  ;;  %v418_v59 = vunpack.c.l.s8.bf16 %v162_v46  ;;  %v260_v61 = vld [vmem:[%s2962_s1 + $0x1e2] sm:$0x3]  ;;  %v1848_v62 = vcombine.low %v433_v41, %v434_v42  ;;  %v483_v63 = vunpack.c.l.s8.bf16 %v227_v50  ;;  %v211_v1 = vld [vmem:[%s2962_s1 + $0x180] sm:$0x3]  ;;  %v229_v6 = vld [vmem:[%s2962_s1 + $0x1a4] sm:$0x3] }
  0x5c   :  { %1998 = vmatpush3.bf16.msra.mxu0 %v1838_v35  ;;  %v484_v0 = vunpack.c.l.s8.bf16 %v228_v51  ;;  %v212_v2 = vld [vmem:[%s2962_s1 + $0x182] sm:$0x3]  ;;  %v1855_v3 = vcombine.low %v447_v49, %v448_v31  ;;  %v449_v4 = vunpack.c.l.s8.bf16 %v193_v55  ;;  %v450_v5 = vunpack.c.l.s8.bf16 %v194_v56  ;;  %v230_v7 = vld [vmem:[%s2962_s1 + $0x1a6] sm:$0x3]  ;;  %v243_v11 = vld [vmem:[%s2962_s1 + $0x1c0] sm:$0x3] }
  0x5d   :  { %1999 = vmatprep.subr.bf16.mxu0 %v1847_v40  ;;  %v1864_v8 = vcombine.low %v465_v53, %v466_v54  ;;  %v515_v9 = vunpack.c.l.s8.bf16 %v259_v60  ;;  %v516_v10 = vunpack.c.l.s8.bf16 %v260_v61  ;;  %v244_v12 = vld [vmem:[%s2962_s1 + $0x1c2] sm:$0x3]  ;;  %v1840_v13 = vcombine.low %v417_v58, %v418_v59  ;;  %v261_v15 = vld [vmem:[%s2962_s1 + $0x1e4] sm:$0x3]  ;;  %v262_v16 = vld [vmem:[%s2962_s1 + $0x1e6] sm:$0x3] }
  0x5e   :  { %2020 = vmatpush3.bf16.msra.mxu1 %v1854_v48  ;;  %v467_v14 = vunpack.c.l.s8.bf16 %v211_v1  ;;  %v468_v43 = vunpack.c.l.s8.bf16 %v212_v2  ;;  %v607_v17 = vrot.slane %v2656_v44, %v2345_v47  ;;  %v1873_v18 = vcombine.low %v483_v63, %v484_v0  ;;  %v213_v21 = vld [vmem:[%s2962_s1 + $0x184] sm:$0x3]  ;;  %v214_v22 = vld [vmem:[%s2962_s1 + $0x186] sm:$0x3]  ;;  %v231_v27 = vld [vmem:[%s2962_s1 + $0x1a8] sm:$0x3] }
  0x5f   :  { %2021 = vmatprep.subr.bf16.mxu1 %v1863_v52  ;;  %v485_v19 = vunpack.c.l.s8.bf16 %v229_v6  ;;  %v486_v20 = vunpack.c.l.s8.bf16 %v230_v7  ;;  %v1856_v23 = vcombine.low %v449_v4, %v450_v5  ;;  %v499_v24 = vunpack.c.l.s8.bf16 %v243_v11  ;;  %v232_v44 = vld [vmem:[%s2962_s1 + $0x1aa] sm:$0x3]  ;;  %v245_v32 = vld [vmem:[%s2962_s1 + $0x1c4] sm:$0x3]  ;;  %v246_v33 = vld [vmem:[%s2962_s1 + $0x1c6] sm:$0x3] }
  0x60   :  { %2000 = vmatpush3.bf16.msra.mxu0 %v1839_v57  ;;  %v500_v25 = vunpack.c.l.s8.bf16 %v244_v12  ;;  %v1889_v28 = vcombine.low %v515_v9, %v516_v10  ;;  %v517_v29 = vunpack.c.l.s8.bf16 %v261_v15  ;;  %v518_v30 = vunpack.c.l.s8.bf16 %v262_v16  ;;  %v263_v37 = vld [vmem:[%s2962_s1 + $0x1e8] sm:$0x3]  ;;  %v264_v38 = vld [vmem:[%s2962_s1 + $0x1ea] sm:$0x3]  ;;  %v233_v50 = vld [vmem:[%s2962_s1 + $0x1ac] sm:$0x3] }
  0x61   :  { %2001 = vmatprep.subr.bf16.mxu0 %v1848_v62  ;;  %v1865_v34 = vcombine.low %v467_v14, %v468_v43  ;;  %v469_v35 = vunpack.c.l.s8.bf16 %v213_v21  ;;  %v470_v36 = vunpack.c.l.s8.bf16 %v214_v22  ;;  %v629_v39 = vcombine.high %v607_v17, %v607_v17  ;;  %v215_v45 = vld [vmem:[%s2962_s1 + $0x188] sm:$0x3]  ;;  %v216_v46 = vld [vmem:[%s2962_s1 + $0x18a] sm:$0x3]  ;;  %v234_v51 = vld [vmem:[%s2962_s1 + $0x1ae] sm:$0x3] }
  0x62   :  { %2022 = vmatpush3.bf16.msra.mxu1 %v1855_v3  ;;  %v1874_v40 = vcombine.low %v485_v19, %v486_v20  ;;  %v487_v41 = vunpack.c.l.s8.bf16 %v231_v27  ;;  %v488_v42 = vunpack.c.l.s8.bf16 %v232_v44  ;;  %v1881_v48 = vcombine.low %v499_v24, %v500_v25  ;;  %v247_v56 = vld [vmem:[%s2962_s1 + $0x1c8] sm:$0x3]  ;;  %v248_v57 = vld [vmem:[%s2962_s1 + $0x1ca] sm:$0x3]  ;;  %v266_v61 = vld [vmem:[%s2962_s1 + $0x1ee] sm:$0x3] }
  0x63   :  { %2023 = vmatprep.subr.bf16.mxu1 %v1864_v8  ;;  %v501_v49 = vunpack.c.l.s8.bf16 %v245_v32  ;;  %v502_v31 = vunpack.c.l.s8.bf16 %v246_v33  ;;  %v584_v52 = vcombine.high %v2634_v26, %v2634_v26  ;;  %v1890_v53 = vcombine.low %v517_v29, %v518_v30  ;;  %v265_v26 = vld [vmem:[%s2962_s1 + $0x1ec] sm:$0x3]  ;;  %v218_v3 = vld [vmem:[%s2962_s1 + $0x18e] sm:$0x3]  ;;  %v235_v7 = vld [vmem:[%s2962_s1 + $0x1b0] sm:$0x3] }
  0x64   :  { %2002 = vmatpush3.bf16.msra.mxu0 %v1840_v13  ;;  %v519_v54 = vunpack.c.l.s8.bf16 %v263_v37  ;;  %v520_v55 = vunpack.c.l.s8.bf16 %v264_v38  ;;  %v1866_v58 = vcombine.low %v469_v35, %v470_v36  ;;  %v471_v59 = vunpack.c.l.s8.bf16 %v215_v45  ;;  %v217_v2 = vld [vmem:[%s2962_s1 + $0x18c] sm:$0x3]  ;;  %v236_v8 = vld [vmem:[%s2962_s1 + $0x1b2] sm:$0x3]  ;;  %v250_v14 = vld [vmem:[%s2962_s1 + $0x1ce] sm:$0x3] }
  0x65   :  { %2031 = vmatprep.subr.bf16.mxu0 %v1873_v18  ;;  %v472_v60 = vunpack.c.l.s8.bf16 %v216_v46  ;;  %v2828_v62 = vrot.slane %v584_v52, %v2345_v47  ;;  %v1875_v63 = vcombine.low %v487_v41, %v488_v42  ;;  %v489_v0 = vunpack.c.l.s8.bf16 %v233_v50  ;;  %v249_v13 = vld [vmem:[%s2962_s1 + $0x1cc] sm:$0x3]  ;;  %v268_v18 = vld [vmem:[%s2962_s1 + $0x1f2] sm:$0x3]  ;;  %v238_v29 = vld [vmem:[%s2962_s1 + $0x1b6] sm:$0x3] }
  0x66   :  { %2024 = vmatpush3.bf16.msra.mxu1 %v1856_v23  ;;  %v490_v1 = vunpack.c.l.s8.bf16 %v234_v51  ;;  %v1882_v4 = vcombine.low %v501_v49, %v502_v31  ;;  %v503_v5 = vunpack.c.l.s8.bf16 %v247_v56  ;;  %v504_v6 = vunpack.c.l.s8.bf16 %v248_v57  ;;  %v219_v23 = vld [vmem:[%s2962_s1 + $0x190] sm:$0x3]  ;;  %v220_v24 = vld [vmem:[%s2962_s1 + $0x192] sm:$0x3]  ;;  %v270_v41 = vld [vmem:[%s2962_s1 + $0x1f6] sm:$0x3] }
  0x67   :  { %1610 = vmatmul.mubr.bf16.vlgmr.msra.gmra.mrb[8].mxu0 %v607_v17  ;;  %2053 = vmatprep.subr.bf16.mxu1 %v1889_v28  ;;  %v600_v9 = vcombine.high %v2828_v62, %v2828_v62  ;;  %v1891_v10 = vcombine.low %v519_v54, %v520_v55  ;;  %v521_v11 = vunpack.c.l.s8.bf16 %v265_v26  ;;  %v522_v12 = vunpack.c.l.s8.bf16 %v266_v61  ;;  %v267_v17 = vld [vmem:[%s2962_s1 + $0x1f0] sm:$0x3]  ;;  %v237_v28 = vld [vmem:[%s2962_s1 + $0x1b4] sm:$0x3]  ;;  %v252_v36 = vld [vmem:[%s2962_s1 + $0x1d2] sm:$0x3] }
  0x68   :  { %2032 = vmatpush3.bf16.msra.mxu0 %v1865_v34  ;;  %v1867_v43 = vcombine.low %v471_v59, %v472_v60  ;;  %v473_v15 = vunpack.c.l.s8.bf16 %v217_v2  ;;  %v474_v16 = vunpack.c.l.s8.bf16 %v218_v3  ;;  %v1876_v20 = vcombine.low %v489_v0, %v490_v1  ;;  %v251_v35 = vld [vmem:[%s2962_s1 + $0x1d0] sm:$0x3]  ;;  %v222_v49 = vld [vmem:[%s2962_s1 + $0x196] sm:$0x3]  ;;  %v239_v52 = vld [vmem:[%s2962_s1 + $0x1b8] sm:$0x3] }
  0x69   :  { %1650 = vmatmul.mubr.bf16.vlgmr.msra.gmra.mrb[8].mxu1 %v629_v39  ;;  %2033 = vmatprep.subr.bf16.mxu0 %v1874_v40  ;;  %v628_v19 = vrot.slane %v600_v9, %v2345_v47  ;;  %v491_v21 = vunpack.c.l.s8.bf16 %v235_v7  ;;  %v492_v22 = vunpack.c.l.s8.bf16 %v236_v8  ;;  %v1883_v25 = vcombine.low %v503_v5, %v504_v6  ;;  %v269_v40 = vld [vmem:[%s2962_s1 + $0x1f4] sm:$0x3]  ;;  %v271_v61 = vld [vmem:[%s2962_s1 + $0x1f8] sm:$0x3]  ;;  %v241_v8 = vld [vmem:[%s2962_s1 + $0x1bc] sm:$0x3] }
  0x6a   :  { %2054 = vmatpush3.bf16.msra.mxu1 %v1881_v48  ;;  %v505_v27 = vunpack.c.l.s8.bf16 %v249_v13  ;;  %v506_v44 = vunpack.c.l.s8.bf16 %v250_v14  ;;  %v1892_v32 = vcombine.low %v521_v11, %v522_v12  ;;  %v523_v33 = vunpack.c.l.s8.bf16 %v267_v17  ;;  %v221_v48 = vld [vmem:[%s2962_s1 + $0x194] sm:$0x3]  ;;  %v223_v3 = vld [vmem:[%s2962_s1 + $0x198] sm:$0x3]  ;;  %v242_v9 = vld [vmem:[%s2962_s1 + $0x1be] sm:$0x3] }
  0x6b   :  { %2055 = vmatprep.subr.bf16.mxu1 %v1890_v53  ;;  %1689 = vmatprep.mubr.bf16.mxu0 %v628_v19  ;;  %v632_v30 = vcombine.high %v628_v19, %v628_v19  ;;  %v524_v34 = vunpack.c.l.s8.bf16 %v268_v18  ;;  %v1868_v37 = vcombine.low %v473_v15, %v474_v16  ;;  %v475_v38 = vunpack.c.l.s8.bf16 %v219_v23  ;;  %v240_v53 = vld [vmem:[%s2962_s1 + $0x1ba] sm:$0x3]  ;;  %v253_v57 = vld [vmem:[%s2962_s1 + $0x1d4] sm:$0x3]  ;;  %v255_v13 = vld [vmem:[%s2962_s1 + $0x1d8] sm:$0x3] }
  0x6c   :  { %2034 = vmatpush3.bf16.msra.mxu0 %v1866_v58  ;;  %v476_v39 = vunpack.c.l.s8.bf16 %v220_v24  ;;  %v1877_v42 = vcombine.low %v491_v21, %v492_v22  ;;  %v493_v45 = vunpack.c.l.s8.bf16 %v237_v28  ;;  %v494_v46 = vunpack.c.l.s8.bf16 %v238_v29  ;;  %v254_v58 = vld [vmem:[%s2962_s1 + $0x1d6] sm:$0x3]  ;;  %v256_v14 = vld [vmem:[%s2962_s1 + $0x1da] sm:$0x3]  ;;  %v273_v17 = vld [vmem:[%s2962_s1 + $0x1fc] sm:$0x3] }
  0x6d   :  { %2035 = vmatprep.subr.bf16.mxu0 %v1875_v63  ;;  %1729 = vmatprep.mubr.bf16.mxu1 %v632_v30  ;;  %v1884_v31 = vcombine.low %v505_v27, %v506_v44  ;;  %v507_v50 = vunpack.c.l.s8.bf16 %v251_v35  ;;  %v508_v51 = vunpack.c.l.s8.bf16 %v252_v36  ;;  %v1893_v54 = vcombine.low %v523_v33, %v524_v34  ;;  %v272_v63 = vld [vmem:[%s2962_s1 + $0x1fa] sm:$0x3]  ;;  %v274_v18 = vld [vmem:[%s2962_s1 + $0x1fe] sm:$0x3]  ;;  %v225_v22 = vld [vmem:[%s2962_s1 + $0x19c] sm:$0x3] }
  0x6e   :  { %2056 = vmatpush3.bf16.msra.mxu1 %v1882_v4  ;;  %v525_v55 = vunpack.c.l.s8.bf16 %v269_v40  ;;  %v526_v56 = vunpack.c.l.s8.bf16 %v270_v41  ;;  %v1869_v59 = vcombine.low %v475_v38, %v476_v39  ;;  %v477_v60 = vunpack.c.l.s8.bf16 %v221_v48  ;;  %v224_v4 = vld [vmem:[%s2962_s1 + $0x19a] sm:$0x3]  ;;  %v226_v23 = vld [vmem:[%s2962_s1 + $0x19e] sm:$0x3]  ;;  %v257_v30 = vld [vmem:[%s2962_s1 + $0x1dc] sm:$0x3] }
  0x6f   :  { %2057 = vmatprep.subr.bf16.mxu1 %v1891_v10  ;;  %v478_v26 = vunpack.c.l.s8.bf16 %v222_v49  ;;  %v1878_v0 = vcombine.low %v493_v45, %v494_v46  ;;  %v495_v1 = vunpack.c.l.s8.bf16 %v239_v52  ;;  %v496_v2 = vunpack.c.l.s8.bf16 %v240_v53  ;;  %s2104_s0 = smov [#allocation2]  }
  0x70   :  { %2036 = vmatpush3.bf16.msra.mxu0 %v1867_v43  ;;  %v1885_v5 = vcombine.low %v507_v50, %v508_v51  ;;  %v509_v6 = vunpack.c.l.s8.bf16 %v253_v57  ;;  %v510_v7 = vunpack.c.l.s8.bf16 %v254_v58  ;;  %v1894_v10 = vcombine.low %v525_v55, %v526_v56  ;;  %s1761_s7 = sshll.u32 %s2104_s0, 4  ;;  %s1762_s7 = int_to_ptr.vmem [resolvable:$true] %s1761_s7 }
  0x71   :  { %2037 = vmatprep.subr.bf16.mxu0 %v1876_v20  ;;  %v527_v11 = vunpack.c.l.s8.bf16 %v271_v61  ;;  %v528_v12 = vunpack.c.l.s8.bf16 %v272_v63  ;;  %v1870_v43 = vcombine.low %v477_v60, %v478_v26  ;;  %v479_v15 = vunpack.c.l.s8.bf16 %v223_v3  ;;  %s2079_s8 = scalar_lea.vmem %s1762_s7, 32  ;;  %p2084_p1 = scmp.lt.s32.totalorder %s1762_s7, %s1762_s7 }
  0x72   :  { %2058 = vmatpush3.bf16.msra.mxu1 %v1883_v25  ;;  %v480_v16 = vunpack.c.l.s8.bf16 %v224_v4  ;;  %v1879_v19 = vcombine.low %v495_v1, %v496_v2  ;;  %v497_v20 = vunpack.c.l.s8.bf16 %v241_v8  ;;  %v498_v21 = vunpack.c.l.s8.bf16 %v242_v9  ;;  %p2080_p0 = scmp.ne.s32.totalorder %s1762_s7, %s2079_s8  ;;  %p2085_p2 = scmp.lt.s32.totalorder %s2079_s8, %s2079_s8 }
  0x73   :  { %2059 = vmatprep.subr.bf16.mxu1 %v1892_v32  ;;  %v1886_v24 = vcombine.low %v509_v6, %v510_v7  ;;  %v511_v25 = vunpack.c.l.s8.bf16 %v255_v13  ;;  %v512_v27 = vunpack.c.l.s8.bf16 %v256_v14  ;;  %v1895_v44 = vcombine.low %v527_v11, %v528_v12  ;;  %v258_v32 = vld [vmem:[%s2962_s1 + $0x1de] sm:$0x3] }
  0x74   :  { %2038 = vmatpush3.bf16.msra.mxu0 %v1868_v37  ;;  %v529_v28 = vunpack.c.l.s8.bf16 %v273_v17  ;;  %v530_v29 = vunpack.c.l.s8.bf16 %v274_v18  ;;  %v1871_v33 = vcombine.low %v479_v15, %v480_v16  ;;  %v481_v34 = vunpack.c.l.s8.bf16 %v225_v22  ;;  %p2086_p3 = por %p2085_p2, %p2084_p1 }
  0x75   :  { %2039 = vmatprep.subr.bf16.mxu0 %v1877_v42  ;;  %v482_v35 = vunpack.c.l.s8.bf16 %v226_v23  ;;  %v1880_v36 = vcombine.low %v497_v20, %v498_v21  ;;  %v1887_v37 = vcombine.low %v511_v25, %v512_v27  ;;  %v513_v38 = vunpack.c.l.s8.bf16 %v257_v30  ;;  %v1897_v25 = vld [vmem:[%s2963_s2] ss:$0 sm:$0xff] }
  0x76   :  { %2060 = vmatpush3.bf16.msra.mxu1 %v1884_v31  ;;  %v514_v39 = vunpack.c.l.s8.bf16 %v258_v32  ;;  %v1896_v40 = vcombine.low %v529_v28, %v530_v29  ;;  %v614_v42 = vrot.slane %v2828_v62, %v2345_v47  ;;  %v1898_v28 = vld [vmem:[%s2964_s3] ss:$0 sm:$0xff]  ;;  %vm1753_vm0 = vcmask 74752   ;;  %p2087_p4 = pnand %p2086_p3, %p2080_p0 }
  0x77   :  { %2061 = vmatprep.subr.bf16.mxu1 %v1893_v54  ;;  %v1872_v41 = vcombine.low %v481_v34, %v482_v35 }
  0x78   :  { %2040 = vmatpush3.bf16.msra.mxu0 %v1869_v59  ;;  %v1888_v45 = vcombine.low %v513_v38, %v514_v39  ;;  %v630_v46 = vcombine.high %v614_v42, %v614_v42 }
  0x79   :  { %2041 = vmatprep.subr.bf16.mxu0 %v1878_v0 }
  0x7a   :  { %2062 = vmatpush3.bf16.msra.mxu1 %v1885_v5 }
  0x7b   :  { %2063 = vmatprep.subr.bf16.mxu1 %v1894_v10 }
  0x7c   :  { %2042 = vmatpush3.bf16.msra.mxu0 %v1870_v43 }
  0x7d   :  { %2043 = vmatprep.subr.bf16.mxu0 %v1879_v19 }
  0x7e   :  { %2064 = vmatpush3.bf16.msra.mxu1 %v1886_v24 }
  0x7f   :  { %2065 = vmatprep.subr.bf16.mxu1 %v1895_v44 }
  0x80   :  { %2044 = vmatpush3.bf16.msra.mxu0 %v1871_v33 }
  0x81   :  { %2045 = vmatprep.subr.bf16.mxu0 %v1880_v36 }
  0x82   :  { %2066 = vmatpush3.bf16.msra.mxu1 %v1887_v37 }
  0x83   :  { %2067 = vmatprep.subr.bf16.mxu1 %v1896_v40 }
  0x84   :  { %2046 = vmatpush3.bf16.msra.mxu0 %v1872_v41 }
  0x86   :  { %2068 = vmatpush3.bf16.msra.mxu1 %v1888_v45 }
  0x87   :  { %1690 = vmatmul.mubr.bf16.vlgmr.msra.gmra.mrb[12].mxu0 %v614_v42 }
  0x89   :  { %1730 = vmatmul.mubr.bf16.vlgmr.msra.gmra.mrb[12].mxu1 %v630_v46 }
  0xfa   :  { %v1915_v48 = vpop.f32.mrb[0].mxu0 }
  0xfb   :  { %v1916_v49 = vpop.f32.mrb[1].mxu0 }
  0xfc   :  { %v1937_v31 = vpop.f32.mrb[0].mxu1  ;;  %v1917_v50 = vadd.f32 %v1916_v49, %v1915_v48  ;;  %v1918_v51 = vpop.f32.mrb[2].mxu0 }
  0xfd   :  { %v1938_v52 = vpop.f32.mrb[1].mxu1  ;;  %v1919_v53 = vpop.f32.mrb[3].mxu0 }
  0xfe   :  { %v1939_v54 = vadd.f32 %v1938_v52, %v1937_v31  ;;  %v1940_v55 = vpop.f32.mrb[2].mxu1 }
  0xff   :  { %v1941_v56 = vpop.f32.mrb[3].mxu1 }
 0x100   :  { %v1492_v57 = vadd.f32 %v1939_v54, %v1917_v50 }
 0x11a   :  { %v1959_v47 = vpop.f32.mrb[4].mxu0 }
 0x11b   :  { %v1960_v62 = vpop.f32.mrb[5].mxu0 }
 0x11c   :  { %v1981_v58 = vpop.f32.mrb[4].mxu1  ;;  %v1961_v59 = vadd.f32 %v1960_v62, %v1959_v47  ;;  %v1962_v60 = vpop.f32.mrb[6].mxu0 }
 0x11d   :  { %v1982_v26 = vpop.f32.mrb[5].mxu1  ;;  %v1963_v61 = vpop.f32.mrb[7].mxu0 }
 0x11e   :  { %v1532_v63 = vadd.f32 %v1961_v59, %v1492_v57  ;;  %v1983_v0 = vadd.f32 %v1982_v26, %v1981_v58  ;;  %v1984_v1 = vpop.f32.mrb[6].mxu1 }
 0x11f   :  { %v1985_v2 = vpop.f32.mrb[7].mxu1 }
 0x120   :  { %v1572_v3 = vadd.f32 %v1983_v0, %v1532_v63 }
 0x13a   :  { %v2003_v4 = vpop.f32.mrb[8].mxu0 }
 0x13b   :  { %v2004_v5 = vpop.f32.mrb[9].mxu0 }
 0x13c   :  { %v2025_v6 = vpop.f32.mrb[8].mxu1  ;;  %v2005_v7 = vadd.f32 %v2004_v5, %v2003_v4  ;;  %v2006_v8 = vpop.f32.mrb[10].mxu0 }
 0x13d   :  { %v2026_v9 = vpop.f32.mrb[9].mxu1  ;;  %v2007_v10 = vpop.f32.mrb[11].mxu0 }
 0x13e   :  { %v1612_v11 = vadd.f32 %v2005_v7, %v1572_v3  ;;  %v2027_v12 = vadd.f32 %v2026_v9, %v2025_v6  ;;  %v2028_v13 = vpop.f32.mrb[10].mxu1 }
 0x13f   :  { %v2029_v14 = vpop.f32.mrb[11].mxu1 }
 0x140   :  { %v1652_v43 = vadd.f32 %v2027_v12, %v1612_v11 }
 0x15a   :  { %v2047_v15 = vpop.f32.mrb[12].mxu0 }
 0x15b   :  { %v2048_v16 = vpop.f32.mrb[13].mxu0 }
 0x15c   :  { %v2069_v17 = vpop.f32.mrb[12].mxu1  ;;  %v2049_v18 = vadd.f32 %v2048_v16, %v2047_v15  ;;  %v2050_v19 = vpop.f32.mrb[14].mxu0 }
 0x15d   :  { %v2070_v20 = vpop.f32.mrb[13].mxu1  ;;  %v2051_v21 = vpop.f32.mrb[15].mxu0 }
 0x15e   :  { %v1692_v22 = vadd.f32 %v2049_v18, %v1652_v43  ;;  %v2071_v23 = vadd.f32 %v2070_v20, %v2069_v17  ;;  %v2072_v24 = vpop.f32.mrb[14].mxu1 }
 0x15f   :  { %v2073_v27 = vpop.f32.mrb[15].mxu1 }
 0x160   :  { %v1732_v44 = vadd.f32 %v2071_v23, %v1692_v22 }
 0x162   :  { %v1744_v29 = vmul.f32 %v1897_v25, %v1732_v44 }
 0x164   :  { %v1752_v30 = vadd.f32 %v1898_v28, %v1744_v29 }
 0x166   :  { %1754 = vst.msk [vmem:[#allocation2] sm:$0x3] %vm1753_vm0, %v1752_v30 }
 0x167   :  { %2090 = shalt.err (!%p2087_p4)
}
 0x168   :  { %s2091_s10 = scalar_lea.hbm %s2965_s4, 32 }
 0x169   :  { %p2092_p5 = scmp.ne.s32.totalorder %s2965_s4, %s2091_s10  ;;  %p2095_p6 = scmp.lt.u32.totalorder %s2091_s10, %s2965_s4 }
 0x16b   :  { %p2097_p7 = pnand %p2095_p6, %p2092_p5 }
 0x16d   :  { %2100 = shalt.err (!%p2097_p7)
}
 0x16e   :  { %1764 = dma.vmem_to_hbm [thread:$0]  %s1762_s7, 32, %s2965_s4, [#allocation3]  }
 0x16f   :  { %2101 = dma.done.wait [#allocation3], 32  }
 0x170   :  { %2102 = vsyncadd [#allocation3], 4294967264 }
 0x171   :  { %1768 = vsyncpa [#allocation3], 1 }

</bundles_post_ra>
